<compile_context>
chip_gen: v7x
topology: tpu7x:2x2x1
jax: 0.10.0
libtpu: 0.0.40
codegen_flags: <defaults>
</compile_context>

<pallas_src>
import jax
import jax.numpy as jnp
from jax.experimental import pallas as pl
from jax.experimental.pallas import tpu as pltpu

# Hidden layer sizes of the MLP (8 Linear layers, PReLU after the first 7).
HIDDEN = (1280, 896, 512, 256, 128, 64, 32)
NUM_LINEAR = len(HIDDEN) + 1  # 8


def _round_up(x, m):
    return (x + m - 1) // m * m


def _mlp_kernel(*refs):
    """Fused forward pass for the whole MLP on one batch tile.

    refs = (x_ref,
            w0..w7  (VMEM, bf16 [in_p, out_p]),
            b0..b7  (VMEM, f32 [1, out_p]),
            alpha_ref (SMEM, [7] PReLU slopes),
            out_ref)
    """
    x_ref = refs[0]
    w_refs = refs[1:1 + NUM_LINEAR]
    b_refs = refs[1 + NUM_LINEAR:1 + 2 * NUM_LINEAR]
    alpha_ref = refs[1 + 2 * NUM_LINEAR]
    out_ref = refs[-1]

    h = x_ref[...].astype(jnp.float32)
    for i in range(NUM_LINEAR):
        # Linear: h @ W + b   (bf16 MXU matmul, f32 accumulation).
        h = jnp.dot(h.astype(jnp.bfloat16), w_refs[i][...],
                    preferred_element_type=jnp.float32)
        h = h + b_refs[i][...]  # (1, out) -> (tile, out) natural broadcast
        if i < NUM_LINEAR - 1:
            # PReLU with a single learnable slope (nn.PReLU() default: 1 param).
            a = alpha_ref[i]
            h = jnp.where(h >= 0.0, h, a * h)
            # Dropout (eval mode) = identity.
    out_ref[...] = h.astype(out_ref.dtype)


def _default_block_b():
    """v5e is already MXU-bound at 256 rows; v6e/v7x benefit from 512."""
    try:
        kind = jax.devices()[0].device_kind.lower()
    except Exception:
        kind = ""
    if "v5" in kind and ("lite" in kind or "v5e" in kind):
        return 256
    return 512


def mlp_forward(x, weights, biases, alphas, *, block_b=None):
    """Run the fused MLP Pallas kernel, tiling over the batch dimension.

    Handles arbitrary batch sizes (pads to the tile) and arbitrary layer
    widths (lane-pads every hidden/output width to a multiple of 128).
    """
    B, in_size = x.shape
    out_size = weights[-1].shape[1]
    dims = [in_size] + list(HIDDEN) + [out_size]

    # --- Lane-pad every layer width (not the input width) to a multiple of
    # --- 128: the MXU burns a full column pass for N=64/32 anyway, zero
    # --- columns stay zero through bias + PReLU (numerically inert), and all
    # --- epilogue vregs / stores become unmasked and lane-dense.
    # --- Weights streamed as bf16 (halves resident VMEM, MXU-friendly);
    # --- biases stay f32 (tiny).
    pdims = [dims[0]] + [_round_up(d, 128) for d in dims[1:]]
    wp, bp = [], []
    for i in range(NUM_LINEAR):
        w = jnp.pad(weights[i],
                    ((0, pdims[i] - dims[i]), (0, pdims[i + 1] - dims[i + 1])))
        b = jnp.pad(biases[i].reshape(1, -1),
                    ((0, 0), (0, pdims[i + 1] - dims[i + 1])))
        wp.append(w.astype(jnp.bfloat16))
        bp.append(b.astype(jnp.float32))
    out_pad = pdims[-1]
    out_dtype = x.dtype

    # --- Batch tile: large enough to amortize the ~0.35us per-grid-step
    # --- overhead (512 on v6e/v7x, 256 on v5e), but capped so the grid has at
    # --- least 2 steps whenever B >= 16: with dimension_semantics=("parallel",)
    # --- that lets v7x shard the batch across both TensorCores.
    if block_b is None:
        block_b = _default_block_b()
    bb = _round_up(min(block_b, B), 8)
    if B >= 16 and _round_up(B, bb) // bb < 2:
        bb = _round_up((B + 1) // 2, 8)
    Bp = _round_up(B, bb)
    if Bp != B:
        x = jnp.pad(x, ((0, Bp - B), (0, 0)))
    grid = (Bp // bb,)

    flops = 2 * Bp * sum(int(w.shape[0]) * int(w.shape[1]) for w in wp)
    bytes_accessed = (
        Bp * in_size * x.dtype.itemsize
        + sum(int(w.size) * w.dtype.itemsize for w in wp)
        + sum(int(b.size) * b.dtype.itemsize for b in bp)
        + Bp * out_pad * jnp.dtype(out_dtype).itemsize
    )

    def _launch(single_buffer_weights):
        in_specs = [pl.BlockSpec((bb, in_size), lambda i: (i, 0))]
        # Weights / biases: full arrays, constant index_map -> VMEM-resident
        # across the grid.  They never re-DMA after step 0, so the default
        # second pipeline buffer is dead VMEM -> single-buffer them (matters
        # most under v7x's 64 MiB physical VMEM).
        resident_kw = (
            {"pipeline_mode": pl.Buffered(1)} if single_buffer_weights else {})
        for w in wp:
            in_specs.append(pl.BlockSpec(w.shape, lambda i: (0, 0), **resident_kw))
        for b in bp:
            in_specs.append(pl.BlockSpec(b.shape, lambda i: (0, 0), **resident_kw))
        # PReLU slopes: tiny scalar table -> SMEM.
        in_specs.append(pl.BlockSpec(memory_space=pltpu.MemorySpace.SMEM))

        out_specs = pl.BlockSpec((bb, out_pad), lambda i: (i, 0))

        return pl.pallas_call(
            _mlp_kernel,
            out_shape=jax.ShapeDtypeStruct((Bp, out_pad), out_dtype),
            grid=grid,
            in_specs=in_specs,
            out_specs=out_specs,
            compiler_params=pltpu.CompilerParams(
                dimension_semantics=("parallel",),
                # Actual footprint at bb=512 is ~12-15 MiB (bf16 weights
                # ~3.7 MiB single-buffered + activation temporaries + I/O
                # double buffers); 32 MiB leaves headroom and fits v7x.
                vmem_limit_bytes=32 << 20,
            ),
            cost_estimate=pl.CostEstimate(
                flops=flops, transcendentals=0, bytes_accessed=bytes_accessed),
        )(x, *wp, *bp, alphas)

    try:
        out = _launch(True)
    except Exception:
        # pipeline_mode=pl.Buffered(1) unsupported on this JAX build; default
        # double-buffering only costs ~3.7 MiB of extra VMEM.
        out = _launch(False)

    return out[:B, :out_size]


def init_params(key, input_size, output_size):
    """Deterministic parameter init mirroring nn.Linear defaults (uniform +-1/sqrt(fan_in))."""
    dims = (input_size,) + HIDDEN + (output_size,)
    weights, biases = [], []
    for li in range(NUM_LINEAR):
        fan_in, fan_out = dims[li], dims[li + 1]
        key, kw, kb = jax.random.split(key, 3)
        bound = 1.0 / jnp.sqrt(float(fan_in))
        # Stored as [in, out] for x @ W.
        w = jax.random.uniform(kw, (fan_in, fan_out), jnp.float32, -bound, bound)
        b = jax.random.uniform(kb, (1, fan_out), jnp.float32, -bound, bound)
        weights.append(w)
        biases.append(b)
    # nn.PReLU() default init: single slope = 0.25 per activation layer.
    alphas = jnp.full((len(HIDDEN),), 0.25, dtype=jnp.float32)
    return weights, biases, alphas


def mlp_reference(x, weights, biases, alphas):
    """Plain-JAX reference with the same bf16-weight / f32-accumulate arithmetic."""
    h = x.astype(jnp.float32)
    for i in range(NUM_LINEAR):
        h = jnp.dot(h.astype(jnp.bfloat16), weights[i].astype(jnp.bfloat16),
                    preferred_element_type=jnp.float32) + biases[i]
        if i < NUM_LINEAR - 1:
            h = jnp.where(h >= 0.0, h, alphas[i] * h)
    return h


if __name__ == "__main__":
    input_size = 32
    output_size = 10
    batch = 16  # small demo batch; the wrapper splits it into >=2 tiles

    key = jax.random.PRNGKey(0)
    key, kx = jax.random.split(key)
    x = jax.random.normal(kx, (batch, input_size), jnp.float32)

    weights, biases, alphas = init_params(key, input_size, output_size)

    out = mlp_forward(x, weights, biases, alphas)
    out = jax.block_until_ready(out)

    ref = mlp_reference(x, weights, biases, alphas)
    assert out.shape == (batch, output_size)
    assert jnp.allclose(out, ref, atol=1e-4, rtol=2e-2), "Pallas output mismatch vs reference"

    print("KERNEL_OK")
</pallas_src>

<mosaic_0001>
module attributes {stable_mosaic.version = 11 : i64} {
  func.func @_mlp_kernel(%arg0: i32, %arg1: memref<8x32xf32, #tpu.memory_space<vmem>>, %arg2: memref<32x1280xbf16, #tpu.memory_space<vmem>>, %arg3: memref<1280x896xbf16, #tpu.memory_space<vmem>>, %arg4: memref<896x512xbf16, #tpu.memory_space<vmem>>, %arg5: memref<512x256xbf16, #tpu.memory_space<vmem>>, %arg6: memref<256x128xbf16, #tpu.memory_space<vmem>>, %arg7: memref<128x128xbf16, #tpu.memory_space<vmem>>, %arg8: memref<128x128xbf16, #tpu.memory_space<vmem>>, %arg9: memref<128x128xbf16, #tpu.memory_space<vmem>>, %arg10: memref<1x1280xf32, #tpu.memory_space<vmem>>, %arg11: memref<1x896xf32, #tpu.memory_space<vmem>>, %arg12: memref<1x512xf32, #tpu.memory_space<vmem>>, %arg13: memref<1x256xf32, #tpu.memory_space<vmem>>, %arg14: memref<1x128xf32, #tpu.memory_space<vmem>>, %arg15: memref<1x128xf32, #tpu.memory_space<vmem>>, %arg16: memref<1x128xf32, #tpu.memory_space<vmem>>, %arg17: memref<1x128xf32, #tpu.memory_space<vmem>>, %arg18: memref<7xf32, #tpu.memory_space<smem>>, %arg19: memref<8x128xf32, #tpu.memory_space<vmem>>) attributes {dimension_semantics = [#tpu.dimension_semantics<parallel>], iteration_bounds = array<i64: 2>, scalar_prefetch = 0 : i64, scratch_operands = 0 : i64, tpu.core_type = #tpu.core_type<tc>, window_params = [{transform_indices = @transform_0, window_bounds = array<i64: 8, 32>}, {pipeline_mode = #tpu.pipeline_mode<synchronous>, transform_indices = @transform_1, window_bounds = array<i64: 32, 1280>}, {pipeline_mode = #tpu.pipeline_mode<synchronous>, transform_indices = @transform_2, window_bounds = array<i64: 1280, 896>}, {pipeline_mode = #tpu.pipeline_mode<synchronous>, transform_indices = @transform_3, window_bounds = array<i64: 896, 512>}, {pipeline_mode = #tpu.pipeline_mode<synchronous>, transform_indices = @transform_4, window_bounds = array<i64: 512, 256>}, {pipeline_mode = #tpu.pipeline_mode<synchronous>, transform_indices = @transform_5, window_bounds = array<i64: 256, 128>}, {pipeline_mode = #tpu.pipeline_mode<synchronous>, transform_indices = @transform_6, window_bounds = array<i64: 128, 128>}, {pipeline_mode = #tpu.pipeline_mode<synchronous>, transform_indices = @transform_7, window_bounds = array<i64: 128, 128>}, {pipeline_mode = #tpu.pipeline_mode<synchronous>, transform_indices = @transform_8, window_bounds = array<i64: 128, 128>}, {pipeline_mode = #tpu.pipeline_mode<synchronous>, transform_indices = @transform_9, window_bounds = array<i64: 1, 1280>}, {pipeline_mode = #tpu.pipeline_mode<synchronous>, transform_indices = @transform_10, window_bounds = array<i64: 1, 896>}, {pipeline_mode = #tpu.pipeline_mode<synchronous>, transform_indices = @transform_11, window_bounds = array<i64: 1, 512>}, {pipeline_mode = #tpu.pipeline_mode<synchronous>, transform_indices = @transform_12, window_bounds = array<i64: 1, 256>}, {pipeline_mode = #tpu.pipeline_mode<synchronous>, transform_indices = @transform_13, window_bounds = array<i64: 1, 128>}, {pipeline_mode = #tpu.pipeline_mode<synchronous>, transform_indices = @transform_14, window_bounds = array<i64: 1, 128>}, {pipeline_mode = #tpu.pipeline_mode<synchronous>, transform_indices = @transform_15, window_bounds = array<i64: 1, 128>}, {pipeline_mode = #tpu.pipeline_mode<synchronous>, transform_indices = @transform_16, window_bounds = array<i64: 1, 128>}, {transform_indices = @transform_17, window_bounds = array<i64: 7>}, {transform_indices = @transform_18, window_bounds = array<i64: 8, 128>}]} {
    %c0 = arith.constant 0 : index
    %c0_0 = arith.constant 0 : index
    %0 = vector.load %arg1[%c0, %c0_0] : memref<8x32xf32, #tpu.memory_space<vmem>>, vector<8x32xf32>
    %1 = arith.truncf %0 : vector<8x32xf32> to vector<8x32xbf16>
    %c0_1 = arith.constant 0 : index
    %c0_2 = arith.constant 0 : index
    %2 = vector.load %arg2[%c0_1, %c0_2] : memref<32x1280xbf16, #tpu.memory_space<vmem>>, vector<32x1280xbf16>
    %cst = arith.constant dense<0.000000e+00> : vector<8x1280xf32>
    %3 = tpu.matmul %1, %2, %cst {dimension_numbers = #tpu.dot_dimension_numbers<[1], [0], [0], [1], [0, 0, 1, 1], [], []>} : vector<8x32xbf16>, vector<32x1280xbf16>, vector<8x1280xf32> -> vector<8x1280xf32>
    %c0_3 = arith.constant 0 : index
    %c0_4 = arith.constant 0 : index
    %4 = vector.load %arg10[%c0_3, %c0_4] : memref<1x1280xf32, #tpu.memory_space<vmem>>, vector<1x1280xf32>
    %5 = vector.broadcast %4 : vector<1x1280xf32> to vector<8x1280xf32>
    %6 = arith.addf %3, %5 : vector<8x1280xf32>
    %c0_5 = arith.constant 0 : index
    %7 = memref.load %arg18[%c0_5] : memref<7xf32, #tpu.memory_space<smem>>
    %cst_6 = arith.constant 0.000000e+00 : f32
    %8 = vector.broadcast %cst_6 : f32 to vector<8x1280xf32>
    %9 = arith.cmpf oge, %6, %8 : vector<8x1280xf32>
    %10 = vector.broadcast %7 : f32 to vector<8x1280xf32>
    %11 = arith.mulf %10, %6 : vector<8x1280xf32>
    %12 = arith.select %9, %6, %11 : vector<8x1280xi1>, vector<8x1280xf32>
    %13 = arith.truncf %12 : vector<8x1280xf32> to vector<8x1280xbf16>
    %c0_7 = arith.constant 0 : index
    %c0_8 = arith.constant 0 : index
    %14 = vector.load %arg3[%c0_7, %c0_8] : memref<1280x896xbf16, #tpu.memory_space<vmem>>, vector<1280x896xbf16>
    %cst_9 = arith.constant dense<0.000000e+00> : vector<8x896xf32>
    %15 = tpu.matmul %13, %14, %cst_9 {dimension_numbers = #tpu.dot_dimension_numbers<[1], [0], [0], [1], [0, 0, 1, 1], [], []>} : vector<8x1280xbf16>, vector<1280x896xbf16>, vector<8x896xf32> -> vector<8x896xf32>
    %c0_10 = arith.constant 0 : index
    %c0_11 = arith.constant 0 : index
    %16 = vector.load %arg11[%c0_10, %c0_11] : memref<1x896xf32, #tpu.memory_space<vmem>>, vector<1x896xf32>
    %17 = vector.broadcast %16 : vector<1x896xf32> to vector<8x896xf32>
    %18 = arith.addf %15, %17 : vector<8x896xf32>
    %c1 = arith.constant 1 : index
    %19 = memref.load %arg18[%c1] : memref<7xf32, #tpu.memory_space<smem>>
    %cst_12 = arith.constant 0.000000e+00 : f32
    %20 = vector.broadcast %cst_12 : f32 to vector<8x896xf32>
    %21 = arith.cmpf oge, %18, %20 : vector<8x896xf32>
    %22 = vector.broadcast %19 : f32 to vector<8x896xf32>
    %23 = arith.mulf %22, %18 : vector<8x896xf32>
    %24 = arith.select %21, %18, %23 : vector<8x896xi1>, vector<8x896xf32>
    %25 = arith.truncf %24 : vector<8x896xf32> to vector<8x896xbf16>
    %c0_13 = arith.constant 0 : index
    %c0_14 = arith.constant 0 : index
    %26 = vector.load %arg4[%c0_13, %c0_14] : memref<896x512xbf16, #tpu.memory_space<vmem>>, vector<896x512xbf16>
    %cst_15 = arith.constant dense<0.000000e+00> : vector<8x512xf32>
    %27 = tpu.matmul %25, %26, %cst_15 {dimension_numbers = #tpu.dot_dimension_numbers<[1], [0], [0], [1], [0, 0, 1, 1], [], []>} : vector<8x896xbf16>, vector<896x512xbf16>, vector<8x512xf32> -> vector<8x512xf32>
    %c0_16 = arith.constant 0 : index
    %c0_17 = arith.constant 0 : index
    %28 = vector.load %arg12[%c0_16, %c0_17] : memref<1x512xf32, #tpu.memory_space<vmem>>, vector<1x512xf32>
    %29 = vector.broadcast %28 : vector<1x512xf32> to vector<8x512xf32>
    %30 = arith.addf %27, %29 : vector<8x512xf32>
    %c2 = arith.constant 2 : index
    %31 = memref.load %arg18[%c2] : memref<7xf32, #tpu.memory_space<smem>>
    %cst_18 = arith.constant 0.000000e+00 : f32
    %32 = vector.broadcast %cst_18 : f32 to vector<8x512xf32>
    %33 = arith.cmpf oge, %30, %32 : vector<8x512xf32>
    %34 = vector.broadcast %31 : f32 to vector<8x512xf32>
    %35 = arith.mulf %34, %30 : vector<8x512xf32>
    %36 = arith.select %33, %30, %35 : vector<8x512xi1>, vector<8x512xf32>
    %37 = arith.truncf %36 : vector<8x512xf32> to vector<8x512xbf16>
    %c0_19 = arith.constant 0 : index
    %c0_20 = arith.constant 0 : index
    %38 = vector.load %arg5[%c0_19, %c0_20] : memref<512x256xbf16, #tpu.memory_space<vmem>>, vector<512x256xbf16>
    %cst_21 = arith.constant dense<0.000000e+00> : vector<8x256xf32>
    %39 = tpu.matmul %37, %38, %cst_21 {dimension_numbers = #tpu.dot_dimension_numbers<[1], [0], [0], [1], [0, 0, 1, 1], [], []>} : vector<8x512xbf16>, vector<512x256xbf16>, vector<8x256xf32> -> vector<8x256xf32>
    %c0_22 = arith.constant 0 : index
    %c0_23 = arith.constant 0 : index
    %40 = vector.load %arg13[%c0_22, %c0_23] : memref<1x256xf32, #tpu.memory_space<vmem>>, vector<1x256xf32>
    %41 = vector.broadcast %40 : vector<1x256xf32> to vector<8x256xf32>
    %42 = arith.addf %39, %41 : vector<8x256xf32>
    %c3 = arith.constant 3 : index
    %43 = memref.load %arg18[%c3] : memref<7xf32, #tpu.memory_space<smem>>
    %cst_24 = arith.constant 0.000000e+00 : f32
    %44 = vector.broadcast %cst_24 : f32 to vector<8x256xf32>
    %45 = arith.cmpf oge, %42, %44 : vector<8x256xf32>
    %46 = vector.broadcast %43 : f32 to vector<8x256xf32>
    %47 = arith.mulf %46, %42 : vector<8x256xf32>
    %48 = arith.select %45, %42, %47 : vector<8x256xi1>, vector<8x256xf32>
    %49 = arith.truncf %48 : vector<8x256xf32> to vector<8x256xbf16>
    %c0_25 = arith.constant 0 : index
    %c0_26 = arith.constant 0 : index
    %50 = vector.load %arg6[%c0_25, %c0_26] : memref<256x128xbf16, #tpu.memory_space<vmem>>, vector<256x128xbf16>
    %cst_27 = arith.constant dense<0.000000e+00> : vector<8x128xf32>
    %51 = tpu.matmul %49, %50, %cst_27 {dimension_numbers = #tpu.dot_dimension_numbers<[1], [0], [0], [1], [0, 0, 1, 1], [], []>} : vector<8x256xbf16>, vector<256x128xbf16>, vector<8x128xf32> -> vector<8x128xf32>
    %c0_28 = arith.constant 0 : index
    %c0_29 = arith.constant 0 : index
    %52 = vector.load %arg14[%c0_28, %c0_29] : memref<1x128xf32, #tpu.memory_space<vmem>>, vector<1x128xf32>
    %53 = vector.broadcast %52 : vector<1x128xf32> to vector<8x128xf32>
    %54 = arith.addf %51, %53 : vector<8x128xf32>
    %c4 = arith.constant 4 : index
    %55 = memref.load %arg18[%c4] : memref<7xf32, #tpu.memory_space<smem>>
    %cst_30 = arith.constant 0.000000e+00 : f32
    %56 = vector.broadcast %cst_30 : f32 to vector<8x128xf32>
    %57 = arith.cmpf oge, %54, %56 : vector<8x128xf32>
    %58 = vector.broadcast %55 : f32 to vector<8x128xf32>
    %59 = arith.mulf %58, %54 : vector<8x128xf32>
    %60 = arith.select %57, %54, %59 : vector<8x128xi1>, vector<8x128xf32>
    %61 = arith.truncf %60 : vector<8x128xf32> to vector<8x128xbf16>
    %c0_31 = arith.constant 0 : index
    %c0_32 = arith.constant 0 : index
    %62 = vector.load %arg7[%c0_31, %c0_32] : memref<128x128xbf16, #tpu.memory_space<vmem>>, vector<128x128xbf16>
    %cst_33 = arith.constant dense<0.000000e+00> : vector<8x128xf32>
    %63 = tpu.matmul %61, %62, %cst_33 {dimension_numbers = #tpu.dot_dimension_numbers<[1], [0], [0], [1], [0, 0, 1, 1], [], []>} : vector<8x128xbf16>, vector<128x128xbf16>, vector<8x128xf32> -> vector<8x128xf32>
    %c0_34 = arith.constant 0 : index
    %c0_35 = arith.constant 0 : index
    %64 = vector.load %arg15[%c0_34, %c0_35] : memref<1x128xf32, #tpu.memory_space<vmem>>, vector<1x128xf32>
    %65 = vector.broadcast %64 : vector<1x128xf32> to vector<8x128xf32>
    %66 = arith.addf %63, %65 : vector<8x128xf32>
    %c5 = arith.constant 5 : index
    %67 = memref.load %arg18[%c5] : memref<7xf32, #tpu.memory_space<smem>>
    %cst_36 = arith.constant 0.000000e+00 : f32
    %68 = vector.broadcast %cst_36 : f32 to vector<8x128xf32>
    %69 = arith.cmpf oge, %66, %68 : vector<8x128xf32>
    %70 = vector.broadcast %67 : f32 to vector<8x128xf32>
    %71 = arith.mulf %70, %66 : vector<8x128xf32>
    %72 = arith.select %69, %66, %71 : vector<8x128xi1>, vector<8x128xf32>
    %73 = arith.truncf %72 : vector<8x128xf32> to vector<8x128xbf16>
    %c0_37 = arith.constant 0 : index
    %c0_38 = arith.constant 0 : index
    %74 = vector.load %arg8[%c0_37, %c0_38] : memref<128x128xbf16, #tpu.memory_space<vmem>>, vector<128x128xbf16>
    %cst_39 = arith.constant dense<0.000000e+00> : vector<8x128xf32>
    %75 = tpu.matmul %73, %74, %cst_39 {dimension_numbers = #tpu.dot_dimension_numbers<[1], [0], [0], [1], [0, 0, 1, 1], [], []>} : vector<8x128xbf16>, vector<128x128xbf16>, vector<8x128xf32> -> vector<8x128xf32>
    %c0_40 = arith.constant 0 : index
    %c0_41 = arith.constant 0 : index
    %76 = vector.load %arg16[%c0_40, %c0_41] : memref<1x128xf32, #tpu.memory_space<vmem>>, vector<1x128xf32>
    %77 = vector.broadcast %76 : vector<1x128xf32> to vector<8x128xf32>
    %78 = arith.addf %75, %77 : vector<8x128xf32>
    %c6 = arith.constant 6 : index
    %79 = memref.load %arg18[%c6] : memref<7xf32, #tpu.memory_space<smem>>
    %cst_42 = arith.constant 0.000000e+00 : f32
    %80 = vector.broadcast %cst_42 : f32 to vector<8x128xf32>
    %81 = arith.cmpf oge, %78, %80 : vector<8x128xf32>
    %82 = vector.broadcast %79 : f32 to vector<8x128xf32>
    %83 = arith.mulf %82, %78 : vector<8x128xf32>
    %84 = arith.select %81, %78, %83 : vector<8x128xi1>, vector<8x128xf32>
    %85 = arith.truncf %84 : vector<8x128xf32> to vector<8x128xbf16>
    %c0_43 = arith.constant 0 : index
    %c0_44 = arith.constant 0 : index
    %86 = vector.load %arg9[%c0_43, %c0_44] : memref<128x128xbf16, #tpu.memory_space<vmem>>, vector<128x128xbf16>
    %cst_45 = arith.constant dense<0.000000e+00> : vector<8x128xf32>
    %87 = tpu.matmul %85, %86, %cst_45 {dimension_numbers = #tpu.dot_dimension_numbers<[1], [0], [0], [1], [0, 0, 1, 1], [], []>} : vector<8x128xbf16>, vector<128x128xbf16>, vector<8x128xf32> -> vector<8x128xf32>
    %c0_46 = arith.constant 0 : index
    %c0_47 = arith.constant 0 : index
    %88 = vector.load %arg17[%c0_46, %c0_47] : memref<1x128xf32, #tpu.memory_space<vmem>>, vector<1x128xf32>
    %89 = vector.broadcast %88 : vector<1x128xf32> to vector<8x128xf32>
    %90 = arith.addf %87, %89 : vector<8x128xf32>
    %c0_48 = arith.constant 0 : index
    %c0_49 = arith.constant 0 : index
    %91 = vector.load %arg19[%c0_48, %c0_49] : memref<8x128xf32, #tpu.memory_space<vmem>>, vector<8x128xf32>
    tpu.vector_store %arg19[%c0_48, %c0_49], %90 {strides = array<i32>} : memref<8x128xf32, #tpu.memory_space<vmem>>, vector<8x128xf32>,
    return
  }
  func.func @transform_0(%arg0: i32) -> (i32, i32) {
    %c0_i32 = arith.constant 0 : i32
    %c0_i32_0 = arith.constant 0 : i32
    return %arg0, %c0_i32 : i32, i32
  }
  func.func @transform_1(%arg0: i32) -> (i32, i32) {
    %c0_i32 = arith.constant 0 : i32
    %c0_i32_0 = arith.constant 0 : i32
    %c0_i32_1 = arith.constant 0 : i32
    return %c0_i32, %c0_i32_0 : i32, i32
  }
  func.func @transform_2(%arg0: i32) -> (i32, i32) {
    %c0_i32 = arith.constant 0 : i32
    %c0_i32_0 = arith.constant 0 : i32
    %c0_i32_1 = arith.constant 0 : i32
    return %c0_i32, %c0_i32_0 : i32, i32
  }
  func.func @transform_3(%arg0: i32) -> (i32, i32) {
    %c0_i32 = arith.constant 0 : i32
    %c0_i32_0 = arith.constant 0 : i32
    %c0_i32_1 = arith.constant 0 : i32
    return %c0_i32, %c0_i32_0 : i32, i32
  }
  func.func @transform_4(%arg0: i32) -> (i32, i32) {
    %c0_i32 = arith.constant 0 : i32
    %c0_i32_0 = arith.constant 0 : i32
    %c0_i32_1 = arith.constant 0 : i32
    return %c0_i32, %c0_i32_0 : i32, i32
  }
  func.func @transform_5(%arg0: i32) -> (i32, i32) {
    %c0_i32 = arith.constant 0 : i32
    %c0_i32_0 = arith.constant 0 : i32
    %c0_i32_1 = arith.constant 0 : i32
    return %c0_i32, %c0_i32_0 : i32, i32
  }
  func.func @transform_6(%arg0: i32) -> (i32, i32) {
    %c0_i32 = arith.constant 0 : i32
    %c0_i32_0 = arith.constant 0 : i32
    %c0_i32_1 = arith.constant 0 : i32
    return %c0_i32, %c0_i32_0 : i32, i32
  }
  func.func @transform_7(%arg0: i32) -> (i32, i32) {
    %c0_i32 = arith.constant 0 : i32
    %c0_i32_0 = arith.constant 0 : i32
    %c0_i32_1 = arith.constant 0 : i32
    return %c0_i32, %c0_i32_0 : i32, i32
  }
  func.func @transform_8(%arg0: i32) -> (i32, i32) {
    %c0_i32 = arith.constant 0 : i32
    %c0_i32_0 = arith.constant 0 : i32
    %c0_i32_1 = arith.constant 0 : i32
    return %c0_i32, %c0_i32_0 : i32, i32
  }
  func.func @transform_9(%arg0: i32) -> (i32, i32) {
    %c0_i32 = arith.constant 0 : i32
    %c0_i32_0 = arith.constant 0 : i32
    %c0_i32_1 = arith.constant 0 : i32
    return %c0_i32, %c0_i32_0 : i32, i32
  }
  func.func @transform_10(%arg0: i32) -> (i32, i32) {
    %c0_i32 = arith.constant 0 : i32
    %c0_i32_0 = arith.constant 0 : i32
    %c0_i32_1 = arith.constant 0 : i32
    return %c0_i32, %c0_i32_0 : i32, i32
  }
  func.func @transform_11(%arg0: i32) -> (i32, i32) {
    %c0_i32 = arith.constant 0 : i32
    %c0_i32_0 = arith.constant 0 : i32
    %c0_i32_1 = arith.constant 0 : i32
    return %c0_i32, %c0_i32_0 : i32, i32
  }
  func.func @transform_12(%arg0: i32) -> (i32, i32) {
    %c0_i32 = arith.constant 0 : i32
    %c0_i32_0 = arith.constant 0 : i32
    %c0_i32_1 = arith.constant 0 : i32
    return %c0_i32, %c0_i32_0 : i32, i32
  }
  func.func @transform_13(%arg0: i32) -> (i32, i32) {
    %c0_i32 = arith.constant 0 : i32
    %c0_i32_0 = arith.constant 0 : i32
    %c0_i32_1 = arith.constant 0 : i32
    return %c0_i32, %c0_i32_0 : i32, i32
  }
  func.func @transform_14(%arg0: i32) -> (i32, i32) {
    %c0_i32 = arith.constant 0 : i32
    %c0_i32_0 = arith.constant 0 : i32
    %c0_i32_1 = arith.constant 0 : i32
    return %c0_i32, %c0_i32_0 : i32, i32
  }
  func.func @transform_15(%arg0: i32) -> (i32, i32) {
    %c0_i32 = arith.constant 0 : i32
    %c0_i32_0 = arith.constant 0 : i32
    %c0_i32_1 = arith.constant 0 : i32
    return %c0_i32, %c0_i32_0 : i32, i32
  }
  func.func @transform_16(%arg0: i32) -> (i32, i32) {
    %c0_i32 = arith.constant 0 : i32
    %c0_i32_0 = arith.constant 0 : i32
    %c0_i32_1 = arith.constant 0 : i32
    return %c0_i32, %c0_i32_0 : i32, i32
  }
  func.func @transform_17(%arg0: i32) -> i32 {
    %c0_i32 = arith.constant 0 : i32
    %c0_i32_0 = arith.constant 0 : i32
    return %c0_i32 : i32
  }
  func.func @transform_18(%arg0: i32) -> (i32, i32) {
    %c0_i32 = arith.constant 0 : i32
    %c0_i32_0 = arith.constant 0 : i32
    return %arg0, %c0_i32 : i32, i32
  }
}

module attributes {stable_mosaic.version = 11 : i64} {
  func.func @_mlp_kernel(%arg0: i32, %arg1: memref<8x32xf32, #tpu.memory_space<vmem>>, %arg2: memref<32x1280xbf16, #tpu.memory_space<vmem>>, %arg3: memref<1280x896xbf16, #tpu.memory_space<vmem>>, %arg4: memref<896x512xbf16, #tpu.memory_space<vmem>>, %arg5: memref<512x256xbf16, #tpu.memory_space<vmem>>, %arg6: memref<256x128xbf16, #tpu.memory_space<vmem>>, %arg7: memref<128x128xbf16, #tpu.memory_space<vmem>>, %arg8: memref<128x128xbf16, #tpu.memory_space<vmem>>, %arg9: memref<128x128xbf16, #tpu.memory_space<vmem>>, %arg10: memref<1x1280xf32, #tpu.memory_space<vmem>>, %arg11: memref<1x896xf32, #tpu.memory_space<vmem>>, %arg12: memref<1x512xf32, #tpu.memory_space<vmem>>, %arg13: memref<1x256xf32, #tpu.memory_space<vmem>>, %arg14: memref<1x128xf32, #tpu.memory_space<vmem>>, %arg15: memref<1x128xf32, #tpu.memory_space<vmem>>, %arg16: memref<1x128xf32, #tpu.memory_space<vmem>>, %arg17: memref<1x128xf32, #tpu.memory_space<vmem>>, %arg18: memref<7xf32, #tpu.memory_space<smem>>, %arg19: memref<8x128xf32, #tpu.memory_space<vmem>>) attributes {dimension_semantics = [#tpu.dimension_semantics<parallel>], iteration_bounds = array<i64: 2>, scalar_prefetch = 0 : i64, scratch_operands = 0 : i64, tpu.core_type = #tpu.core_type<tc>, window_params = [{transform_indices = @transform_0, window_bounds = array<i64: 8, 32>}, {pipeline_mode = #tpu.pipeline_mode<synchronous>, transform_indices = @transform_1, window_bounds = array<i64: 32, 1280>}, {pipeline_mode = #tpu.pipeline_mode<synchronous>, transform_indices = @transform_2, window_bounds = array<i64: 1280, 896>}, {pipeline_mode = #tpu.pipeline_mode<synchronous>, transform_indices = @transform_3, window_bounds = array<i64: 896, 512>}, {pipeline_mode = #tpu.pipeline_mode<synchronous>, transform_indices = @transform_4, window_bounds = array<i64: 512, 256>}, {pipeline_mode = #tpu.pipeline_mode<synchronous>, transform_indices = @transform_5, window_bounds = array<i64: 256, 128>}, {pipeline_mode = #tpu.pipeline_mode<synchronous>, transform_indices = @transform_6, window_bounds = array<i64: 128, 128>}, {pipeline_mode = #tpu.pipeline_mode<synchronous>, transform_indices = @transform_7, window_bounds = array<i64: 128, 128>}, {pipeline_mode = #tpu.pipeline_mode<synchronous>, transform_indices = @transform_8, window_bounds = array<i64: 128, 128>}, {pipeline_mode = #tpu.pipeline_mode<synchronous>, transform_indices = @transform_9, window_bounds = array<i64: 1, 1280>}, {pipeline_mode = #tpu.pipeline_mode<synchronous>, transform_indices = @transform_10, window_bounds = array<i64: 1, 896>}, {pipeline_mode = #tpu.pipeline_mode<synchronous>, transform_indices = @transform_11, window_bounds = array<i64: 1, 512>}, {pipeline_mode = #tpu.pipeline_mode<synchronous>, transform_indices = @transform_12, window_bounds = array<i64: 1, 256>}, {pipeline_mode = #tpu.pipeline_mode<synchronous>, transform_indices = @transform_13, window_bounds = array<i64: 1, 128>}, {pipeline_mode = #tpu.pipeline_mode<synchronous>, transform_indices = @transform_14, window_bounds = array<i64: 1, 128>}, {pipeline_mode = #tpu.pipeline_mode<synchronous>, transform_indices = @transform_15, window_bounds = array<i64: 1, 128>}, {pipeline_mode = #tpu.pipeline_mode<synchronous>, transform_indices = @transform_16, window_bounds = array<i64: 1, 128>}, {transform_indices = @transform_17, window_bounds = array<i64: 7>}, {transform_indices = @transform_18, window_bounds = array<i64: 8, 128>}]} {
    %c0 = arith.constant 0 : index
    %c0_0 = arith.constant 0 : index
    %0 = vector.load %arg1[%c0, %c0_0] : memref<8x32xf32, #tpu.memory_space<vmem>>, vector<8x32xf32>
    %1 = arith.truncf %0 : vector<8x32xf32> to vector<8x32xbf16>
    %c0_1 = arith.constant 0 : index
    %c0_2 = arith.constant 0 : index
    %2 = vector.load %arg2[%c0_1, %c0_2] : memref<32x1280xbf16, #tpu.memory_space<vmem>>, vector<32x1280xbf16>
    %cst = arith.constant dense<0.000000e+00> : vector<8x1280xf32>
    %3 = tpu.matmul %1, %2, %cst {dimension_numbers = #tpu.dot_dimension_numbers<[1], [0], [0], [1], [0, 0, 1, 1], [], []>} : vector<8x32xbf16>, vector<32x1280xbf16>, vector<8x1280xf32> -> vector<8x1280xf32>
    %c0_3 = arith.constant 0 : index
    %c0_4 = arith.constant 0 : index
    %4 = vector.load %arg10[%c0_3, %c0_4] : memref<1x1280xf32, #tpu.memory_space<vmem>>, vector<1x1280xf32>
    %5 = vector.broadcast %4 : vector<1x1280xf32> to vector<8x1280xf32>
    %6 = arith.addf %3, %5 : vector<8x1280xf32>
    %c0_5 = arith.constant 0 : index
    %7 = memref.load %arg18[%c0_5] : memref<7xf32, #tpu.memory_space<smem>>
    %cst_6 = arith.constant 0.000000e+00 : f32
    %8 = vector.broadcast %cst_6 : f32 to vector<8x1280xf32>
    %9 = arith.cmpf oge, %6, %8 : vector<8x1280xf32>
    %10 = vector.broadcast %7 : f32 to vector<8x1280xf32>
    %11 = arith.mulf %10, %6 : vector<8x1280xf32>
    %12 = arith.select %9, %6, %11 : vector<8x1280xi1>, vector<8x1280xf32>
    %13 = arith.truncf %12 : vector<8x1280xf32> to vector<8x1280xbf16>
    %c0_7 = arith.constant 0 : index
    %c0_8 = arith.constant 0 : index
    %14 = vector.load %arg3[%c0_7, %c0_8] : memref<1280x896xbf16, #tpu.memory_space<vmem>>, vector<1280x896xbf16>
    %cst_9 = arith.constant dense<0.000000e+00> : vector<8x896xf32>
    %15 = tpu.matmul %13, %14, %cst_9 {dimension_numbers = #tpu.dot_dimension_numbers<[1], [0], [0], [1], [0, 0, 1, 1], [], []>} : vector<8x1280xbf16>, vector<1280x896xbf16>, vector<8x896xf32> -> vector<8x896xf32>
    %c0_10 = arith.constant 0 : index
    %c0_11 = arith.constant 0 : index
    %16 = vector.load %arg11[%c0_10, %c0_11] : memref<1x896xf32, #tpu.memory_space<vmem>>, vector<1x896xf32>
    %17 = vector.broadcast %16 : vector<1x896xf32> to vector<8x896xf32>
    %18 = arith.addf %15, %17 : vector<8x896xf32>
    %c1 = arith.constant 1 : index
    %19 = memref.load %arg18[%c1] : memref<7xf32, #tpu.memory_space<smem>>
    %cst_12 = arith.constant 0.000000e+00 : f32
    %20 = vector.broadcast %cst_12 : f32 to vector<8x896xf32>
    %21 = arith.cmpf oge, %18, %20 : vector<8x896xf32>
    %22 = vector.broadcast %19 : f32 to vector<8x896xf32>
    %23 = arith.mulf %22, %18 : vector<8x896xf32>
    %24 = arith.select %21, %18, %23 : vector<8x896xi1>, vector<8x896xf32>
    %25 = arith.truncf %24 : vector<8x896xf32> to vector<8x896xbf16>
    %c0_13 = arith.constant 0 : index
    %c0_14 = arith.constant 0 : index
    %26 = vector.load %arg4[%c0_13, %c0_14] : memref<896x512xbf16, #tpu.memory_space<vmem>>, vector<896x512xbf16>
    %cst_15 = arith.constant dense<0.000000e+00> : vector<8x512xf32>
    %27 = tpu.matmul %25, %26, %cst_15 {dimension_numbers = #tpu.dot_dimension_numbers<[1], [0], [0], [1], [0, 0, 1, 1], [], []>} : vector<8x896xbf16>, vector<896x512xbf16>, vector<8x512xf32> -> vector<8x512xf32>
    %c0_16 = arith.constant 0 : index
    %c0_17 = arith.constant 0 : index
    %28 = vector.load %arg12[%c0_16, %c0_17] : memref<1x512xf32, #tpu.memory_space<vmem>>, vector<1x512xf32>
    %29 = vector.broadcast %28 : vector<1x512xf32> to vector<8x512xf32>
    %30 = arith.addf %27, %29 : vector<8x512xf32>
    %c2 = arith.constant 2 : index
    %31 = memref.load %arg18[%c2] : memref<7xf32, #tpu.memory_space<smem>>
    %cst_18 = arith.constant 0.000000e+00 : f32
    %32 = vector.broadcast %cst_18 : f32 to vector<8x512xf32>
    %33 = arith.cmpf oge, %30, %32 : vector<8x512xf32>
    %34 = vector.broadcast %31 : f32 to vector<8x512xf32>
    %35 = arith.mulf %34, %30 : vector<8x512xf32>
    %36 = arith.select %33, %30, %35 : vector<8x512xi1>, vector<8x512xf32>
    %37 = arith.truncf %36 : vector<8x512xf32> to vector<8x512xbf16>
    %c0_19 = arith.constant 0 : index
    %c0_20 = arith.constant 0 : index
    %38 = vector.load %arg5[%c0_19, %c0_20] : memref<512x256xbf16, #tpu.memory_space<vmem>>, vector<512x256xbf16>
    %cst_21 = arith.constant dense<0.000000e+00> : vector<8x256xf32>
    %39 = tpu.matmul %37, %38, %cst_21 {dimension_numbers = #tpu.dot_dimension_numbers<[1], [0], [0], [1], [0, 0, 1, 1], [], []>} : vector<8x512xbf16>, vector<512x256xbf16>, vector<8x256xf32> -> vector<8x256xf32>
    %c0_22 = arith.constant 0 : index
    %c0_23 = arith.constant 0 : index
    %40 = vector.load %arg13[%c0_22, %c0_23] : memref<1x256xf32, #tpu.memory_space<vmem>>, vector<1x256xf32>
    %41 = vector.broadcast %40 : vector<1x256xf32> to vector<8x256xf32>
    %42 = arith.addf %39, %41 : vector<8x256xf32>
    %c3 = arith.constant 3 : index
    %43 = memref.load %arg18[%c3] : memref<7xf32, #tpu.memory_space<smem>>
    %cst_24 = arith.constant 0.000000e+00 : f32
    %44 = vector.broadcast %cst_24 : f32 to vector<8x256xf32>
    %45 = arith.cmpf oge, %42, %44 : vector<8x256xf32>
    %46 = vector.broadcast %43 : f32 to vector<8x256xf32>
    %47 = arith.mulf %46, %42 : vector<8x256xf32>
    %48 = arith.select %45, %42, %47 : vector<8x256xi1>, vector<8x256xf32>
    %49 = arith.truncf %48 : vector<8x256xf32> to vector<8x256xbf16>
    %c0_25 = arith.constant 0 : index
    %c0_26 = arith.constant 0 : index
    %50 = vector.load %arg6[%c0_25, %c0_26] : memref<256x128xbf16, #tpu.memory_space<vmem>>, vector<256x128xbf16>
    %cst_27 = arith.constant dense<0.000000e+00> : vector<8x128xf32>
    %51 = tpu.matmul %49, %50, %cst_27 {dimension_numbers = #tpu.dot_dimension_numbers<[1], [0], [0], [1], [0, 0, 1, 1], [], []>} : vector<8x256xbf16>, vector<256x128xbf16>, vector<8x128xf32> -> vector<8x128xf32>
    %c0_28 = arith.constant 0 : index
    %c0_29 = arith.constant 0 : index
    %52 = vector.load %arg14[%c0_28, %c0_29] : memref<1x128xf32, #tpu.memory_space<vmem>>, vector<1x128xf32>
    %53 = vector.broadcast %52 : vector<1x128xf32> to vector<8x128xf32>
    %54 = arith.addf %51, %53 : vector<8x128xf32>
    %c4 = arith.constant 4 : index
    %55 = memref.load %arg18[%c4] : memref<7xf32, #tpu.memory_space<smem>>
    %cst_30 = arith.constant 0.000000e+00 : f32
    %56 = vector.broadcast %cst_30 : f32 to vector<8x128xf32>
    %57 = arith.cmpf oge, %54, %56 : vector<8x128xf32>
    %58 = vector.broadcast %55 : f32 to vector<8x128xf32>
    %59 = arith.mulf %58, %54 : vector<8x128xf32>
    %60 = arith.select %57, %54, %59 : vector<8x128xi1>, vector<8x128xf32>
    %61 = arith.truncf %60 : vector<8x128xf32> to vector<8x128xbf16>
    %c0_31 = arith.constant 0 : index
    %c0_32 = arith.constant 0 : index
    %62 = vector.load %arg7[%c0_31, %c0_32] : memref<128x128xbf16, #tpu.memory_space<vmem>>, vector<128x128xbf16>
    %cst_33 = arith.constant dense<0.000000e+00> : vector<8x128xf32>
    %63 = tpu.matmul %61, %62, %cst_33 {dimension_numbers = #tpu.dot_dimension_numbers<[1], [0], [0], [1], [0, 0, 1, 1], [], []>} : vector<8x128xbf16>, vector<128x128xbf16>, vector<8x128xf32> -> vector<8x128xf32>
    %c0_34 = arith.constant 0 : index
    %c0_35 = arith.constant 0 : index
    %64 = vector.load %arg15[%c0_34, %c0_35] : memref<1x128xf32, #tpu.memory_space<vmem>>, vector<1x128xf32>
    %65 = vector.broadcast %64 : vector<1x128xf32> to vector<8x128xf32>
    %66 = arith.addf %63, %65 : vector<8x128xf32>
    %c5 = arith.constant 5 : index
    %67 = memref.load %arg18[%c5] : memref<7xf32, #tpu.memory_space<smem>>
    %cst_36 = arith.constant 0.000000e+00 : f32
    %68 = vector.broadcast %cst_36 : f32 to vector<8x128xf32>
    %69 = arith.cmpf oge, %66, %68 : vector<8x128xf32>
    %70 = vector.broadcast %67 : f32 to vector<8x128xf32>
    %71 = arith.mulf %70, %66 : vector<8x128xf32>
    %72 = arith.select %69, %66, %71 : vector<8x128xi1>, vector<8x128xf32>
    %73 = arith.truncf %72 : vector<8x128xf32> to vector<8x128xbf16>
    %c0_37 = arith.constant 0 : index
    %c0_38 = arith.constant 0 : index
    %74 = vector.load %arg8[%c0_37, %c0_38] : memref<128x128xbf16, #tpu.memory_space<vmem>>, vector<128x128xbf16>
    %cst_39 = arith.constant dense<0.000000e+00> : vector<8x128xf32>
    %75 = tpu.matmul %73, %74, %cst_39 {dimension_numbers = #tpu.dot_dimension_numbers<[1], [0], [0], [1], [0, 0, 1, 1], [], []>} : vector<8x128xbf16>, vector<128x128xbf16>, vector<8x128xf32> -> vector<8x128xf32>
    %c0_40 = arith.constant 0 : index
    %c0_41 = arith.constant 0 : index
    %76 = vector.load %arg16[%c0_40, %c0_41] : memref<1x128xf32, #tpu.memory_space<vmem>>, vector<1x128xf32>
    %77 = vector.broadcast %76 : vector<1x128xf32> to vector<8x128xf32>
    %78 = arith.addf %75, %77 : vector<8x128xf32>
    %c6 = arith.constant 6 : index
    %79 = memref.load %arg18[%c6] : memref<7xf32, #tpu.memory_space<smem>>
    %cst_42 = arith.constant 0.000000e+00 : f32
    %80 = vector.broadcast %cst_42 : f32 to vector<8x128xf32>
    %81 = arith.cmpf oge, %78, %80 : vector<8x128xf32>
    %82 = vector.broadcast %79 : f32 to vector<8x128xf32>
    %83 = arith.mulf %82, %78 : vector<8x128xf32>
    %84 = arith.select %81, %78, %83 : vector<8x128xi1>, vector<8x128xf32>
    %85 = arith.truncf %84 : vector<8x128xf32> to vector<8x128xbf16>
    %c0_43 = arith.constant 0 : index
    %c0_44 = arith.constant 0 : index
    %86 = vector.load %arg9[%c0_43, %c0_44] : memref<128x128xbf16, #tpu.memory_space<vmem>>, vector<128x128xbf16>
    %cst_45 = arith.constant dense<0.000000e+00> : vector<8x128xf32>
    %87 = tpu.matmul %85, %86, %cst_45 {dimension_numbers = #tpu.dot_dimension_numbers<[1], [0], [0], [1], [0, 0, 1, 1], [], []>} : vector<8x128xbf16>, vector<128x128xbf16>, vector<8x128xf32> -> vector<8x128xf32>
    %c0_46 = arith.constant 0 : index
    %c0_47 = arith.constant 0 : index
    %88 = vector.load %arg17[%c0_46, %c0_47] : memref<1x128xf32, #tpu.memory_space<vmem>>, vector<1x128xf32>
    %89 = vector.broadcast %88 : vector<1x128xf32> to vector<8x128xf32>
    %90 = arith.addf %87, %89 : vector<8x128xf32>
    %c0_48 = arith.constant 0 : index
    %c0_49 = arith.constant 0 : index
    %91 = vector.load %arg19[%c0_48, %c0_49] : memref<8x128xf32, #tpu.memory_space<vmem>>, vector<8x128xf32>
    tpu.vector_store %arg19[%c0_48, %c0_49], %90 {strides = array<i32>} : memref<8x128xf32, #tpu.memory_space<vmem>>, vector<8x128xf32>,
    return
  }
  func.func @transform_0(%arg0: i32) -> (i32, i32) {
    %c0_i32 = arith.constant 0 : i32
    %c0_i32_0 = arith.constant 0 : i32
    return %arg0, %c0_i32 : i32, i32
  }
  func.func @transform_1(%arg0: i32) -> (i32, i32) {
    %c0_i32 = arith.constant 0 : i32
    %c0_i32_0 = arith.constant 0 : i32
    %c0_i32_1 = arith.constant 0 : i32
    return %c0_i32, %c0_i32_0 : i32, i32
  }
  func.func @transform_2(%arg0: i32) -> (i32, i32) {
    %c0_i32 = arith.constant 0 : i32
    %c0_i32_0 = arith.constant 0 : i32
    %c0_i32_1 = arith.constant 0 : i32
    return %c0_i32, %c0_i32_0 : i32, i32
  }
  func.func @transform_3(%arg0: i32) -> (i32, i32) {
    %c0_i32 = arith.constant 0 : i32
    %c0_i32_0 = arith.constant 0 : i32
    %c0_i32_1 = arith.constant 0 : i32
    return %c0_i32, %c0_i32_0 : i32, i32
  }
  func.func @transform_4(%arg0: i32) -> (i32, i32) {
    %c0_i32 = arith.constant 0 : i32
    %c0_i32_0 = arith.constant 0 : i32
    %c0_i32_1 = arith.constant 0 : i32
    return %c0_i32, %c0_i32_0 : i32, i32
  }
  func.func @transform_5(%arg0: i32) -> (i32, i32) {
    %c0_i32 = arith.constant 0 : i32
    %c0_i32_0 = arith.constant 0 : i32
    %c0_i32_1 = arith.constant 0 : i32
    return %c0_i32, %c0_i32_0 : i32, i32
  }
  func.func @transform_6(%arg0: i32) -> (i32, i32) {
    %c0_i32 = arith.constant 0 : i32
    %c0_i32_0 = arith.constant 0 : i32
    %c0_i32_1 = arith.constant 0 : i32
    return %c0_i32, %c0_i32_0 : i32, i32
  }
  func.func @transform_7(%arg0: i32) -> (i32, i32) {
    %c0_i32 = arith.constant 0 : i32
    %c0_i32_0 = arith.constant 0 : i32
    %c0_i32_1 = arith.constant 0 : i32
    return %c0_i32, %c0_i32_0 : i32, i32
  }
  func.func @transform_8(%arg0: i32) -> (i32, i32) {
    %c0_i32 = arith.constant 0 : i32
    %c0_i32_0 = arith.constant 0 : i32
    %c0_i32_1 = arith.constant 0 : i32
    return %c0_i32, %c0_i32_0 : i32, i32
  }
  func.func @transform_9(%arg0: i32) -> (i32, i32) {
    %c0_i32 = arith.constant 0 : i32
    %c0_i32_0 = arith.constant 0 : i32
    %c0_i32_1 = arith.constant 0 : i32
    return %c0_i32, %c0_i32_0 : i32, i32
  }
  func.func @transform_10(%arg0: i32) -> (i32, i32) {
    %c0_i32 = arith.constant 0 : i32
    %c0_i32_0 = arith.constant 0 : i32
    %c0_i32_1 = arith.constant 0 : i32
    return %c0_i32, %c0_i32_0 : i32, i32
  }
  func.func @transform_11(%arg0: i32) -> (i32, i32) {
    %c0_i32 = arith.constant 0 : i32
    %c0_i32_0 = arith.constant 0 : i32
    %c0_i32_1 = arith.constant 0 : i32
    return %c0_i32, %c0_i32_0 : i32, i32
  }
  func.func @transform_12(%arg0: i32) -> (i32, i32) {
    %c0_i32 = arith.constant 0 : i32
    %c0_i32_0 = arith.constant 0 : i32
    %c0_i32_1 = arith.constant 0 : i32
    return %c0_i32, %c0_i32_0 : i32, i32
  }
  func.func @transform_13(%arg0: i32) -> (i32, i32) {
    %c0_i32 = arith.constant 0 : i32
    %c0_i32_0 = arith.constant 0 : i32
    %c0_i32_1 = arith.constant 0 : i32
    return %c0_i32, %c0_i32_0 : i32, i32
  }
  func.func @transform_14(%arg0: i32) -> (i32, i32) {
    %c0_i32 = arith.constant 0 : i32
    %c0_i32_0 = arith.constant 0 : i32
    %c0_i32_1 = arith.constant 0 : i32
    return %c0_i32, %c0_i32_0 : i32, i32
  }
  func.func @transform_15(%arg0: i32) -> (i32, i32) {
    %c0_i32 = arith.constant 0 : i32
    %c0_i32_0 = arith.constant 0 : i32
    %c0_i32_1 = arith.constant 0 : i32
    return %c0_i32, %c0_i32_0 : i32, i32
  }
  func.func @transform_16(%arg0: i32) -> (i32, i32) {
    %c0_i32 = arith.constant 0 : i32
    %c0_i32_0 = arith.constant 0 : i32
    %c0_i32_1 = arith.constant 0 : i32
    return %c0_i32, %c0_i32_0 : i32, i32
  }
  func.func @transform_17(%arg0: i32) -> i32 {
    %c0_i32 = arith.constant 0 : i32
    %c0_i32_0 = arith.constant 0 : i32
    return %c0_i32 : i32
  }
  func.func @transform_18(%arg0: i32) -> (i32, i32) {
    %c0_i32 = arith.constant 0 : i32
    %c0_i32_0 = arith.constant 0 : i32
    return %arg0, %c0_i32 : i32, i32
  }
}

</mosaic_0001>

<bundles_post_ra>
// kernel: tpu_custom_call.1
= control target key start
LH: loop header
LB: loop body
LE: loop exit
PB: predicated region body
PF: predicated region fallthrough
CT: control target
= control target key end

     0   :  { %s12984_s0 = inlined_call_operand.hbm [shape: f32[16,32], index: 0, kind: input, shape index: {}]   ;;  %s12985_s1 = inlined_call_operand.hbm [shape: bf16[32,1280], index: 1, kind: input, shape index: {}]   ;;  %s12986_s2 = inlined_call_operand.hbm [shape: bf16[1280,896], index: 2, kind: input, shape index: {}]   ;;  %s12987_s3 = inlined_call_operand.hbm [shape: bf16[896,512], index: 3, kind: input, shape index: {}]   ;;  %s12988_s4 = inlined_call_operand.hbm [shape: bf16[512,256], index: 4, kind: input, shape index: {}]   ;;  %s12989_s5 = inlined_call_operand.hbm [shape: bf16[256,128], index: 5, kind: input, shape index: {}]   ;;  %s12990_s6 = inlined_call_operand.hbm [shape: bf16[128,128], index: 6, kind: input, shape index: {}]   ;;  %s12991_s7 = inlined_call_operand.hbm [shape: bf16[128,128], index: 7, kind: input, shape index: {}]   ;;  %s12992_s8 = inlined_call_operand.hbm [shape: bf16[128,128], index: 8, kind: input, shape index: {}]   ;;  %s12993_s9 = inlined_call_operand.hbm [shape: f32[1,1280], index: 9, kind: input, shape index: {}]   ;;  %s12994_s10 = inlined_call_operand.hbm [shape: f32[1,896], index: 10, kind: input, shape index: {}]   ;;  %s12995_s11 = inlined_call_operand.hbm [shape: f32[1,512], index: 11, kind: input, shape index: {}]   ;;  %s12996_s12 = inlined_call_operand.hbm [shape: f32[1,256], index: 12, kind: input, shape index: {}]   ;;  %s12997_s13 = inlined_call_operand.hbm [shape: f32[1,128], index: 13, kind: input, shape index: {}]   ;;  %s12998_s14 = inlined_call_operand.hbm [shape: f32[1,128], index: 14, kind: input, shape index: {}]   ;;  %s12999_s15 = inlined_call_operand.hbm [shape: f32[1,128], index: 15, kind: input, shape index: {}]   ;;  %s13000_s16 = inlined_call_operand.hbm [shape: f32[1,128], index: 16, kind: input, shape index: {}]   ;;  %s13001_s17 = inlined_call_operand.hbm [shape: f32[7], index: 17, kind: input, shape index: {}]   ;;  %s13002_s18 = inlined_call_operand.hbm [shape: f32[16,128], index: 18, kind: output, shape index: {}]  }
   0x1   :  { %13022 = sst [smem:[#allocation49_spill]] %s12984_s0 }
   0x2   :  { %13023 = sst [smem:[#allocation50_spill]] %s12985_s1 }
   0x3   :  { %13024 = sst [smem:[#allocation51_spill]] %s12986_s2 }
   0x4   :  { %13025 = sst [smem:[#allocation52_spill]] %s12987_s3 }
   0x5   :  { %13026 = sst [smem:[#allocation53_spill]] %s12988_s4 }
   0x6   :  { %13027 = sst [smem:[#allocation54_spill]] %s13001_s17 }
   0x7   :  { %13028 = sst [smem:[#allocation55_spill]] %s13002_s18 }
   0x8   :  { %23 = vsyncpa [#allocation3], 0 }
   0x9   :  { %25 = vsyncpa [#allocation3 + $0x1], 0 }
   0xa   :  { %26 = vsyncpa [#allocation7], 0 }
   0xb   :  { %27 = vsyncpa [#allocation10], 0 }
   0xc   :  { %28 = vsyncpa [#allocation13], 0 }
   0xd   :  { %29 = vsyncpa [#allocation16], 0 }
   0xe   :  { %30 = vsyncpa [#allocation19], 0 }
   0xf   :  { %31 = vsyncpa [#allocation22], 0 }
  0x10   :  { %32 = vsyncpa [#allocation25], 0 }
  0x11   :  { %33 = vsyncpa [#allocation28], 0 }
  0x12   :  { %34 = vsyncpa [#allocation5], 0 }
  0x13   :  { %35 = vsyncpa [#allocation4], 0 }
  0x14   :  { %37 = vsyncpa [#allocation4 + $0x1], 0  ;;  %s12156_s27 = smov 0   ;;  %s12158_s28 = smov 0  }
  0x15   :  { %s12160_s29 = smov 0   ;;  %s12162_s30 = smov 0  }
  0x16 LB: > { %13029 = sst [smem:[#allocation43_spill]] %s12015_s27  ;;  %s12029_s0 = smov [#allocation6]   ;;  %s12027_s30 = sphi %s12162_s30, %s12558_s30   ;;  %s12023_s29 = sphi %s12160_s29, %s13087_s29   ;;  %s12019_s28 = sphi %s12158_s28, %s13086_s28   ;;  %s12015_s27 = sphi %s12156_s27, %s13085_s27  }
  0x17   : > { %13030 = sst [smem:[#allocation44_spill]] %s12019_s28  ;;  %s469_s19 = sshll.u32 %s12029_s0, 4  ;;  %s12182_s19 = int_to_ptr.vmem [resolvable:$true] %s469_s19 }
  0x18   : > { %13031 = sst [smem:[#allocation45_spill]] %s12023_s29  ;;  %s12177_s1 = sadd.s32 4294967295, %s12027_s30  }
  0x19   : > { %13032 = sst [smem:[#allocation46_spill]] %s12027_s30  ;;  %p8625_p0 = scmp.ge.s32.totalorder %s12027_s30, 1 }
  0x1a   : > { %13033 = sst [smem:[#allocation47_spill]] %s12177_s1  ;;  %p13016_p1 = scmp.eq.s32.totalorder %s12177_s1, 0 }
  0x1b   : > { %p457_p2 = scmp.lt.s32.totalorder %s12027_s30, 3  ;;  %s12030_s21 = smov [#allocation9]  }
  0x1c   : > { %s495_s22 = sshll.u32 %s12030_s21, 4  ;;  %s12031_s23 = smov [#allocation12]   ;;  %s12197_s22 = int_to_ptr.vmem [resolvable:$true] %s495_s22 }
  0x1d   : > { %p12184_p3 = pnand %p8625_p0, %p457_p2  ;;  %s12199_s24 = sshll.u32 %s12031_s23, 4  ;;  %s522_s24 = int_to_ptr.vmem [resolvable:$true] %s12199_s24 }
  0x1e   : > { %s13037_s0 = sld [smem:[#allocation50_spill]] }
  0x1f   : > { %s13034_s20 = scalar_select %p12184_p3, 1, 0 }
  0x20   : > { %p9972_p5 = pneg %p12184_p3 }
  0x21   : > { %13035 = sst [smem:[#allocation48_spill]] %s13034_s20 }
  0x22   : > { %p12193_p6 = pnand %p9972_p5, %p13016_p1 }
  0x24   : > { %s11434_s18 = scalar_lea.hbm %s13037_s0, 2560  ;;  %p12209_p8 = pneg %p12193_p6 }
  0x25   : > { %p11435_p7 = scmp.ne.s32.totalorder %s13037_s0, %s11434_s18  ;;  %p11441_p11 = scmp.lt.u32.totalorder %s11434_s18, %s13037_s0 }
  0x27   : > { %p11437_p9 = pnand %p12209_p8, %p11435_p7 }
  0x29   : > { %p11438_p10 = pneg %p11437_p9 }
  0x2b   : > { %p11443_p12 = pnand %p11441_p11, %p11438_p10 }
  0x2d   : > { %11446 = shalt.err (!%p11443_p12)
}
  0x2e   : > { %s11447_s27 = scalar_lea.vmem %s12182_s19, 2560  ;;  %p11455_p5 = scmp.lt.s32.totalorder %s12182_s19, %s12182_s19 }
  0x2f   : > { %p11448_p13 = scmp.ne.s32.totalorder %s12182_s19, %s11447_s27  ;;  %p11456_p4 = scmp.lt.s32.totalorder %s11447_s27, %s11447_s27 }
  0x31   : > { %p11450_p0 = pnand %p11448_p13, %p12209_p8  ;;  %p11457_p7 = por %p11456_p4, %p11455_p5 }
  0x33   : > { %p11451_p2 = pneg %p11450_p0 }
  0x35   : > { %p11458_p9 = pnand %p11457_p7, %p11451_p2 }
  0x37   : > { %11461 = shalt.err (!%p11458_p9)
}
  0x38   : > { %s12032_s20 = smov 640   ;;  %s12033_s18 = smov 40  }
  0x39   : > { %9975 = dma.hbm_to_vmem [thread:$0]  (!%p12193_p6), %s13037_s0, 2560, %s12182_s19, [#allocation7], %s12032_s20, %s12032_s20, %s12033_s18  }
  0x3a   : > { %s13039_s3 = sld [smem:[#allocation52_spill]] }
  0x40   : > { %s11462_s28 = scalar_lea.hbm %s13039_s3, 28672 }
  0x41   : > { %p11463_p4 = scmp.ne.s32.totalorder %s13039_s3, %s11462_s28  ;;  %p11469_p12 = scmp.lt.u32.totalorder %s11462_s28, %s13039_s3 }
  0x43   : > { %p11465_p10 = pnand %p11463_p4, %p12209_p8 }
  0x45   : > { %p11466_p11 = pneg %p11465_p10 }
  0x47   : > { %p11471_p13 = pnand %p11469_p12, %p11466_p11 }
  0x49   : > { %11474 = shalt.err (!%p11471_p13)
}
  0x4a   : > { %s11475_s19 = scalar_lea.vmem %s12197_s22, 28672  ;;  %p11483_p7 = scmp.lt.s32.totalorder %s12197_s22, %s12197_s22 }
  0x4b   : > { %p11476_p0 = scmp.ne.s32.totalorder %s12197_s22, %s11475_s19  ;;  %p11484_p9 = scmp.lt.s32.totalorder %s11475_s19, %s11475_s19 }
  0x4d   : > { %p11478_p2 = pnand %p11476_p0, %p12209_p8  ;;  %p11485_p4 = por %p11484_p9, %p11483_p7 }
  0x4f   : > { %p11479_p5 = pneg %p11478_p2 }
  0x51   : > { %p11486_p10 = pnand %p11485_p4, %p11479_p5 }
  0x53   : > { %11489 = shalt.err (!%p11486_p10)
}
  0x54   : > { %s12034_s29 = smov 256   ;;  %s12035_s17 = smov 16  }
  0x55   : > { %9981 = dma.hbm_to_vmem [thread:$0]  (!%p12193_p6), %s13039_s3, 28672, %s12197_s22, [#allocation10], %s12034_s29, %s12034_s29, %s12035_s17  }
  0x56   : > { %s11490_s1 = scalar_lea.hbm %s12989_s5, 2048 }
  0x57   : > { %p11491_p11 = scmp.ne.s32.totalorder %s12989_s5, %s11490_s1  ;;  %p11497_p0 = scmp.lt.u32.totalorder %s11490_s1, %s12989_s5 }
  0x59   : > { %p11493_p12 = pnand %p11491_p11, %p12209_p8 }
  0x5b   : > { %p11494_p13 = pneg %p11493_p12 }
  0x5d   : > { %p11499_p2 = pnand %p11497_p0, %p11494_p13 }
  0x5f   : > { %11502 = shalt.err (!%p11499_p2)
}
  0x60   : > { %s11503_s19 = scalar_lea.vmem %s522_s24, 2048  ;;  %p11511_p4 = scmp.lt.s32.totalorder %s522_s24, %s522_s24 }
  0x61   : > { %p11504_p5 = scmp.ne.s32.totalorder %s522_s24, %s11503_s19  ;;  %p11512_p10 = scmp.lt.s32.totalorder %s11503_s19, %s11503_s19 }
  0x63   : > { %p11506_p7 = pnand %p11504_p5, %p12209_p8  ;;  %p11513_p1 = por %p11512_p10, %p11511_p4 }
  0x65   : > { %p11507_p9 = pneg %p11506_p7 }
  0x67   : > { %p11514_p3 = pnand %p11513_p1, %p11507_p9 }
  0x69   : > { %11517 = shalt.err (!%p11514_p3)
}
  0x6a   : > { %s13019_s22 = smov 64   ;;  %s12037_s29 = smov 4  }
  0x6b   : > { %9987 = dma.hbm_to_vmem [thread:$0]  (!%p12193_p6), %s12989_s5, 2048, %s522_s24, [#allocation13], %s13019_s22, %s13019_s22, %s12037_s29  }
  0x6c   : > { %s12038_s30 = smov [#allocation15]   ;;  %s12039_s18 = smov [#allocation18]  }
  0x6d   : > { %s547_s20 = sshll.u32 %s12038_s30, 4  ;;  %s574_s1 = sshll.u32 %s12039_s18, 4  ;;  %s548_s20 = int_to_ptr.vmem [resolvable:$true] %s547_s20  ;;  %s575_s1 = int_to_ptr.vmem [resolvable:$true] %s574_s1 }
  0x6e   : > { %s11518_s23 = scalar_lea.hbm %s12991_s7, 1024 }
  0x6f   : > { %p11519_p1 = scmp.ne.s32.totalorder %s12991_s7, %s11518_s23  ;;  %p11525_p12 = scmp.lt.u32.totalorder %s11518_s23, %s12991_s7 }
  0x71   : > { %p11521_p3 = pnand %p11519_p1, %p12209_p8 }
  0x73   : > { %p11522_p11 = pneg %p11521_p3 }
  0x75   : > { %p11527_p13 = pnand %p11525_p12, %p11522_p11 }
  0x77   : > { %11530 = shalt.err (!%p11527_p13)
}
  0x78   : > { %s11531_s24 = scalar_lea.vmem %s548_s20, 1024  ;;  %p11539_p7 = scmp.lt.s32.totalorder %s548_s20, %s548_s20 }
  0x79   : > { %p11532_p0 = scmp.ne.s32.totalorder %s548_s20, %s11531_s24  ;;  %p11540_p9 = scmp.lt.s32.totalorder %s11531_s24, %s11531_s24 }
  0x7b   : > { %p11534_p2 = pnand %p11532_p0, %p12209_p8  ;;  %p11541_p4 = por %p11540_p9, %p11539_p7 }
  0x7d   : > { %p11535_p5 = pneg %p11534_p2 }
  0x7f   : > { %p11542_p10 = pnand %p11541_p4, %p11535_p5 }
  0x81   : > { %11545 = shalt.err (!%p11542_p10)
}
  0x82   : > { %9993 = dma.hbm_to_vmem [thread:$0]  (!%p12193_p6), %s12991_s7, 1024, %s548_s20, [#allocation16], %s13019_s22, %s13019_s22, %s12037_s29  }
  0x83   : > { %s11546_s30 = scalar_lea.hbm %s12993_s9, 160 }
  0x84   : > { %p11547_p1 = scmp.ne.s32.totalorder %s12993_s9, %s11546_s30  ;;  %p11553_p12 = scmp.lt.u32.totalorder %s11546_s30, %s12993_s9 }
  0x86   : > { %p11549_p3 = pnand %p11547_p1, %p12209_p8 }
  0x88   : > { %p11550_p11 = pneg %p11549_p3 }
  0x8a   : > { %p11555_p13 = pnand %p11553_p12, %p11550_p11 }
  0x8c   : > { %11558 = shalt.err (!%p11555_p13)
}
  0x8d   : > { %s11559_s27 = scalar_lea.vmem %s575_s1, 160  ;;  %p11567_p7 = scmp.lt.s32.totalorder %s575_s1, %s575_s1 }
  0x8e   : > { %p11560_p0 = scmp.ne.s32.totalorder %s575_s1, %s11559_s27  ;;  %p11568_p9 = scmp.lt.s32.totalorder %s11559_s27, %s11559_s27 }
  0x90   : > { %p11562_p2 = pnand %p11560_p0, %p12209_p8  ;;  %p11569_p4 = por %p11568_p9, %p11567_p7 }
  0x92   : > { %p11563_p5 = pneg %p11562_p2 }
  0x94   : > { %p11570_p10 = pnand %p11569_p4, %p11563_p5 }
  0x96   : > { %11573 = shalt.err (!%p11570_p10)
}
  0x97   : > { %9999 = dma.hbm_to_vmem [thread:$0]  (!%p12193_p6), %s12993_s9, 160, %s575_s1, [#allocation19]  }
  0x98   : > { %s12040_s24 = smov [#allocation21]   ;;  %s12041_s0 = smov [#allocation24]  }
  0x99   : > { %s596_s3 = sshll.u32 %s12040_s24, 4  ;;  %s618_s17 = sshll.u32 %s12041_s0, 4  ;;  %s597_s3 = int_to_ptr.vmem [resolvable:$true] %s596_s3  ;;  %s619_s17 = int_to_ptr.vmem [resolvable:$true] %s618_s17 }
  0x9a   : > { %s11574_s18 = scalar_lea.hbm %s12995_s11, 64 }
  0x9b   : > { %p11575_p1 = scmp.ne.s32.totalorder %s12995_s11, %s11574_s18  ;;  %p11581_p12 = scmp.lt.u32.totalorder %s11574_s18, %s12995_s11 }
  0x9d   : > { %p11577_p3 = pnand %p11575_p1, %p12209_p8 }
  0x9f   : > { %p11578_p11 = pneg %p11577_p3 }
  0xa1   : > { %p11583_p13 = pnand %p11581_p12, %p11578_p11 }
  0xa3   : > { %11586 = shalt.err (!%p11583_p13)
}
  0xa4   : > { %s11587_s1 = scalar_lea.vmem %s597_s3, 64  ;;  %p11595_p7 = scmp.lt.s32.totalorder %s597_s3, %s597_s3 }
  0xa5   : > { %p11588_p0 = scmp.ne.s32.totalorder %s597_s3, %s11587_s1  ;;  %p11596_p9 = scmp.lt.s32.totalorder %s11587_s1, %s11587_s1 }
  0xa7   : > { %p11590_p2 = pnand %p11588_p0, %p12209_p8  ;;  %p11597_p4 = por %p11596_p9, %p11595_p7 }
  0xa9   : > { %p11591_p5 = pneg %p11590_p2 }
  0xab   : > { %p11598_p10 = pnand %p11597_p4, %p11591_p5 }
  0xad   : > { %11601 = shalt.err (!%p11598_p10)
}
  0xae   : > { %10005 = dma.hbm_to_vmem [thread:$0]  (!%p12193_p6), %s12995_s11, 64, %s597_s3, [#allocation22]  }
  0xaf   : > { %s11602_s28 = scalar_lea.hbm %s12997_s13, 16 }
  0xb0   : > { %p11603_p1 = scmp.ne.s32.totalorder %s12997_s13, %s11602_s28  ;;  %p11609_p12 = scmp.lt.u32.totalorder %s11602_s28, %s12997_s13 }
  0xb2   : > { %p11605_p3 = pnand %p11603_p1, %p12209_p8 }
  0xb4   : > { %p11606_p11 = pneg %p11605_p3 }
  0xb6   : > { %p11611_p13 = pnand %p11609_p12, %p11606_p11 }
  0xb8   : > { %11614 = shalt.err (!%p11611_p13)
}
  0xb9   : > { %s11615_s23 = scalar_lea.vmem %s619_s17, 16  ;;  %s11622_s3 = scalar_lea.vmem %s619_s17, 32 }
  0xba   : > { %p11616_p0 = scmp.ne.s32.totalorder %s619_s17, %s11615_s23  ;;  %p11623_p7 = scmp.lt.s32.totalorder %s619_s17, %s619_s17 }
  0xbb   : > { %p11624_p9 = scmp.lt.s32.totalorder %s11622_s3, %s11615_s23 }
  0xbc   : > { %p11618_p2 = pnand %p11616_p0, %p12209_p8 }
  0xbd   : > { %p11625_p4 = por %p11624_p9, %p11623_p7 }
  0xbe   : > { %p11619_p5 = pneg %p11618_p2 }
  0xc0   : > { %p11626_p10 = pnand %p11625_p4, %p11619_p5 }
  0xc2   : > { %11629 = shalt.err (!%p11626_p10)
}
  0xc3   : > { %10011 = dma.hbm_to_vmem [thread:$0]  (!%p12193_p6), %s12997_s13, 16, %s619_s17, [#allocation25]  }
  0xc4   : > { %s12042_s20 = smov [#allocation27]   ;;  %s12043_s24 = smov [#allocation8]  }
  0xc5   : > { %s640_s19 = sshll.u32 %s12042_s20, 4  ;;  %s482_s0 = sshll.u32 %s12043_s24, 4  ;;  %s641_s19 = int_to_ptr.vmem [resolvable:$true] %s640_s19  ;;  %s483_s0 = int_to_ptr.vmem [resolvable:$true] %s482_s0 }
  0xc6   : > { %s11630_s18 = scalar_lea.hbm %s12999_s15, 16 }
  0xc7   : > { %p11631_p1 = scmp.ne.s32.totalorder %s12999_s15, %s11630_s18  ;;  %p11637_p12 = scmp.lt.u32.totalorder %s11630_s18, %s12999_s15 }
  0xc9   : > { %p11633_p3 = pnand %p11631_p1, %p12209_p8 }
  0xcb   : > { %p11634_p11 = pneg %p11633_p3 }
  0xcd   : > { %p11639_p13 = pnand %p11637_p12, %p11634_p11 }
  0xcf   : > { %11642 = shalt.err (!%p11639_p13)
}
  0xd0   : > { %s11643_s17 = scalar_lea.vmem %s641_s19, 16  ;;  %s11650_s27 = scalar_lea.vmem %s641_s19, 32 }
  0xd1   : > { %p11644_p0 = scmp.ne.s32.totalorder %s641_s19, %s11643_s17  ;;  %p11651_p7 = scmp.lt.s32.totalorder %s641_s19, %s641_s19 }
  0xd2   : > { %p11652_p9 = scmp.lt.s32.totalorder %s11650_s27, %s11643_s17 }
  0xd3   : > { %p11646_p2 = pnand %p11644_p0, %p12209_p8 }
  0xd4   : > { %p11653_p4 = por %p11652_p9, %p11651_p7 }
  0xd5   : > { %p11647_p5 = pneg %p11646_p2 }
  0xd7   : > { %p11654_p10 = pnand %p11653_p4, %p11647_p5 }
  0xd9   : > { %11657 = shalt.err (!%p11654_p10)
}
  0xda   : > { %10017 = dma.hbm_to_vmem [thread:$0]  (!%p12193_p6), %s12999_s15, 16, %s641_s19, [#allocation28]  }
  0xdb   : > { %s13040_s30 = sld [smem:[#allocation51_spill]] }
  0xe1   : > { %s13041_s18 = smov %s13040_s30  ;;  %s11658_s25 = scalar_lea.hbm %s13040_s30, 71680 }
  0xe2   : > { %p11659_p1 = scmp.ne.s32.totalorder %s13041_s18, %s11658_s25  ;;  %p11665_p12 = scmp.lt.u32.totalorder %s11658_s25, %s13041_s18 }
  0xe4   : > { %p11661_p3 = pnand %p11659_p1, %p12209_p8 }
  0xe6   : > { %p11662_p11 = pneg %p11661_p3 }
  0xe8   : > { %p11667_p13 = pnand %p11665_p12, %p11662_p11 }
  0xea   : > { %11670 = shalt.err (!%p11667_p13)
}
  0xeb   : > { %s11671_s27 = scalar_lea.vmem %s483_s0, 71680  ;;  %p11679_p7 = scmp.lt.s32.totalorder %s483_s0, %s483_s0 }
  0xec   : > { %p11672_p0 = scmp.ne.s32.totalorder %s483_s0, %s11671_s27  ;;  %p11680_p9 = scmp.lt.s32.totalorder %s11671_s27, %s11671_s27 }
  0xee   : > { %p11674_p2 = pnand %p11672_p0, %p12209_p8  ;;  %p11681_p4 = por %p11680_p9, %p11679_p7 }
  0xf0   : > { %p11675_p5 = pneg %p11674_p2 }
  0xf2   : > { %p11682_p10 = pnand %p11681_p4, %p11675_p5 }
  0xf4   : > { %11685 = shalt.err (!%p11682_p10)
}
  0xf5   : > { %s12044_s19 = smov 448   ;;  %s12045_s1 = smov 28  }
  0xf6   : > { %9978 = dma.hbm_to_vmem [thread:$0]  (!%p12193_p6), %s13041_s18, 71680, %s483_s0, [#allocation7], %s12044_s19, %s12044_s19, %s12045_s1  }
  0xf7   : > { %s12046_s28 = smov [#allocation11]   ;;  %s13042_s4 = sld [smem:[#allocation53_spill]] }
  0xf8   : > { %s508_s30 = sshll.u32 %s12046_s28, 4  ;;  %s509_s30 = int_to_ptr.vmem [resolvable:$true] %s508_s30 }
  0xfd   : > { %s11686_s23 = scalar_lea.hbm %s13042_s4, 8192 }
  0xfe   : > { %p11687_p1 = scmp.ne.s32.totalorder %s13042_s4, %s11686_s23  ;;  %p11693_p12 = scmp.lt.u32.totalorder %s11686_s23, %s13042_s4 }
 0x100   : > { %p11689_p3 = pnand %p11687_p1, %p12209_p8 }
 0x102   : > { %p11690_p11 = pneg %p11689_p3 }
 0x104   : > { %p11695_p13 = pnand %p11693_p12, %p11690_p11 }
 0x106   : > { %11698 = shalt.err (!%p11695_p13)
}
 0x107   : > { %s11699_s0 = scalar_lea.vmem %s509_s30, 8192  ;;  %p11707_p7 = scmp.lt.s32.totalorder %s509_s30, %s509_s30 }
 0x108   : > { %p11700_p0 = scmp.ne.s32.totalorder %s509_s30, %s11699_s0  ;;  %p11708_p9 = scmp.lt.s32.totalorder %s11699_s0, %s11699_s0 }
 0x10a   : > { %p11702_p2 = pnand %p11700_p0, %p12209_p8  ;;  %p11709_p4 = por %p11708_p9, %p11707_p7 }
 0x10c   : > { %p11703_p5 = pneg %p11702_p2 }
 0x10e   : > { %p11710_p10 = pnand %p11709_p4, %p11703_p5 }
 0x110   : > { %11713 = shalt.err (!%p11710_p10)
}
 0x111   : > { %s12047_s19 = smov 128   ;;  %s12048_s1 = smov 8  }
 0x112   : > { %9984 = dma.hbm_to_vmem [thread:$0]  (!%p12193_p6), %s13042_s4, 8192, %s509_s30, [#allocation10], %s12047_s19, %s12047_s19, %s12048_s1  }
 0x113   : > { %s12049_s24 = smov [#allocation14]   ;;  %s12050_s25 = smov [#allocation17]  }
 0x114   : > { %s534_s28 = sshll.u32 %s12049_s24, 4  ;;  %s560_s26 = sshll.u32 %s12050_s25, 4  ;;  %s535_s28 = int_to_ptr.vmem [resolvable:$true] %s534_s28  ;;  %s12404_s26 = int_to_ptr.vmem [resolvable:$true] %s560_s26 }
 0x115   : > { %s11714_s17 = scalar_lea.hbm %s12990_s6, 1024 }
 0x116   : > { %p11715_p1 = scmp.ne.s32.totalorder %s12990_s6, %s11714_s17  ;;  %p11721_p12 = scmp.lt.u32.totalorder %s11714_s17, %s12990_s6 }
 0x118   : > { %p11717_p3 = pnand %p11715_p1, %p12209_p8 }
 0x11a   : > { %p11718_p11 = pneg %p11717_p3 }
 0x11c   : > { %p11723_p13 = pnand %p11721_p12, %p11718_p11 }
 0x11e   : > { %11726 = shalt.err (!%p11723_p13)
}
 0x11f   : > { %s11727_s19 = scalar_lea.vmem %s535_s28, 1024  ;;  %p11735_p7 = scmp.lt.s32.totalorder %s535_s28, %s535_s28 }
 0x120   : > { %p11728_p0 = scmp.ne.s32.totalorder %s535_s28, %s11727_s19  ;;  %p11736_p9 = scmp.lt.s32.totalorder %s11727_s19, %s11727_s19 }
 0x122   : > { %p11730_p2 = pnand %p11728_p0, %p12209_p8  ;;  %p11737_p4 = por %p11736_p9, %p11735_p7 }
 0x124   : > { %p11731_p5 = pneg %p11730_p2 }
 0x126   : > { %p11738_p10 = pnand %p11737_p4, %p11731_p5 }
 0x128   : > { %11741 = shalt.err (!%p11738_p10)
}
 0x129   : > { %s13043_s1 = smov 64   ;;  %s11742_s3 = scalar_lea.hbm %s12992_s8, 1024 }
 0x12a   : > { %9990 = dma.hbm_to_vmem [thread:$0]  (!%p12193_p6), %s12990_s6, 1024, %s535_s28, [#allocation13], %s13043_s1, %s13043_s1, %s12037_s29  }
 0x12b   : > { %p11743_p1 = scmp.ne.s32.totalorder %s12992_s8, %s11742_s3  ;;  %p11749_p12 = scmp.lt.u32.totalorder %s11742_s3, %s12992_s8 }
 0x12d   : > { %p11745_p3 = pnand %p11743_p1, %p12209_p8 }
 0x12f   : > { %p11746_p11 = pneg %p11745_p3 }
 0x131   : > { %p11751_p13 = pnand %p11749_p12, %p11746_p11 }
 0x133   : > { %11754 = shalt.err (!%p11751_p13)
}
 0x134   : > { %s11755_s28 = scalar_lea.vmem %s12404_s26, 1024  ;;  %p11763_p7 = scmp.lt.s32.totalorder %s12404_s26, %s12404_s26 }
 0x135   : > { %p11756_p0 = scmp.ne.s32.totalorder %s12404_s26, %s11755_s28  ;;  %p11764_p9 = scmp.lt.s32.totalorder %s11755_s28, %s11755_s28 }
 0x137   : > { %p11758_p2 = pnand %p11756_p0, %p12209_p8  ;;  %p11765_p4 = por %p11764_p9, %p11763_p7 }
 0x139   : > { %p11759_p5 = pneg %p11758_p2 }
 0x13b   : > { %p11766_p10 = pnand %p11765_p4, %p11759_p5 }
 0x13d   : > { %11769 = shalt.err (!%p11766_p10)
}
 0x13e   : > { %9996 = dma.hbm_to_vmem [thread:$0]  (!%p12193_p6), %s12992_s8, 1024, %s12404_s26, [#allocation16], %s13043_s1, %s13043_s1, %s12037_s29  }
 0x13f   : > { %s12051_s20 = smov [#allocation20]   ;;  %s12052_s25 = smov [#allocation23]  }
 0x140   : > { %s585_s24 = sshll.u32 %s12051_s20, 4  ;;  %s607_s23 = sshll.u32 %s12052_s25, 4  ;;  %s586_s24 = int_to_ptr.vmem [resolvable:$true] %s585_s24  ;;  %s12453_s23 = int_to_ptr.vmem [resolvable:$true] %s607_s23 }
 0x141   : > { %s11770_s27 = scalar_lea.hbm %s12994_s10, 112 }
 0x142   : > { %p11771_p1 = scmp.ne.s32.totalorder %s12994_s10, %s11770_s27  ;;  %p11777_p12 = scmp.lt.u32.totalorder %s11770_s27, %s12994_s10 }
 0x144   : > { %p11773_p3 = pnand %p11771_p1, %p12209_p8 }
 0x146   : > { %p11774_p11 = pneg %p11773_p3 }
 0x148   : > { %p11779_p13 = pnand %p11777_p12, %p11774_p11 }
 0x14a   : > { %11782 = shalt.err (!%p11779_p13)
}
 0x14b   : > { %s11783_s26 = scalar_lea.vmem %s586_s24, 112  ;;  %s11790_s1 = scalar_lea.vmem %s586_s24, 128 }
 0x14c   : > { %p11784_p0 = scmp.ne.s32.totalorder %s586_s24, %s11783_s26  ;;  %p11791_p7 = scmp.lt.s32.totalorder %s586_s24, %s586_s24 }
 0x14d   : > { %p11792_p9 = scmp.lt.s32.totalorder %s11790_s1, %s11783_s26 }
 0x14e   : > { %p11786_p2 = pnand %p11784_p0, %p12209_p8 }
 0x14f   : > { %p11793_p4 = por %p11792_p9, %p11791_p7 }
 0x150   : > { %p11787_p5 = pneg %p11786_p2 }
 0x152   : > { %p11794_p10 = pnand %p11793_p4, %p11787_p5 }
 0x154   : > { %11797 = shalt.err (!%p11794_p10)
}
 0x155   : > { %10002 = dma.hbm_to_vmem [thread:$0]  (!%p12193_p6), %s12994_s10, 112, %s586_s24, [#allocation19]  }
 0x156   : > { %s11798_s3 = scalar_lea.hbm %s12996_s12, 32 }
 0x157   : > { %p11799_p1 = scmp.ne.s32.totalorder %s12996_s12, %s11798_s3  ;;  %p11805_p12 = scmp.lt.u32.totalorder %s11798_s3, %s12996_s12 }
 0x159   : > { %p11801_p3 = pnand %p11799_p1, %p12209_p8 }
 0x15b   : > { %p11802_p11 = pneg %p11801_p3 }
 0x15d   : > { %p11807_p13 = pnand %p11805_p12, %p11802_p11 }
 0x15f   : > { %11810 = shalt.err (!%p11807_p13)
}
 0x160   : > { %s11811_s24 = scalar_lea.vmem %s12453_s23, 32  ;;  %p11819_p7 = scmp.lt.s32.totalorder %s12453_s23, %s12453_s23 }
 0x161   : > { %p11812_p0 = scmp.ne.s32.totalorder %s12453_s23, %s11811_s24  ;;  %p11820_p9 = scmp.lt.s32.totalorder %s11811_s24, %s11811_s24 }
 0x163   : > { %p11814_p2 = pnand %p11812_p0, %p12209_p8  ;;  %p11821_p4 = por %p11820_p9, %p11819_p7 }
 0x165   : > { %p11815_p5 = pneg %p11814_p2 }
 0x167   : > { %p11822_p10 = pnand %p11821_p4, %p11815_p5 }
 0x169   : > { %11825 = shalt.err (!%p11822_p10)
}
 0x16a   : > { %10008 = dma.hbm_to_vmem [thread:$0]  (!%p12193_p6), %s12996_s12, 32, %s12453_s23, [#allocation22]  }
 0x16b   : > { %s12053_s26 = smov [#allocation26]   ;;  %s12054_s30 = smov [#allocation29]  }
 0x16c   : > { %s629_s1 = sshll.u32 %s12053_s26, 4  ;;  %s651_s19 = sshll.u32 %s12054_s30, 4  ;;  %s630_s1 = int_to_ptr.vmem [resolvable:$true] %s629_s1  ;;  %s12496_s19 = int_to_ptr.vmem [resolvable:$true] %s651_s19 }
 0x16d   : > { %s11826_s3 = scalar_lea.hbm %s12998_s14, 16 }
 0x16e   : > { %p11827_p1 = scmp.ne.s32.totalorder %s12998_s14, %s11826_s3  ;;  %p11833_p12 = scmp.lt.u32.totalorder %s11826_s3, %s12998_s14 }
 0x170   : > { %p11829_p3 = pnand %p11827_p1, %p12209_p8 }
 0x172   : > { %p11830_p11 = pneg %p11829_p3 }
 0x174   : > { %p11835_p13 = pnand %p11833_p12, %p11830_p11 }
 0x176   : > { %11838 = shalt.err (!%p11835_p13)
}
 0x177   : > { %s11839_s22 = scalar_lea.vmem %s630_s1, 16  ;;  %s11846_s24 = scalar_lea.vmem %s630_s1, 32 }
 0x178   : > { %p11840_p0 = scmp.ne.s32.totalorder %s630_s1, %s11839_s22  ;;  %p11847_p7 = scmp.lt.s32.totalorder %s630_s1, %s630_s1 }
 0x179   : > { %p11848_p9 = scmp.lt.s32.totalorder %s11846_s24, %s11839_s22 }
 0x17a   : > { %p11842_p2 = pnand %p11840_p0, %p12209_p8 }
 0x17b   : > { %p11849_p4 = por %p11848_p9, %p11847_p7 }
 0x17c   : > { %p11843_p5 = pneg %p11842_p2 }
 0x17e   : > { %p11850_p10 = pnand %p11849_p4, %p11843_p5 }
 0x180   : > { %11853 = shalt.err (!%p11850_p10)
}
 0x181   : > { %10014 = dma.hbm_to_vmem [thread:$0]  (!%p12193_p6), %s12998_s14, 16, %s630_s1, [#allocation25]  }
 0x182   : > { %s11854_s20 = scalar_lea.hbm %s13000_s16, 16 }
 0x183   : > { %p11855_p1 = scmp.ne.s32.totalorder %s13000_s16, %s11854_s20  ;;  %p11861_p12 = scmp.lt.u32.totalorder %s11854_s20, %s13000_s16 }
 0x185   : > { %p11857_p3 = pnand %p11855_p1, %p12209_p8 }
 0x187   : > { %p11858_p11 = pneg %p11857_p3 }
 0x189   : > { %p11863_p13 = pnand %p11861_p12, %p11858_p11 }
 0x18b   : > { %11866 = shalt.err (!%p11863_p13)
}
 0x18c   : > { %s11867_s1 = scalar_lea.vmem %s12496_s19, 16  ;;  %s11874_s0 = scalar_lea.vmem %s12496_s19, 32 }
 0x18d   : > { %p11868_p0 = scmp.ne.s32.totalorder %s12496_s19, %s11867_s1  ;;  %p11875_p7 = scmp.lt.s32.totalorder %s12496_s19, %s12496_s19 }
 0x18e   : > { %p11876_p9 = scmp.lt.s32.totalorder %s11874_s0, %s11867_s1 }
 0x18f   : > { %p11870_p2 = pnand %p11868_p0, %p12209_p8 }
 0x190   : > { %p11877_p4 = por %p11876_p9, %p11875_p7 }
 0x191   : > { %p11871_p5 = pneg %p11870_p2 }
 0x193   : > { %p11878_p10 = pnand %p11877_p4, %p11871_p5 }
 0x195   : > { %11881 = shalt.err (!%p11878_p10)
}
 0x196   : > { %10020 = dma.hbm_to_vmem [thread:$0]  (!%p12193_p6), %s13000_s16, 16, %s12496_s19, [#allocation28]  }
 0x197   : > { %s13044_s29 = sld [smem:[#allocation54_spill]] }
 0x19d   : > { %s13045_s26 = smov %s13044_s29  ;;  %s11882_s30 = scalar_lea.hbm %s13044_s29, 16 }
 0x19e   : > { %p11883_p1 = scmp.ne.s32.totalorder %s13045_s26, %s11882_s30  ;;  %p11889_p12 = scmp.lt.u32.totalorder %s11882_s30, %s13045_s26 }
 0x1a0   : > { %p11885_p3 = pnand %p11883_p1, %p12209_p8 }
 0x1a2   : > { %p11886_p11 = pneg %p11885_p3 }
 0x1a4   : > { %p11891_p13 = pnand %p11889_p12, %p11886_p11 }
 0x1a6   : > { %11894 = shalt.err (!%p11891_p13)
}
 0x1a7   : > { %s12055_s27 = smov [#allocation30]   ;;  %s13046_s0 = sld [smem:[#allocation46_spill]] }
 0x1a8   : > { %s13047_s23 = sld [smem:[#allocation45_spill]]  ;;  %s13048_s22 = sld [smem:[#allocation44_spill]] }
 0x1a9   : > { %s13049_s21 = sld [smem:[#allocation43_spill]]  ;;  %s13050_s24 = sld [smem:[#allocation47_spill]] }
 0x1aa   : > { %10023 = dma.hbm_to_smem (!%p12193_p6), %s13045_s26, 16, %s12055_s27, [#allocation5]  }
 0x1ad   : > { %s8624_s28 = sadd.s32 4294967294, %s13046_s0   ;;  %s12558_s30 = sadd.s32 1, %s13046_s0  }
 0x1ae   : > { %s50_s2 = sadd.s32 1, %s13047_s23  ;;  %s47_s29 = ssub.s32 %s13046_s0, %s12558_s30 }
 0x1af   : > { %p57_p8 = scmp.ne.s32.totalorder %s13047_s23, %s13048_s22  ;;  %p48_p0 = scmp.eq.s32.totalorder %s47_s29, 0 }
 0x1b0   : > { %p58_p2 = scmp.eq.s32.totalorder %s13046_s0, 0  ;;  %p63_p5 = scmp.ne.s32.totalorder %s13048_s22, %s13049_s21 }
 0x1b1   : > { %p444_p7 = scmp.eq.s32.totalorder %s13050_s24, 1  ;;  %p13051_p4 = scmp.eq.s32.totalorder %s13050_s24, 0 }
 0x1b2   : > { %s12570_s20 = scalar_select %p48_p0, %s13047_s23, %s50_s2  }
 0x1b3   : > { %p59_p9 = por %p58_p2, %p57_p8  ;;  %p12574_p10 = por %p13051_p4, %p63_p5 }
 0x1b4   : > { %p12578_p6 = por %p444_p7, %p57_p8  ;;  %p450_p1 = scmp.eq.s32.totalorder %s8624_s28, 1 }
 0x1b5   : > { %p10049_p3 = scmp.lt.s32.totalorder %s13046_s0, 2  ;;  %s671_s17 = sand.u32 1, %s13047_s23  }
 0x1b6   : > { %s13053_s3 = scalar_select %p12578_p6, 1, 0 }
 0x1b7   : > { %p12584_p11 = por %p450_p1, %p63_p5  ;;  %s8644_s19 = sshll.u32 %s671_s17, 3 }
 0x1b8   : > { %s8645_s1 = sshll.u32 %s13046_s0, 7  ;;  %s13055_s24 = sld [smem:[#allocation49_spill]] }
 0x1b9   : > { %s13054_s27 = scalar_select %p12584_p11, 1, 0 }
 0x1ba   : > { %s675_s29 = scalar_lea.vmem [#allocation2], %s8644_s19  ;;  %p12594_p12 = pnand %p10049_p3, %p59_p9 }
 0x1bb   : > { %s682_s4 = sshll.u32 %s675_s29, 4  ;;  %s672_s0 = scalar_lea.sflag [#allocation3], %s671_s17  ;;  %s12598_s4 = int_to_ptr.vmem [resolvable:$true] %s682_s4 }
 0x1bc   : > { %p11897_p8 = pneg %p12594_p12 }
 0x1be   : > { %s12592_s2 = scalar_lea.hbm %s13055_s24, %s8645_s1  ;;  %s11900_s22 = scalar_lea.hbm %s13055_s24, 256 }
 0x1bf   : > { %s11895_s23 = scalar_lea.hbm %s12592_s2, 128  ;;  %p11901_p5 = scmp.lt.u32.totalorder %s12592_s2, %s13055_s24 }
 0x1c0   : > { %p11896_p13 = scmp.ne.s32.totalorder %s12592_s2, %s11895_s23  ;;  %p11902_p7 = scmp.lt.u32.totalorder %s11900_s22, %s11895_s23 }
 0x1c1   : > { %p11904_p4 = scmp.lt.u32.totalorder %s11895_s23, %s12592_s2 }
 0x1c2   : > { %p11898_p0 = pnand %p11897_p8, %p11896_p13  ;;  %p11903_p9 = por %p11902_p7, %p11901_p5 }
 0x1c4   : > { %p11899_p2 = pneg %p11898_p0  ;;  %p11905_p1 = por %p11904_p4, %p11903_p9 }
 0x1c6   : > { %p11906_p3 = pnand %p11905_p1, %p11899_p2 }
 0x1c8   : > { %11909 = shalt.err (!%p11906_p3)
}
 0x1c9   : > { %s11910_s17 = scalar_lea.vmem %s12598_s4, 128  ;;  %s12056_s1 = smov [#allocation2]  }
 0x1ca   : > { %p11911_p13 = scmp.ne.s32.totalorder %s12598_s4, %s11910_s17  ;;  %s11915_s19 = sshll.u32 %s12056_s1, 4  ;;  %s11916_s19 = int_to_ptr.vmem [resolvable:$false] %s11915_s19 }
 0x1cb   : > { %s11917_s21 = scalar_lea.vmem %s11916_s19, 256  ;;  %p11918_p6 = scmp.lt.s32.totalorder %s12598_s4, %s11916_s19 }
 0x1cc   : > { %p11913_p0 = pnand %p11911_p13, %p11897_p8  ;;  %p11919_p5 = scmp.lt.s32.totalorder %s11917_s21, %s11910_s17 }
 0x1ce   : > { %p11914_p11 = pneg %p11913_p0  ;;  %p11920_p7 = por %p11919_p5, %p11918_p6 }
 0x1d0   : > { %p11921_p9 = pnand %p11920_p7, %p11914_p11 }
 0x1d2   : > { %11924 = shalt.err (!%p11921_p9)
}
 0x1d3   : > { %10027 = dma.hbm_to_vmem [thread:$0]  (!%p12594_p12), %s12592_s2, 128, %s12598_s4, %s672_s0  }
 0x1d4   : > { %s13057_s23 = sld [smem:[#allocation48_spill]] }
 0x1da   : > { %p13058_p2 = scmp.ne.s32.totalorder %s13057_s23, 0 }
 0x1db   : > { %s13059_s22 = sld [smem:[#allocation44_spill]] (!%p13058_p2) }
 0x1dc   : > { %691 = sbr.rel (%p13058_p2) target bundleno = 2975 (0xb9f), region = 92 }
 0x1e1   : > { %s12628_s29 = sand.u32 (!%p13058_p2), 1, %s13059_s22  }
 0x1e2   : > { %s8647_s1 = sshll.u32 (!%p13058_p2), %s12628_s29, 3  ;;  %s694_s17 = scalar_lea.sflag (!%p13058_p2), [#allocation3], %s12628_s29 }
 0x1e3   : > { %s12634_s19 = scalar_lea.vmem [#allocation2], %s8647_s1 }
 0x1e4   : > { %11970 = dma.done.wait (%p12574_p10), %s694_s17, 128  }
 0x1e5   : > { %11972 = vsyncadd (%p12574_p10), %s694_s17, 4294967168  ;;  %s13060_s4 = sld [smem:[#allocation47_spill]] }
 0x1eb   : > { %p13061_p6 = scmp.eq.s32.totalorder %s13060_s4, 0 }
 0x1ed   : > { %11974 = dma.done.wait (%p13061_p6), [#allocation7], 74240   ;;  %p13062_p11 = pmov %p13061_p6 }
 0x1ee   : > { %p13063_p12 = pmov %p13061_p6 }
 0x1ef   : > { %11976 = vsyncadd (%p13062_p11), [#allocation7], 4294893056 }
 0x1f0   : > { %11978 = dma.done.wait (%p13063_p12), [#allocation10], 36864   ;;  %p13064_p8 = pmov %p13061_p6 }
 0x1f1   : > { %p13065_p4 = pmov %p13061_p6 }
 0x1f2   : > { %11980 = vsyncadd (%p13064_p8), [#allocation10], 4294930432 }
 0x1f3   : > { %11982 = dma.done.wait (%p13065_p4), [#allocation13], 3072   ;;  %p13066_p1 = pmov %p13065_p4 }
 0x1f5   : > { %11984 = vsyncadd (%p13066_p1), [#allocation13], 4294964224  ;;  %p13067_p10 = pmov %p13066_p1 }
 0x1f6   : > { %p13068_p3 = pmov %p13066_p1 }
 0x1f7   : > { %11986 = dma.done.wait (%p13067_p10), [#allocation16], 2048  }
 0x1f8   : > { %11988 = vsyncadd (%p13068_p3), [#allocation16], 4294965248  ;;  %p13069_p13 = pmov %p13066_p1 }
 0x1f9   : > { %p13070_p0 = pmov %p13066_p1 }
 0x1fa   : > { %11990 = dma.done.wait (%p13069_p13), [#allocation19], 272  }
 0x1fb   : > { %11992 = vsyncadd (%p13070_p0), [#allocation19], 4294967024  ;;  %p13071_p5 = pmov %p13070_p0 }
 0x1fc   : > { %p13072_p7 = pmov %p13070_p0 }
 0x1fd   : > { %11994 = dma.done.wait (%p13071_p5), [#allocation22], 96  }
 0x1fe   : > { %11996 = vsyncadd (%p13072_p7), [#allocation22], 4294967200  ;;  %p13073_p9 = pmov %p13070_p0 }
 0x1ff   : > { %p13074_p2 = pmov %p13070_p0 }
 0x200   : > { %11998 = dma.done.wait (%p13073_p9), [#allocation25], 32  }
 0x201   : > { %12000 = vsyncadd (%p13074_p2), [#allocation25], 4294967264  ;;  %p13075_p6 = pmov %p13070_p0 }
 0x202   : > { %p13076_p11 = pmov %p13070_p0 }
 0x203   : > { %12002 = dma.done.wait (%p13075_p6), [#allocation28], 32  }
 0x204   : > { %12004 = vsyncadd (%p13076_p11), [#allocation28], 4294967264  ;;  %p13077_p12 = pmov %p13070_p0 }
 0x205   : > { %p13078_p8 = pmov %p13070_p0 }
 0x206   : > { %12006 = dma.done.wait (%p13077_p12), [#allocation5], 16  }
 0x207   : > { %12008 = vsyncadd (%p13078_p8), [#allocation5], 4294967280 }
 0x208   : > { %770 = sfence }
 0x209   : > { %v10130_v0 = vld [vmem:[#allocation6 + $0x4] ss:$40 sps:$4 sm:$0xff]   ;;  %v10132_v1 = vld [vmem:[#allocation6] ss:$40 sps:$4 sm:$0xff]   ;;  %v12057_v2 = vmov 0   ;;  %v820_v5 = vld [vmem:[%s12634_s19] sm:$0xff] }
 0x20a   : > { %1032 = vmatprep.mubr.bf16.mxu0 %v12057_v2  ;;  %1155 = vmatprep.mubr.bf16.mxu1 %v12057_v2  ;;  %v10133_v3 = vld [vmem:[#allocation6 + $0x54] ss:$40 sps:$4 sm:$0xff]   ;;  %v10135_v4 = vld [vmem:[#allocation6 + $0x50] ss:$40 sps:$4 sm:$0xff]   ;;  %v12679_v7 = vpack.c.bf16 %v820_v5, %v820_v5  ;;  %vm996_vm0 = vcmask 261120   ;;  %s1205_s25 = sld [smem:[#allocation30]] }
 0x20b   : > { %1000 = vmatprep.subr.bf16.mxu0 %v10130_v0  ;;  %v10138_v6 = vld [vmem:[#allocation6 + $0xc] ss:$40 sps:$4 sm:$0xff]   ;;  %v10136_v8 = vld [vmem:[#allocation6 + $0x8] ss:$40 sps:$4 sm:$0xff]   ;;  %v10141_v9 = vld [vmem:[#allocation6 + $0x5c] ss:$40 sps:$4 sm:$0xff]  }
 0x20c   : > { %1001 = vmatpush1.bf16.msra.mxu0 %v10132_v1  ;;  %v10148_v10 = vld [vmem:[#allocation6 + $0x1c] ss:$40 sps:$4 sm:$0xff]   ;;  %v10150_v11 = vld [vmem:[#allocation6 + $0x18] ss:$40 sps:$4 sm:$0xff]   ;;  %v10154_v13 = vld [vmem:[#allocation6 + $0x6c] ss:$40 sps:$4 sm:$0xff]  }
 0x20d   : > { %1002 = vmatprep.subr.bf16.mxu0 %v10133_v3  ;;  %v10139_v12 = vld [vmem:[#allocation6 + $0x58] ss:$40 sps:$4 sm:$0xff]   ;;  %v10144_v14 = vld [vmem:[#allocation6 + $0x14] ss:$40 sps:$4 sm:$0xff]   ;;  %1123 = vmatprep.subr.bf16.mxu1 %v10148_v10  ;;  %v10156_v15 = vld [vmem:[#allocation6 + $0x68] ss:$40 sps:$4 sm:$0xff]  }
 0x20e   : > { %1124 = vmatpush1.bf16.msra.mxu1 %v10150_v11  ;;  %v10162_v16 = vld [vmem:[#allocation8 + $0x4] ss:$28 sps:$4 sm:$0xff]   ;;  %v10142_v17 = vld [vmem:[#allocation6 + $0x10] ss:$40 sps:$4 sm:$0xff]   ;;  %v10159_v26 = vld [vmem:[#allocation6 + $0x74] ss:$40 sps:$4 sm:$0xff]  }
 0x20f   : > { %1125 = vmatprep.subr.bf16.mxu1 %v10154_v13  ;;  %v10147_v18 = vld [vmem:[#allocation6 + $0x64] ss:$40 sps:$4 sm:$0xff]   ;;  %v10160_v19 = vld [vmem:[#allocation8] ss:$28 sps:$4 sm:$0xff]   ;;  %v10166_v23 = vld [vmem:[#allocation8 + $0x38] ss:$28 sps:$4 sm:$0xff]  }
 0x210   : > { %1003 = vmatpush1.bf16.msra.mxu0 %v10135_v4  ;;  %v10168_v20 = vld [vmem:[#allocation8 + $0x3c] ss:$28 sps:$4 sm:$0xff]   ;;  %v10145_v21 = vld [vmem:[#allocation6 + $0x60] ss:$40 sps:$4 sm:$0xff]   ;;  %v10153_v22 = vld [vmem:[#allocation6 + $0x24] ss:$40 sps:$4 sm:$0xff]  }
 0x211   : > { %1041 = vmatprep.subr.bf16.mxu0 %v10138_v6  ;;  %v10174_v24 = vld [vmem:[#allocation8 + $0x74] ss:$28 sps:$4 sm:$0xff]   ;;  %v10151_v25 = vld [vmem:[#allocation6 + $0x20] ss:$40 sps:$4 sm:$0xff]   ;;  %v10192_v36 = vld [vmem:[#allocation8 + $0x11c] ss:$28 sps:$4 sm:$0xff]  }
 0x212   : > { %1126 = vmatpush1.bf16.msra.mxu1 %v10156_v15  ;;  %v10172_v27 = vld [vmem:[#allocation8 + $0x70] ss:$28 sps:$4 sm:$0xff]   ;;  %v10178_v31 = vld [vmem:[#allocation8 + $0xa8] ss:$28 sps:$4 sm:$0xff]   ;;  %v10184_v35 = vld [vmem:[#allocation8 + $0xe0] ss:$28 sps:$4 sm:$0xff]  }
 0x213   : > { %8686 = vmatmul.mubr.msk.bf16.vlgmr.msra.gmra.mrb[0].mxu0 %vm996_vm0, %v12679_v7  ;;  %4804 = vmatprep.subr.bf16.mxu1 %v10162_v16  ;;  %v10180_v28 = vld [vmem:[#allocation8 + $0xac] ss:$28 sps:$4 sm:$0xff]   ;;  %v10157_v29 = vld [vmem:[#allocation6 + $0x70] ss:$40 sps:$4 sm:$0xff]   ;;  %v10186_v32 = vld [vmem:[#allocation8 + $0xe4] ss:$28 sps:$4 sm:$0xff]  }
 0x214   : > { %1042 = vmatpush1.bf16.msra.mxu0 %v10136_v8  ;;  %1073 = vmatprep.mubr.bf16.mxu0 %v12057_v2  ;;  %v10165_v30 = vld [vmem:[#allocation8 + $0xc] ss:$28 sps:$4 sm:$0xff]   ;;  %v10171_v34 = vld [vmem:[#allocation8 + $0x44] ss:$28 sps:$4 sm:$0xff]   ;;  %v10177_v38 = vld [vmem:[#allocation8 + $0x7c] ss:$28 sps:$4 sm:$0xff]  }
 0x215   : > { %1043 = vmatprep.subr.bf16.mxu0 %v10141_v9  ;;  %8689 = vmatmul.mubr.msk.bf16.vlgmr.msra.gmra.mrb[0].mxu1 %vm996_vm0, %v12679_v7  ;;  %v10163_v33 = vld [vmem:[#allocation8 + $0x8] ss:$28 sps:$4 sm:$0xff]   ;;  %v10169_v37 = vld [vmem:[#allocation8 + $0x40] ss:$28 sps:$4 sm:$0xff]   ;;  %v10190_v39 = vld [vmem:[#allocation8 + $0x118] ss:$28 sps:$4 sm:$0xff]  }
 0x216   : > { %4805 = vmatpush1.bf16.msra.mxu1 %v10160_v19  ;;  %v10198_v40 = vld [vmem:[#allocation8 + $0x154] ss:$28 sps:$4 sm:$0xff]   ;;  %v10204_v44 = vld [vmem:[#allocation8 + $0x18c] ss:$28 sps:$4 sm:$0xff]   ;;  %v10210_v48 = vld [vmem:[#allocation8 + $0x1c4] ss:$28 sps:$4 sm:$0xff]  }
 0x217   : > { %4806 = vmatprep.subr.bf16.mxu1 %v10168_v20  ;;  %v10175_v41 = vld [vmem:[#allocation8 + $0x78] ss:$28 sps:$4 sm:$0xff]   ;;  %v10196_v43 = vld [vmem:[#allocation8 + $0x150] ss:$28 sps:$4 sm:$0xff]   ;;  %v10202_v47 = vld [vmem:[#allocation8 + $0x188] ss:$28 sps:$4 sm:$0xff]  }
 0x218   : > { %1044 = vmatpush1.bf16.msra.mxu0 %v10139_v12  ;;  %v10183_v42 = vld [vmem:[#allocation8 + $0xb4] ss:$28 sps:$4 sm:$0xff]   ;;  %v10189_v46 = vld [vmem:[#allocation8 + $0xec] ss:$28 sps:$4 sm:$0xff]   ;;  %v10195_v50 = vld [vmem:[#allocation8 + $0x124] ss:$28 sps:$4 sm:$0xff]  }
 0x219   : > { %1082 = vmatprep.subr.bf16.mxu0 %v10144_v14  ;;  %v10181_v45 = vld [vmem:[#allocation8 + $0xb0] ss:$28 sps:$4 sm:$0xff]   ;;  %v10187_v49 = vld [vmem:[#allocation8 + $0xe8] ss:$28 sps:$4 sm:$0xff]   ;;  %v10193_v51 = vld [vmem:[#allocation8 + $0x120] ss:$28 sps:$4 sm:$0xff]  }
 0x21a   : > { %4807 = vmatpush1.bf16.msra.mxu1 %v10166_v23  ;;  %v10208_v52 = vld [vmem:[#allocation8 + $0x1c0] ss:$28 sps:$4 sm:$0xff]   ;;  %v10214_v55 = vld [vmem:[#allocation8 + $0x1f8] ss:$28 sps:$4 sm:$0xff]   ;;  %v10220_v59 = vld [vmem:[#allocation8 + $0x230] ss:$28 sps:$4 sm:$0xff]  }
 0x21b   : > { %8687 = vmatmul.mubr.msk.bf16.vlgmr.msra.gmra.mrb[4].mxu0 %vm996_vm0, %v12679_v7  ;;  %4808 = vmatprep.subr.bf16.mxu1 %v10174_v24  ;;  %v10201_v53 = vld [vmem:[#allocation8 + $0x15c] ss:$28 sps:$4 sm:$0xff]   ;;  %v10222_v56 = vld [vmem:[#allocation8 + $0x234] ss:$28 sps:$4 sm:$0xff]   ;;  %v10228_v60 = vld [vmem:[#allocation8 + $0x26c] ss:$28 sps:$4 sm:$0xff]  }
 0x21c   : > { %1083 = vmatpush1.bf16.msra.mxu0 %v10142_v17  ;;  %1114 = vmatprep.mubr.bf16.mxu0 %v12057_v2  ;;  %v10216_v54 = vld [vmem:[#allocation8 + $0x1fc] ss:$28 sps:$4 sm:$0xff]   ;;  %v10207_v58 = vld [vmem:[#allocation8 + $0x194] ss:$28 sps:$4 sm:$0xff]   ;;  %v10213_v62 = vld [vmem:[#allocation8 + $0x1cc] ss:$28 sps:$4 sm:$0xff]  }
 0x21d   : > { %1084 = vmatprep.subr.bf16.mxu0 %v10147_v18  ;;  %v10199_v57 = vld [vmem:[#allocation8 + $0x158] ss:$28 sps:$4 sm:$0xff]   ;;  %v10205_v61 = vld [vmem:[#allocation8 + $0x190] ss:$28 sps:$4 sm:$0xff]   ;;  %v10226_v63 = vld [vmem:[#allocation8 + $0x268] ss:$28 sps:$4 sm:$0xff]  }
 0x21e   : > { %4809 = vmatpush1.bf16.msra.mxu1 %v10172_v27  ;;  %v10234_v0 = vld [vmem:[#allocation8 + $0x2a4] ss:$28 sps:$4 sm:$0xff]   ;;  %v10240_v5 = vld [vmem:[#allocation8 + $0x2dc] ss:$28 sps:$4 sm:$0xff]   ;;  %v10231_v10 = vld [vmem:[#allocation8 + $0x274] ss:$28 sps:$4 sm:$0xff]  }
 0x21f   : > { %4810 = vmatprep.subr.bf16.mxu1 %v10180_v28  ;;  %v10211_v1 = vld [vmem:[#allocation8 + $0x1c8] ss:$28 sps:$4 sm:$0xff]   ;;  %v10232_v4 = vld [vmem:[#allocation8 + $0x2a0] ss:$28 sps:$4 sm:$0xff]   ;;  %v10238_v8 = vld [vmem:[#allocation8 + $0x2d8] ss:$28 sps:$4 sm:$0xff]  }
 0x220   : > { %1085 = vmatpush1.bf16.msra.mxu0 %v10145_v21  ;;  %v10219_v3 = vld [vmem:[#allocation8 + $0x204] ss:$28 sps:$4 sm:$0xff]   ;;  %v10223_v9 = vld [vmem:[#allocation8 + $0x238] ss:$28 sps:$4 sm:$0xff]   ;;  %v10229_v11 = vld [vmem:[#allocation8 + $0x270] ss:$28 sps:$4 sm:$0xff]  }
 0x221   : > { %1164 = vmatprep.subr.bf16.mxu0 %v10153_v22  ;;  %v10217_v6 = vld [vmem:[#allocation8 + $0x200] ss:$28 sps:$4 sm:$0xff]   ;;  %v10237_v12 = vld [vmem:[#allocation8 + $0x2ac] ss:$28 sps:$4 sm:$0xff]   ;;  %v10246_v16 = vld [vmem:[#allocation8 + $0x314] ss:$28 sps:$4 sm:$0xff]  }
 0x222   : > { %4811 = vmatpush1.bf16.msra.mxu1 %v10178_v31  ;;  %v10235_v13 = vld [vmem:[#allocation8 + $0x2a8] ss:$28 sps:$4 sm:$0xff]   ;;  %v10241_v15 = vld [vmem:[#allocation8 + $0x2e0] ss:$28 sps:$4 sm:$0xff]   ;;  %v10244_v18 = vld [vmem:[#allocation8 + $0x310] ss:$28 sps:$4 sm:$0xff]  }
 0x223   : > { %8688 = vmatmul.mubr.msk.bf16.vlgmr.msra.gmra.mrb[8].mxu0 %vm996_vm0, %v12679_v7  ;;  %4812 = vmatprep.subr.bf16.mxu1 %v10186_v32  ;;  %v10243_v14 = vld [vmem:[#allocation8 + $0x2e4] ss:$28 sps:$4 sm:$0xff]   ;;  %v10249_v17 = vld [vmem:[#allocation8 + $0x31c] ss:$28 sps:$4 sm:$0xff]   ;;  %v10252_v20 = vld [vmem:[#allocation8 + $0x34c] ss:$28 sps:$4 sm:$0xff]  }
 0x224   : > { %1165 = vmatpush1.bf16.msra.mxu0 %v10151_v25  ;;  %1196 = vmatprep.mubr.bf16.mxu0 %v12057_v2  ;;  %v10247_v19 = vld [vmem:[#allocation8 + $0x318] ss:$28 sps:$4 sm:$0xff]   ;;  %v10250_v22 = vld [vmem:[#allocation8 + $0x348] ss:$28 sps:$4 sm:$0xff]   ;;  %v10253_v23 = vld [vmem:[#allocation8 + $0x350] ss:$28 sps:$4 sm:$0xff]  }
 0x225   : > { %1166 = vmatprep.subr.bf16.mxu0 %v10159_v26  ;;  %v10255_v21 = vld [vmem:[#allocation8 + $0x354] ss:$28 sps:$4 sm:$0xff]   ;;  %v10258_v24 = vld [vmem:[#allocation8 + $0x384] ss:$28 sps:$4 sm:$0xff]   ;;  %v10261_v25 = vld [vmem:[#allocation8 + $0x38c] ss:$28 sps:$4 sm:$0xff]   ;;  %v846_v26 = vlaneseq }
 0x226   : > { %4813 = vmatpush1.bf16.msra.mxu1 %v10184_v35  ;;  %v12696_v28 = vld [vmem:[#allocation18] sm:$0xff]  ;;  %s9251_s2 = sld [smem:[#allocation30 + $0x1]]  ;;  %s9476_s28 = sld [smem:[#allocation30 + $0x2]] }
 0x227   : > { %4814 = vmatprep.subr.bf16.mxu1 %v10192_v36  ;;  %v12694_v27 = vshrl.u32 %v846_v26, 7  ;;  %v10295_v26 = vld [vmem:[#allocation8 + $0x4d8] ss:$28 sps:$4 sm:$0xff]   ;;  %s9541_s0 = sld [smem:[#allocation30 + $0x3]]  ;;  %s9559_s21 = sld [smem:[#allocation30 + $0x4]] }
 0x228   : > { %1167 = vmatpush1.bf16.msra.mxu0 %v10157_v29  ;;  %s9569_s23 = sld [smem:[#allocation30 + $0x5]]  ;;  %s9579_s22 = sld [smem:[#allocation30 + $0x6]] }
 0x229   : > { %5009 = vmatprep.subr.bf16.mxu0 %v10165_v30  ;;  %v12699_v29 = vsub.s32 0, %v12694_v27  ;;  %v12702_v30 = vsub.s32 1, %v12694_v27  ;;  %v12711_v35 = vsub.s32 3, %v12694_v27  ;;  %s9590_s17 = sshll.u32 %s13060_s4, 7  ;;  %s818_s19 = scalar_lea.vmem [#allocation31], %s8647_s1 }
 0x22a   : > { %4815 = vmatpush1.bf16.msra.mxu1 %v10190_v39  ;;  %s8377_s4 = scalar_lea.sflag [#allocation4], %s12628_s29  ;;  %p13080_p1 = scmp.ne.s32.totalorder %s13053_s3, 0 }
 0x22b   : > { %8690 = vmatmul.mubr.msk.bf16.vlgmr.msra.gmra.mrb[12].mxu0 %vm996_vm0, %v12679_v7  ;;  %4816 = vmatprep.subr.bf16.mxu1 %v10198_v40  ;;  %v10225_v7 = vld [vmem:[#allocation8 + $0x23c] ss:$28 sps:$4 sm:$0xff]   ;;  %v849_v31 = vrot.slane %v12696_v28, %v12699_v29  ;;  %v853_v32 = vrot.slane %v12696_v28, %v12702_v30  ;;  %s12060_s1 = smov [#allocation31]  }
 0x22c   : > { %5010 = vmatpush1.bf16.msra.mxu0 %v10163_v33 }
 0x22d   : > { %5011 = vmatprep.subr.bf16.mxu0 %v10171_v34  ;;  %v12708_v34 = vstv %s1205_s25  ;;  %s8390_s25 = sshll.u32 %s818_s19, 4  ;;  %s12942_s25 = int_to_ptr.vmem [resolvable:$true] %s8390_s25 }
 0x22e   : > { %4817 = vmatpush1.bf16.msra.mxu1 %v10196_v43 }
 0x22f   : > { %4818 = vmatprep.subr.bf16.mxu1 %v10204_v44  ;;  %v10256_v44 = vld [vmem:[#allocation8 + $0x380] ss:$28 sps:$4 sm:$0xff]  }
 0x230   : > { %5012 = vmatpush1.bf16.msra.mxu0 %v10169_v37 }
 0x231   : > { %5013 = vmatprep.subr.bf16.mxu0 %v10177_v38 }
 0x232   : > { %4819 = vmatpush1.bf16.msra.mxu1 %v10202_v47  ;;  %v861_v47 = vrot.slane %v12696_v28, %v12711_v35 }
 0x233   : > { %4820 = vmatprep.subr.bf16.mxu1 %v10210_v48 }
 0x234   : > { %5014 = vmatpush1.bf16.msra.mxu0 %v10175_v41 }
 0x235   : > { %5015 = vmatprep.subr.bf16.mxu0 %v10183_v42 }
 0x236   : > { %4821 = vmatpush1.bf16.msra.mxu1 %v10208_v52 }
 0x237   : > { %4822 = vmatprep.subr.bf16.mxu1 %v10216_v54 }
 0x238   : > { %5016 = vmatpush1.bf16.msra.mxu0 %v10181_v45  ;;  %v10259_v45 = vld [vmem:[#allocation8 + $0x388] ss:$28 sps:$4 sm:$0xff]  }
 0x239   : > { %5017 = vmatprep.subr.bf16.mxu0 %v10189_v46 }
 0x23a   : > { %4823 = vmatpush1.bf16.msra.mxu1 %v10214_v55 }
 0x23b   : > { %4824 = vmatprep.subr.bf16.mxu1 %v10222_v56  ;;  %v10262_v56 = vld [vmem:[#allocation8 + $0x3b8] ss:$28 sps:$4 sm:$0xff]  }
 0x23c   : > { %5018 = vmatpush1.bf16.msra.mxu0 %v10187_v49 }
 0x23d   : > { %5019 = vmatprep.subr.bf16.mxu0 %v10195_v50  ;;  %v10264_v50 = vld [vmem:[#allocation8 + $0x3bc] ss:$28 sps:$4 sm:$0xff]  }
 0x23e   : > { %4825 = vmatpush1.bf16.msra.mxu1 %v10220_v59  ;;  %v10270_v59 = vld [vmem:[#allocation8 + $0x3f4] ss:$28 sps:$4 sm:$0xff]  }
 0x23f   : > { %4826 = vmatprep.subr.bf16.mxu1 %v10228_v60  ;;  %v10273_v60 = vld [vmem:[#allocation8 + $0x3fc] ss:$28 sps:$4 sm:$0xff]  }
 0x240   : > { %5020 = vmatpush1.bf16.msra.mxu0 %v10193_v51  ;;  %v10267_v51 = vld [vmem:[#allocation8 + $0x3c4] ss:$28 sps:$4 sm:$0xff]  }
 0x241   : > { %5021 = vmatprep.subr.bf16.mxu0 %v10201_v53 }
 0x242   : > { %4827 = vmatpush1.bf16.msra.mxu1 %v10226_v63  ;;  %v10268_v63 = vld [vmem:[#allocation8 + $0x3f0] ss:$28 sps:$4 sm:$0xff]  }
 0x243   : > { %4828 = vmatprep.subr.bf16.mxu1 %v10234_v0  ;;  %v10271_v0 = vld [vmem:[#allocation8 + $0x3f8] ss:$28 sps:$4 sm:$0xff]  }
 0x244   : > { %5022 = vmatpush1.bf16.msra.mxu0 %v10199_v57  ;;  %v10265_v57 = vld [vmem:[#allocation8 + $0x3c0] ss:$28 sps:$4 sm:$0xff]  }
 0x245   : > { %5023 = vmatprep.subr.bf16.mxu0 %v10207_v58 }
 0x246   : > { %4829 = vmatpush1.bf16.msra.mxu1 %v10232_v4  ;;  %v10279_v4 = vld [vmem:[#allocation8 + $0x434] ss:$28 sps:$4 sm:$0xff]  }
 0x247   : > { %4830 = vmatprep.subr.bf16.mxu1 %v10240_v5 }
 0x248   : > { %5024 = vmatpush1.bf16.msra.mxu0 %v10205_v61 }
 0x249   : > { %5025 = vmatprep.subr.bf16.mxu0 %v10213_v62 }
 0x24a   : > { %4831 = vmatpush1.bf16.msra.mxu1 %v10238_v8  ;;  %v10274_v8 = vld [vmem:[#allocation8 + $0x428] ss:$28 sps:$4 sm:$0xff]  }
 0x24b   : > { %4832 = vmatprep.subr.bf16.mxu1 %v10246_v16  ;;  %v10291_v16 = vld [vmem:[#allocation8 + $0x4a4] ss:$28 sps:$4 sm:$0xff]  }
 0x24c   : > { %5026 = vmatpush1.bf16.msra.mxu0 %v10211_v1 }
 0x24d   : > { %5027 = vmatprep.subr.bf16.mxu0 %v10219_v3  ;;  %v10276_v3 = vld [vmem:[#allocation8 + $0x42c] ss:$28 sps:$4 sm:$0xff]  }
 0x24e   : > { %4833 = vmatpush1.bf16.msra.mxu1 %v10244_v18  ;;  %v10286_v18 = vld [vmem:[#allocation8 + $0x498] ss:$28 sps:$4 sm:$0xff]  }
 0x24f   : > { %4834 = vmatprep.subr.bf16.mxu1 %v10252_v20 }
 0x250   : > { %5028 = vmatpush1.bf16.msra.mxu0 %v10217_v6 }
 0x251   : > { %5029 = vmatprep.subr.bf16.mxu0 %v10225_v7 }
 0x252   : > { %4835 = vmatpush1.bf16.msra.mxu1 %v10250_v22  ;;  %v10297_v22 = vld [vmem:[#allocation8 + $0x4dc] ss:$28 sps:$4 sm:$0xff]  }
 0x253   : > { %4845 = vmatprep.subr.bf16.mxu1 %v10258_v24 }
 0x254   : > { %5030 = vmatpush1.bf16.msra.mxu0 %v10223_v9  ;;  %v10277_v9 = vld [vmem:[#allocation8 + $0x430] ss:$28 sps:$4 sm:$0xff]  }
 0x255   : > { %5031 = vmatprep.subr.bf16.mxu0 %v10231_v10 }
 0x258   : > { %5032 = vmatpush1.bf16.msra.mxu0 %v10229_v11  ;;  %v10282_v11 = vld [vmem:[#allocation8 + $0x464] ss:$28 sps:$4 sm:$0xff]  }
 0x259   : > { %5033 = vmatprep.subr.bf16.mxu0 %v10237_v12  ;;  %v10285_v12 = vld [vmem:[#allocation8 + $0x46c] ss:$28 sps:$4 sm:$0xff]  }
 0x25c   : > { %5034 = vmatpush1.bf16.msra.mxu0 %v10235_v13  ;;  %v10280_v13 = vld [vmem:[#allocation8 + $0x460] ss:$28 sps:$4 sm:$0xff]  }
 0x25d   : > { %5035 = vmatprep.subr.bf16.mxu0 %v10243_v14  ;;  %v10283_v14 = vld [vmem:[#allocation8 + $0x468] ss:$28 sps:$4 sm:$0xff]  }
 0x260   : > { %5036 = vmatpush1.bf16.msra.mxu0 %v10241_v15  ;;  %v10288_v15 = vld [vmem:[#allocation8 + $0x49c] ss:$28 sps:$4 sm:$0xff]  }
 0x261   : > { %5037 = vmatprep.subr.bf16.mxu0 %v10249_v17 }
 0x264   : > { %5038 = vmatpush1.bf16.msra.mxu0 %v10247_v19  ;;  %v10289_v19 = vld [vmem:[#allocation8 + $0x4a0] ss:$28 sps:$4 sm:$0xff]  }
 0x265   : > { %5039 = vmatprep.subr.bf16.mxu0 %v10255_v21  ;;  %v10294_v21 = vld [vmem:[#allocation8 + $0x4d4] ss:$28 sps:$4 sm:$0xff]  }
 0x268   : > { %5040 = vmatpush1.bf16.msra.mxu0 %v10253_v23 }
 0x269   : > { %5050 = vmatprep.subr.bf16.mxu0 %v10261_v25  ;;  %v10292_v25 = vld [vmem:[#allocation8 + $0x4d0] ss:$28 sps:$4 sm:$0xff]  }
 0x2e6   : > { %v1034_v33 = vpop.f32.mrb[0].mxu0 }
 0x2e7   : > { %v1035_v36 = vadd.f32 %v1034_v33, %v849_v31  ;;  %v1036_v37 = vpop.f32.mrb[1].mxu0  ;;  %v10300_v31 = vld [vmem:[#allocation8 + $0x50c] ss:$28 sps:$4 sm:$0xff]  }
 0x2e8   : > { %v1037_v38 = vadd.f32 %v1036_v37, %v853_v32  ;;  %v1038_v39 = vpop.f32.mrb[2].mxu0  ;;  %v12736_v17 = vpop.f32.mrb[0].mxu1  ;;  %v10303_v32 = vld [vmem:[#allocation8 + $0x514] ss:$28 sps:$4 sm:$0xff]   ;;  %v10298_v33 = vld [vmem:[#allocation8 + $0x508] ss:$28 sps:$4 sm:$0xff]  }
 0x2e9   : > { %vm1206_vm1 = vcmp.ge.f32.partialorder %v1035_v36, 0.0  ;;  %v1217_v40 = vmul.f32 %v12708_v34, %v1035_v36  ;;  %v1039_v41 = vpop.f32.mrb[3].mxu0  ;;  %v12738_v20 = vpop.f32.mrb[1].mxu1  ;;  %v10306_v37 = vld [vmem:[#allocation8 + $0x544] ss:$28 sps:$4 sm:$0xff]  }
 0x2ea   : > { %vm1207_vm2 = vcmp.ge.f32.partialorder %v1037_v38, 0.0  ;;  %v1218_v42 = vmul.f32 %v12708_v34, %v1037_v38  ;;  %v1161_v23 = vpop.f32.mrb[2].mxu1  ;;  %v10304_v39 = vld [vmem:[#allocation8 + $0x540] ss:$28 sps:$4 sm:$0xff]  }
 0x2eb   : > { %v1227_v43 = vsel %vm1206_vm1, %v1035_v36, %v1217_v40  ;;  %v1162_v24 = vpop.f32.mrb[3].mxu1  ;;  %v10301_v36 = vld [vmem:[#allocation8 + $0x510] ss:$28 sps:$4 sm:$0xff]   ;;  %v10307_v40 = vld [vmem:[#allocation8 + $0x548] ss:$28 sps:$4 sm:$0xff]  }
 0x2ec   : > { %v1228_v46 = vsel %vm1207_vm2, %v1037_v38, %v1218_v42  ;;  %v12719_v49 = vpack.c.bf16 %v1227_v43, %v1227_v43  ;;  %v10309_v38 = vld [vmem:[#allocation8 + $0x54c] ss:$28 sps:$4 sm:$0xff]   ;;  %v10312_v41 = vld [vmem:[#allocation8 + $0x57c] ss:$28 sps:$4 sm:$0xff]   ;;  %v10315_v42 = vld [vmem:[#allocation8 + $0x584] ss:$28 sps:$4 sm:$0xff]  }
 0x2ed   : > { %v12717_v48 = vpack.c.bf16 %v1228_v46, %v1228_v46  ;;  %v10310_v43 = vld [vmem:[#allocation8 + $0x578] ss:$28 sps:$4 sm:$0xff]   ;;  %v10355_v23 = vld [vmem:[#allocation8 + $0x708] ss:$28 sps:$4 sm:$0xff]  }
 0x2ee   : > { %v12721_v52 = vpop.f32.mrb[4].mxu0  ;;  %v10321_v46 = vld [vmem:[#allocation8 + $0x5bc] ss:$28 sps:$4 sm:$0xff]  }
 0x2ef   : > { %4836 = vmatprep.mubr.bf16.mxu1 %v12717_v48  ;;  %5041 = vmatprep.mubr.bf16.mxu0 %v12717_v48  ;;  %v1077_v53 = vpop.f32.mrb[5].mxu0 }
 0x2f0   : > { %4837 = vmatmul.mubr.bf16.vlgmr.msra.gmra.mrb[4].mxu1 %v12719_v49  ;;  %5042 = vmatmul.mubr.bf16.vlgmr.msra.gmra.mrb[16].mxu0 %v12719_v49  ;;  %v1078_v54 = vadd.f32 %v1077_v53, %v861_v47  ;;  %v1079_v55 = vpop.f32.mrb[6].mxu0  ;;  %v10316_v47 = vld [vmem:[#allocation8 + $0x5b0] ss:$28 sps:$4 sm:$0xff]  }
 0x2f1   : > { %4846 = vmatpush1.bf16.msra.mxu1 %v10256_v44  ;;  %5051 = vmatpush1.bf16.msra.mxu0 %v10259_v45  ;;  %v1080_v58 = vpop.f32.mrb[7].mxu0  ;;  %v10313_v44 = vld [vmem:[#allocation8 + $0x580] ss:$28 sps:$4 sm:$0xff]   ;;  %v10318_v45 = vld [vmem:[#allocation8 + $0x5b4] ss:$28 sps:$4 sm:$0xff]  }
 0x2f2   : > { %4847 = vmatprep.subr.bf16.mxu1 %v10264_v50  ;;  %5052 = vmatprep.subr.bf16.mxu0 %v10267_v51  ;;  %vm1209_vm3 = vcmp.ge.f32.partialorder %v1078_v54, 0.0  ;;  %v1220_v61 = vmul.f32 %v12708_v34, %v1078_v54  ;;  %v10319_v50 = vld [vmem:[#allocation8 + $0x5b8] ss:$28 sps:$4 sm:$0xff]   ;;  %v10324_v51 = vld [vmem:[#allocation8 + $0x5ec] ss:$28 sps:$4 sm:$0xff]   ;;  %v12741_v58 = vsub.s32 2, %v12694_v27 }
 0x2f3   : > { %v10327_v53 = vld [vmem:[#allocation8 + $0x5f4] ss:$28 sps:$4 sm:$0xff]  }
 0x2f4   : > { %v1230_v62 = vsel %vm1209_vm3, %v1078_v54, %v1220_v61  ;;  %v10322_v54 = vld [vmem:[#allocation8 + $0x5e8] ss:$28 sps:$4 sm:$0xff]   ;;  %v10325_v55 = vld [vmem:[#allocation8 + $0x5f0] ss:$28 sps:$4 sm:$0xff]  }
 0x2f5   : > { %4848 = vmatpush1.bf16.msra.mxu1 %v10262_v56  ;;  %5053 = vmatpush1.bf16.msra.mxu0 %v10265_v57  ;;  %v12728_v1 = vpack.c.bf16 %v1230_v62, %v1230_v62  ;;  %v10330_v56 = vld [vmem:[#allocation8 + $0x624] ss:$28 sps:$4 sm:$0xff]   ;;  %v10333_v57 = vld [vmem:[#allocation8 + $0x62c] ss:$28 sps:$4 sm:$0xff]   ;;  %v10336_v62 = vld [vmem:[#allocation8 + $0x65c] ss:$28 sps:$4 sm:$0xff]  }
 0x2f6   : > { %4849 = vmatprep.subr.bf16.mxu1 %v10270_v59  ;;  %5054 = vmatprep.subr.bf16.mxu0 %v10273_v60  ;;  %v12730_v5 = vpop.f32.mrb[8].mxu0  ;;  %v868_v59 = vsub.s32 5, %v12694_v27  ;;  %v10328_v60 = vld [vmem:[#allocation8 + $0x620] ss:$28 sps:$4 sm:$0xff]   ;;  %v10331_v61 = vld [vmem:[#allocation8 + $0x628] ss:$28 sps:$4 sm:$0xff]  }
 0x2f7   : > { %4877 = vmatprep.mubr.bf16.mxu1 %v12728_v1  ;;  %5082 = vmatprep.mubr.bf16.mxu0 %v12728_v1  ;;  %v12734_v6 = vpop.f32.mrb[9].mxu0 }
 0x2f8   : > { %v1120_v7 = vpop.f32.mrb[10].mxu0 }
 0x2f9   : > { %4850 = vmatpush1.bf16.msra.mxu1 %v10268_v63  ;;  %5055 = vmatpush1.bf16.msra.mxu0 %v10271_v0  ;;  %v1121_v10 = vpop.f32.mrb[11].mxu0  ;;  %v10339_v63 = vld [vmem:[#allocation8 + $0x664] ss:$28 sps:$4 sm:$0xff]   ;;  %v857_v0 = vrot.slane %v12696_v28, %v12741_v58 }
 0x2fa   : > { %4851 = vmatprep.subr.bf16.mxu1 %v10276_v3  ;;  %5056 = vmatprep.subr.bf16.mxu0 %v10279_v4  ;;  %v869_v3 = vrot.slane %v12696_v28, %v868_v59  ;;  %v10334_v4 = vld [vmem:[#allocation8 + $0x658] ss:$28 sps:$4 sm:$0xff]   ;;  %v10337_v7 = vld [vmem:[#allocation8 + $0x660] ss:$28 sps:$4 sm:$0xff]  }
 0x2fb   : > { %v1076_v10 = vadd.f32 %v12721_v52, %v857_v0  ;;  %v10351_v28 = vld [vmem:[#allocation8 + $0x6d4] ss:$28 sps:$4 sm:$0xff]   ;;  %v10354_v52 = vld [vmem:[#allocation8 + $0x704] ss:$28 sps:$4 sm:$0xff]  }
 0x2fc   : > { %v10394_v0 = vld [vmem:[#allocation8 + $0x888] ss:$28 sps:$4 sm:$0xff]  }
 0x2fd   : > { %4852 = vmatpush1.bf16.msra.mxu1 %v10274_v8  ;;  %5057 = vmatpush1.bf16.msra.mxu0 %v10277_v9  ;;  %v10342_v8 = vld [vmem:[#allocation8 + $0x694] ss:$28 sps:$4 sm:$0xff]   ;;  %v10345_v9 = vld [vmem:[#allocation8 + $0x69c] ss:$28 sps:$4 sm:$0xff]   ;;  %vm1208_vm4 = vcmp.ge.f32.partialorder %v1076_v10, 0.0 }
 0x2fe   : > { %4853 = vmatprep.subr.bf16.mxu1 %v10282_v11  ;;  %5058 = vmatprep.subr.bf16.mxu0 %v10285_v12  ;;  %v1119_v11 = vadd.f32 %v12734_v6, %v869_v3  ;;  %v10340_v12 = vld [vmem:[#allocation8 + $0x690] ss:$28 sps:$4 sm:$0xff]  }
 0x2ff   : > { %v10357_v6 = vld [vmem:[#allocation8 + $0x70c] ss:$28 sps:$4 sm:$0xff]  }
 0x300   : > { %vm1211_vm5 = vcmp.ge.f32.partialorder %v1119_v11, 0.0  ;;  %v10397_v3 = vld [vmem:[#allocation8 + $0x890] ss:$28 sps:$4 sm:$0xff]  }
 0x301   : > { %4854 = vmatpush1.bf16.msra.mxu1 %v10280_v13  ;;  %5059 = vmatpush1.bf16.msra.mxu0 %v10283_v14  ;;  %v10343_v13 = vld [vmem:[#allocation8 + $0x698] ss:$28 sps:$4 sm:$0xff]   ;;  %v10348_v14 = vld [vmem:[#allocation8 + $0x6cc] ss:$28 sps:$4 sm:$0xff]  }
 0x302   : > { %4855 = vmatprep.subr.bf16.mxu1 %v10288_v15  ;;  %5060 = vmatprep.subr.bf16.mxu0 %v10291_v16  ;;  %v1219_v15 = vmul.f32 %v12708_v34, %v1076_v10  ;;  %v1222_v16 = vmul.f32 %v12708_v34, %v1119_v11 }
 0x304   : > { %v1232_v24 = vsel %vm1211_vm5, %v1119_v11, %v1222_v16  ;;  %v10411_v11 = vld [vmem:[#allocation8 + $0x904] ss:$28 sps:$4 sm:$0xff]   ;;  %v10415_v16 = vld [vmem:[#allocation8 + $0x938] ss:$28 sps:$4 sm:$0xff]  }
 0x305   : > { %4856 = vmatpush1.bf16.msra.mxu1 %v10286_v18  ;;  %5061 = vmatpush1.bf16.msra.mxu0 %v10289_v19  ;;  %v10346_v18 = vld [vmem:[#allocation8 + $0x6c8] ss:$28 sps:$4 sm:$0xff]   ;;  %v10349_v19 = vld [vmem:[#allocation8 + $0x6d0] ss:$28 sps:$4 sm:$0xff]  }
 0x306   : > { %4857 = vmatprep.subr.bf16.mxu1 %v10294_v21  ;;  %5062 = vmatprep.subr.bf16.mxu0 %v10297_v22  ;;  %v1229_v21 = vsel %vm1208_vm4, %v1076_v10, %v1219_v15  ;;  %v10352_v22 = vld [vmem:[#allocation8 + $0x700] ss:$28 sps:$4 sm:$0xff]   ;;  %v10412_v15 = vld [vmem:[#allocation8 + $0x930] ss:$28 sps:$4 sm:$0xff]  }
 0x307   : > { %v10408_v10 = vld [vmem:[#allocation8 + $0x8fc] ss:$28 sps:$4 sm:$0xff]  }
 0x309   : > { %4858 = vmatpush1.bf16.msra.mxu1 %v10292_v25  ;;  %5063 = vmatpush1.bf16.msra.mxu0 %v10295_v26  ;;  %v12753_v25 = vpack.c.bf16 %v1229_v21, %v1229_v21  ;;  %v10360_v26 = vld [vmem:[#allocation8 + $0x73c] ss:$28 sps:$4 sm:$0xff]   ;;  %v10426_v21 = vld [vmem:[#allocation8 + $0x9a4] ss:$28 sps:$4 sm:$0xff]  }
 0x30a   : > { %4859 = vmatprep.subr.bf16.mxu1 %v10300_v31  ;;  %5064 = vmatprep.subr.bf16.mxu0 %v10303_v32  ;;  %v10363_v31 = vld [vmem:[#allocation8 + $0x744] ss:$28 sps:$4 sm:$0xff]   ;;  %v12755_v32 = vpack.c.bf16 %v1232_v24, %v1232_v24  ;;  %v876_v24 = vsub.s32 7, %v12694_v27 }
 0x30d   : > { %4860 = vmatpush1.bf16.msra.mxu1 %v10298_v33  ;;  %5065 = vmatpush1.bf16.msra.mxu0 %v10301_v36  ;;  %v10358_v33 = vld [vmem:[#allocation8 + $0x738] ss:$28 sps:$4 sm:$0xff]   ;;  %v10361_v36 = vld [vmem:[#allocation8 + $0x740] ss:$28 sps:$4 sm:$0xff]  }
 0x30e   : > { %4861 = vmatprep.subr.bf16.mxu1 %v10306_v37  ;;  %5066 = vmatprep.subr.bf16.mxu0 %v10309_v38  ;;  %v10366_v37 = vld [vmem:[#allocation8 + $0x774] ss:$28 sps:$4 sm:$0xff]   ;;  %v10369_v38 = vld [vmem:[#allocation8 + $0x77c] ss:$28 sps:$4 sm:$0xff]  }
 0x311   : > { %4862 = vmatpush1.bf16.msra.mxu1 %v10304_v39  ;;  %5067 = vmatpush1.bf16.msra.mxu0 %v10307_v40  ;;  %v10364_v39 = vld [vmem:[#allocation8 + $0x770] ss:$28 sps:$4 sm:$0xff]   ;;  %v10367_v40 = vld [vmem:[#allocation8 + $0x778] ss:$28 sps:$4 sm:$0xff]  }
 0x312   : > { %4863 = vmatprep.subr.bf16.mxu1 %v10312_v41  ;;  %5068 = vmatprep.subr.bf16.mxu0 %v10315_v42  ;;  %v10372_v41 = vld [vmem:[#allocation8 + $0x7ac] ss:$28 sps:$4 sm:$0xff]   ;;  %v10375_v42 = vld [vmem:[#allocation8 + $0x7b4] ss:$28 sps:$4 sm:$0xff]  }
 0x315   : > { %4864 = vmatpush1.bf16.msra.mxu1 %v10310_v43  ;;  %5069 = vmatpush1.bf16.msra.mxu0 %v10313_v44  ;;  %v10370_v43 = vld [vmem:[#allocation8 + $0x7a8] ss:$28 sps:$4 sm:$0xff]   ;;  %v10373_v44 = vld [vmem:[#allocation8 + $0x7b0] ss:$28 sps:$4 sm:$0xff]  }
 0x316   : > { %4865 = vmatprep.subr.bf16.mxu1 %v10318_v45  ;;  %5070 = vmatprep.subr.bf16.mxu0 %v10321_v46  ;;  %v10378_v45 = vld [vmem:[#allocation8 + $0x7e4] ss:$28 sps:$4 sm:$0xff]   ;;  %v10381_v46 = vld [vmem:[#allocation8 + $0x7ec] ss:$28 sps:$4 sm:$0xff]  }
 0x319   : > { %4866 = vmatpush1.bf16.msra.mxu1 %v10316_v47  ;;  %5071 = vmatpush1.bf16.msra.mxu0 %v10319_v50  ;;  %v10376_v47 = vld [vmem:[#allocation8 + $0x7e0] ss:$28 sps:$4 sm:$0xff]   ;;  %v10379_v50 = vld [vmem:[#allocation8 + $0x7e8] ss:$28 sps:$4 sm:$0xff]  }
 0x31a   : > { %4867 = vmatprep.subr.bf16.mxu1 %v10324_v51  ;;  %5072 = vmatprep.subr.bf16.mxu0 %v10327_v53  ;;  %v10384_v51 = vld [vmem:[#allocation8 + $0x81c] ss:$28 sps:$4 sm:$0xff]   ;;  %v10387_v53 = vld [vmem:[#allocation8 + $0x824] ss:$28 sps:$4 sm:$0xff]  }
 0x31d   : > { %4868 = vmatpush1.bf16.msra.mxu1 %v10322_v54  ;;  %5073 = vmatpush1.bf16.msra.mxu0 %v10325_v55  ;;  %v10382_v54 = vld [vmem:[#allocation8 + $0x818] ss:$28 sps:$4 sm:$0xff]   ;;  %v10385_v55 = vld [vmem:[#allocation8 + $0x820] ss:$28 sps:$4 sm:$0xff]  }
 0x31e   : > { %4869 = vmatprep.subr.bf16.mxu1 %v10330_v56  ;;  %5074 = vmatprep.subr.bf16.mxu0 %v10333_v57  ;;  %v10390_v56 = vld [vmem:[#allocation8 + $0x854] ss:$28 sps:$4 sm:$0xff]   ;;  %v10393_v57 = vld [vmem:[#allocation8 + $0x85c] ss:$28 sps:$4 sm:$0xff]  }
 0x321   : > { %4870 = vmatpush1.bf16.msra.mxu1 %v10328_v60  ;;  %5075 = vmatpush1.bf16.msra.mxu0 %v10331_v61  ;;  %v10388_v60 = vld [vmem:[#allocation8 + $0x850] ss:$28 sps:$4 sm:$0xff]   ;;  %v10391_v61 = vld [vmem:[#allocation8 + $0x858] ss:$28 sps:$4 sm:$0xff]  }
 0x322   : > { %4871 = vmatprep.subr.bf16.mxu1 %v10336_v62  ;;  %5076 = vmatprep.subr.bf16.mxu0 %v10339_v63  ;;  %v10396_v62 = vld [vmem:[#allocation8 + $0x88c] ss:$28 sps:$4 sm:$0xff]   ;;  %v10399_v63 = vld [vmem:[#allocation8 + $0x894] ss:$28 sps:$4 sm:$0xff]  }
 0x325   : > { %4872 = vmatpush1.bf16.msra.mxu1 %v10334_v4  ;;  %5077 = vmatpush1.bf16.msra.mxu0 %v10337_v7  ;;  %v10402_v4 = vld [vmem:[#allocation8 + $0x8c4] ss:$28 sps:$4 sm:$0xff]   ;;  %v10405_v7 = vld [vmem:[#allocation8 + $0x8cc] ss:$28 sps:$4 sm:$0xff]  }
 0x326   : > { %4873 = vmatprep.subr.bf16.mxu1 %v10342_v8  ;;  %5078 = vmatprep.subr.bf16.mxu0 %v10345_v9  ;;  %v10400_v8 = vld [vmem:[#allocation8 + $0x8c0] ss:$28 sps:$4 sm:$0xff]   ;;  %v10403_v9 = vld [vmem:[#allocation8 + $0x8c8] ss:$28 sps:$4 sm:$0xff]  }
 0x329   : > { %4874 = vmatpush1.bf16.msra.mxu1 %v10340_v12  ;;  %5079 = vmatpush1.bf16.msra.mxu0 %v10343_v13  ;;  %v10406_v12 = vld [vmem:[#allocation8 + $0x8f8] ss:$28 sps:$4 sm:$0xff]   ;;  %v10409_v13 = vld [vmem:[#allocation8 + $0x900] ss:$28 sps:$4 sm:$0xff]  }
 0x32a   : > { %4875 = vmatprep.subr.bf16.mxu1 %v10348_v14  ;;  %5080 = vmatprep.subr.bf16.mxu0 %v10351_v28  ;;  %v10414_v14 = vld [vmem:[#allocation8 + $0x934] ss:$28 sps:$4 sm:$0xff]   ;;  %v10417_v28 = vld [vmem:[#allocation8 + $0x93c] ss:$28 sps:$4 sm:$0xff]  }
 0x32d   : > { %4876 = vmatpush1.bf16.msra.mxu1 %v10346_v18  ;;  %5081 = vmatpush1.bf16.msra.mxu0 %v10349_v19  ;;  %v10420_v18 = vld [vmem:[#allocation8 + $0x96c] ss:$28 sps:$4 sm:$0xff]   ;;  %v10423_v19 = vld [vmem:[#allocation8 + $0x974] ss:$28 sps:$4 sm:$0xff]  }
 0x32e   : > { %4886 = vmatprep.subr.bf16.mxu1 %v10354_v52  ;;  %5091 = vmatprep.subr.bf16.mxu0 %v10357_v6  ;;  %v10418_v52 = vld [vmem:[#allocation8 + $0x968] ss:$28 sps:$4 sm:$0xff]   ;;  %v10421_v6 = vld [vmem:[#allocation8 + $0x970] ss:$28 sps:$4 sm:$0xff]  }
 0x330   : > { %4878 = vmatmul.mubr.bf16.vlgmr.msra.gmra.mrb[4].mxu1 %v12753_v25  ;;  %5083 = vmatmul.mubr.bf16.vlgmr.msra.gmra.mrb[16].mxu0 %v12753_v25 }
 0x331   : > { %4887 = vmatpush1.bf16.msra.mxu1 %v10352_v22  ;;  %5092 = vmatpush1.bf16.msra.mxu0 %v10355_v23  ;;  %v10429_v22 = vld [vmem:[#allocation8 + $0x9ac] ss:$28 sps:$4 sm:$0xff]   ;;  %v864_v23 = vsub.s32 4, %v12694_v27 }
 0x332   : > { %4888 = vmatprep.subr.bf16.mxu1 %v10360_v26  ;;  %5093 = vmatprep.subr.bf16.mxu0 %v10363_v31  ;;  %v10424_v26 = vld [vmem:[#allocation8 + $0x9a0] ss:$28 sps:$4 sm:$0xff]   ;;  %v10427_v31 = vld [vmem:[#allocation8 + $0x9a8] ss:$28 sps:$4 sm:$0xff]  }
 0x333   : > { %4918 = vmatprep.mubr.bf16.mxu1 %v12755_v32  ;;  %5123 = vmatprep.mubr.bf16.mxu0 %v12755_v32 }
 0x335   : > { %4889 = vmatpush1.bf16.msra.mxu1 %v10358_v33  ;;  %5094 = vmatpush1.bf16.msra.mxu0 %v10361_v36  ;;  %v10432_v33 = vld [vmem:[#allocation8 + $0x9dc] ss:$28 sps:$4 sm:$0xff]   ;;  %v10435_v36 = vld [vmem:[#allocation8 + $0x9e4] ss:$28 sps:$4 sm:$0xff]  }
 0x336   : > { %4890 = vmatprep.subr.bf16.mxu1 %v10366_v37  ;;  %5095 = vmatprep.subr.bf16.mxu0 %v10369_v38  ;;  %v12763_v37 = vld [vmem:[#allocation18] sm:$0xff] }
 0x337   : > { %v865_v38 = vrot.slane %v12763_v37, %v864_v23 }
 0x339   : > { %4891 = vmatpush1.bf16.msra.mxu1 %v10364_v39  ;;  %5096 = vmatpush1.bf16.msra.mxu0 %v10367_v40  ;;  %v877_v39 = vrot.slane %v12763_v37, %v876_v24  ;;  %v10430_v40 = vld [vmem:[#allocation8 + $0x9d8] ss:$28 sps:$4 sm:$0xff]   ;;  %v10475_v24 = vld [vmem:[#allocation8 + $0xb68] ss:$28 sps:$4 sm:$0xff]  }
 0x33a   : > { %4892 = vmatprep.subr.bf16.mxu1 %v10372_v41  ;;  %5097 = vmatprep.subr.bf16.mxu0 %v10375_v42  ;;  %v10433_v41 = vld [vmem:[#allocation8 + $0x9e0] ss:$28 sps:$4 sm:$0xff]   ;;  %v12769_v42 = vpop.f32.mrb[12].mxu0 }
 0x33d   : > { %4893 = vmatpush1.bf16.msra.mxu1 %v10370_v43  ;;  %5098 = vmatpush1.bf16.msra.mxu0 %v10373_v44  ;;  %v10438_v43 = vld [vmem:[#allocation8 + $0xa14] ss:$28 sps:$4 sm:$0xff]   ;;  %v10441_v44 = vld [vmem:[#allocation8 + $0xa1c] ss:$28 sps:$4 sm:$0xff]  }
 0x33e   : > { %4894 = vmatprep.subr.bf16.mxu1 %v10378_v45  ;;  %5099 = vmatprep.subr.bf16.mxu0 %v10381_v46  ;;  %v1117_v45 = vadd.f32 %v12730_v5, %v865_v38  ;;  %v12772_v46 = vpop.f32.mrb[13].mxu0  ;;  %v10442_v5 = vld [vmem:[#allocation8 + $0xa48] ss:$28 sps:$4 sm:$0xff]   ;;  %v10486_v38 = vld [vmem:[#allocation8 + $0xbd4] ss:$28 sps:$4 sm:$0xff]  }
 0x340   : > { %vm1210_vm6 = vcmp.ge.f32.partialorder %v1117_v45, 0.0 }
 0x341   : > { %4895 = vmatpush1.bf16.msra.mxu1 %v10376_v47  ;;  %5100 = vmatpush1.bf16.msra.mxu0 %v10379_v50  ;;  %v1160_v47 = vadd.f32 %v12738_v20, %v877_v39  ;;  %v1202_v50 = vpop.f32.mrb[14].mxu0  ;;  %v10450_v20 = vld [vmem:[#allocation8 + $0xa84] ss:$28 sps:$4 sm:$0xff]   ;;  %v10489_v39 = vld [vmem:[#allocation8 + $0xbdc] ss:$28 sps:$4 sm:$0xff]  }
 0x342   : > { %4896 = vmatprep.subr.bf16.mxu1 %v10384_v51  ;;  %5101 = vmatprep.subr.bf16.mxu0 %v10387_v53  ;;  %v10436_v51 = vld [vmem:[#allocation8 + $0xa10] ss:$28 sps:$4 sm:$0xff]   ;;  %v10439_v53 = vld [vmem:[#allocation8 + $0xa18] ss:$28 sps:$4 sm:$0xff]   ;;  %v10498_v50 = vld [vmem:[#allocation8 + $0xc44] ss:$28 sps:$4 sm:$0xff]  }
 0x343   : > { %vm1213_vm7 = vcmp.ge.f32.partialorder %v1160_v47, 0.0 }
 0x345   : > { %4897 = vmatpush1.bf16.msra.mxu1 %v10382_v54  ;;  %5102 = vmatpush1.bf16.msra.mxu0 %v10385_v55  ;;  %v1203_v54 = vpop.f32.mrb[15].mxu0  ;;  %v10444_v55 = vld [vmem:[#allocation8 + $0xa4c] ss:$28 sps:$4 sm:$0xff]  }
 0x346   : > { %4898 = vmatprep.subr.bf16.mxu1 %v10390_v56  ;;  %5103 = vmatprep.subr.bf16.mxu0 %v10393_v57  ;;  %v10447_v56 = vld [vmem:[#allocation8 + $0xa54] ss:$28 sps:$4 sm:$0xff]   ;;  %v1221_v57 = vmul.f32 %v12708_v34, %v1117_v45  ;;  %v10499_v54 = vld [vmem:[#allocation8 + $0xc48] ss:$28 sps:$4 sm:$0xff]  }
 0x349   : > { %4899 = vmatpush1.bf16.msra.mxu1 %v10388_v60  ;;  %5104 = vmatpush1.bf16.msra.mxu0 %v10391_v61  ;;  %v1224_v60 = vmul.f32 %v12708_v34, %v1160_v47  ;;  %v10445_v61 = vld [vmem:[#allocation8 + $0xa50] ss:$28 sps:$4 sm:$0xff]  }
 0x34a   : > { %4900 = vmatprep.subr.bf16.mxu1 %v10396_v62  ;;  %5105 = vmatprep.subr.bf16.mxu0 %v10399_v63  ;;  %v10453_v62 = vld [vmem:[#allocation8 + $0xa8c] ss:$28 sps:$4 sm:$0xff]   ;;  %v1231_v63 = vsel %vm1210_vm6, %v1117_v45, %v1221_v57  ;;  %v10502_v57 = vld [vmem:[#allocation8 + $0xc78] ss:$28 sps:$4 sm:$0xff]  }
 0x34b   : > { %v10490_v45 = vld [vmem:[#allocation8 + $0xc08] ss:$28 sps:$4 sm:$0xff]  }
 0x34d   : > { %4901 = vmatpush1.bf16.msra.mxu1 %v10394_v0  ;;  %5106 = vmatpush1.bf16.msra.mxu0 %v10397_v3  ;;  %v10448_v0 = vld [vmem:[#allocation8 + $0xa80] ss:$28 sps:$4 sm:$0xff]   ;;  %v10451_v3 = vld [vmem:[#allocation8 + $0xa88] ss:$28 sps:$4 sm:$0xff]  }
 0x34e   : > { %4902 = vmatprep.subr.bf16.mxu1 %v10402_v4  ;;  %5107 = vmatprep.subr.bf16.mxu0 %v10405_v7  ;;  %v1234_v4 = vsel %vm1213_vm7, %v1160_v47, %v1224_v60  ;;  %v12777_v7 = vpack.c.bf16 %v1231_v63, %v1231_v63  ;;  %v10493_v47 = vld [vmem:[#allocation8 + $0xc10] ss:$28 sps:$4 sm:$0xff]   ;;  %v10505_v60 = vld [vmem:[#allocation8 + $0xc80] ss:$28 sps:$4 sm:$0xff]  }
 0x34f   : > { %v10516_v63 = vld [vmem:[#allocation8 + $0xcec] ss:$28 sps:$4 sm:$0xff]  }
 0x351   : > { %4903 = vmatpush1.bf16.msra.mxu1 %v10400_v8  ;;  %5108 = vmatpush1.bf16.msra.mxu0 %v10403_v9  ;;  %v10456_v8 = vld [vmem:[#allocation8 + $0xabc] ss:$28 sps:$4 sm:$0xff]   ;;  %v10459_v9 = vld [vmem:[#allocation8 + $0xac4] ss:$28 sps:$4 sm:$0xff]  }
 0x352   : > { %4904 = vmatprep.subr.bf16.mxu1 %v10408_v10  ;;  %5109 = vmatprep.subr.bf16.mxu0 %v10411_v11  ;;  %v10454_v10 = vld [vmem:[#allocation8 + $0xab8] ss:$28 sps:$4 sm:$0xff]   ;;  %v10457_v11 = vld [vmem:[#allocation8 + $0xac0] ss:$28 sps:$4 sm:$0xff]  }
 0x355   : > { %4905 = vmatpush1.bf16.msra.mxu1 %v10406_v12  ;;  %5110 = vmatpush1.bf16.msra.mxu0 %v10409_v13  ;;  %v12779_v12 = vpack.c.bf16 %v1234_v4, %v1234_v4  ;;  %v10462_v13 = vld [vmem:[#allocation8 + $0xaf4] ss:$28 sps:$4 sm:$0xff]  }
 0x356   : > { %4906 = vmatprep.subr.bf16.mxu1 %v10414_v14  ;;  %5111 = vmatprep.subr.bf16.mxu0 %v10417_v28  ;;  %v10465_v14 = vld [vmem:[#allocation8 + $0xafc] ss:$28 sps:$4 sm:$0xff]   ;;  %v10460_v28 = vld [vmem:[#allocation8 + $0xaf0] ss:$28 sps:$4 sm:$0xff]  }
 0x357   : > { %v10517_v4 = vld [vmem:[#allocation8 + $0xcf0] ss:$28 sps:$4 sm:$0xff]  }
 0x359   : > { %4907 = vmatpush1.bf16.msra.mxu1 %v10412_v15  ;;  %5112 = vmatpush1.bf16.msra.mxu0 %v10415_v16  ;;  %v10463_v15 = vld [vmem:[#allocation8 + $0xaf8] ss:$28 sps:$4 sm:$0xff]   ;;  %v10468_v16 = vld [vmem:[#allocation8 + $0xb2c] ss:$28 sps:$4 sm:$0xff]  }
 0x35a   : > { %4908 = vmatprep.subr.bf16.mxu1 %v10420_v18  ;;  %5113 = vmatprep.subr.bf16.mxu0 %v10423_v19  ;;  %v10471_v18 = vld [vmem:[#allocation8 + $0xb34] ss:$28 sps:$4 sm:$0xff]   ;;  %v10466_v19 = vld [vmem:[#allocation8 + $0xb28] ss:$28 sps:$4 sm:$0xff]  }
 0x35d   : > { %4909 = vmatpush1.bf16.msra.mxu1 %v10418_v52  ;;  %5114 = vmatpush1.bf16.msra.mxu0 %v10421_v6  ;;  %v10469_v52 = vld [vmem:[#allocation8 + $0xb30] ss:$28 sps:$4 sm:$0xff]   ;;  %v10474_v6 = vld [vmem:[#allocation8 + $0xb64] ss:$28 sps:$4 sm:$0xff]  }
 0x35e   : > { %4910 = vmatprep.subr.bf16.mxu1 %v10426_v21  ;;  %5115 = vmatprep.subr.bf16.mxu0 %v10429_v22  ;;  %v10477_v21 = vld [vmem:[#allocation8 + $0xb6c] ss:$28 sps:$4 sm:$0xff]   ;;  %v10472_v22 = vld [vmem:[#allocation8 + $0xb60] ss:$28 sps:$4 sm:$0xff]  }
 0x361   : > { %4911 = vmatpush1.bf16.msra.mxu1 %v10424_v26  ;;  %5116 = vmatpush1.bf16.msra.mxu0 %v10427_v31  ;;  %v10480_v26 = vld [vmem:[#allocation8 + $0xb9c] ss:$28 sps:$4 sm:$0xff]   ;;  %v10483_v31 = vld [vmem:[#allocation8 + $0xba4] ss:$28 sps:$4 sm:$0xff]  }
 0x362   : > { %4912 = vmatprep.subr.bf16.mxu1 %v10432_v33  ;;  %5117 = vmatprep.subr.bf16.mxu0 %v10435_v36  ;;  %v10478_v33 = vld [vmem:[#allocation8 + $0xb98] ss:$28 sps:$4 sm:$0xff]   ;;  %v10481_v36 = vld [vmem:[#allocation8 + $0xba0] ss:$28 sps:$4 sm:$0xff]  }
 0x365   : > { %4913 = vmatpush1.bf16.msra.mxu1 %v10430_v40  ;;  %5118 = vmatpush1.bf16.msra.mxu0 %v10433_v41  ;;  %v10484_v40 = vld [vmem:[#allocation8 + $0xbd0] ss:$28 sps:$4 sm:$0xff]   ;;  %v10487_v41 = vld [vmem:[#allocation8 + $0xbd8] ss:$28 sps:$4 sm:$0xff]  }
 0x366   : > { %4914 = vmatprep.subr.bf16.mxu1 %v10438_v43  ;;  %5119 = vmatprep.subr.bf16.mxu0 %v10441_v44  ;;  %v10492_v43 = vld [vmem:[#allocation8 + $0xc0c] ss:$28 sps:$4 sm:$0xff]   ;;  %v10495_v44 = vld [vmem:[#allocation8 + $0xc14] ss:$28 sps:$4 sm:$0xff]  }
 0x369   : > { %4915 = vmatpush1.bf16.msra.mxu1 %v10436_v51  ;;  %5120 = vmatpush1.bf16.msra.mxu0 %v10439_v53  ;;  %v10501_v51 = vld [vmem:[#allocation8 + $0xc4c] ss:$28 sps:$4 sm:$0xff]   ;;  %v10496_v53 = vld [vmem:[#allocation8 + $0xc40] ss:$28 sps:$4 sm:$0xff]  }
 0x36a   : > { %4916 = vmatprep.subr.bf16.mxu1 %v10444_v55  ;;  %5121 = vmatprep.subr.bf16.mxu0 %v10447_v56  ;;  %v10504_v55 = vld [vmem:[#allocation8 + $0xc7c] ss:$28 sps:$4 sm:$0xff]   ;;  %v10507_v56 = vld [vmem:[#allocation8 + $0xc84] ss:$28 sps:$4 sm:$0xff]  }
 0x36d   : > { %4917 = vmatpush1.bf16.msra.mxu1 %v10442_v5  ;;  %5122 = vmatpush1.bf16.msra.mxu0 %v10445_v61  ;;  %v10510_v5 = vld [vmem:[#allocation8 + $0xcb4] ss:$28 sps:$4 sm:$0xff]   ;;  %v10513_v61 = vld [vmem:[#allocation8 + $0xcbc] ss:$28 sps:$4 sm:$0xff]  }
 0x36e   : > { %4927 = vmatprep.subr.bf16.mxu1 %v10450_v20  ;;  %5132 = vmatprep.subr.bf16.mxu0 %v10453_v62  ;;  %v10508_v20 = vld [vmem:[#allocation8 + $0xcb0] ss:$28 sps:$4 sm:$0xff]   ;;  %v10511_v62 = vld [vmem:[#allocation8 + $0xcb8] ss:$28 sps:$4 sm:$0xff]  }
 0x370   : > { %4919 = vmatmul.mubr.bf16.vlgmr.msra.gmra.mrb[4].mxu1 %v12777_v7  ;;  %5124 = vmatmul.mubr.bf16.vlgmr.msra.gmra.mrb[16].mxu0 %v12777_v7 }
 0x371   : > { %4928 = vmatpush1.bf16.msra.mxu1 %v10448_v0  ;;  %5133 = vmatpush1.bf16.msra.mxu0 %v10451_v3  ;;  %v10519_v0 = vld [vmem:[#allocation8 + $0xcf4] ss:$28 sps:$4 sm:$0xff]   ;;  %v10514_v3 = vld [vmem:[#allocation8 + $0xce8] ss:$28 sps:$4 sm:$0xff]  }
 0x372   : > { %4929 = vmatprep.subr.bf16.mxu1 %v10456_v8  ;;  %5134 = vmatprep.subr.bf16.mxu0 %v10459_v9  ;;  %v10522_v8 = vld [vmem:[#allocation8 + $0xd24] ss:$28 sps:$4 sm:$0xff]   ;;  %v10525_v9 = vld [vmem:[#allocation8 + $0xd2c] ss:$28 sps:$4 sm:$0xff]  }
 0x373   : > { %4959 = vmatprep.mubr.bf16.mxu1 %v12779_v12  ;;  %5164 = vmatprep.mubr.bf16.mxu0 %v12779_v12 }
 0x375   : > { %4930 = vmatpush1.bf16.msra.mxu1 %v10454_v10  ;;  %5135 = vmatpush1.bf16.msra.mxu0 %v10457_v11  ;;  %v872_v10 = vsub.s32 6, %v12694_v27  ;;  %v10520_v11 = vld [vmem:[#allocation8 + $0xd20] ss:$28 sps:$4 sm:$0xff]   ;;  %v11256_v27 = vld [vmem:[#allocation9 + $0x624] ss:$16 sps:$4 sm:$0xff]  }
 0x376   : > { %4931 = vmatprep.subr.bf16.mxu1 %v10462_v13  ;;  %5136 = vmatprep.subr.bf16.mxu0 %v10465_v14  ;;  %v10523_v13 = vld [vmem:[#allocation8 + $0xd28] ss:$28 sps:$4 sm:$0xff]  }
 0x377   : > { %v12786_v14 = vld [vmem:[#allocation18 + $0x8] sm:$0x3] }
 0x379   : > { %4932 = vmatpush1.bf16.msra.mxu1 %v10460_v28  ;;  %5137 = vmatpush1.bf16.msra.mxu0 %v10463_v15  ;;  %v10528_v28 = vld [vmem:[#allocation8 + $0xd5c] ss:$28 sps:$4 sm:$0xff]   ;;  %v10531_v15 = vld [vmem:[#allocation8 + $0xd64] ss:$28 sps:$4 sm:$0xff]  }
 0x37a   : > { %4933 = vmatprep.subr.bf16.mxu1 %v10468_v16  ;;  %5138 = vmatprep.subr.bf16.mxu0 %v10471_v18  ;;  %v873_v16 = vrot.slane %v12763_v37, %v872_v10  ;;  %v10526_v18 = vld [vmem:[#allocation8 + $0xd58] ss:$28 sps:$4 sm:$0xff]   ;;  %v10540_v37 = vld [vmem:[#allocation8 + $0xdcc] ss:$28 sps:$4 sm:$0xff]  }
 0x37d   : > { %4934 = vmatpush1.bf16.msra.mxu1 %v10466_v19  ;;  %5139 = vmatpush1.bf16.msra.mxu0 %v10469_v52  ;;  %v10529_v19 = vld [vmem:[#allocation8 + $0xd60] ss:$28 sps:$4 sm:$0xff]   ;;  %v885_v52 = vrot.slane %v12786_v14, %v12702_v30 }
 0x37e   : > { %4935 = vmatprep.subr.bf16.mxu1 %v10474_v6  ;;  %5140 = vmatprep.subr.bf16.mxu0 %v10477_v21  ;;  %v10534_v6 = vld [vmem:[#allocation8 + $0xd94] ss:$28 sps:$4 sm:$0xff]   ;;  %v10537_v21 = vld [vmem:[#allocation8 + $0xd9c] ss:$28 sps:$4 sm:$0xff]  }
 0x381   : > { %4936 = vmatpush1.bf16.msra.mxu1 %v10472_v22  ;;  %5141 = vmatpush1.bf16.msra.mxu0 %v10475_v24  ;;  %v1158_v22 = vadd.f32 %v12736_v17, %v873_v16  ;;  %v10532_v24 = vld [vmem:[#allocation8 + $0xd90] ss:$28 sps:$4 sm:$0xff]   ;;  %v10546_v17 = vld [vmem:[#allocation8 + $0xe04] ss:$28 sps:$4 sm:$0xff]   ;;  %v10585_v16 = vld [vmem:[#allocation8 + $0xf5c] ss:$28 sps:$4 sm:$0xff]  }
 0x382   : > { %4937 = vmatprep.subr.bf16.mxu1 %v10480_v26  ;;  %5142 = vmatprep.subr.bf16.mxu0 %v10483_v31  ;;  %v10535_v26 = vld [vmem:[#allocation8 + $0xd98] ss:$28 sps:$4 sm:$0xff]   ;;  %v1201_v31 = vadd.f32 %v12772_v46, %v885_v52  ;;  %v10549_v46 = vld [vmem:[#allocation8 + $0xe0c] ss:$28 sps:$4 sm:$0xff]  }
 0x383   : > { %vm1212_vm8 = vcmp.ge.f32.partialorder %v1158_v22, 0.0  ;;  %v10588_v52 = vld [vmem:[#allocation8 + $0xf8c] ss:$28 sps:$4 sm:$0xff]  }
 0x384   : > { %vm1215_vm9 = vcmp.ge.f32.partialorder %v1201_v31, 0.0 }
 0x385   : > { %4938 = vmatpush1.bf16.msra.mxu1 %v10478_v33  ;;  %5143 = vmatpush1.bf16.msra.mxu0 %v10481_v36  ;;  %v10543_v33 = vld [vmem:[#allocation8 + $0xdd4] ss:$28 sps:$4 sm:$0xff]   ;;  %v1223_v36 = vmul.f32 %v12708_v34, %v1158_v22 }
 0x386   : > { %4939 = vmatprep.subr.bf16.mxu1 %v10486_v38  ;;  %5144 = vmatprep.subr.bf16.mxu0 %v10489_v39  ;;  %v10538_v38 = vld [vmem:[#allocation8 + $0xdc8] ss:$28 sps:$4 sm:$0xff]   ;;  %v10541_v39 = vld [vmem:[#allocation8 + $0xdd0] ss:$28 sps:$4 sm:$0xff]  }
 0x389   : > { %4940 = vmatpush1.bf16.msra.mxu1 %v10484_v40  ;;  %5145 = vmatpush1.bf16.msra.mxu0 %v10487_v41  ;;  %v1226_v40 = vmul.f32 %v12708_v34, %v1201_v31  ;;  %v1233_v41 = vsel %vm1212_vm8, %v1158_v22, %v1223_v36  ;;  %v10589_v22 = vld [vmem:[#allocation8 + $0xf90] ss:$28 sps:$4 sm:$0xff]   ;;  %v10603_v36 = vld [vmem:[#allocation8 + $0x1004] ss:$28 sps:$4 sm:$0xff]   ;;  %vm12059_vm8 = vmmov 0  }
 0x38a   : > { %4941 = vmatprep.subr.bf16.mxu1 %v10492_v43  ;;  %5146 = vmatprep.subr.bf16.mxu0 %v10495_v44  ;;  %v10544_v43 = vld [vmem:[#allocation8 + $0xe00] ss:$28 sps:$4 sm:$0xff]   ;;  %v10547_v44 = vld [vmem:[#allocation8 + $0xe08] ss:$28 sps:$4 sm:$0xff]  }
 0x38d   : > { %4942 = vmatpush1.bf16.msra.mxu1 %v10490_v45  ;;  %5147 = vmatpush1.bf16.msra.mxu0 %v10493_v47  ;;  %v10552_v45 = vld [vmem:[#allocation8 + $0xe3c] ss:$28 sps:$4 sm:$0xff]   ;;  %v10555_v47 = vld [vmem:[#allocation8 + $0xe44] ss:$28 sps:$4 sm:$0xff]  }
 0x38e   : > { %4943 = vmatprep.subr.bf16.mxu1 %v10498_v50  ;;  %5148 = vmatprep.subr.bf16.mxu0 %v10501_v51  ;;  %v1236_v50 = vsel %vm1215_vm9, %v1201_v31, %v1226_v40  ;;  %v12797_v51 = vpack.c.bf16 %v1233_v41, %v1233_v41  ;;  %v10592_v31 = vld [vmem:[#allocation8 + $0xfc0] ss:$28 sps:$4 sm:$0xff]   ;;  %v10606_v40 = vld [vmem:[#allocation8 + $0x1034] ss:$28 sps:$4 sm:$0xff]  }
 0x38f   : > { %v10607_v41 = vld [vmem:[#allocation8 + $0x1038] ss:$28 sps:$4 sm:$0xff]  }
 0x391   : > { %4944 = vmatpush1.bf16.msra.mxu1 %v10496_v53  ;;  %5149 = vmatpush1.bf16.msra.mxu0 %v10499_v54  ;;  %v10550_v53 = vld [vmem:[#allocation8 + $0xe38] ss:$28 sps:$4 sm:$0xff]   ;;  %v10553_v54 = vld [vmem:[#allocation8 + $0xe40] ss:$28 sps:$4 sm:$0xff]  }
 0x392   : > { %4945 = vmatprep.subr.bf16.mxu1 %v10504_v55  ;;  %5150 = vmatprep.subr.bf16.mxu0 %v10507_v56  ;;  %v12799_v55 = vpack.c.bf16 %v1236_v50, %v1236_v50  ;;  %v10558_v56 = vld [vmem:[#allocation8 + $0xe74] ss:$28 sps:$4 sm:$0xff]   ;;  %v10618_v50 = vld [vmem:[#allocation8 + $0x10a4] ss:$28 sps:$4 sm:$0xff]  }
 0x395   : > { %4946 = vmatpush1.bf16.msra.mxu1 %v10502_v57  ;;  %5151 = vmatpush1.bf16.msra.mxu0 %v10505_v60  ;;  %v10561_v57 = vld [vmem:[#allocation8 + $0xe7c] ss:$28 sps:$4 sm:$0xff]   ;;  %v10556_v60 = vld [vmem:[#allocation8 + $0xe70] ss:$28 sps:$4 sm:$0xff]  }
 0x396   : > { %4947 = vmatprep.subr.bf16.mxu1 %v10510_v5  ;;  %5152 = vmatprep.subr.bf16.mxu0 %v10513_v61  ;;  %v10559_v5 = vld [vmem:[#allocation8 + $0xe78] ss:$28 sps:$4 sm:$0xff]   ;;  %v10564_v61 = vld [vmem:[#allocation8 + $0xeac] ss:$28 sps:$4 sm:$0xff]  }
 0x399   : > { %4948 = vmatpush1.bf16.msra.mxu1 %v10508_v20  ;;  %5153 = vmatpush1.bf16.msra.mxu0 %v10511_v62  ;;  %v10567_v20 = vld [vmem:[#allocation8 + $0xeb4] ss:$28 sps:$4 sm:$0xff]   ;;  %v10562_v62 = vld [vmem:[#allocation8 + $0xea8] ss:$28 sps:$4 sm:$0xff]  }
 0x39a   : > { %4949 = vmatprep.subr.bf16.mxu1 %v10516_v63  ;;  %5154 = vmatprep.subr.bf16.mxu0 %v10519_v0  ;;  %v10565_v63 = vld [vmem:[#allocation8 + $0xeb0] ss:$28 sps:$4 sm:$0xff]   ;;  %v10570_v0 = vld [vmem:[#allocation8 + $0xee4] ss:$28 sps:$4 sm:$0xff]  }
 0x39d   : > { %4950 = vmatpush1.bf16.msra.mxu1 %v10514_v3  ;;  %5155 = vmatpush1.bf16.msra.mxu0 %v10517_v4  ;;  %v10573_v3 = vld [vmem:[#allocation8 + $0xeec] ss:$28 sps:$4 sm:$0xff]   ;;  %v10568_v4 = vld [vmem:[#allocation8 + $0xee0] ss:$28 sps:$4 sm:$0xff]  }
 0x39e   : > { %4951 = vmatprep.subr.bf16.mxu1 %v10522_v8  ;;  %5156 = vmatprep.subr.bf16.mxu0 %v10525_v9  ;;  %v10571_v8 = vld [vmem:[#allocation8 + $0xee8] ss:$28 sps:$4 sm:$0xff]   ;;  %v10576_v9 = vld [vmem:[#allocation8 + $0xf1c] ss:$28 sps:$4 sm:$0xff]  }
 0x3a1   : > { %4952 = vmatpush1.bf16.msra.mxu1 %v10520_v11  ;;  %5157 = vmatpush1.bf16.msra.mxu0 %v10523_v13  ;;  %v10579_v11 = vld [vmem:[#allocation8 + $0xf24] ss:$28 sps:$4 sm:$0xff]   ;;  %v10574_v13 = vld [vmem:[#allocation8 + $0xf18] ss:$28 sps:$4 sm:$0xff]  }
 0x3a2   : > { %4953 = vmatprep.subr.bf16.mxu1 %v10528_v28  ;;  %5158 = vmatprep.subr.bf16.mxu0 %v10531_v15  ;;  %v10577_v28 = vld [vmem:[#allocation8 + $0xf20] ss:$28 sps:$4 sm:$0xff]   ;;  %v10582_v15 = vld [vmem:[#allocation8 + $0xf54] ss:$28 sps:$4 sm:$0xff]  }
 0x3a5   : > { %4954 = vmatpush1.bf16.msra.mxu1 %v10526_v18  ;;  %5159 = vmatpush1.bf16.msra.mxu0 %v10529_v19  ;;  %v10580_v18 = vld [vmem:[#allocation8 + $0xf50] ss:$28 sps:$4 sm:$0xff]   ;;  %v10583_v19 = vld [vmem:[#allocation8 + $0xf58] ss:$28 sps:$4 sm:$0xff]  }
 0x3a6   : > { %4955 = vmatprep.subr.bf16.mxu1 %v10534_v6  ;;  %5160 = vmatprep.subr.bf16.mxu0 %v10537_v21  ;;  %v10591_v6 = vld [vmem:[#allocation8 + $0xf94] ss:$28 sps:$4 sm:$0xff]   ;;  %v10586_v21 = vld [vmem:[#allocation8 + $0xf88] ss:$28 sps:$4 sm:$0xff]  }
 0x3a9   : > { %4956 = vmatpush1.bf16.msra.mxu1 %v10532_v24  ;;  %5161 = vmatpush1.bf16.msra.mxu0 %v10535_v26  ;;  %v10594_v24 = vld [vmem:[#allocation8 + $0xfc4] ss:$28 sps:$4 sm:$0xff]   ;;  %v10597_v26 = vld [vmem:[#allocation8 + $0xfcc] ss:$28 sps:$4 sm:$0xff]  }
 0x3aa   : > { %4957 = vmatprep.subr.bf16.mxu1 %v10540_v37  ;;  %5162 = vmatprep.subr.bf16.mxu0 %v10543_v33  ;;  %v10595_v37 = vld [vmem:[#allocation8 + $0xfc8] ss:$28 sps:$4 sm:$0xff]   ;;  %v10600_v33 = vld [vmem:[#allocation8 + $0xffc] ss:$28 sps:$4 sm:$0xff]  }
 0x3ad   : > { %4958 = vmatpush1.bf16.msra.mxu1 %v10538_v38  ;;  %5163 = vmatpush1.bf16.msra.mxu0 %v10541_v39  ;;  %v10598_v38 = vld [vmem:[#allocation8 + $0xff8] ss:$28 sps:$4 sm:$0xff]   ;;  %v10601_v39 = vld [vmem:[#allocation8 + $0x1000] ss:$28 sps:$4 sm:$0xff]  }
 0x3ae   : > { %4968 = vmatprep.subr.bf16.mxu1 %v10546_v17  ;;  %5173 = vmatprep.subr.bf16.mxu0 %v10549_v46  ;;  %v10609_v17 = vld [vmem:[#allocation8 + $0x103c] ss:$28 sps:$4 sm:$0xff]   ;;  %v10604_v46 = vld [vmem:[#allocation8 + $0x1030] ss:$28 sps:$4 sm:$0xff]  }
 0x3b0   : > { %4960 = vmatmul.mubr.bf16.vlgmr.msra.gmra.mrb[4].mxu1 %v12797_v51  ;;  %5165 = vmatmul.mubr.bf16.vlgmr.msra.gmra.mrb[16].mxu0 %v12797_v51 }
 0x3b1   : > { %4969 = vmatpush1.bf16.msra.mxu1 %v10544_v43  ;;  %5174 = vmatpush1.bf16.msra.mxu0 %v10547_v44  ;;  %v10612_v43 = vld [vmem:[#allocation8 + $0x106c] ss:$28 sps:$4 sm:$0xff]   ;;  %v10615_v44 = vld [vmem:[#allocation8 + $0x1074] ss:$28 sps:$4 sm:$0xff]  }
 0x3b2   : > { %4970 = vmatprep.subr.bf16.mxu1 %v10552_v45  ;;  %5175 = vmatprep.subr.bf16.mxu0 %v10555_v47  ;;  %v10610_v45 = vld [vmem:[#allocation8 + $0x1068] ss:$28 sps:$4 sm:$0xff]   ;;  %v10613_v47 = vld [vmem:[#allocation8 + $0x1070] ss:$28 sps:$4 sm:$0xff]  }
 0x3b3   : > { %5000 = vmatprep.mubr.bf16.mxu1 %v12799_v55  ;;  %5205 = vmatprep.mubr.bf16.mxu0 %v12799_v55 }
 0x3b5   : > { %4971 = vmatpush1.bf16.msra.mxu1 %v10550_v53  ;;  %5176 = vmatpush1.bf16.msra.mxu0 %v10553_v54  ;;  %v10621_v53 = vld [vmem:[#allocation8 + $0x10ac] ss:$28 sps:$4 sm:$0xff]   ;;  %v10616_v54 = vld [vmem:[#allocation8 + $0x10a0] ss:$28 sps:$4 sm:$0xff]  }
 0x3b6   : > { %4972 = vmatprep.subr.bf16.mxu1 %v10558_v56  ;;  %5177 = vmatprep.subr.bf16.mxu0 %v10561_v57  ;;  %v10619_v56 = vld [vmem:[#allocation8 + $0x10a8] ss:$28 sps:$4 sm:$0xff]   ;;  %v881_v57 = vrot.slane %v12786_v14, %v12699_v29 }
 0x3b7   : > { %v10636_v14 = vld [vmem:[#allocation8 + $0x114c] ss:$28 sps:$4 sm:$0xff]  }
 0x3b9   : > { %4973 = vmatpush1.bf16.msra.mxu1 %v10556_v60  ;;  %5178 = vmatpush1.bf16.msra.mxu0 %v10559_v5  ;;  %v10624_v60 = vld [vmem:[#allocation8 + $0x10dc] ss:$28 sps:$4 sm:$0xff]   ;;  %v10627_v5 = vld [vmem:[#allocation8 + $0x10e4] ss:$28 sps:$4 sm:$0xff]  }
 0x3ba   : > { %4974 = vmatprep.subr.bf16.mxu1 %v10564_v61  ;;  %5179 = vmatprep.subr.bf16.mxu0 %v10567_v20  ;;  %v10622_v61 = vld [vmem:[#allocation8 + $0x10d8] ss:$28 sps:$4 sm:$0xff]   ;;  %v10625_v20 = vld [vmem:[#allocation8 + $0x10e0] ss:$28 sps:$4 sm:$0xff]  }
 0x3bd   : > { %4975 = vmatpush1.bf16.msra.mxu1 %v10562_v62  ;;  %5180 = vmatpush1.bf16.msra.mxu0 %v10565_v63  ;;  %v1199_v62 = vadd.f32 %v12769_v42, %v881_v57  ;;  %v10630_v63 = vld [vmem:[#allocation8 + $0x1114] ss:$28 sps:$4 sm:$0xff]  }
 0x3be   : > { %4976 = vmatprep.subr.bf16.mxu1 %v10570_v0  ;;  %5181 = vmatprep.subr.bf16.mxu0 %v10573_v3  ;;  %v10633_v0 = vld [vmem:[#allocation8 + $0x111c] ss:$28 sps:$4 sm:$0xff]   ;;  %v10628_v3 = vld [vmem:[#allocation8 + $0x1110] ss:$28 sps:$4 sm:$0xff]  }
 0x3bf   : > { %vm1214_vm10 = vcmp.ge.f32.partialorder %v1199_v62, 0.0  ;;  %v10642_v42 = vld [vmem:[#allocation8 + $0x14] ss:$28 sps:$4 sm:$0xff]  }
 0x3c0   : > { %v10675_v57 = vld [vmem:[#allocation8 + $0x198] ss:$28 sps:$4 sm:$0xff]  }
 0x3c1   : > { %4977 = vmatpush1.bf16.msra.mxu1 %v10568_v4  ;;  %5182 = vmatpush1.bf16.msra.mxu0 %v10571_v8  ;;  %v10631_v4 = vld [vmem:[#allocation8 + $0x1118] ss:$28 sps:$4 sm:$0xff]  }
 0x3c2   : > { %4978 = vmatprep.subr.bf16.mxu1 %v10576_v9  ;;  %5183 = vmatprep.subr.bf16.mxu0 %v10579_v11  ;;  %v10639_v8 = vld [vmem:[#allocation8 + $0x1154] ss:$28 sps:$4 sm:$0xff]   ;;  %v1225_v9 = vmul.f32 %v12708_v34, %v1199_v62  ;;  %v10634_v11 = vld [vmem:[#allocation8 + $0x1148] ss:$28 sps:$4 sm:$0xff]  }
 0x3c3   : > { %v10645_v34 = vld [vmem:[#allocation8 + $0x48] ss:$28 sps:$4 sm:$0xff]  }
 0x3c5   : > { %4979 = vmatpush1.bf16.msra.mxu1 %v10574_v13  ;;  %5184 = vmatpush1.bf16.msra.mxu0 %v10577_v28  ;;  %v10637_v13 = vld [vmem:[#allocation8 + $0x1150] ss:$28 sps:$4 sm:$0xff]   ;;  %v10643_v28 = vld [vmem:[#allocation8 + $0x1d8] ss:$28 sps:$4 sm:$0xff]  }
 0x3c6   : > { %4980 = vmatprep.subr.bf16.mxu1 %v10582_v15  ;;  %5185 = vmatprep.subr.bf16.mxu0 %v10585_v16  ;;  %v1235_v15 = vsel %vm1214_vm10, %v1199_v62, %v1225_v9  ;;  %v10640_v16 = vld [vmem:[#allocation8 + $0x10] ss:$28 sps:$4 sm:$0xff]   ;;  %v10684_v62 = vld [vmem:[#allocation8 + $0x398] ss:$28 sps:$4 sm:$0xff]   ;;  %v10690_v9 = vld [vmem:[#allocation8 + $0x240] ss:$28 sps:$4 sm:$0xff]  }
 0x3c9   : > { %4981 = vmatpush1.bf16.msra.mxu1 %v10580_v18  ;;  %5186 = vmatpush1.bf16.msra.mxu0 %v10583_v19  ;;  %v10644_v18 = vld [vmem:[#allocation8 + $0x18] ss:$28 sps:$4 sm:$0xff]   ;;  %v10647_v19 = vld [vmem:[#allocation8 + $0x4c] ss:$28 sps:$4 sm:$0xff]  }
 0x3ca   : > { %4982 = vmatprep.subr.bf16.mxu1 %v10588_v52  ;;  %5187 = vmatprep.subr.bf16.mxu0 %v10591_v6  ;;  %v10648_v52 = vld [vmem:[#allocation8 + $0x210] ss:$28 sps:$4 sm:$0xff]   ;;  %v12809_v6 = vpack.c.bf16 %v1235_v15, %v1235_v15  ;;  %v10699_v15 = vld [vmem:[#allocation8 + $0x440] ss:$28 sps:$4 sm:$0xff]  }
 0x3cd   : > { %4983 = vmatpush1.bf16.msra.mxu1 %v10586_v21  ;;  %5188 = vmatpush1.bf16.msra.mxu0 %v10589_v22  ;;  %v10649_v21 = vld [vmem:[#allocation8 + $0x50] ss:$28 sps:$4 sm:$0xff]   ;;  %v10652_v22 = vld [vmem:[#allocation8 + $0x84] ss:$28 sps:$4 sm:$0xff]  }
 0x3ce   : > { %4984 = vmatprep.subr.bf16.mxu1 %v10594_v24  ;;  %5189 = vmatprep.subr.bf16.mxu0 %v10597_v26  ;;  %v10653_v24 = vld [vmem:[#allocation8 + $0x248] ss:$28 sps:$4 sm:$0xff]   ;;  %v10650_v26 = vld [vmem:[#allocation8 + $0x80] ss:$28 sps:$4 sm:$0xff]  }
 0x3d1   : > { %4985 = vmatpush1.bf16.msra.mxu1 %v10592_v31  ;;  %5190 = vmatpush1.bf16.msra.mxu0 %v10595_v37  ;;  %v10654_v31 = vld [vmem:[#allocation8 + $0x88] ss:$28 sps:$4 sm:$0xff]   ;;  %v10657_v37 = vld [vmem:[#allocation8 + $0xbc] ss:$28 sps:$4 sm:$0xff]  }
 0x3d2   : > { %4986 = vmatprep.subr.bf16.mxu1 %v10600_v33  ;;  %5191 = vmatprep.subr.bf16.mxu0 %v10603_v36  ;;  %v10658_v33 = vld [vmem:[#allocation8 + $0x280] ss:$28 sps:$4 sm:$0xff]   ;;  %v10655_v36 = vld [vmem:[#allocation8 + $0xb8] ss:$28 sps:$4 sm:$0xff]  }
 0x3d5   : > { %4987 = vmatpush1.bf16.msra.mxu1 %v10598_v38  ;;  %5192 = vmatpush1.bf16.msra.mxu0 %v10601_v39  ;;  %v10659_v38 = vld [vmem:[#allocation8 + $0xc0] ss:$28 sps:$4 sm:$0xff]   ;;  %v10662_v39 = vld [vmem:[#allocation8 + $0xf4] ss:$28 sps:$4 sm:$0xff]  }
 0x3d6   : > { %4988 = vmatprep.subr.bf16.mxu1 %v10606_v40  ;;  %5193 = vmatprep.subr.bf16.mxu0 %v10609_v17  ;;  %v10663_v40 = vld [vmem:[#allocation8 + $0x2b8] ss:$28 sps:$4 sm:$0xff]  }
 0x3d7   : > { %v10664_v17 = vld [vmem:[#allocation8 + $0xf8] ss:$28 sps:$4 sm:$0xff]  }
 0x3d9   : > { %4989 = vmatpush1.bf16.msra.mxu1 %v10604_v46  ;;  %5194 = vmatpush1.bf16.msra.mxu0 %v10607_v41  ;;  %v10667_v46 = vld [vmem:[#allocation8 + $0x12c] ss:$28 sps:$4 sm:$0xff]  }
 0x3da   : > { %4990 = vmatprep.subr.bf16.mxu1 %v10612_v43  ;;  %5195 = vmatprep.subr.bf16.mxu0 %v10615_v44  ;;  %v10668_v41 = vld [vmem:[#allocation8 + $0x2f0] ss:$28 sps:$4 sm:$0xff]   ;;  %v10665_v43 = vld [vmem:[#allocation8 + $0x128] ss:$28 sps:$4 sm:$0xff]  }
 0x3db   : > { %v10669_v44 = vld [vmem:[#allocation8 + $0x130] ss:$28 sps:$4 sm:$0xff]  }
 0x3dd   : > { %4991 = vmatpush1.bf16.msra.mxu1 %v10610_v45  ;;  %5196 = vmatpush1.bf16.msra.mxu0 %v10613_v47  ;;  %v10672_v45 = vld [vmem:[#allocation8 + $0x164] ss:$28 sps:$4 sm:$0xff]  }
 0x3de   : > { %4992 = vmatprep.subr.bf16.mxu1 %v10618_v50  ;;  %5197 = vmatprep.subr.bf16.mxu0 %v10621_v53  ;;  %v10673_v47 = vld [vmem:[#allocation8 + $0x328] ss:$28 sps:$4 sm:$0xff]   ;;  %v10670_v50 = vld [vmem:[#allocation8 + $0x160] ss:$28 sps:$4 sm:$0xff]  }
 0x3df   : > { %v10674_v53 = vld [vmem:[#allocation8 + $0x168] ss:$28 sps:$4 sm:$0xff]  }
 0x3e1   : > { %4993 = vmatpush1.bf16.msra.mxu1 %v10616_v54  ;;  %5198 = vmatpush1.bf16.msra.mxu0 %v10619_v56  ;;  %v10677_v54 = vld [vmem:[#allocation8 + $0x19c] ss:$28 sps:$4 sm:$0xff]  }
 0x3e2   : > { %4994 = vmatprep.subr.bf16.mxu1 %v10624_v60  ;;  %5199 = vmatprep.subr.bf16.mxu0 %v10627_v5  ;;  %v10678_v56 = vld [vmem:[#allocation8 + $0x360] ss:$28 sps:$4 sm:$0xff]   ;;  %v10682_v5 = vld [vmem:[#allocation8 + $0x1d4] ss:$28 sps:$4 sm:$0xff]  }
 0x3e3   : > { %v10679_v60 = vld [vmem:[#allocation8 + $0x1a0] ss:$28 sps:$4 sm:$0xff]  }
 0x3e5   : > { %4995 = vmatpush1.bf16.msra.mxu1 %v10622_v61  ;;  %5200 = vmatpush1.bf16.msra.mxu0 %v10625_v20  ;;  %v10683_v61 = vld [vmem:[#allocation8 + $0x558] ss:$28 sps:$4 sm:$0xff]   ;;  %v10680_v20 = vld [vmem:[#allocation8 + $0x1d0] ss:$28 sps:$4 sm:$0xff]  }
 0x3e6   : > { %4996 = vmatprep.subr.bf16.mxu1 %v10630_v63  ;;  %5201 = vmatprep.subr.bf16.mxu0 %v10633_v0  ;;  %v10687_v63 = vld [vmem:[#allocation8 + $0x20c] ss:$28 sps:$4 sm:$0xff]  }
 0x3e7   : > { %v10688_v0 = vld [vmem:[#allocation8 + $0x590] ss:$28 sps:$4 sm:$0xff]  }
 0x3e9   : > { %4997 = vmatpush1.bf16.msra.mxu1 %v10628_v3  ;;  %5202 = vmatpush1.bf16.msra.mxu0 %v10631_v4  ;;  %v10685_v3 = vld [vmem:[#allocation8 + $0x208] ss:$28 sps:$4 sm:$0xff]   ;;  %v10689_v4 = vld [vmem:[#allocation8 + $0x3d0] ss:$28 sps:$4 sm:$0xff]  }
 0x3ea   : > { %4998 = vmatprep.subr.bf16.mxu1 %v10636_v14  ;;  %5203 = vmatprep.subr.bf16.mxu0 %v10639_v8  ;;  %v10692_v14 = vld [vmem:[#allocation8 + $0x244] ss:$28 sps:$4 sm:$0xff]  }
 0x3eb   : > { %v10693_v8 = vld [vmem:[#allocation8 + $0x5c8] ss:$28 sps:$4 sm:$0xff]  }
 0x3ed   : > { %4999 = vmatpush1.bf16.msra.mxu1 %v10634_v11  ;;  %5204 = vmatpush1.bf16.msra.mxu0 %v10637_v13  ;;  %v10694_v11 = vld [vmem:[#allocation8 + $0x408] ss:$28 sps:$4 sm:$0xff]   ;;  %v10697_v13 = vld [vmem:[#allocation8 + $0x27c] ss:$28 sps:$4 sm:$0xff]  }
 0x3ee   : > { %5214 = vmatprep.subr.bf16.mxu1 %v10642_v42  ;;  %9593 = vmatprep.subr.bf16.mxu0 %v10643_v28  ;;  %v10698_v42 = vld [vmem:[#allocation8 + $0x600] ss:$28 sps:$4 sm:$0xff]   ;;  %v10695_v28 = vld [vmem:[#allocation8 + $0x278] ss:$28 sps:$4 sm:$0xff]  }
 0x3f0   : > { %5001 = vmatmul.mubr.bf16.vlgmr.msra.gmra.mrb[4].mxu1 %v12809_v6  ;;  %5206 = vmatmul.mubr.bf16.vlgmr.msra.gmra.mrb[16].mxu0 %v12809_v6 }
 0x3f1   : > { %5215 = vmatpush1.bf16.msra.mxu1 %v10640_v16  ;;  %5246 = vmatprep.mubr.bf16.mxu1 %v12717_v48  ;;  %v10702_v16 = vld [vmem:[#allocation8 + $0x2b4] ss:$28 sps:$4 sm:$0xff]  }
 0x3f2   : > { %9594 = vmatpush3.bf16.msra.mxu0 %v10644_v18  ;;  %5451 = vmatprep.mubr.bf16.mxu0 %v12717_v48  ;;  %v10660_v48 = vld [vmem:[#allocation8 + $0xf0] ss:$28 sps:$4 sm:$0xff]   ;;  %v10703_v18 = vld [vmem:[#allocation8 + $0x638] ss:$28 sps:$4 sm:$0xff]  }
 0x3f3   : > { %5216 = vmatprep.subr.bf16.mxu1 %v10647_v19  ;;  %9595 = vmatprep.subr.bf16.mxu0 %v10648_v52  ;;  %v10700_v19 = vld [vmem:[#allocation8 + $0x2b0] ss:$28 sps:$4 sm:$0xff]   ;;  %v10704_v52 = vld [vmem:[#allocation8 + $0x478] ss:$28 sps:$4 sm:$0xff]  }
 0x3f5   : > { %5217 = vmatpush1.bf16.msra.mxu1 %v10645_v34  ;;  %v10707_v34 = vld [vmem:[#allocation8 + $0x2ec] ss:$28 sps:$4 sm:$0xff]  }
 0x3f6   : > { %9596 = vmatpush3.bf16.msra.mxu0 %v10649_v21  ;;  %5218 = vmatprep.subr.bf16.mxu1 %v10652_v22  ;;  %v10708_v21 = vld [vmem:[#allocation8 + $0x670] ss:$28 sps:$4 sm:$0xff]   ;;  %v10705_v22 = vld [vmem:[#allocation8 + $0x2e8] ss:$28 sps:$4 sm:$0xff]  }
 0x3f7   : > { %9597 = vmatprep.subr.bf16.mxu0 %v10653_v24  ;;  %v10709_v24 = vld [vmem:[#allocation8 + $0x4b0] ss:$28 sps:$4 sm:$0xff]  }
 0x3f9   : > { %5219 = vmatpush1.bf16.msra.mxu1 %v10650_v26  ;;  %v10712_v26 = vld [vmem:[#allocation8 + $0x324] ss:$28 sps:$4 sm:$0xff]  }
 0x3fa   : > { %9598 = vmatpush3.bf16.msra.mxu0 %v10654_v31  ;;  %5220 = vmatprep.subr.bf16.mxu1 %v10657_v37  ;;  %v10713_v31 = vld [vmem:[#allocation8 + $0x6a8] ss:$28 sps:$4 sm:$0xff]   ;;  %v10710_v37 = vld [vmem:[#allocation8 + $0x320] ss:$28 sps:$4 sm:$0xff]  }
 0x3fb   : > { %9599 = vmatprep.subr.bf16.mxu0 %v10658_v33  ;;  %v10714_v33 = vld [vmem:[#allocation8 + $0x4e8] ss:$28 sps:$4 sm:$0xff]  }
 0x3fd   : > { %5221 = vmatpush1.bf16.msra.mxu1 %v10655_v36  ;;  %v10717_v36 = vld [vmem:[#allocation8 + $0x35c] ss:$28 sps:$4 sm:$0xff]  }
 0x3fe   : > { %9600 = vmatpush3.bf16.msra.mxu0 %v10659_v38  ;;  %5222 = vmatprep.subr.bf16.mxu1 %v10662_v39  ;;  %v10718_v38 = vld [vmem:[#allocation8 + $0x6e0] ss:$28 sps:$4 sm:$0xff]   ;;  %v10715_v39 = vld [vmem:[#allocation8 + $0x358] ss:$28 sps:$4 sm:$0xff]  }
 0x3ff   : > { %9601 = vmatprep.subr.bf16.mxu0 %v10663_v40  ;;  %v10719_v40 = vld [vmem:[#allocation8 + $0x520] ss:$28 sps:$4 sm:$0xff]  }
 0x401   : > { %5223 = vmatpush1.bf16.msra.mxu1 %v10660_v48  ;;  %v10722_v48 = vld [vmem:[#allocation8 + $0x394] ss:$28 sps:$4 sm:$0xff]  }
 0x402   : > { %9602 = vmatpush3.bf16.msra.mxu0 %v10664_v17  ;;  %5224 = vmatprep.subr.bf16.mxu1 %v10667_v46  ;;  %v10723_v17 = vld [vmem:[#allocation8 + $0x8d8] ss:$28 sps:$4 sm:$0xff]   ;;  %v10720_v46 = vld [vmem:[#allocation8 + $0x390] ss:$28 sps:$4 sm:$0xff]  }
 0x403   : > { %9603 = vmatprep.subr.bf16.mxu0 %v10668_v41  ;;  %v10724_v41 = vld [vmem:[#allocation8 + $0x718] ss:$28 sps:$4 sm:$0xff]  }
 0x405   : > { %5225 = vmatpush1.bf16.msra.mxu1 %v10665_v43  ;;  %v10727_v43 = vld [vmem:[#allocation8 + $0x3cc] ss:$28 sps:$4 sm:$0xff]  }
 0x406   : > { %9604 = vmatpush3.bf16.msra.mxu0 %v10669_v44  ;;  %5226 = vmatprep.subr.bf16.mxu1 %v10672_v45  ;;  %v10728_v44 = vld [vmem:[#allocation8 + $0x910] ss:$28 sps:$4 sm:$0xff]   ;;  %v10725_v45 = vld [vmem:[#allocation8 + $0x3c8] ss:$28 sps:$4 sm:$0xff]  }
 0x407   : > { %9605 = vmatprep.subr.bf16.mxu0 %v10673_v47  ;;  %v10729_v47 = vld [vmem:[#allocation8 + $0x750] ss:$28 sps:$4 sm:$0xff]  }
 0x409   : > { %5227 = vmatpush1.bf16.msra.mxu1 %v10670_v50  ;;  %v10732_v50 = vld [vmem:[#allocation8 + $0x404] ss:$28 sps:$4 sm:$0xff]  }
 0x40a   : > { %9606 = vmatpush3.bf16.msra.mxu0 %v10674_v53  ;;  %5228 = vmatprep.subr.bf16.mxu1 %v10677_v54  ;;  %v10733_v53 = vld [vmem:[#allocation8 + $0x948] ss:$28 sps:$4 sm:$0xff]   ;;  %v10730_v54 = vld [vmem:[#allocation8 + $0x400] ss:$28 sps:$4 sm:$0xff]  }
 0x40b   : > { %9607 = vmatprep.subr.bf16.mxu0 %v10678_v56  ;;  %v10737_v56 = vld [vmem:[#allocation8 + $0x43c] ss:$28 sps:$4 sm:$0xff]  }
 0x40d   : > { %5229 = vmatpush1.bf16.msra.mxu1 %v10675_v57  ;;  %v10738_v57 = vld [vmem:[#allocation8 + $0x980] ss:$28 sps:$4 sm:$0xff]  }
 0x40e   : > { %9608 = vmatpush3.bf16.msra.mxu0 %v10679_v60  ;;  %5230 = vmatprep.subr.bf16.mxu1 %v10682_v5  ;;  %v10735_v60 = vld [vmem:[#allocation8 + $0x438] ss:$28 sps:$4 sm:$0xff]  }
 0x40f   : > { %9615 = vmatprep.subr.bf16.mxu0 %v10683_v61  ;;  %v10742_v5 = vld [vmem:[#allocation8 + $0x474] ss:$28 sps:$4 sm:$0xff]  }
 0x410   : > { %v10743_v61 = vld [vmem:[#allocation8 + $0x9b8] ss:$28 sps:$4 sm:$0xff]  }
 0x411   : > { %5452 = vmatmul.mubr.bf16.vlgmr.msra.gmra.mrb[20].mxu0 %v12719_v49  ;;  %5231 = vmatpush1.bf16.msra.mxu1 %v10680_v20  ;;  %v10740_v20 = vld [vmem:[#allocation8 + $0x470] ss:$28 sps:$4 sm:$0xff]  }
 0x412   : > { %9616 = vmatpush3.bf16.msra.mxu0 %v10684_v62  ;;  %5491 = vmatprep.mubr.bf16.mxu0 %v12728_v1  ;;  %v10744_v62 = vld [vmem:[#allocation8 + $0x7f8] ss:$28 sps:$4 sm:$0xff]  }
 0x413   : > { %5232 = vmatprep.subr.bf16.mxu1 %v10687_v63  ;;  %9617 = vmatprep.subr.bf16.mxu0 %v10688_v0  ;;  %v10747_v63 = vld [vmem:[#allocation8 + $0x4ac] ss:$28 sps:$4 sm:$0xff]  }
 0x414   : > { %v10748_v0 = vld [vmem:[#allocation8 + $0x9f0] ss:$28 sps:$4 sm:$0xff]  }
 0x415   : > { %5233 = vmatpush1.bf16.msra.mxu1 %v10685_v3  ;;  %v10745_v3 = vld [vmem:[#allocation8 + $0x4a8] ss:$28 sps:$4 sm:$0xff]  }
 0x416   : > { %9618 = vmatpush3.bf16.msra.mxu0 %v10689_v4  ;;  %5234 = vmatprep.subr.bf16.mxu1 %v10692_v14  ;;  %v10749_v4 = vld [vmem:[#allocation8 + $0x830] ss:$28 sps:$4 sm:$0xff]   ;;  %v10752_v14 = vld [vmem:[#allocation8 + $0x4e4] ss:$28 sps:$4 sm:$0xff]  }
 0x417   : > { %9619 = vmatprep.subr.bf16.mxu0 %v10693_v8  ;;  %v10753_v8 = vld [vmem:[#allocation8 + $0xa28] ss:$28 sps:$4 sm:$0xff]  }
 0x419   : > { %5235 = vmatpush1.bf16.msra.mxu1 %v10690_v9  ;;  %v10750_v9 = vld [vmem:[#allocation8 + $0x4e0] ss:$28 sps:$4 sm:$0xff]  }
 0x41a   : > { %9620 = vmatpush3.bf16.msra.mxu0 %v10694_v11  ;;  %5236 = vmatprep.subr.bf16.mxu1 %v10697_v13  ;;  %v10754_v11 = vld [vmem:[#allocation8 + $0x868] ss:$28 sps:$4 sm:$0xff]   ;;  %v10757_v13 = vld [vmem:[#allocation8 + $0x51c] ss:$28 sps:$4 sm:$0xff]  }
 0x41b   : > { %9621 = vmatprep.subr.bf16.mxu0 %v10698_v42  ;;  %v10758_v42 = vld [vmem:[#allocation8 + $0xa60] ss:$28 sps:$4 sm:$0xff]  }
 0x41d   : > { %5237 = vmatpush1.bf16.msra.mxu1 %v10695_v28  ;;  %v10755_v28 = vld [vmem:[#allocation8 + $0x518] ss:$28 sps:$4 sm:$0xff]  }
 0x41e   : > { %9622 = vmatpush3.bf16.msra.mxu0 %v10699_v15  ;;  %5238 = vmatprep.subr.bf16.mxu1 %v10702_v16  ;;  %v10759_v15 = vld [vmem:[#allocation8 + $0x8a0] ss:$28 sps:$4 sm:$0xff]   ;;  %v10762_v16 = vld [vmem:[#allocation8 + $0x554] ss:$28 sps:$4 sm:$0xff]  }
 0x41f   : > { %9623 = vmatprep.subr.bf16.mxu0 %v10703_v18  ;;  %v10763_v18 = vld [vmem:[#allocation8 + $0xc58] ss:$28 sps:$4 sm:$0xff]  }
 0x421   : > { %5239 = vmatpush1.bf16.msra.mxu1 %v10700_v19  ;;  %v10760_v19 = vld [vmem:[#allocation8 + $0x550] ss:$28 sps:$4 sm:$0xff]  }
 0x422   : > { %9624 = vmatpush3.bf16.msra.mxu0 %v10704_v52  ;;  %5240 = vmatprep.subr.bf16.mxu1 %v10707_v34  ;;  %v10764_v52 = vld [vmem:[#allocation8 + $0xa98] ss:$28 sps:$4 sm:$0xff]   ;;  %v10767_v34 = vld [vmem:[#allocation8 + $0x58c] ss:$28 sps:$4 sm:$0xff]  }
 0x423   : > { %9625 = vmatprep.subr.bf16.mxu0 %v10708_v21  ;;  %v10768_v21 = vld [vmem:[#allocation8 + $0xc90] ss:$28 sps:$4 sm:$0xff]  }
 0x425   : > { %5241 = vmatpush1.bf16.msra.mxu1 %v10705_v22  ;;  %v10765_v22 = vld [vmem:[#allocation8 + $0x588] ss:$28 sps:$4 sm:$0xff]  }
 0x426   : > { %9626 = vmatpush3.bf16.msra.mxu0 %v10709_v24  ;;  %5242 = vmatprep.subr.bf16.mxu1 %v10712_v26  ;;  %v10769_v24 = vld [vmem:[#allocation8 + $0xad0] ss:$28 sps:$4 sm:$0xff]   ;;  %v10772_v26 = vld [vmem:[#allocation8 + $0x5c4] ss:$28 sps:$4 sm:$0xff]  }
 0x427   : > { %9627 = vmatprep.subr.bf16.mxu0 %v10713_v31  ;;  %v10773_v31 = vld [vmem:[#allocation8 + $0xcc8] ss:$28 sps:$4 sm:$0xff]  }
 0x429   : > { %5243 = vmatpush1.bf16.msra.mxu1 %v10710_v37  ;;  %v10770_v37 = vld [vmem:[#allocation8 + $0x5c0] ss:$28 sps:$4 sm:$0xff]  }
 0x42a   : > { %9628 = vmatpush3.bf16.msra.mxu0 %v10714_v33  ;;  %5244 = vmatprep.subr.bf16.mxu1 %v10717_v36  ;;  %v10774_v33 = vld [vmem:[#allocation8 + $0xb08] ss:$28 sps:$4 sm:$0xff]   ;;  %v10777_v36 = vld [vmem:[#allocation8 + $0x5fc] ss:$28 sps:$4 sm:$0xff]  }
 0x42b   : > { %9629 = vmatprep.subr.bf16.mxu0 %v10718_v38  ;;  %v10778_v38 = vld [vmem:[#allocation8 + $0xd00] ss:$28 sps:$4 sm:$0xff]  }
 0x42d   : > { %5245 = vmatpush1.bf16.msra.mxu1 %v10715_v39  ;;  %v10775_v39 = vld [vmem:[#allocation8 + $0x5f8] ss:$28 sps:$4 sm:$0xff]  }
 0x42e   : > { %9630 = vmatpush3.bf16.msra.mxu0 %v10719_v40  ;;  %5255 = vmatprep.subr.bf16.mxu1 %v10722_v48  ;;  %v10779_v40 = vld [vmem:[#allocation8 + $0xb40] ss:$28 sps:$4 sm:$0xff]   ;;  %v10782_v48 = vld [vmem:[#allocation8 + $0x634] ss:$28 sps:$4 sm:$0xff]  }
 0x42f   : > { %9637 = vmatprep.subr.bf16.mxu0 %v10723_v17  ;;  %v10783_v17 = vld [vmem:[#allocation8 + $0xd38] ss:$28 sps:$4 sm:$0xff]  }
 0x430   : > { %5247 = vmatmul.mubr.bf16.vlgmr.msra.gmra.mrb[8].mxu1 %v12719_v49  ;;  %v10734_v49 = vld [vmem:[#allocation8 + $0x788] ss:$28 sps:$4 sm:$0xff]  }
 0x431   : > { %5492 = vmatmul.mubr.bf16.vlgmr.msra.gmra.mrb[24].mxu0 %v12753_v25  ;;  %5256 = vmatpush1.bf16.msra.mxu1 %v10720_v46  ;;  %v10780_v46 = vld [vmem:[#allocation8 + $0x630] ss:$28 sps:$4 sm:$0xff]  }
 0x432   : > { %5287 = vmatprep.mubr.bf16.mxu1 %v12728_v1  ;;  %9638 = vmatpush3.bf16.msra.mxu0 %v10724_v41  ;;  %v10739_v1 = vld [vmem:[#allocation8 + $0x7c0] ss:$28 sps:$4 sm:$0xff]   ;;  %v10784_v41 = vld [vmem:[#allocation8 + $0xb78] ss:$28 sps:$4 sm:$0xff]  }
 0x433   : > { %5531 = vmatprep.mubr.bf16.mxu0 %v12755_v32  ;;  %5257 = vmatprep.subr.bf16.mxu1 %v10727_v43  ;;  %v10787_v43 = vld [vmem:[#allocation8 + $0x66c] ss:$28 sps:$4 sm:$0xff]  }
 0x434   : > { %9639 = vmatprep.subr.bf16.mxu0 %v10728_v44  ;;  %v10788_v44 = vld [vmem:[#allocation8 + $0xd70] ss:$28 sps:$4 sm:$0xff]  }
 0x435   : > { %5258 = vmatpush1.bf16.msra.mxu1 %v10725_v45  ;;  %v10785_v45 = vld [vmem:[#allocation8 + $0x668] ss:$28 sps:$4 sm:$0xff]  }
 0x436   : > { %9640 = vmatpush3.bf16.msra.mxu0 %v10729_v47  ;;  %5259 = vmatprep.subr.bf16.mxu1 %v10732_v50  ;;  %v10789_v47 = vld [vmem:[#allocation8 + $0xbb0] ss:$28 sps:$4 sm:$0xff]   ;;  %v10792_v50 = vld [vmem:[#allocation8 + $0x6a4] ss:$28 sps:$4 sm:$0xff]  }
 0x437   : > { %9641 = vmatprep.subr.bf16.mxu0 %v10733_v53  ;;  %v10793_v53 = vld [vmem:[#allocation8 + $0xda8] ss:$28 sps:$4 sm:$0xff]  }
 0x439   : > { %5260 = vmatpush1.bf16.msra.mxu1 %v10730_v54  ;;  %v10790_v54 = vld [vmem:[#allocation8 + $0x6a0] ss:$28 sps:$4 sm:$0xff]  }
 0x43a   : > { %9642 = vmatpush3.bf16.msra.mxu0 %v10734_v49  ;;  %5261 = vmatprep.subr.bf16.mxu1 %v10737_v56  ;;  %v10794_v49 = vld [vmem:[#allocation8 + $0xbe8] ss:$28 sps:$4 sm:$0xff]   ;;  %v10797_v56 = vld [vmem:[#allocation8 + $0x6dc] ss:$28 sps:$4 sm:$0xff]  }
 0x43b   : > { %9643 = vmatprep.subr.bf16.mxu0 %v10738_v57  ;;  %v10798_v57 = vld [vmem:[#allocation8 + $0xde0] ss:$28 sps:$4 sm:$0xff]  }
 0x43d   : > { %5262 = vmatpush1.bf16.msra.mxu1 %v10735_v60  ;;  %v10795_v60 = vld [vmem:[#allocation8 + $0x6d8] ss:$28 sps:$4 sm:$0xff]  }
 0x43e   : > { %9644 = vmatpush3.bf16.msra.mxu0 %v10739_v1  ;;  %5263 = vmatprep.subr.bf16.mxu1 %v10742_v5  ;;  %v10799_v1 = vld [vmem:[#allocation8 + $0xc20] ss:$28 sps:$4 sm:$0xff]   ;;  %v10802_v5 = vld [vmem:[#allocation8 + $0x714] ss:$28 sps:$4 sm:$0xff]  }
 0x43f   : > { %9645 = vmatprep.subr.bf16.mxu0 %v10743_v61  ;;  %v10803_v61 = vld [vmem:[#allocation8 + $0xfd8] ss:$28 sps:$4 sm:$0xff]  }
 0x441   : > { %5264 = vmatpush1.bf16.msra.mxu1 %v10740_v20  ;;  %v10800_v20 = vld [vmem:[#allocation8 + $0x710] ss:$28 sps:$4 sm:$0xff]  }
 0x442   : > { %9646 = vmatpush3.bf16.msra.mxu0 %v10744_v62  ;;  %5265 = vmatprep.subr.bf16.mxu1 %v10747_v63  ;;  %v10804_v62 = vld [vmem:[#allocation8 + $0xe18] ss:$28 sps:$4 sm:$0xff]   ;;  %v10807_v63 = vld [vmem:[#allocation8 + $0x74c] ss:$28 sps:$4 sm:$0xff]  }
 0x443   : > { %9647 = vmatprep.subr.bf16.mxu0 %v10748_v0  ;;  %v10808_v0 = vld [vmem:[#allocation8 + $0x1010] ss:$28 sps:$4 sm:$0xff]  }
 0x445   : > { %5266 = vmatpush1.bf16.msra.mxu1 %v10745_v3  ;;  %v10805_v3 = vld [vmem:[#allocation8 + $0x748] ss:$28 sps:$4 sm:$0xff]  }
 0x446   : > { %9648 = vmatpush3.bf16.msra.mxu0 %v10749_v4  ;;  %5267 = vmatprep.subr.bf16.mxu1 %v10752_v14  ;;  %v10809_v4 = vld [vmem:[#allocation8 + $0xe50] ss:$28 sps:$4 sm:$0xff]   ;;  %v10812_v14 = vld [vmem:[#allocation8 + $0x784] ss:$28 sps:$4 sm:$0xff]  }
 0x447   : > { %9649 = vmatprep.subr.bf16.mxu0 %v10753_v8  ;;  %v10813_v8 = vld [vmem:[#allocation8 + $0x1048] ss:$28 sps:$4 sm:$0xff]  }
 0x449   : > { %5268 = vmatpush1.bf16.msra.mxu1 %v10750_v9  ;;  %v10810_v9 = vld [vmem:[#allocation8 + $0x780] ss:$28 sps:$4 sm:$0xff]  }
 0x44a   : > { %9650 = vmatpush3.bf16.msra.mxu0 %v10754_v11  ;;  %5269 = vmatprep.subr.bf16.mxu1 %v10757_v13  ;;  %v10817_v11 = vld [vmem:[#allocation8 + $0x7bc] ss:$28 sps:$4 sm:$0xff]  }
 0x44b   : > { %9651 = vmatprep.subr.bf16.mxu0 %v10758_v42  ;;  %v10818_v13 = vld [vmem:[#allocation8 + $0x1080] ss:$28 sps:$4 sm:$0xff]   ;;  %v10815_v42 = vld [vmem:[#allocation8 + $0x7b8] ss:$28 sps:$4 sm:$0xff]  }
 0x44d   : > { %5270 = vmatpush1.bf16.msra.mxu1 %v10755_v28  ;;  %v10822_v28 = vld [vmem:[#allocation8 + $0x7f4] ss:$28 sps:$4 sm:$0xff]  }
 0x44e   : > { %9652 = vmatpush3.bf16.msra.mxu0 %v10759_v15  ;;  %5271 = vmatprep.subr.bf16.mxu1 %v10762_v16  ;;  %v10823_v15 = vld [vmem:[#allocation8 + $0x10b8] ss:$28 sps:$4 sm:$0xff]   ;;  %v10820_v16 = vld [vmem:[#allocation8 + $0x7f0] ss:$28 sps:$4 sm:$0xff]  }
 0x44f   : > { %9659 = vmatprep.subr.bf16.mxu0 %v10763_v18  ;;  %v10824_v18 = vld [vmem:[#allocation8 + $0xef8] ss:$28 sps:$4 sm:$0xff]  }
 0x451   : > { %5532 = vmatmul.mubr.bf16.vlgmr.msra.gmra.mrb[28].mxu0 %v12777_v7  ;;  %5272 = vmatpush1.bf16.msra.mxu1 %v10760_v19  ;;  %v10827_v19 = vld [vmem:[#allocation8 + $0x82c] ss:$28 sps:$4 sm:$0xff]  }
 0x452   : > { %9660 = vmatpush3.bf16.msra.mxu0 %v10764_v52  ;;  %5571 = vmatprep.mubr.bf16.mxu0 %v12779_v12  ;;  %v10828_v52 = vld [vmem:[#allocation8 + $0x10f0] ss:$28 sps:$4 sm:$0xff]  }
 0x453   : > { %5273 = vmatprep.subr.bf16.mxu1 %v10767_v34  ;;  %9661 = vmatprep.subr.bf16.mxu0 %v10768_v21  ;;  %v10825_v34 = vld [vmem:[#allocation8 + $0x828] ss:$28 sps:$4 sm:$0xff]   ;;  %v10829_v21 = vld [vmem:[#allocation8 + $0xf30] ss:$28 sps:$4 sm:$0xff]  }
 0x455   : > { %5274 = vmatpush1.bf16.msra.mxu1 %v10765_v22  ;;  %v10832_v22 = vld [vmem:[#allocation8 + $0x864] ss:$28 sps:$4 sm:$0xff]  }
 0x456   : > { %9662 = vmatpush3.bf16.msra.mxu0 %v10769_v24  ;;  %5275 = vmatprep.subr.bf16.mxu1 %v10772_v26  ;;  %v10833_v24 = vld [vmem:[#allocation8 + $0x1128] ss:$28 sps:$4 sm:$0xff]   ;;  %v10830_v26 = vld [vmem:[#allocation8 + $0x860] ss:$28 sps:$4 sm:$0xff]  }
 0x457   : > { %9663 = vmatprep.subr.bf16.mxu0 %v10773_v31  ;;  %v10834_v31 = vld [vmem:[#allocation8 + $0xf68] ss:$28 sps:$4 sm:$0xff]  }
 0x459   : > { %5276 = vmatpush1.bf16.msra.mxu1 %v10770_v37  ;;  %v10837_v37 = vld [vmem:[#allocation8 + $0x89c] ss:$28 sps:$4 sm:$0xff]  }
 0x45a   : > { %9664 = vmatpush3.bf16.msra.mxu0 %v10774_v33  ;;  %5277 = vmatprep.subr.bf16.mxu1 %v10777_v36  ;;  %v10838_v33 = vld [vmem:[#allocation8 + $0x1160] ss:$28 sps:$4 sm:$0xff]   ;;  %v10835_v36 = vld [vmem:[#allocation8 + $0x898] ss:$28 sps:$4 sm:$0xff]  }
 0x45b   : > { %9665 = vmatprep.subr.bf16.mxu0 %v10778_v38  ;;  %v10839_v38 = vld [vmem:[#allocation8 + $0xfa0] ss:$28 sps:$4 sm:$0xff]  }
 0x45d   : > { %5278 = vmatpush1.bf16.msra.mxu1 %v10775_v39  ;;  %v10842_v39 = vld [vmem:[#allocation8 + $0x8d4] ss:$28 sps:$4 sm:$0xff]  }
 0x45e   : > { %9666 = vmatpush3.bf16.msra.mxu0 %v10779_v40  ;;  %5279 = vmatprep.subr.bf16.mxu1 %v10782_v48  ;;  %v10845_v40 = vld [vmem:[#allocation9 + $0x4] ss:$16 sps:$4 sm:$0xff]   ;;  %v10840_v48 = vld [vmem:[#allocation8 + $0x8d0] ss:$28 sps:$4 sm:$0xff]  }
 0x45f   : > { %9667 = vmatprep.subr.bf16.mxu0 %v10783_v17  ;;  %v10843_v17 = vld [vmem:[#allocation9] ss:$16 sps:$4 sm:$0xff]  }
 0x461   : > { %5280 = vmatpush1.bf16.msra.mxu1 %v10780_v46  ;;  %v10848_v46 = vld [vmem:[#allocation8 + $0x90c] ss:$28 sps:$4 sm:$0xff]  }
 0x462   : > { %9668 = vmatpush3.bf16.msra.mxu0 %v10784_v41  ;;  %5281 = vmatprep.subr.bf16.mxu1 %v10787_v43  ;;  %v10851_v41 = vld [vmem:[#allocation9 + $0x24] ss:$16 sps:$4 sm:$0xff]  }
 0x463   : > { %9669 = vmatprep.subr.bf16.mxu0 %v10788_v44  ;;  %v10846_v43 = vld [vmem:[#allocation8 + $0x908] ss:$28 sps:$4 sm:$0xff]   ;;  %v10849_v44 = vld [vmem:[#allocation9 + $0x20] ss:$16 sps:$4 sm:$0xff]  }
 0x465   : > { %5282 = vmatpush1.bf16.msra.mxu1 %v10785_v45  ;;  %v10854_v45 = vld [vmem:[#allocation8 + $0x944] ss:$28 sps:$4 sm:$0xff]  }
 0x466   : > { %9670 = vmatpush3.bf16.msra.mxu0 %v10789_v47  ;;  %5283 = vmatprep.subr.bf16.mxu1 %v10792_v50  ;;  %v10857_v47 = vld [vmem:[#allocation9 + $0x44] ss:$16 sps:$4 sm:$0xff]   ;;  %v10852_v50 = vld [vmem:[#allocation8 + $0x940] ss:$28 sps:$4 sm:$0xff]  }
 0x467   : > { %9671 = vmatprep.subr.bf16.mxu0 %v10793_v53  ;;  %v10855_v53 = vld [vmem:[#allocation9 + $0x40] ss:$16 sps:$4 sm:$0xff]  }
 0x469   : > { %5284 = vmatpush1.bf16.msra.mxu1 %v10790_v54  ;;  %v10860_v54 = vld [vmem:[#allocation8 + $0x97c] ss:$28 sps:$4 sm:$0xff]  }
 0x46a   : > { %9672 = vmatpush3.bf16.msra.mxu0 %v10794_v49  ;;  %5285 = vmatprep.subr.bf16.mxu1 %v10797_v56  ;;  %v10863_v49 = vld [vmem:[#allocation9 + $0x64] ss:$16 sps:$4 sm:$0xff]  }
 0x46b   : > { %9673 = vmatprep.subr.bf16.mxu0 %v10798_v57  ;;  %v10858_v56 = vld [vmem:[#allocation8 + $0x978] ss:$28 sps:$4 sm:$0xff]   ;;  %v10861_v57 = vld [vmem:[#allocation9 + $0x60] ss:$16 sps:$4 sm:$0xff]  }
 0x46d   : > { %5286 = vmatpush1.bf16.msra.mxu1 %v10795_v60  ;;  %v10866_v60 = vld [vmem:[#allocation8 + $0x9b4] ss:$28 sps:$4 sm:$0xff]  }
 0x46e   : > { %9674 = vmatpush3.bf16.msra.mxu0 %v10799_v1  ;;  %5296 = vmatprep.subr.bf16.mxu1 %v10802_v5  ;;  %v10869_v1 = vld [vmem:[#allocation9 + $0x84] ss:$16 sps:$4 sm:$0xff]   ;;  %v10864_v5 = vld [vmem:[#allocation8 + $0x9b0] ss:$28 sps:$4 sm:$0xff]  }
 0x46f   : > { %9681 = vmatprep.subr.bf16.mxu0 %v10803_v61  ;;  %v10867_v61 = vld [vmem:[#allocation9 + $0x80] ss:$16 sps:$4 sm:$0xff]  }
 0x470   : > { %5288 = vmatmul.mubr.bf16.vlgmr.msra.gmra.mrb[8].mxu1 %v12753_v25  ;;  %v10814_v25 = vld [vmem:[#allocation8 + $0xe88] ss:$28 sps:$4 sm:$0xff]  }
 0x471   : > { %5572 = vmatmul.mubr.bf16.vlgmr.msra.gmra.mrb[32].mxu0 %v12797_v51  ;;  %5297 = vmatpush1.bf16.msra.mxu1 %v10800_v20  ;;  %v10872_v20 = vld [vmem:[#allocation8 + $0x9ec] ss:$28 sps:$4 sm:$0xff]  }
 0x472   : > { %5328 = vmatprep.mubr.bf16.mxu1 %v12755_v32  ;;  %9682 = vmatpush3.bf16.msra.mxu0 %v10804_v62  ;;  %v10819_v32 = vld [vmem:[#allocation8 + $0xec0] ss:$28 sps:$4 sm:$0xff]   ;;  %v10875_v62 = vld [vmem:[#allocation9 + $0xa4] ss:$16 sps:$4 sm:$0xff]  }
 0x473   : > { %5611 = vmatprep.mubr.bf16.mxu0 %v12799_v55  ;;  %5298 = vmatprep.subr.bf16.mxu1 %v10807_v63  ;;  %v10870_v63 = vld [vmem:[#allocation8 + $0x9e8] ss:$28 sps:$4 sm:$0xff]  }
 0x474   : > { %9683 = vmatprep.subr.bf16.mxu0 %v10808_v0  ;;  %v10873_v0 = vld [vmem:[#allocation9 + $0xa0] ss:$16 sps:$4 sm:$0xff]  }
 0x475   : > { %5299 = vmatpush1.bf16.msra.mxu1 %v10805_v3  ;;  %v10878_v3 = vld [vmem:[#allocation8 + $0xa24] ss:$28 sps:$4 sm:$0xff]  }
 0x476   : > { %9684 = vmatpush3.bf16.msra.mxu0 %v10809_v4  ;;  %5300 = vmatprep.subr.bf16.mxu1 %v10812_v14  ;;  %v10881_v4 = vld [vmem:[#allocation9 + $0xc4] ss:$16 sps:$4 sm:$0xff]   ;;  %v10876_v14 = vld [vmem:[#allocation8 + $0xa20] ss:$28 sps:$4 sm:$0xff]  }
 0x477   : > { %9685 = vmatprep.subr.bf16.mxu0 %v10813_v8  ;;  %v10879_v8 = vld [vmem:[#allocation9 + $0xc0] ss:$16 sps:$4 sm:$0xff]  }
 0x479   : > { %5301 = vmatpush1.bf16.msra.mxu1 %v10810_v9  ;;  %v10884_v9 = vld [vmem:[#allocation8 + $0xa5c] ss:$28 sps:$4 sm:$0xff]  }
 0x47a   : > { %9686 = vmatpush3.bf16.msra.mxu0 %v10814_v25  ;;  %5302 = vmatprep.subr.bf16.mxu1 %v10817_v11  ;;  %v10887_v25 = vld [vmem:[#allocation9 + $0xe4] ss:$16 sps:$4 sm:$0xff]  }
 0x47b   : > { %9687 = vmatprep.subr.bf16.mxu0 %v10818_v13  ;;  %v10882_v11 = vld [vmem:[#allocation8 + $0xa58] ss:$28 sps:$4 sm:$0xff]   ;;  %v10885_v13 = vld [vmem:[#allocation9 + $0xe0] ss:$16 sps:$4 sm:$0xff]  }
 0x47d   : > { %5303 = vmatpush1.bf16.msra.mxu1 %v10815_v42  ;;  %v10890_v42 = vld [vmem:[#allocation8 + $0xa94] ss:$28 sps:$4 sm:$0xff]  }
 0x47e   : > { %9688 = vmatpush3.bf16.msra.mxu0 %v10819_v32  ;;  %5304 = vmatprep.subr.bf16.mxu1 %v10822_v28  ;;  %v10893_v32 = vld [vmem:[#allocation9 + $0x104] ss:$16 sps:$4 sm:$0xff]   ;;  %v10888_v28 = vld [vmem:[#allocation8 + $0xa90] ss:$28 sps:$4 sm:$0xff]  }
 0x47f   : > { %9689 = vmatprep.subr.bf16.mxu0 %v10823_v15  ;;  %v10891_v15 = vld [vmem:[#allocation9 + $0x100] ss:$16 sps:$4 sm:$0xff]  }
 0x481   : > { %5305 = vmatpush1.bf16.msra.mxu1 %v10820_v16  ;;  %v10896_v16 = vld [vmem:[#allocation8 + $0xacc] ss:$28 sps:$4 sm:$0xff]  }
 0x482   : > { %9690 = vmatpush3.bf16.msra.mxu0 %v10824_v18  ;;  %5306 = vmatprep.subr.bf16.mxu1 %v10827_v19  ;;  %v10899_v18 = vld [vmem:[#allocation9 + $0x124] ss:$16 sps:$4 sm:$0xff]  }
 0x483   : > { %9691 = vmatprep.subr.bf16.mxu0 %v10828_v52  ;;  %v10894_v19 = vld [vmem:[#allocation8 + $0xac8] ss:$28 sps:$4 sm:$0xff]   ;;  %v10897_v52 = vld [vmem:[#allocation9 + $0x120] ss:$16 sps:$4 sm:$0xff]  }
 0x485   : > { %5307 = vmatpush1.bf16.msra.mxu1 %v10825_v34  ;;  %v10902_v34 = vld [vmem:[#allocation8 + $0xb04] ss:$28 sps:$4 sm:$0xff]  }
 0x486   : > { %9692 = vmatpush3.bf16.msra.mxu0 %v10829_v21  ;;  %5308 = vmatprep.subr.bf16.mxu1 %v10832_v22  ;;  %v10905_v21 = vld [vmem:[#allocation9 + $0x144] ss:$16 sps:$4 sm:$0xff]   ;;  %v10900_v22 = vld [vmem:[#allocation8 + $0xb00] ss:$28 sps:$4 sm:$0xff]  }
 0x487   : > { %9693 = vmatprep.subr.bf16.mxu0 %v10833_v24  ;;  %v10903_v24 = vld [vmem:[#allocation9 + $0x140] ss:$16 sps:$4 sm:$0xff]  }
 0x489   : > { %5309 = vmatpush1.bf16.msra.mxu1 %v10830_v26  ;;  %v10908_v26 = vld [vmem:[#allocation8 + $0xb3c] ss:$28 sps:$4 sm:$0xff]  }
 0x48a   : > { %9694 = vmatpush3.bf16.msra.mxu0 %v10834_v31  ;;  %5310 = vmatprep.subr.bf16.mxu1 %v10837_v37  ;;  %v10911_v31 = vld [vmem:[#allocation9 + $0x164] ss:$16 sps:$4 sm:$0xff]  }
 0x48b   : > { %9695 = vmatprep.subr.bf16.mxu0 %v10838_v33  ;;  %v10914_v37 = vld [vmem:[#allocation8 + $0xb74] ss:$28 sps:$4 sm:$0xff]  }
 0x48c   : > { %v10917_v33 = vld [vmem:[#allocation9 + $0x184] ss:$16 sps:$4 sm:$0xff]  }
 0x48d   : > { %5311 = vmatpush1.bf16.msra.mxu1 %v10835_v36  ;;  %v10912_v36 = vld [vmem:[#allocation8 + $0xb70] ss:$28 sps:$4 sm:$0xff]  }
 0x48e   : > { %9696 = vmatpush3.bf16.msra.mxu0 %v10839_v38  ;;  %5312 = vmatprep.subr.bf16.mxu1 %v10842_v39  ;;  %v12830_v38 = vld [vmem:[#allocation20] sm:$0xff] }
 0x48f   : > { %7015 = vmatprep.subr.bf16.mxu0 %v10845_v40  ;;  %v10915_v39 = vld [vmem:[#allocation9 + $0x180] ss:$16 sps:$4 sm:$0xff]   ;;  %v10920_v40 = vld [vmem:[#allocation8 + $0xbac] ss:$28 sps:$4 sm:$0xff]  }
 0x491   : > { %5612 = vmatmul.mubr.bf16.vlgmr.msra.gmra.mrb[36].mxu0 %v12809_v6  ;;  %5313 = vmatpush1.bf16.msra.mxu1 %v10840_v48  ;;  %v10923_v48 = vld [vmem:[#allocation9 + $0x1a4] ss:$16 sps:$4 sm:$0xff]  }
 0x492   : > { %7016 = vmatpush1.bf16.msra.mxu0 %v10843_v17  ;;  %5314 = vmatprep.subr.bf16.mxu1 %v10848_v46  ;;  %v1892_v17 = vrot.slane %v12830_v38, %v12699_v29  ;;  %v1896_v46 = vrot.slane %v12830_v38, %v12702_v30 }
 0x493   : > { %7017 = vmatprep.subr.bf16.mxu0 %v10851_v41  ;;  %v1904_v41 = vrot.slane %v12830_v38, %v12711_v35 }
 0x495   : > { %5315 = vmatpush1.bf16.msra.mxu1 %v10846_v43  ;;  %v10918_v43 = vld [vmem:[#allocation8 + $0xba8] ss:$28 sps:$4 sm:$0xff]  }
 0x496   : > { %7018 = vmatpush1.bf16.msra.mxu0 %v10849_v44  ;;  %5316 = vmatprep.subr.bf16.mxu1 %v10854_v45  ;;  %v10921_v44 = vld [vmem:[#allocation9 + $0x1a0] ss:$16 sps:$4 sm:$0xff]  }
 0x497   : > { %7019 = vmatprep.subr.bf16.mxu0 %v10857_v47  ;;  %v10926_v45 = vld [vmem:[#allocation8 + $0xbe4] ss:$28 sps:$4 sm:$0xff]  }
 0x499   : > { %5317 = vmatpush1.bf16.msra.mxu1 %v10852_v50 }
 0x49a   : > { %7020 = vmatpush1.bf16.msra.mxu0 %v10855_v53  ;;  %5318 = vmatprep.subr.bf16.mxu1 %v10860_v54  ;;  %v10929_v53 = vld [vmem:[#allocation9 + $0x1c4] ss:$16 sps:$4 sm:$0xff]  }
 0x49b   : > { %7021 = vmatprep.subr.bf16.mxu0 %v10863_v49  ;;  %v12840_v49 = vstv %s9251_s2 }
 0x49d   : > { %5319 = vmatpush1.bf16.msra.mxu1 %v10858_v56 }
 0x49e   : > { %7022 = vmatpush1.bf16.msra.mxu0 %v10861_v57  ;;  %5320 = vmatprep.subr.bf16.mxu1 %v10866_v60 }
 0x49f   : > { %7023 = vmatprep.subr.bf16.mxu0 %v10869_v1 }
 0x4a1   : > { %5321 = vmatpush1.bf16.msra.mxu1 %v10864_v5 }
 0x4a2   : > { %7024 = vmatpush1.bf16.msra.mxu0 %v10867_v61  ;;  %5322 = vmatprep.subr.bf16.mxu1 %v10872_v20  ;;  %v10924_v20 = vld [vmem:[#allocation8 + $0xbe0] ss:$28 sps:$4 sm:$0xff]  }
 0x4a3   : > { %7025 = vmatprep.subr.bf16.mxu0 %v10875_v62 }
 0x4a5   : > { %5323 = vmatpush1.bf16.msra.mxu1 %v10870_v63 }
 0x4a6   : > { %7026 = vmatpush1.bf16.msra.mxu0 %v10873_v0  ;;  %5324 = vmatprep.subr.bf16.mxu1 %v10878_v3  ;;  %v10927_v0 = vld [vmem:[#allocation9 + $0x1c0] ss:$16 sps:$4 sm:$0xff]   ;;  %v10932_v3 = vld [vmem:[#allocation8 + $0xc1c] ss:$28 sps:$4 sm:$0xff]  }
 0x4a7   : > { %7027 = vmatprep.subr.bf16.mxu0 %v10881_v4 }
 0x4a9   : > { %5325 = vmatpush1.bf16.msra.mxu1 %v10876_v14  ;;  %v10935_v14 = vld [vmem:[#allocation9 + $0x1e4] ss:$16 sps:$4 sm:$0xff]  }
 0x4aa   : > { %7028 = vmatpush1.bf16.msra.mxu0 %v10879_v8  ;;  %5326 = vmatprep.subr.bf16.mxu1 %v10884_v9 }
 0x4ab   : > { %7029 = vmatprep.subr.bf16.mxu0 %v10887_v25  ;;  %v10930_v25 = vld [vmem:[#allocation8 + $0xc18] ss:$28 sps:$4 sm:$0xff]  }
 0x4ad   : > { %5327 = vmatpush1.bf16.msra.mxu1 %v10882_v11 }
 0x4ae   : > { %7030 = vmatpush1.bf16.msra.mxu0 %v10885_v13  ;;  %5337 = vmatprep.subr.bf16.mxu1 %v10890_v42  ;;  %v10933_v13 = vld [vmem:[#allocation9 + $0x1e0] ss:$16 sps:$4 sm:$0xff]  }
 0x4af   : > { %7031 = vmatprep.subr.bf16.mxu0 %v10893_v32  ;;  %v10938_v32 = vld [vmem:[#allocation8 + $0xc54] ss:$28 sps:$4 sm:$0xff]  }
 0x4b0   : > { %5329 = vmatmul.mubr.bf16.vlgmr.msra.gmra.mrb[8].mxu1 %v12777_v7  ;;  %v10906_v7 = vld [vmem:[#allocation8 + $0xb38] ss:$28 sps:$4 sm:$0xff]  }
 0x4b1   : > { %5338 = vmatpush1.bf16.msra.mxu1 %v10888_v28  ;;  %5369 = vmatprep.mubr.bf16.mxu1 %v12779_v12  ;;  %v10909_v12 = vld [vmem:[#allocation9 + $0x160] ss:$16 sps:$4 sm:$0xff]   ;;  %v10941_v28 = vld [vmem:[#allocation9 + $0x204] ss:$16 sps:$4 sm:$0xff]  }
 0x4b2   : > { %7032 = vmatpush1.bf16.msra.mxu0 %v10891_v15  ;;  %5339 = vmatprep.subr.bf16.mxu1 %v10896_v16  ;;  %v10936_v16 = vld [vmem:[#allocation8 + $0xc50] ss:$28 sps:$4 sm:$0xff]  }
 0x4b3   : > { %7033 = vmatprep.subr.bf16.mxu0 %v10899_v18 }
 0x4b5   : > { %5340 = vmatpush1.bf16.msra.mxu1 %v10894_v19  ;;  %v10939_v19 = vld [vmem:[#allocation9 + $0x200] ss:$16 sps:$4 sm:$0xff]  }
 0x4b6   : > { %7034 = vmatpush1.bf16.msra.mxu0 %v10897_v52  ;;  %5341 = vmatprep.subr.bf16.mxu1 %v10902_v34  ;;  %v10944_v34 = vld [vmem:[#allocation8 + $0xc8c] ss:$28 sps:$4 sm:$0xff]  }
 0x4b7   : > { %7035 = vmatprep.subr.bf16.mxu0 %v10905_v21  ;;  %v10947_v21 = vld [vmem:[#allocation9 + $0x224] ss:$16 sps:$4 sm:$0xff]  }
 0x4b9   : > { %5342 = vmatpush1.bf16.msra.mxu1 %v10900_v22 }
 0x4ba   : > { %7036 = vmatpush1.bf16.msra.mxu0 %v10903_v24  ;;  %5343 = vmatprep.subr.bf16.mxu1 %v10908_v26  ;;  %v10942_v24 = vld [vmem:[#allocation8 + $0xc88] ss:$28 sps:$4 sm:$0xff]   ;;  %v10945_v26 = vld [vmem:[#allocation9 + $0x220] ss:$16 sps:$4 sm:$0xff]  }
 0x4bb   : > { %7037 = vmatprep.subr.bf16.mxu0 %v10911_v31  ;;  %v10950_v31 = vld [vmem:[#allocation8 + $0xcc4] ss:$28 sps:$4 sm:$0xff]  }
 0x4bd   : > { %5344 = vmatpush1.bf16.msra.mxu1 %v10906_v7  ;;  %v10953_v7 = vld [vmem:[#allocation9 + $0x244] ss:$16 sps:$4 sm:$0xff]  }
 0x4be   : > { %7038 = vmatpush1.bf16.msra.mxu0 %v10909_v12  ;;  %5345 = vmatprep.subr.bf16.mxu1 %v10914_v37  ;;  %v10948_v12 = vld [vmem:[#allocation8 + $0xcc0] ss:$28 sps:$4 sm:$0xff]  }
 0x4bf   : > { %7039 = vmatprep.subr.bf16.mxu0 %v10917_v33  ;;  %v10951_v37 = vld [vmem:[#allocation9 + $0x240] ss:$16 sps:$4 sm:$0xff]   ;;  %v10956_v33 = vld [vmem:[#allocation8 + $0xcfc] ss:$28 sps:$4 sm:$0xff]  }
 0x4c1   : > { %5346 = vmatpush1.bf16.msra.mxu1 %v10912_v36  ;;  %v10959_v36 = vld [vmem:[#allocation9 + $0x264] ss:$16 sps:$4 sm:$0xff]  }
 0x4c2   : > { %7040 = vmatpush1.bf16.msra.mxu0 %v10915_v39  ;;  %5347 = vmatprep.subr.bf16.mxu1 %v10920_v40  ;;  %v10954_v39 = vld [vmem:[#allocation8 + $0xcf8] ss:$28 sps:$4 sm:$0xff]   ;;  %v10957_v40 = vld [vmem:[#allocation9 + $0x260] ss:$16 sps:$4 sm:$0xff]  }
 0x4c3   : > { %v5002_v47 = vpop.f32.mrb[4].mxu1  ;;  %v12838_v50 = vpop.f32.mrb[16].mxu0  ;;  %7041 = vmatprep.subr.bf16.mxu0 %v10923_v48  ;;  %v10962_v48 = vld [vmem:[#allocation8 + $0xd34] ss:$28 sps:$4 sm:$0xff]  }
 0x4c4   : > { %v9812_v54 = vadd.f32 %v5002_v47, %v1892_v17  ;;  %v5004_v56 = vpop.f32.mrb[5].mxu1  ;;  %v5209_v57 = vpop.f32.mrb[17].mxu0  ;;  %v10965_v17 = vld [vmem:[#allocation9 + $0x284] ss:$16 sps:$4 sm:$0xff]   ;;  %v10969_v47 = vld [vmem:[#allocation9 + $0x2a0] ss:$16 sps:$4 sm:$0xff]  }
 0x4c5   : > { %v9813_v60 = vadd.f32 %v5004_v56, %v1896_v46  ;;  %v9815_v1 = vadd.f32 %v5209_v57, %v1904_v41  ;;  %v5006_v5 = vpop.f32.mrb[6].mxu1  ;;  %v5211_v61 = vpop.f32.mrb[18].mxu0  ;;  %5348 = vmatpush1.bf16.msra.mxu1 %v10918_v43  ;;  %v10960_v46 = vld [vmem:[#allocation8 + $0xd30] ss:$28 sps:$4 sm:$0xff]  }
 0x4c6   : > { %7042 = vmatpush1.bf16.msra.mxu0 %v10921_v44  ;;  %v5007_v62 = vpop.f32.mrb[7].mxu1  ;;  %v5212_v63 = vpop.f32.mrb[19].mxu0  ;;  %5349 = vmatprep.subr.bf16.mxu1 %v10926_v45  ;;  %v5628_v8 = vmul.f32 %v9812_v54, %v12840_v49  ;;  %vm5620_vm12 = vcmp.ge.f32.partialorder %v9812_v54, 0.0  ;;  %v10963_v41 = vld [vmem:[#allocation9 + $0x280] ss:$16 sps:$4 sm:$0xff]  }
 0x4c7   : > { %vm5621_vm11 = vcmp.ge.f32.partialorder %v9813_v60, 0.0  ;;  %v5629_v4 = vmul.f32 %v9813_v60, %v12840_v49  ;;  %7043 = vmatprep.subr.bf16.mxu0 %v10929_v53  ;;  %v5631_v9 = vmul.f32 %v9815_v1, %v12840_v49  ;;  %vm5623_vm13 = vcmp.ge.f32.partialorder %v9815_v1, 0.0  ;;  %v10968_v43 = vld [vmem:[#allocation8 + $0xd6c] ss:$28 sps:$4 sm:$0xff]   ;;  %v10971_v44 = vld [vmem:[#allocation9 + $0x2a4] ss:$16 sps:$4 sm:$0xff]  }
 0x4c8   : > { %v5635_v15 = vsel %vm5620_vm12, %v9812_v54, %v5628_v8  ;;  %v10966_v45 = vld [vmem:[#allocation8 + $0xd68] ss:$28 sps:$4 sm:$0xff]   ;;  %v10975_v61 = vld [vmem:[#allocation9 + $0x2c0] ss:$16 sps:$4 sm:$0xff]  }
 0x4c9   : > { %5350 = vmatpush1.bf16.msra.mxu1 %v10924_v20  ;;  %v5636_v11 = vsel %vm5621_vm11, %v9813_v60, %v5629_v4  ;;  %v5638_v18 = vsel %vm5623_vm13, %v9815_v1, %v5631_v9  ;;  %v12848_v52 = vpack.c.bf16 %v5635_v15, %v5635_v15  ;;  %v10974_v53 = vld [vmem:[#allocation8 + $0xda4] ss:$28 sps:$4 sm:$0xff]   ;;  %v10980_v20 = vld [vmem:[#allocation8 + $0xddc] ss:$28 sps:$4 sm:$0xff]   ;;  %v10986_v4 = vld [vmem:[#allocation8 + $0xe14] ss:$28 sps:$4 sm:$0xff]  }
 0x4ca   : > { %7044 = vmatpush1.bf16.msra.mxu0 %v10927_v0  ;;  %5351 = vmatprep.subr.bf16.mxu1 %v10932_v3  ;;  %v12845_v42 = vpack.c.bf16 %v5636_v11, %v5636_v11  ;;  %v12850_v22 = vpack.c.bf16 %v5638_v18, %v5638_v18  ;;  %v10977_v54 = vld [vmem:[#allocation9 + $0x2c4] ss:$16 sps:$4 sm:$0xff]   ;;  %v10972_v60 = vld [vmem:[#allocation8 + $0xda0] ss:$28 sps:$4 sm:$0xff]   ;;  %v10984_v8 = vld [vmem:[#allocation8 + $0xe10] ss:$28 sps:$4 sm:$0xff]  }
 0x4cb   : > { %7045 = vmatprep.subr.bf16.mxu0 %v10935_v14  ;;  %v10983_v63 = vld [vmem:[#allocation9 + $0x2e4] ss:$16 sps:$4 sm:$0xff]   ;;  %v10981_v3 = vld [vmem:[#allocation9 + $0x2e0] ss:$16 sps:$4 sm:$0xff]  }
 0x4cc   : > { %7047 = vmatprep.mubr.bf16.mxu0 %v12845_v42  ;;  %v10978_v0 = vld [vmem:[#allocation8 + $0xdd8] ss:$28 sps:$4 sm:$0xff]   ;;  %v10987_v9 = vld [vmem:[#allocation9 + $0x300] ss:$16 sps:$4 sm:$0xff]  }
 0x4cd   : > { %5352 = vmatpush1.bf16.msra.mxu1 %v10930_v25  ;;  %v10989_v14 = vld [vmem:[#allocation9 + $0x304] ss:$16 sps:$4 sm:$0xff]   ;;  %v10992_v25 = vld [vmem:[#allocation8 + $0xe4c] ss:$28 sps:$4 sm:$0xff]   ;;  %v10999_v18 = vld [vmem:[#allocation9 + $0x340] ss:$16 sps:$4 sm:$0xff]  }
 0x4ce   : > { %7046 = vmatpush1.bf16.msra.mxu0 %v10933_v13  ;;  %5353 = vmatprep.subr.bf16.mxu1 %v10938_v32  ;;  %v10995_v11 = vld [vmem:[#allocation9 + $0x324] ss:$16 sps:$4 sm:$0xff]   ;;  %v10993_v32 = vld [vmem:[#allocation9 + $0x320] ss:$16 sps:$4 sm:$0xff]  }
 0x4cf   : > { %7056 = vmatprep.subr.bf16.mxu0 %v10941_v28  ;;  %v10990_v13 = vld [vmem:[#allocation8 + $0xe48] ss:$28 sps:$4 sm:$0xff]  }
 0x4d0   : > { %v10998_v28 = vld [vmem:[#allocation8 + $0xe84] ss:$28 sps:$4 sm:$0xff]  }
 0x4d1   : > { %7048 = vmatmul.mubr.bf16.vlgmr.msra.gmra.mrb[40].mxu0 %v12848_v52  ;;  %5354 = vmatpush1.bf16.msra.mxu1 %v10936_v16  ;;  %v11001_v15 = vld [vmem:[#allocation9 + $0x344] ss:$16 sps:$4 sm:$0xff]   ;;  %v10996_v16 = vld [vmem:[#allocation8 + $0xe80] ss:$28 sps:$4 sm:$0xff]  }
 0x4d2   : > { %7057 = vmatpush1.bf16.msra.mxu0 %v10939_v19  ;;  %7088 = vmatprep.mubr.bf16.mxu0 %v12850_v22  ;;  %v11004_v19 = vld [vmem:[#allocation8 + $0xebc] ss:$28 sps:$4 sm:$0xff]  }
 0x4d3   : > { %5355 = vmatprep.subr.bf16.mxu1 %v10944_v34  ;;  %7058 = vmatprep.subr.bf16.mxu0 %v10947_v21  ;;  %v11007_v34 = vld [vmem:[#allocation9 + $0x364] ss:$16 sps:$4 sm:$0xff]  }
 0x4d4   : > { %v11010_v21 = vld [vmem:[#allocation8 + $0xef4] ss:$28 sps:$4 sm:$0xff]  }
 0x4d5   : > { %5356 = vmatpush1.bf16.msra.mxu1 %v10942_v24  ;;  %v11013_v24 = vld [vmem:[#allocation9 + $0x384] ss:$16 sps:$4 sm:$0xff]  }
 0x4d6   : > { %7059 = vmatpush1.bf16.msra.mxu0 %v10945_v26  ;;  %5357 = vmatprep.subr.bf16.mxu1 %v10950_v31  ;;  %v11008_v26 = vld [vmem:[#allocation8 + $0xef0] ss:$28 sps:$4 sm:$0xff]  }
 0x4d7   : > { %7060 = vmatprep.subr.bf16.mxu0 %v10953_v7  ;;  %v11011_v31 = vld [vmem:[#allocation9 + $0x380] ss:$16 sps:$4 sm:$0xff]   ;;  %v11016_v7 = vld [vmem:[#allocation8 + $0xf2c] ss:$28 sps:$4 sm:$0xff]  }
 0x4d9   : > { %5358 = vmatpush1.bf16.msra.mxu1 %v10948_v12  ;;  %v11019_v12 = vld [vmem:[#allocation9 + $0x3a4] ss:$16 sps:$4 sm:$0xff]  }
 0x4da   : > { %7061 = vmatpush1.bf16.msra.mxu0 %v10951_v37  ;;  %5359 = vmatprep.subr.bf16.mxu1 %v10956_v33  ;;  %v1900_v37 = vrot.slane %v12830_v38, %v12741_v58  ;;  %v11014_v33 = vld [vmem:[#allocation8 + $0xf28] ss:$28 sps:$4 sm:$0xff]  }
 0x4db   : > { %7062 = vmatprep.subr.bf16.mxu0 %v10959_v36  ;;  %v1916_v36 = vrot.slane %v12830_v38, %v872_v10  ;;  %v11028_v10 = vld [vmem:[#allocation8 + $0xf9c] ss:$28 sps:$4 sm:$0xff]  }
 0x4dd   : > { %5360 = vmatpush1.bf16.msra.mxu1 %v10954_v39  ;;  %v11017_v39 = vld [vmem:[#allocation9 + $0x3a0] ss:$16 sps:$4 sm:$0xff]  }
 0x4de   : > { %7063 = vmatpush1.bf16.msra.mxu0 %v10957_v40  ;;  %5361 = vmatprep.subr.bf16.mxu1 %v10962_v48  ;;  %v11022_v40 = vld [vmem:[#allocation8 + $0xf64] ss:$28 sps:$4 sm:$0xff]  }
 0x4df   : > { %7064 = vmatprep.subr.bf16.mxu0 %v10965_v17  ;;  %v11025_v48 = vld [vmem:[#allocation9 + $0x3c4] ss:$16 sps:$4 sm:$0xff]   ;;  %v9814_v17 = vadd.f32 %v12838_v50, %v1900_v37 }
 0x4e0   : > { %v11026_v50 = vld [vmem:[#allocation8 + $0xf98] ss:$28 sps:$4 sm:$0xff]  }
 0x4e1   : > { %5362 = vmatpush1.bf16.msra.mxu1 %v10960_v46  ;;  %vm5622_vm14 = vcmp.ge.f32.partialorder %v9814_v17, 0.0  ;;  %v11160_v37 = vld [vmem:[#allocation9 + $0x424] ss:$16 sps:$4 sm:$0xff]  }
 0x4e2   : > { %7065 = vmatpush1.bf16.msra.mxu0 %v10963_v41  ;;  %5363 = vmatprep.subr.bf16.mxu1 %v10968_v43  ;;  %v11020_v43 = vld [vmem:[#allocation8 + $0xf60] ss:$28 sps:$4 sm:$0xff]  }
 0x4e3   : > { %7066 = vmatprep.subr.bf16.mxu0 %v10971_v44 }
 0x4e4   : > { %v9609_v56 = vpop.f32.mrb[20].mxu0 }
 0x4e5   : > { %v9610_v57 = vpop.f32.mrb[21].mxu0  ;;  %5364 = vmatpush1.bf16.msra.mxu1 %v10966_v45 }
 0x4e6   : > { %v12854_v1 = vadd.f32 %v9610_v57, %v9609_v56  ;;  %v9612_v5 = vpop.f32.mrb[22].mxu0  ;;  %7067 = vmatpush1.bf16.msra.mxu0 %v10969_v47  ;;  %5365 = vmatprep.subr.bf16.mxu1 %v10974_v53  ;;  %v11023_v53 = vld [vmem:[#allocation9 + $0x3c0] ss:$16 sps:$4 sm:$0xff]   ;;  %v5630_v56 = vmul.f32 %v9814_v17, %v12840_v49 }
 0x4e7   : > { %v9613_v62 = vpop.f32.mrb[23].mxu0  ;;  %7068 = vmatprep.subr.bf16.mxu0 %v10977_v54  ;;  %v11031_v54 = vld [vmem:[#allocation9 + $0x3e4] ss:$16 sps:$4 sm:$0xff]  }
 0x4e8   : > { %v5454_v44 = vadd.f32 %v12854_v1, %v1916_v36  ;;  %v11034_v5 = vld [vmem:[#allocation8 + $0xfd4] ss:$28 sps:$4 sm:$0xff]   ;;  %v5637_v1 = vsel %vm5622_vm14, %v9814_v17, %v5630_v56  ;;  %v11065_v17 = vld [vmem:[#allocation9 + $0x68] ss:$16 sps:$4 sm:$0xff]  }
 0x4e9   : > { %5366 = vmatpush1.bf16.msra.mxu1 %v10972_v60  ;;  %v11029_v60 = vld [vmem:[#allocation9 + $0x3e0] ss:$16 sps:$4 sm:$0xff]   ;;  %v12866_v62 = vpack.c.bf16 %v5637_v1, %v5637_v1 }
 0x4ea   : > { %7069 = vmatpush1.bf16.msra.mxu0 %v10975_v61  ;;  %5367 = vmatprep.subr.bf16.mxu1 %v10980_v20  ;;  %v11032_v61 = vld [vmem:[#allocation8 + $0xfd0] ss:$28 sps:$4 sm:$0xff]  }
 0x4eb   : > { %7070 = vmatprep.subr.bf16.mxu0 %v10983_v63  ;;  %v11037_v20 = vld [vmem:[#allocation8 + $0x100c] ss:$28 sps:$4 sm:$0xff]   ;;  %v11158_v36 = vld [vmem:[#allocation9 + $0x420] ss:$16 sps:$4 sm:$0xff]  }
 0x4ec   : > { %v11035_v63 = vld [vmem:[#allocation8 + $0x1008] ss:$28 sps:$4 sm:$0xff]  }
 0x4ed   : > { %5368 = vmatpush1.bf16.msra.mxu1 %v10978_v0  ;;  %v11040_v0 = vld [vmem:[#allocation8 + $0x1044] ss:$28 sps:$4 sm:$0xff]  }
 0x4ee   : > { %7071 = vmatpush1.bf16.msra.mxu0 %v10981_v3  ;;  %5378 = vmatprep.subr.bf16.mxu1 %v10986_v4  ;;  %v11038_v3 = vld [vmem:[#allocation8 + $0x1040] ss:$28 sps:$4 sm:$0xff]  }
 0x4ef   : > { %7072 = vmatprep.subr.bf16.mxu0 %v10989_v14  ;;  %v11043_v4 = vld [vmem:[#allocation8 + $0x107c] ss:$28 sps:$4 sm:$0xff]  }
 0x4f0   : > { %5370 = vmatmul.mubr.bf16.vlgmr.msra.gmra.mrb[8].mxu1 %v12797_v51  ;;  %v11002_v51 = vld [vmem:[#allocation8 + $0xeb8] ss:$28 sps:$4 sm:$0xff]  }
 0x4f1   : > { %5379 = vmatpush1.bf16.msra.mxu1 %v10984_v8  ;;  %5410 = vmatprep.mubr.bf16.mxu1 %v12799_v55  ;;  %v11005_v55 = vld [vmem:[#allocation9 + $0x360] ss:$16 sps:$4 sm:$0xff]   ;;  %v11041_v14 = vld [vmem:[#allocation8 + $0x1078] ss:$28 sps:$4 sm:$0xff]  }
 0x4f2   : > { %7073 = vmatpush1.bf16.msra.mxu0 %v10987_v9  ;;  %5380 = vmatprep.subr.bf16.mxu1 %v10992_v25  ;;  %v11046_v8 = vld [vmem:[#allocation8 + $0x10b4] ss:$28 sps:$4 sm:$0xff]   ;;  %v11049_v25 = vld [vmem:[#allocation8 + $0x10ec] ss:$28 sps:$4 sm:$0xff]  }
 0x4f3   : > { %7074 = vmatprep.subr.bf16.mxu0 %v10995_v11  ;;  %v11044_v9 = vld [vmem:[#allocation8 + $0x10b0] ss:$28 sps:$4 sm:$0xff]   ;;  %v11047_v11 = vld [vmem:[#allocation8 + $0x10e8] ss:$28 sps:$4 sm:$0xff]  }
 0x4f5   : > { %5381 = vmatpush1.bf16.msra.mxu1 %v10990_v13  ;;  %v11052_v13 = vld [vmem:[#allocation8 + $0x1124] ss:$28 sps:$4 sm:$0xff]  }
 0x4f6   : > { %7075 = vmatpush1.bf16.msra.mxu0 %v10993_v32  ;;  %5382 = vmatprep.subr.bf16.mxu1 %v10998_v28 }
 0x4f7   : > { %7076 = vmatprep.subr.bf16.mxu0 %v11001_v15  ;;  %v11050_v15 = vld [vmem:[#allocation8 + $0x1120] ss:$28 sps:$4 sm:$0xff]  }
 0x4f9   : > { %5383 = vmatpush1.bf16.msra.mxu1 %v10996_v16 }
 0x4fa   : > { %7077 = vmatpush1.bf16.msra.mxu0 %v10999_v18  ;;  %5384 = vmatprep.subr.bf16.mxu1 %v11004_v19  ;;  %v11055_v19 = vld [vmem:[#allocation8 + $0x115c] ss:$28 sps:$4 sm:$0xff]  }
 0x4fb   : > { %7078 = vmatprep.subr.bf16.mxu0 %v11007_v34 }
 0x4fd   : > { %5385 = vmatpush1.bf16.msra.mxu1 %v11002_v51 }
 0x4fe   : > { %7079 = vmatpush1.bf16.msra.mxu0 %v11005_v55  ;;  %5386 = vmatprep.subr.bf16.mxu1 %v11010_v21  ;;  %v11053_v55 = vld [vmem:[#allocation8 + $0x1158] ss:$28 sps:$4 sm:$0xff]   ;;  %v11058_v21 = vld [vmem:[#allocation9 + $0xc] ss:$16 sps:$4 sm:$0xff]  }
 0x4ff   : > { %7080 = vmatprep.subr.bf16.mxu0 %v11013_v24  ;;  %v11056_v24 = vld [vmem:[#allocation9 + $0x8] ss:$16 sps:$4 sm:$0xff]  }
 0x501   : > { %5387 = vmatpush1.bf16.msra.mxu1 %v11008_v26  ;;  %v11061_v26 = vld [vmem:[#allocation9 + $0x2c] ss:$16 sps:$4 sm:$0xff]  }
 0x502   : > { %7081 = vmatpush1.bf16.msra.mxu0 %v11011_v31  ;;  %5388 = vmatprep.subr.bf16.mxu1 %v11016_v7  ;;  %v11152_v31 = vld [vmem:[#allocation9 + $0x400] ss:$16 sps:$4 sm:$0xff]   ;;  %v11154_v7 = vld [vmem:[#allocation9 + $0x404] ss:$16 sps:$4 sm:$0xff]  }
 0x503   : > { %7082 = vmatprep.subr.bf16.mxu0 %v11019_v12  ;;  %v11059_v12 = vld [vmem:[#allocation9 + $0x28] ss:$16 sps:$4 sm:$0xff]  }
 0x504   : > { %v9631_v46 = vpop.f32.mrb[24].mxu0 }
 0x505   : > { %v9632_v41 = vpop.f32.mrb[25].mxu0  ;;  %5389 = vmatpush1.bf16.msra.mxu1 %v11014_v33  ;;  %v11064_v33 = vld [vmem:[#allocation9 + $0x4c] ss:$16 sps:$4 sm:$0xff]  }
 0x506   : > { %v9633_v45 = vadd.f32 %v9632_v41, %v9631_v46  ;;  %v9634_v47 = vpop.f32.mrb[26].mxu0  ;;  %7083 = vmatpush1.bf16.msra.mxu0 %v11017_v39  ;;  %5390 = vmatprep.subr.bf16.mxu1 %v11022_v40  ;;  %v11062_v39 = vld [vmem:[#allocation9 + $0x48] ss:$16 sps:$4 sm:$0xff]   ;;  %v11166_v40 = vld [vmem:[#allocation9 + $0x444] ss:$16 sps:$4 sm:$0xff]  }
 0x507   : > { %v9635_v38 = vpop.f32.mrb[27].mxu0  ;;  %7084 = vmatprep.subr.bf16.mxu0 %v11025_v48  ;;  %v11067_v48 = vld [vmem:[#allocation9 + $0x6c] ss:$16 sps:$4 sm:$0xff]   ;;  %v11172_v46 = vld [vmem:[#allocation9 + $0x464] ss:$16 sps:$4 sm:$0xff]  }
 0x508   : > { %v5494_v57 = vadd.f32 %v9633_v45, %v5454_v44  ;;  %v11170_v41 = vld [vmem:[#allocation9 + $0x460] ss:$16 sps:$4 sm:$0xff]   ;;  %v11178_v44 = vld [vmem:[#allocation9 + $0x484] ss:$16 sps:$4 sm:$0xff]   ;;  %v11073_v45 = vld [vmem:[#allocation9 + $0xac] ss:$16 sps:$4 sm:$0xff]  }
 0x509   : > { %5391 = vmatpush1.bf16.msra.mxu1 %v11020_v43  ;;  %v11068_v43 = vld [vmem:[#allocation9 + $0x88] ss:$16 sps:$4 sm:$0xff]   ;;  %v11176_v47 = vld [vmem:[#allocation9 + $0x480] ss:$16 sps:$4 sm:$0xff]   ;;  %v11076_v38 = vld [vmem:[#allocation9 + $0xcc] ss:$16 sps:$4 sm:$0xff]  }
 0x50a   : > { %7085 = vmatpush1.bf16.msra.mxu0 %v11023_v53  ;;  %5392 = vmatprep.subr.bf16.mxu1 %v11028_v10  ;;  %v11071_v53 = vld [vmem:[#allocation9 + $0xa8] ss:$16 sps:$4 sm:$0xff]   ;;  %v11184_v10 = vld [vmem:[#allocation9 + $0x4a4] ss:$16 sps:$4 sm:$0xff]  }
 0x50b   : > { %7086 = vmatprep.subr.bf16.mxu0 %v11031_v54  ;;  %v11182_v54 = vld [vmem:[#allocation9 + $0x4a0] ss:$16 sps:$4 sm:$0xff]  }
 0x50d   : > { %5393 = vmatpush1.bf16.msra.mxu1 %v11026_v50  ;;  %v11074_v50 = vld [vmem:[#allocation9 + $0xc8] ss:$16 sps:$4 sm:$0xff]  }
 0x50e   : > { %7087 = vmatpush1.bf16.msra.mxu0 %v11029_v60  ;;  %5394 = vmatprep.subr.bf16.mxu1 %v11034_v5  ;;  %v11190_v60 = vld [vmem:[#allocation9 + $0x4c4] ss:$16 sps:$4 sm:$0xff]  }
 0x50f   : > { %7097 = vmatprep.subr.bf16.mxu0 %v11154_v7  ;;  %v11226_v7 = vld [vmem:[#allocation9 + $0x584] ss:$16 sps:$4 sm:$0xff]  }
 0x511   : > { %7089 = vmatmul.mubr.bf16.vlgmr.msra.gmra.mrb[40].mxu0 %v12866_v62  ;;  %5395 = vmatpush1.bf16.msra.mxu1 %v11032_v61  ;;  %v11079_v61 = vld [vmem:[#allocation9 + $0xec] ss:$16 sps:$4 sm:$0xff]  }
 0x512   : > { %5396 = vmatprep.subr.bf16.mxu1 %v11037_v20  ;;  %7098 = vmatpush1.bf16.msra.mxu0 %v11152_v31  ;;  %v11092_v31 = vld [vmem:[#allocation9 + $0x188] ss:$16 sps:$4 sm:$0xff]  }
 0x513   : > { %7099 = vmatprep.subr.bf16.mxu0 %v11160_v37  ;;  %v11224_v37 = vld [vmem:[#allocation9 + $0x580] ss:$16 sps:$4 sm:$0xff]  }
 0x515   : > { %5397 = vmatpush1.bf16.msra.mxu1 %v11035_v63  ;;  %v11188_v63 = vld [vmem:[#allocation9 + $0x4c0] ss:$16 sps:$4 sm:$0xff]  }
 0x516   : > { %5398 = vmatprep.subr.bf16.mxu1 %v11040_v0  ;;  %7100 = vmatpush1.bf16.msra.mxu0 %v11158_v36  ;;  %v11232_v36 = vld [vmem:[#allocation9 + $0x5a4] ss:$16 sps:$4 sm:$0xff]  }
 0x517   : > { %7101 = vmatprep.subr.bf16.mxu0 %v11166_v40  ;;  %v11230_v40 = vld [vmem:[#allocation9 + $0x5a0] ss:$16 sps:$4 sm:$0xff]  }
 0x519   : > { %5399 = vmatpush1.bf16.msra.mxu1 %v11038_v3  ;;  %v11077_v3 = vld [vmem:[#allocation9 + $0xe8] ss:$16 sps:$4 sm:$0xff]  }
 0x51a   : > { %5400 = vmatprep.subr.bf16.mxu1 %v11043_v4  ;;  %v11196_v4 = vld [vmem:[#allocation9 + $0x4e4] ss:$16 sps:$4 sm:$0xff]  }
 0x51d   : > { %5401 = vmatpush1.bf16.msra.mxu1 %v11041_v14  ;;  %v11082_v14 = vld [vmem:[#allocation9 + $0x10c] ss:$16 sps:$4 sm:$0xff]  }
 0x51e   : > { %5402 = vmatprep.subr.bf16.mxu1 %v11046_v8  ;;  %v11194_v8 = vld [vmem:[#allocation9 + $0x4e0] ss:$16 sps:$4 sm:$0xff]  }
 0x521   : > { %5403 = vmatpush1.bf16.msra.mxu1 %v11044_v9  ;;  %v11080_v9 = vld [vmem:[#allocation9 + $0x108] ss:$16 sps:$4 sm:$0xff]  }
 0x522   : > { %5404 = vmatprep.subr.bf16.mxu1 %v11049_v25  ;;  %v11202_v25 = vld [vmem:[#allocation9 + $0x504] ss:$16 sps:$4 sm:$0xff]  }
 0x524   : > { %v9653_v32 = vpop.f32.mrb[28].mxu0 }
 0x525   : > { %v9654_v28 = vpop.f32.mrb[29].mxu0  ;;  %5405 = vmatpush1.bf16.msra.mxu1 %v11047_v11  ;;  %v11085_v11 = vld [vmem:[#allocation9 + $0x12c] ss:$16 sps:$4 sm:$0xff]  }
 0x526   : > { %v9655_v16 = vadd.f32 %v9654_v28, %v9653_v32  ;;  %v9656_v18 = vpop.f32.mrb[30].mxu0  ;;  %5406 = vmatprep.subr.bf16.mxu1 %v11052_v13  ;;  %v11200_v13 = vld [vmem:[#allocation9 + $0x500] ss:$16 sps:$4 sm:$0xff]   ;;  %v11083_v32 = vld [vmem:[#allocation9 + $0x128] ss:$16 sps:$4 sm:$0xff]  }
 0x527   : > { %v9657_v34 = vpop.f32.mrb[31].mxu0  ;;  %v11208_v28 = vld [vmem:[#allocation9 + $0x524] ss:$16 sps:$4 sm:$0xff]   ;;  %v11086_v18 = vld [vmem:[#allocation9 + $0x148] ss:$16 sps:$4 sm:$0xff]  }
 0x528   : > { %v12869_v51 = vadd.f32 %v9655_v16, %v5494_v57  ;;  %v11206_v16 = vld [vmem:[#allocation9 + $0x520] ss:$16 sps:$4 sm:$0xff]   ;;  %v11091_v34 = vld [vmem:[#allocation9 + $0x16c] ss:$16 sps:$4 sm:$0xff]  }
 0x529   : > { %5407 = vmatpush1.bf16.msra.mxu1 %v11050_v15  ;;  %v11088_v15 = vld [vmem:[#allocation9 + $0x14c] ss:$16 sps:$4 sm:$0xff]  }
 0x52a   : > { %5408 = vmatprep.subr.bf16.mxu1 %v11055_v19  ;;  %v11214_v19 = vld [vmem:[#allocation9 + $0x544] ss:$16 sps:$4 sm:$0xff]  }
 0x52d   : > { %5409 = vmatpush1.bf16.msra.mxu1 %v11053_v55  ;;  %v11089_v55 = vld [vmem:[#allocation9 + $0x168] ss:$16 sps:$4 sm:$0xff]  }
 0x52e   : > { %7179 = vmatprep.subr.bf16.mxu1 %v11058_v21  ;;  %v11220_v21 = vld [vmem:[#allocation9 + $0x564] ss:$16 sps:$4 sm:$0xff]  }
 0x530   : > { %5411 = vmatmul.mubr.bf16.vlgmr.msra.gmra.mrb[8].mxu1 %v12809_v6  ;;  %v11164_v6 = vld [vmem:[#allocation9 + $0x440] ss:$16 sps:$4 sm:$0xff]  }
 0x531   : > { %7180 = vmatpush1.bf16.msra.mxu1 %v11056_v24  ;;  %7211 = vmatprep.mubr.bf16.mxu1 %v12845_v42  ;;  %v11070_v42 = vld [vmem:[#allocation9 + $0x8c] ss:$16 sps:$4 sm:$0xff]  }
 0x532   : > { %7181 = vmatprep.subr.bf16.mxu1 %v11061_v26  ;;  %7102 = vmatpush1.bf16.msra.mxu0 %v11164_v6  ;;  %v11094_v24 = vld [vmem:[#allocation9 + $0x18c] ss:$16 sps:$4 sm:$0xff]   ;;  %v11218_v26 = vld [vmem:[#allocation9 + $0x560] ss:$16 sps:$4 sm:$0xff]  }
 0x533   : > { %7103 = vmatprep.subr.bf16.mxu0 %v11172_v46 }
 0x535   : > { %7182 = vmatpush1.bf16.msra.mxu1 %v11059_v12  ;;  %v11097_v12 = vld [vmem:[#allocation9 + $0x1ac] ss:$16 sps:$4 sm:$0xff]  }
 0x536   : > { %7183 = vmatprep.subr.bf16.mxu1 %v11064_v33  ;;  %7104 = vmatpush1.bf16.msra.mxu0 %v11170_v41  ;;  %v11095_v33 = vld [vmem:[#allocation9 + $0x1a8] ss:$16 sps:$4 sm:$0xff]   ;;  %v11103_v41 = vld [vmem:[#allocation9 + $0x1ec] ss:$16 sps:$4 sm:$0xff]  }
 0x537   : > { %7105 = vmatprep.subr.bf16.mxu0 %v11178_v44 }
 0x539   : > { %7184 = vmatpush1.bf16.msra.mxu1 %v11062_v39  ;;  %v11100_v39 = vld [vmem:[#allocation9 + $0x1cc] ss:$16 sps:$4 sm:$0xff]  }
 0x53a   : > { %7185 = vmatprep.subr.bf16.mxu1 %v11067_v48  ;;  %7106 = vmatpush1.bf16.msra.mxu0 %v11176_v47  ;;  %v11106_v47 = vld [vmem:[#allocation9 + $0x20c] ss:$16 sps:$4 sm:$0xff]  }
 0x53b   : > { %7107 = vmatprep.subr.bf16.mxu0 %v11184_v10  ;;  %v11109_v10 = vld [vmem:[#allocation9 + $0x22c] ss:$16 sps:$4 sm:$0xff]  }
 0x53d   : > { %7186 = vmatpush1.bf16.msra.mxu1 %v11065_v17  ;;  %v11098_v17 = vld [vmem:[#allocation9 + $0x1c8] ss:$16 sps:$4 sm:$0xff]  }
 0x53e   : > { %7187 = vmatprep.subr.bf16.mxu1 %v11070_v42  ;;  %7108 = vmatpush1.bf16.msra.mxu0 %v11182_v54  ;;  %v11112_v54 = vld [vmem:[#allocation9 + $0x24c] ss:$16 sps:$4 sm:$0xff]  }
 0x53f   : > { %7109 = vmatprep.subr.bf16.mxu0 %v11190_v60  ;;  %v11118_v60 = vld [vmem:[#allocation9 + $0x28c] ss:$16 sps:$4 sm:$0xff]  }
 0x541   : > { %7188 = vmatpush1.bf16.msra.mxu1 %v11068_v43 }
 0x542   : > { %7189 = vmatprep.subr.bf16.mxu1 %v11073_v45  ;;  %7110 = vmatpush1.bf16.msra.mxu0 %v11188_v63  ;;  %v11101_v45 = vld [vmem:[#allocation9 + $0x1e8] ss:$16 sps:$4 sm:$0xff]   ;;  %v11236_v63 = vld [vmem:[#allocation9 + $0x5c0] ss:$16 sps:$4 sm:$0xff]  }
 0x543   : > { %7111 = vmatprep.subr.bf16.mxu0 %v11196_v4  ;;  %v11125_v4 = vld [vmem:[#allocation9 + $0x2e8] ss:$16 sps:$4 sm:$0xff]  }
 0x544   : > { %v9675_v56 = vpop.f32.mrb[32].mxu0 }
 0x545   : > { %v9676_v57 = vpop.f32.mrb[33].mxu0  ;;  %7190 = vmatpush1.bf16.msra.mxu1 %v11071_v53  ;;  %v11104_v53 = vld [vmem:[#allocation9 + $0x208] ss:$16 sps:$4 sm:$0xff]  }
 0x546   : > { %v9677_v5 = vadd.f32 %v9676_v57, %v9675_v56  ;;  %v9678_v1 = vpop.f32.mrb[34].mxu0  ;;  %7191 = vmatprep.subr.bf16.mxu1 %v11076_v38  ;;  %7112 = vmatpush1.bf16.msra.mxu0 %v11194_v8  ;;  %v11107_v38 = vld [vmem:[#allocation9 + $0x228] ss:$16 sps:$4 sm:$0xff]   ;;  %v11115_v57 = vld [vmem:[#allocation9 + $0x26c] ss:$16 sps:$4 sm:$0xff]  }
 0x547   : > { %v9679_v20 = vpop.f32.mrb[35].mxu0  ;;  %7113 = vmatprep.subr.bf16.mxu0 %v11202_v25  ;;  %v11110_v56 = vld [vmem:[#allocation9 + $0x248] ss:$16 sps:$4 sm:$0xff]   ;;  %v11121_v1 = vld [vmem:[#allocation9 + $0x2ac] ss:$16 sps:$4 sm:$0xff]  }
 0x548   : > { %v12874_v0 = vadd.f32 %v9677_v5, %v12869_v51  ;;  %v11212_v51 = vld [vmem:[#allocation9 + $0x540] ss:$16 sps:$4 sm:$0xff]   ;;  %v11116_v5 = vld [vmem:[#allocation9 + $0x288] ss:$16 sps:$4 sm:$0xff]   ;;  %v11130_v8 = vld [vmem:[#allocation9 + $0x30c] ss:$16 sps:$4 sm:$0xff]  }
 0x549   : > { %7192 = vmatpush1.bf16.msra.mxu1 %v11074_v50  ;;  %v11113_v50 = vld [vmem:[#allocation9 + $0x268] ss:$16 sps:$4 sm:$0xff]  }
 0x54a   : > { %7193 = vmatprep.subr.bf16.mxu1 %v11079_v61  ;;  %7114 = vmatpush1.bf16.msra.mxu0 %v11200_v13  ;;  %v11124_v61 = vld [vmem:[#allocation9 + $0x2cc] ss:$16 sps:$4 sm:$0xff]   ;;  %v11122_v20 = vld [vmem:[#allocation9 + $0x2c8] ss:$16 sps:$4 sm:$0xff]  }
 0x54b   : > { %7115 = vmatprep.subr.bf16.mxu0 %v11208_v28  ;;  %v11128_v25 = vld [vmem:[#allocation9 + $0x308] ss:$16 sps:$4 sm:$0xff]  }
 0x54c   : > { %v11131_v13 = vld [vmem:[#allocation9 + $0x328] ss:$16 sps:$4 sm:$0xff]  }
 0x54d   : > { %7194 = vmatpush1.bf16.msra.mxu1 %v11077_v3  ;;  %v11244_v3 = vld [vmem:[#allocation9 + $0x5e4] ss:$16 sps:$4 sm:$0xff]   ;;  %v11134_v28 = vld [vmem:[#allocation9 + $0x348] ss:$16 sps:$4 sm:$0xff]  }
 0x54e   : > { %7195 = vmatprep.subr.bf16.mxu1 %v11082_v14  ;;  %7116 = vmatpush1.bf16.msra.mxu0 %v11206_v16  ;;  %v11242_v14 = vld [vmem:[#allocation9 + $0x5e0] ss:$16 sps:$4 sm:$0xff]   ;;  %v11137_v16 = vld [vmem:[#allocation9 + $0x368] ss:$16 sps:$4 sm:$0xff]  }
 0x54f   : > { %7117 = vmatprep.subr.bf16.mxu0 %v11214_v19  ;;  %v11140_v19 = vld [vmem:[#allocation9 + $0x388] ss:$16 sps:$4 sm:$0xff]  }
 0x551   : > { %7196 = vmatpush1.bf16.msra.mxu1 %v11080_v9  ;;  %v11250_v9 = vld [vmem:[#allocation9 + $0x604] ss:$16 sps:$4 sm:$0xff]  }
 0x552   : > { %7197 = vmatprep.subr.bf16.mxu1 %v11085_v11  ;;  %7118 = vmatpush1.bf16.msra.mxu0 %v11212_v51  ;;  %v11133_v11 = vld [vmem:[#allocation9 + $0x32c] ss:$16 sps:$4 sm:$0xff]   ;;  %v11143_v51 = vld [vmem:[#allocation9 + $0x3a8] ss:$16 sps:$4 sm:$0xff]  }
 0x553   : > { %7119 = vmatprep.subr.bf16.mxu0 %v11220_v21  ;;  %v11146_v21 = vld [vmem:[#allocation9 + $0x3c8] ss:$16 sps:$4 sm:$0xff]  }
 0x555   : > { %7198 = vmatpush1.bf16.msra.mxu1 %v11083_v32  ;;  %v11136_v32 = vld [vmem:[#allocation9 + $0x34c] ss:$16 sps:$4 sm:$0xff]  }
 0x556   : > { %7199 = vmatprep.subr.bf16.mxu1 %v11088_v15  ;;  %7120 = vmatpush1.bf16.msra.mxu0 %v11218_v26  ;;  %v11139_v15 = vld [vmem:[#allocation9 + $0x36c] ss:$16 sps:$4 sm:$0xff]   ;;  %v11149_v26 = vld [vmem:[#allocation9 + $0x3e8] ss:$16 sps:$4 sm:$0xff]  }
 0x557   : > { %7121 = vmatprep.subr.bf16.mxu0 %v11226_v7  ;;  %v11155_v7 = vld [vmem:[#allocation9 + $0x408] ss:$16 sps:$4 sm:$0xff]  }
 0x559   : > { %7200 = vmatpush1.bf16.msra.mxu1 %v11086_v18  ;;  %v11142_v18 = vld [vmem:[#allocation9 + $0x38c] ss:$16 sps:$4 sm:$0xff]  }
 0x55a   : > { %7201 = vmatprep.subr.bf16.mxu1 %v11091_v34  ;;  %7122 = vmatpush1.bf16.msra.mxu0 %v11224_v37  ;;  %v11145_v34 = vld [vmem:[#allocation9 + $0x3ac] ss:$16 sps:$4 sm:$0xff]   ;;  %v11161_v37 = vld [vmem:[#allocation9 + $0x428] ss:$16 sps:$4 sm:$0xff]  }
 0x55b   : > { %7123 = vmatprep.subr.bf16.mxu0 %v11232_v36  ;;  %v11167_v36 = vld [vmem:[#allocation9 + $0x448] ss:$16 sps:$4 sm:$0xff]  }
 0x55d   : > { %7202 = vmatpush1.bf16.msra.mxu1 %v11089_v55  ;;  %v11148_v55 = vld [vmem:[#allocation9 + $0x3cc] ss:$16 sps:$4 sm:$0xff]  }
 0x55e   : > { %7203 = vmatprep.subr.bf16.mxu1 %v11094_v24  ;;  %7124 = vmatpush1.bf16.msra.mxu0 %v11230_v40  ;;  %v11151_v24 = vld [vmem:[#allocation9 + $0x3ec] ss:$16 sps:$4 sm:$0xff]   ;;  %v11173_v40 = vld [vmem:[#allocation9 + $0x468] ss:$16 sps:$4 sm:$0xff]  }
 0x561   : > { %7204 = vmatpush1.bf16.msra.mxu1 %v11092_v31  ;;  %v11157_v31 = vld [vmem:[#allocation9 + $0x40c] ss:$16 sps:$4 sm:$0xff]  }
 0x562   : > { %7205 = vmatprep.subr.bf16.mxu1 %v11097_v12  ;;  %v11163_v12 = vld [vmem:[#allocation9 + $0x42c] ss:$16 sps:$4 sm:$0xff]  }
 0x564   : > { %v9697_v48 = vpop.f32.mrb[36].mxu0 }
 0x565   : > { %v9698_v6 = vpop.f32.mrb[37].mxu0  ;;  %7206 = vmatpush1.bf16.msra.mxu1 %v11095_v33  ;;  %v11169_v33 = vld [vmem:[#allocation9 + $0x44c] ss:$16 sps:$4 sm:$0xff]  }
 0x566   : > { %v9699_v46 = vadd.f32 %v9698_v6, %v9697_v48  ;;  %v9700_v42 = vpop.f32.mrb[38].mxu0  ;;  %7207 = vmatprep.subr.bf16.mxu1 %v11100_v39  ;;  %v11175_v39 = vld [vmem:[#allocation9 + $0x46c] ss:$16 sps:$4 sm:$0xff]   ;;  %v11179_v6 = vld [vmem:[#allocation9 + $0x488] ss:$16 sps:$4 sm:$0xff]  }
 0x567   : > { %v9701_v43 = vpop.f32.mrb[39].mxu0  ;;  %v11181_v48 = vld [vmem:[#allocation9 + $0x48c] ss:$16 sps:$4 sm:$0xff]   ;;  %v11191_v42 = vld [vmem:[#allocation9 + $0x4c8] ss:$16 sps:$4 sm:$0xff]  }
 0x568   : > { %v12877_v44 = vadd.f32 %v9699_v46, %v12874_v0  ;;  %v11127_v0 = vld [vmem:[#allocation9 + $0x2ec] ss:$16 sps:$4 sm:$0xff]   ;;  %v11185_v46 = vld [vmem:[#allocation9 + $0x4a8] ss:$16 sps:$4 sm:$0xff]  }
 0x569   : > { %7208 = vmatpush1.bf16.msra.mxu1 %v11098_v17  ;;  %v11187_v17 = vld [vmem:[#allocation9 + $0x4ac] ss:$16 sps:$4 sm:$0xff]   ;;  %v11197_v43 = vld [vmem:[#allocation9 + $0x4e8] ss:$16 sps:$4 sm:$0xff]  }
 0x56a   : > { %7209 = vmatprep.subr.bf16.mxu1 %v11103_v41  ;;  %v11199_v41 = vld [vmem:[#allocation9 + $0x4ec] ss:$16 sps:$4 sm:$0xff]   ;;  %vm5626_vm1 = vcmp.ge.f32.partialorder %v12877_v44, 0.0 }
 0x56d   : > { %7210 = vmatpush1.bf16.msra.mxu1 %v11101_v45  ;;  %v11205_v45 = vld [vmem:[#allocation9 + $0x50c] ss:$16 sps:$4 sm:$0xff]  }
 0x56e   : > { %7220 = vmatprep.subr.bf16.mxu1 %v11106_v47  ;;  %v11203_v47 = vld [vmem:[#allocation9 + $0x508] ss:$16 sps:$4 sm:$0xff]  }
 0x570   : > { %7212 = vmatmul.mubr.bf16.vlgmr.msra.gmra.mrb[12].mxu1 %v12848_v52  ;;  %v11119_v52 = vld [vmem:[#allocation9 + $0x2a8] ss:$16 sps:$4 sm:$0xff]  }
 0x571   : > { %7221 = vmatpush1.bf16.msra.mxu1 %v11104_v53  ;;  %7252 = vmatprep.mubr.bf16.mxu1 %v12850_v22  ;;  %v11238_v22 = vld [vmem:[#allocation9 + $0x5c4] ss:$16 sps:$4 sm:$0xff]   ;;  %v11211_v53 = vld [vmem:[#allocation9 + $0x52c] ss:$16 sps:$4 sm:$0xff]  }
 0x572   : > { %7222 = vmatprep.subr.bf16.mxu1 %v11109_v10  ;;  %7125 = vmatprep.subr.bf16.mxu0 %v11238_v22  ;;  %v11209_v10 = vld [vmem:[#allocation9 + $0x528] ss:$16 sps:$4 sm:$0xff]   ;;  %v11247_v22 = vld [vmem:[#allocation9 + $0x5ec] ss:$16 sps:$4 sm:$0xff]  }
 0x573   : > { %7126 = vmatpush1.bf16.msra.mxu0 %v11236_v63  ;;  %v11253_v63 = vld [vmem:[#allocation9 + $0x60c] ss:$16 sps:$4 sm:$0xff]  }
 0x574   : > { %7127 = vmatprep.subr.bf16.mxu0 %v11244_v3 }
 0x575   : > { %7223 = vmatpush1.bf16.msra.mxu1 %v11107_v38  ;;  %v11217_v38 = vld [vmem:[#allocation9 + $0x54c] ss:$16 sps:$4 sm:$0xff]  }
 0x576   : > { %7224 = vmatprep.subr.bf16.mxu1 %v11112_v54  ;;  %v11215_v54 = vld [vmem:[#allocation9 + $0x548] ss:$16 sps:$4 sm:$0xff]  }
 0x577   : > { %7128 = vmatpush1.bf16.msra.mxu0 %v11242_v14 }
 0x578   : > { %7138 = vmatprep.subr.bf16.mxu0 %v11250_v9 }
 0x579   : > { %7225 = vmatpush1.bf16.msra.mxu1 %v11110_v56  ;;  %v11223_v56 = vld [vmem:[#allocation9 + $0x56c] ss:$16 sps:$4 sm:$0xff]  }
 0x57a   : > { %7226 = vmatprep.subr.bf16.mxu1 %v11115_v57  ;;  %v11221_v57 = vld [vmem:[#allocation9 + $0x568] ss:$16 sps:$4 sm:$0xff]  }
 0x57d   : > { %7227 = vmatpush1.bf16.msra.mxu1 %v11113_v50  ;;  %v11229_v50 = vld [vmem:[#allocation9 + $0x58c] ss:$16 sps:$4 sm:$0xff]  }
 0x57e   : > { %7228 = vmatprep.subr.bf16.mxu1 %v11118_v60  ;;  %v11227_v60 = vld [vmem:[#allocation9 + $0x588] ss:$16 sps:$4 sm:$0xff]  }
 0x581   : > { %7229 = vmatpush1.bf16.msra.mxu1 %v11116_v5  ;;  %v11235_v5 = vld [vmem:[#allocation9 + $0x5ac] ss:$16 sps:$4 sm:$0xff]  }
 0x582   : > { %7230 = vmatprep.subr.bf16.mxu1 %v11121_v1  ;;  %v11233_v1 = vld [vmem:[#allocation9 + $0x5a8] ss:$16 sps:$4 sm:$0xff]  }
 0x585   : > { %7231 = vmatpush1.bf16.msra.mxu1 %v11119_v52  ;;  %v11241_v52 = vld [vmem:[#allocation9 + $0x5cc] ss:$16 sps:$4 sm:$0xff]  }
 0x586   : > { %7232 = vmatprep.subr.bf16.mxu1 %v11124_v61  ;;  %v11239_v61 = vld [vmem:[#allocation9 + $0x5c8] ss:$16 sps:$4 sm:$0xff]  }
 0x589   : > { %7233 = vmatpush1.bf16.msra.mxu1 %v11122_v20  ;;  %v11245_v20 = vld [vmem:[#allocation9 + $0x5e8] ss:$16 sps:$4 sm:$0xff]  }
 0x58a   : > { %7234 = vmatprep.subr.bf16.mxu1 %v11127_v0  ;;  %v11433_v0 = vld [vmem:[#allocation20] sm:$0xff] }
 0x58b   : > { %v1908_v3 = vrot.slane %v11433_v0, %v864_v23  ;;  %v11251_v23 = vld [vmem:[#allocation9 + $0x608] ss:$16 sps:$4 sm:$0xff]  }
 0x58d   : > { %7235 = vmatpush1.bf16.msra.mxu1 %v11125_v4  ;;  %v1912_v4 = vrot.slane %v11433_v0, %v868_v59  ;;  %v11259_v59 = vld [vmem:[#allocation9 + $0x62c] ss:$16 sps:$4 sm:$0xff]  }
 0x58e   : > { %7236 = vmatprep.subr.bf16.mxu1 %v11130_v8  ;;  %v11316_v0 = vld [vmem:[#allocation11 + $0x64] ss:$8 sps:$4 sm:$0xff]  }
 0x591   : > { %7237 = vmatpush1.bf16.msra.mxu1 %v11128_v25 }
 0x592   : > { %7238 = vmatprep.subr.bf16.mxu1 %v11133_v11 }
 0x595   : > { %7239 = vmatpush1.bf16.msra.mxu1 %v11131_v13 }
 0x596   : > { %7240 = vmatprep.subr.bf16.mxu1 %v11136_v32 }
 0x599   : > { %7241 = vmatpush1.bf16.msra.mxu1 %v11134_v28 }
 0x59a   : > { %7242 = vmatprep.subr.bf16.mxu1 %v11139_v15 }
 0x59d   : > { %7243 = vmatpush1.bf16.msra.mxu1 %v11137_v16 }
 0x59e   : > { %7244 = vmatprep.subr.bf16.mxu1 %v11142_v18 }
 0x5a1   : > { %7245 = vmatpush1.bf16.msra.mxu1 %v11140_v19  ;;  %v11248_v19 = vld [vmem:[#allocation9 + $0x600] ss:$16 sps:$4 sm:$0xff]  }
 0x5a2   : > { %7246 = vmatprep.subr.bf16.mxu1 %v11145_v34 }
 0x5a5   : > { %7247 = vmatpush1.bf16.msra.mxu1 %v11143_v51  ;;  %v11254_v51 = vld [vmem:[#allocation9 + $0x620] ss:$16 sps:$4 sm:$0xff]  }
 0x5a6   : > { %7248 = vmatprep.subr.bf16.mxu1 %v11148_v55  ;;  %v11257_v55 = vld [vmem:[#allocation9 + $0x628] ss:$16 sps:$4 sm:$0xff]  }
 0x5a9   : > { %7249 = vmatpush1.bf16.msra.mxu1 %v11146_v21  ;;  %v11262_v21 = vld [vmem:[#allocation9 + $0x644] ss:$16 sps:$4 sm:$0xff]  }
 0x5aa   : > { %7250 = vmatprep.subr.bf16.mxu1 %v11151_v24  ;;  %v11265_v24 = vld [vmem:[#allocation9 + $0x64c] ss:$16 sps:$4 sm:$0xff]  }
 0x5ad   : > { %7251 = vmatpush1.bf16.msra.mxu1 %v11149_v26  ;;  %v11260_v26 = vld [vmem:[#allocation9 + $0x640] ss:$16 sps:$4 sm:$0xff]  }
 0x5ae   : > { %7261 = vmatprep.subr.bf16.mxu1 %v11157_v31  ;;  %v11263_v31 = vld [vmem:[#allocation9 + $0x648] ss:$16 sps:$4 sm:$0xff]  }
 0x5b0   : > { %7253 = vmatmul.mubr.bf16.vlgmr.msra.gmra.mrb[12].mxu1 %v12866_v62  ;;  %v11193_v62 = vld [vmem:[#allocation9 + $0x4cc] ss:$16 sps:$4 sm:$0xff]  }
 0x5b1   : > { %7262 = vmatpush1.bf16.msra.mxu1 %v11155_v7  ;;  %v11268_v7 = vld [vmem:[#allocation9 + $0x664] ss:$16 sps:$4 sm:$0xff]  }
 0x5b2   : > { %7263 = vmatprep.subr.bf16.mxu1 %v11163_v12  ;;  %v11271_v12 = vld [vmem:[#allocation9 + $0x66c] ss:$16 sps:$4 sm:$0xff]  }
 0x5b5   : > { %7264 = vmatpush1.bf16.msra.mxu1 %v11161_v37  ;;  %v11266_v37 = vld [vmem:[#allocation9 + $0x660] ss:$16 sps:$4 sm:$0xff]  }
 0x5b6   : > { %7265 = vmatprep.subr.bf16.mxu1 %v11169_v33  ;;  %v11269_v33 = vld [vmem:[#allocation9 + $0x668] ss:$16 sps:$4 sm:$0xff]  }
 0x5b9   : > { %7266 = vmatpush1.bf16.msra.mxu1 %v11167_v36  ;;  %v11274_v36 = vld [vmem:[#allocation9 + $0x684] ss:$16 sps:$4 sm:$0xff]  }
 0x5ba   : > { %7267 = vmatprep.subr.bf16.mxu1 %v11175_v39  ;;  %v11277_v39 = vld [vmem:[#allocation9 + $0x68c] ss:$16 sps:$4 sm:$0xff]  }
 0x5bd   : > { %7268 = vmatpush1.bf16.msra.mxu1 %v11173_v40  ;;  %v11272_v40 = vld [vmem:[#allocation9 + $0x680] ss:$16 sps:$4 sm:$0xff]  }
 0x5be   : > { %7269 = vmatprep.subr.bf16.mxu1 %v11181_v48  ;;  %v11280_v48 = vld [vmem:[#allocation9 + $0x6a4] ss:$16 sps:$4 sm:$0xff]  }
 0x5c1   : > { %7270 = vmatpush1.bf16.msra.mxu1 %v11179_v6  ;;  %v11283_v6 = vld [vmem:[#allocation9 + $0x6ac] ss:$16 sps:$4 sm:$0xff]  }
 0x5c2   : > { %7271 = vmatprep.subr.bf16.mxu1 %v11187_v17  ;;  %v11278_v17 = vld [vmem:[#allocation9 + $0x6a0] ss:$16 sps:$4 sm:$0xff]  }
 0x5c5   : > { %7272 = vmatpush1.bf16.msra.mxu1 %v11185_v46  ;;  %v11281_v46 = vld [vmem:[#allocation9 + $0x6a8] ss:$16 sps:$4 sm:$0xff]  }
 0x5c6   : > { %7273 = vmatprep.subr.bf16.mxu1 %v11193_v62  ;;  %v11286_v62 = vld [vmem:[#allocation9 + $0x6c4] ss:$16 sps:$4 sm:$0xff]  }
 0x5c9   : > { %7274 = vmatpush1.bf16.msra.mxu1 %v11191_v42  ;;  %v11289_v42 = vld [vmem:[#allocation9 + $0x6cc] ss:$16 sps:$4 sm:$0xff]  }
 0x5ca   : > { %7275 = vmatprep.subr.bf16.mxu1 %v11199_v41  ;;  %v11284_v41 = vld [vmem:[#allocation9 + $0x6c0] ss:$16 sps:$4 sm:$0xff]  }
 0x5cd   : > { %7276 = vmatpush1.bf16.msra.mxu1 %v11197_v43  ;;  %v11287_v43 = vld [vmem:[#allocation9 + $0x6c8] ss:$16 sps:$4 sm:$0xff]  }
 0x5ce   : > { %7277 = vmatprep.subr.bf16.mxu1 %v11205_v45  ;;  %v11292_v45 = vld [vmem:[#allocation9 + $0x6e4] ss:$16 sps:$4 sm:$0xff]  }
 0x5d1   : > { %7278 = vmatpush1.bf16.msra.mxu1 %v11203_v47  ;;  %v11295_v47 = vld [vmem:[#allocation9 + $0x6ec] ss:$16 sps:$4 sm:$0xff]  }
 0x5d2   : > { %7279 = vmatprep.subr.bf16.mxu1 %v11211_v53  ;;  %v5634_v53 = vmul.f32 %v12840_v49, %v12877_v44 }
 0x5d5   : > { %7280 = vmatpush1.bf16.msra.mxu1 %v11209_v10  ;;  %v11290_v10 = vld [vmem:[#allocation9 + $0x6e0] ss:$16 sps:$4 sm:$0xff]  }
 0x5d6   : > { %7281 = vmatprep.subr.bf16.mxu1 %v11217_v38  ;;  %v11293_v38 = vld [vmem:[#allocation9 + $0x6e8] ss:$16 sps:$4 sm:$0xff]  }
 0x5d9   : > { %7282 = vmatpush1.bf16.msra.mxu1 %v11215_v54  ;;  %v11298_v54 = vld [vmem:[#allocation11 + $0x4] ss:$8 sps:$4 sm:$0xff]  }
 0x5da   : > { %7283 = vmatprep.subr.bf16.mxu1 %v11223_v56  ;;  %v5641_v56 = vsel %vm5626_vm1, %v12877_v44, %v5634_v53  ;;  %v11310_v44 = vld [vmem:[#allocation11 + $0x44] ss:$8 sps:$4 sm:$0xff]  }
 0x5dd   : > { %7284 = vmatpush1.bf16.msra.mxu1 %v11221_v57  ;;  %v11296_v57 = vld [vmem:[#allocation11] ss:$8 sps:$4 sm:$0xff]  }
 0x5de   : > { %7285 = vmatprep.subr.bf16.mxu1 %v11229_v50  ;;  %v5648_v50 = vpack.c.bf16 %v5641_v56, %v5641_v56 }
 0x5e1   : > { %7286 = vmatpush1.bf16.msra.mxu1 %v11227_v60  ;;  %v11301_v60 = vld [vmem:[#allocation11 + $0x14] ss:$8 sps:$4 sm:$0xff]  }
 0x5e2   : > { %7287 = vmatprep.subr.bf16.mxu1 %v11235_v5  ;;  %v11304_v5 = vld [vmem:[#allocation11 + $0x24] ss:$8 sps:$4 sm:$0xff]  }
 0x5e5   : > { %7288 = vmatpush1.bf16.msra.mxu1 %v11233_v1  ;;  %v11302_v1 = vld [vmem:[#allocation11 + $0x20] ss:$8 sps:$4 sm:$0xff]  }
 0x5e6   : > { %7289 = vmatprep.subr.bf16.mxu1 %v11241_v52  ;;  %v11307_v52 = vld [vmem:[#allocation11 + $0x34] ss:$8 sps:$4 sm:$0xff]  }
 0x5e9   : > { %7290 = vmatpush1.bf16.msra.mxu1 %v11239_v61  ;;  %v11305_v61 = vld [vmem:[#allocation11 + $0x30] ss:$8 sps:$4 sm:$0xff]  }
 0x5ea   : > { %7291 = vmatprep.subr.bf16.mxu1 %v11247_v22  ;;  %v11308_v22 = vld [vmem:[#allocation11 + $0x40] ss:$8 sps:$4 sm:$0xff]  }
 0x5ed   : > { %7292 = vmatpush1.bf16.msra.mxu1 %v11245_v20  ;;  %v11313_v20 = vld [vmem:[#allocation11 + $0x54] ss:$8 sps:$4 sm:$0xff]  }
 0x5ee   : > { %7302 = vmatprep.subr.bf16.mxu1 %v11253_v63  ;;  %v11311_v63 = vld [vmem:[#allocation11 + $0x50] ss:$8 sps:$4 sm:$0xff]  }
 0x603   : > { %v5412_v14 = vpop.f32.mrb[8].mxu1 }
 0x604   : > { %v9816_v8 = vadd.f32 %v5412_v14, %v1908_v3  ;;  %v5414_v9 = vpop.f32.mrb[9].mxu1  ;;  %v11314_v3 = vld [vmem:[#allocation11 + $0x60] ss:$8 sps:$4 sm:$0xff]   ;;  %v11317_v14 = vld [vmem:[#allocation11 + $0x70] ss:$8 sps:$4 sm:$0xff]  }
 0x605   : > { %v9817_v25 = vadd.f32 %v5414_v9, %v1912_v4  ;;  %v5416_v11 = vpop.f32.mrb[10].mxu1  ;;  %v11319_v4 = vld [vmem:[#allocation11 + $0x74] ss:$8 sps:$4 sm:$0xff]   ;;  %v11320_v9 = vld [vmem:[#allocation11 + $0x80] ss:$8 sps:$4 sm:$0xff]  }
 0x606   : > { %vm5624_vm15 = vcmp.ge.f32.partialorder %v9816_v8, 0.0  ;;  %v5632_v13 = vmul.f32 %v9816_v8, %v12840_v49  ;;  %v5417_v32 = vpop.f32.mrb[11].mxu1  ;;  %v11323_v11 = vld [vmem:[#allocation11 + $0x90] ss:$8 sps:$4 sm:$0xff]  }
 0x607   : > { %vm5625_vm0 = vcmp.ge.f32.partialorder %v9817_v25, 0.0  ;;  %v5633_v28 = vmul.f32 %v9817_v25, %v12840_v49  ;;  %v11299_v49 = vld [vmem:[#allocation11 + $0x10] ss:$8 sps:$4 sm:$0xff]   ;;  %v11326_v32 = vld [vmem:[#allocation11 + $0xa0] ss:$8 sps:$4 sm:$0xff]  }
 0x608   : > { %v5639_v15 = vsel %vm5624_vm15, %v9816_v8, %v5632_v13  ;;  %v11322_v8 = vld [vmem:[#allocation11 + $0x84] ss:$8 sps:$4 sm:$0xff]  }
 0x609   : > { %v5640_v16 = vsel %vm5625_vm0, %v9817_v25, %v5633_v28  ;;  %v5646_v34 = vpack.c.bf16 %v5639_v15, %v5639_v15  ;;  %v11325_v25 = vld [vmem:[#allocation11 + $0x94] ss:$8 sps:$4 sm:$0xff]   ;;  %v11328_v13 = vld [vmem:[#allocation11 + $0xa4] ss:$8 sps:$4 sm:$0xff]   ;;  %v11329_v15 = vld [vmem:[#allocation11 + $0xb0] ss:$8 sps:$4 sm:$0xff]  }
 0x60a   : > { %v5647_v18 = vpack.c.bf16 %v5640_v16, %v5640_v16  ;;  %v11331_v28 = vld [vmem:[#allocation11 + $0xb4] ss:$8 sps:$4 sm:$0xff]   ;;  %v11334_v16 = vld [vmem:[#allocation11 + $0xc4] ss:$8 sps:$4 sm:$0xff]  }
 0x60c   : > { %7129 = vmatprep.mubr.bf16.mxu0 %v5647_v18  ;;  %7293 = vmatprep.mubr.bf16.mxu1 %v5647_v18  ;;  %v11332_v18 = vld [vmem:[#allocation11 + $0xc0] ss:$8 sps:$4 sm:$0xff]  }
 0x60d   : > { %7130 = vmatmul.mubr.bf16.vlgmr.msra.gmra.mrb[40].mxu0 %v5646_v34  ;;  %7294 = vmatmul.mubr.bf16.vlgmr.msra.gmra.mrb[12].mxu1 %v5646_v34  ;;  %v11340_v34 = vld [vmem:[#allocation11 + $0xe4] ss:$8 sps:$4 sm:$0xff]  }
 0x60e   : > { %7139 = vmatpush1.bf16.msra.mxu0 %v11248_v19  ;;  %7303 = vmatpush1.bf16.msra.mxu1 %v11251_v23  ;;  %v11337_v19 = vld [vmem:[#allocation11 + $0xd4] ss:$8 sps:$4 sm:$0xff]   ;;  %v11335_v23 = vld [vmem:[#allocation11 + $0xd0] ss:$8 sps:$4 sm:$0xff]  }
 0x60f   : > { %7140 = vmatprep.subr.bf16.mxu0 %v11256_v27  ;;  %7304 = vmatprep.subr.bf16.mxu1 %v11259_v59  ;;  %v11338_v27 = vld [vmem:[#allocation11 + $0xe0] ss:$8 sps:$4 sm:$0xff]   ;;  %v11343_v59 = vld [vmem:[#allocation11 + $0xf4] ss:$8 sps:$4 sm:$0xff]  }
 0x610   : > { %7170 = vmatprep.mubr.bf16.mxu0 %v12057_v2  ;;  %7334 = vmatprep.mubr.bf16.mxu1 %v12057_v2  ;;  %v11275_v2 = vld [vmem:[#allocation9 + $0x688] ss:$16 sps:$4 sm:$0xff]  }
 0x612   : > { %7141 = vmatpush1.bf16.msra.mxu0 %v11254_v51  ;;  %7305 = vmatpush1.bf16.msra.mxu1 %v11257_v55  ;;  %v11341_v51 = vld [vmem:[#allocation11 + $0xf0] ss:$8 sps:$4 sm:$0xff]   ;;  %v11346_v55 = vld [vmem:[#allocation11 + $0x104] ss:$8 sps:$4 sm:$0xff]  }
 0x613   : > { %7142 = vmatprep.subr.bf16.mxu0 %v11262_v21  ;;  %7306 = vmatprep.subr.bf16.mxu1 %v11265_v24  ;;  %v5873_v21 = vld [vmem:[#allocation21] sm:$0xf] }
 0x614   : > { %v5878_v24 = vrot.slane %v5873_v21, %v12699_v29 }
 0x616   : > { %7143 = vmatpush1.bf16.msra.mxu0 %v11260_v26  ;;  %7307 = vmatpush1.bf16.msra.mxu1 %v11263_v31  ;;  %v5886_v26 = vrot.slane %v5873_v21, %v12741_v58  ;;  %v5882_v31 = vrot.slane %v5873_v21, %v12702_v30 }
 0x617   : > { %7144 = vmatprep.subr.bf16.mxu0 %v11268_v7  ;;  %7308 = vmatprep.subr.bf16.mxu1 %v11271_v12  ;;  %v5890_v7 = vrot.slane %v5873_v21, %v12711_v35 }
 0x61a   : > { %7145 = vmatpush1.bf16.msra.mxu0 %v11266_v37  ;;  %7309 = vmatpush1.bf16.msra.mxu1 %v11269_v33  ;;  %v7348_v37 = vstv %s9476_s28 }
 0x61b   : > { %7146 = vmatprep.subr.bf16.mxu0 %v11274_v36  ;;  %7310 = vmatprep.subr.bf16.mxu1 %v11277_v39 }
 0x61e   : > { %7147 = vmatpush1.bf16.msra.mxu0 %v11272_v40  ;;  %7311 = vmatpush1.bf16.msra.mxu1 %v11275_v2 }
 0x61f   : > { %7148 = vmatprep.subr.bf16.mxu0 %v11280_v48  ;;  %7312 = vmatprep.subr.bf16.mxu1 %v11283_v6 }
 0x622   : > { %7149 = vmatpush1.bf16.msra.mxu0 %v11278_v17  ;;  %7313 = vmatpush1.bf16.msra.mxu1 %v11281_v46 }
 0x623   : > { %7150 = vmatprep.subr.bf16.mxu0 %v11286_v62  ;;  %7314 = vmatprep.subr.bf16.mxu1 %v11289_v42 }
 0x626   : > { %7151 = vmatpush1.bf16.msra.mxu0 %v11284_v41  ;;  %7315 = vmatpush1.bf16.msra.mxu1 %v11287_v43 }
 0x627   : > { %7152 = vmatprep.subr.bf16.mxu0 %v11292_v45  ;;  %7316 = vmatprep.subr.bf16.mxu1 %v11295_v47 }
 0x62a   : > { %7153 = vmatpush1.bf16.msra.mxu0 %v11290_v10  ;;  %7317 = vmatpush1.bf16.msra.mxu1 %v11293_v38 }
 0x62b   : > { %7757 = vmatprep.subr.bf16.mxu0 %v11298_v54  ;;  %v11344_v54 = vld [vmem:[#allocation11 + $0x100] ss:$8 sps:$4 sm:$0xff]  }
 0x62d   : > { %7171 = vmatmul.mubr.bf16.vlgmr.msra.gmra.mrb[40].mxu0 %v5648_v50  ;;  %7335 = vmatmul.mubr.bf16.vlgmr.msra.gmra.mrb[12].mxu1 %v5648_v50 }
 0x62e   : > { %7758 = vmatpush1.bf16.msra.mxu0 %v11296_v57  ;;  %v11349_v57 = vld [vmem:[#allocation11 + $0x114] ss:$8 sps:$4 sm:$0xff]  }
 0x62f   : > { %7759 = vmatprep.subr.bf16.mxu0 %v11301_v60  ;;  %v11347_v60 = vld [vmem:[#allocation11 + $0x110] ss:$8 sps:$4 sm:$0xff]  }
 0x632   : > { %7760 = vmatpush1.bf16.msra.mxu0 %v11299_v49  ;;  %v11352_v49 = vld [vmem:[#allocation11 + $0x124] ss:$8 sps:$4 sm:$0xff]  }
 0x633   : > { %7761 = vmatprep.subr.bf16.mxu0 %v11304_v5  ;;  %v11350_v5 = vld [vmem:[#allocation11 + $0x120] ss:$8 sps:$4 sm:$0xff]  }
 0x636   : > { %7762 = vmatpush1.bf16.msra.mxu0 %v11302_v1  ;;  %v11355_v1 = vld [vmem:[#allocation11 + $0x134] ss:$8 sps:$4 sm:$0xff]  }
 0x637   : > { %7763 = vmatprep.subr.bf16.mxu0 %v11307_v52  ;;  %v11353_v52 = vld [vmem:[#allocation11 + $0x130] ss:$8 sps:$4 sm:$0xff]  }
 0x63a   : > { %7764 = vmatpush1.bf16.msra.mxu0 %v11305_v61  ;;  %v11358_v61 = vld [vmem:[#allocation11 + $0x144] ss:$8 sps:$4 sm:$0xff]  }
 0x63b   : > { %7765 = vmatprep.subr.bf16.mxu0 %v11310_v44  ;;  %v11356_v44 = vld [vmem:[#allocation11 + $0x140] ss:$8 sps:$4 sm:$0xff]  }
 0x63e   : > { %7766 = vmatpush1.bf16.msra.mxu0 %v11308_v22  ;;  %v11361_v22 = vld [vmem:[#allocation11 + $0x154] ss:$8 sps:$4 sm:$0xff]  }
 0x63f   : > { %7767 = vmatprep.subr.bf16.mxu0 %v11313_v20  ;;  %v11359_v20 = vld [vmem:[#allocation11 + $0x150] ss:$8 sps:$4 sm:$0xff]  }
 0x642   : > { %7768 = vmatpush1.bf16.msra.mxu0 %v11311_v63  ;;  %v11364_v63 = vld [vmem:[#allocation11 + $0x164] ss:$8 sps:$4 sm:$0xff]  }
 0x643   : > { %7769 = vmatprep.subr.bf16.mxu0 %v11316_v0  ;;  %v11362_v0 = vld [vmem:[#allocation11 + $0x160] ss:$8 sps:$4 sm:$0xff]  }
 0x646   : > { %7770 = vmatpush1.bf16.msra.mxu0 %v11314_v3  ;;  %v11367_v3 = vld [vmem:[#allocation11 + $0x174] ss:$8 sps:$4 sm:$0xff]  }
 0x647   : > { %7771 = vmatprep.subr.bf16.mxu0 %v11319_v4  ;;  %v11365_v4 = vld [vmem:[#allocation11 + $0x170] ss:$8 sps:$4 sm:$0xff]  }
 0x64a   : > { %7772 = vmatpush1.bf16.msra.mxu0 %v11317_v14  ;;  %v11370_v14 = vld [vmem:[#allocation11 + $0x184] ss:$8 sps:$4 sm:$0xff]  }
 0x64b   : > { %7773 = vmatprep.subr.bf16.mxu0 %v11322_v8  ;;  %v11368_v8 = vld [vmem:[#allocation11 + $0x180] ss:$8 sps:$4 sm:$0xff]  }
 0x64e   : > { %7774 = vmatpush1.bf16.msra.mxu0 %v11320_v9  ;;  %v11373_v9 = vld [vmem:[#allocation11 + $0x194] ss:$8 sps:$4 sm:$0xff]  }
 0x64f   : > { %7775 = vmatprep.subr.bf16.mxu0 %v11325_v25  ;;  %v11371_v25 = vld [vmem:[#allocation11 + $0x190] ss:$8 sps:$4 sm:$0xff]  }
 0x652   : > { %7776 = vmatpush1.bf16.msra.mxu0 %v11323_v11  ;;  %v11376_v11 = vld [vmem:[#allocation11 + $0x1a4] ss:$8 sps:$4 sm:$0xff]  }
 0x653   : > { %7777 = vmatprep.subr.bf16.mxu0 %v11328_v13  ;;  %v11374_v13 = vld [vmem:[#allocation11 + $0x1a0] ss:$8 sps:$4 sm:$0xff]  }
 0x656   : > { %7778 = vmatpush1.bf16.msra.mxu0 %v11326_v32  ;;  %v11379_v32 = vld [vmem:[#allocation11 + $0x1b4] ss:$8 sps:$4 sm:$0xff]  }
 0x657   : > { %7779 = vmatprep.subr.bf16.mxu0 %v11331_v28  ;;  %v11377_v28 = vld [vmem:[#allocation11 + $0x1b0] ss:$8 sps:$4 sm:$0xff]  }
 0x65a   : > { %7780 = vmatpush1.bf16.msra.mxu0 %v11329_v15  ;;  %v11382_v15 = vld [vmem:[#allocation11 + $0x1c4] ss:$8 sps:$4 sm:$0xff]  }
 0x65b   : > { %7781 = vmatprep.subr.bf16.mxu0 %v11334_v16  ;;  %v11380_v16 = vld [vmem:[#allocation11 + $0x1c0] ss:$8 sps:$4 sm:$0xff]  }
 0x65e   : > { %7782 = vmatpush1.bf16.msra.mxu0 %v11332_v18  ;;  %v11385_v18 = vld [vmem:[#allocation11 + $0x1d4] ss:$8 sps:$4 sm:$0xff]  }
 0x65f   : > { %7783 = vmatprep.subr.bf16.mxu0 %v11337_v19  ;;  %v11383_v19 = vld [vmem:[#allocation11 + $0x1d0] ss:$8 sps:$4 sm:$0xff]  }
 0x662   : > { %7784 = vmatpush1.bf16.msra.mxu0 %v11335_v23  ;;  %v11388_v23 = vld [vmem:[#allocation11 + $0x1e4] ss:$8 sps:$4 sm:$0xff]  }
 0x663   : > { %7785 = vmatprep.subr.bf16.mxu0 %v11340_v34  ;;  %v11386_v34 = vld [vmem:[#allocation11 + $0x1e0] ss:$8 sps:$4 sm:$0xff]  }
 0x666   : > { %7786 = vmatpush1.bf16.msra.mxu0 %v11338_v27  ;;  %v11391_v27 = vld [vmem:[#allocation11 + $0x1f4] ss:$8 sps:$4 sm:$0xff]  }
 0x667   : > { %7787 = vmatprep.subr.bf16.mxu0 %v11343_v59  ;;  %v11389_v59 = vld [vmem:[#allocation11 + $0x1f0] ss:$8 sps:$4 sm:$0xff]  }
 0x66a   : > { %7788 = vmatpush1.bf16.msra.mxu0 %v11341_v51  ;;  %v11392_v51 = vld [vmem:[#allocation12 + $0x40] sm:$0xff]  }
 0x66b   : > { %7798 = vmatprep.subr.bf16.mxu0 %v11346_v55  ;;  %v11393_v55 = vld [vmem:[#allocation12] sm:$0xff]  }
 0x700   : > { %v7172_v12 = vpop.f32.mrb[40].mxu0  ;;  %v7336_v33 = vpop.f32.mrb[12].mxu1 }
 0x701   : > { %v9818_v36 = vadd.f32 %v7172_v12, %v5878_v24  ;;  %v9820_v39 = vadd.f32 %v7336_v33, %v5886_v26  ;;  %v7174_v40 = vpop.f32.mrb[41].mxu0  ;;  %v7338_v2 = vpop.f32.mrb[13].mxu1  ;;  %v11394_v24 = vld [vmem:[#allocation12 + $0x48] sm:$0xff]   ;;  %v11398_v12 = vld [vmem:[#allocation12 + $0x58] sm:$0xff]   ;;  %v11400_v33 = vld [vmem:[#allocation12 + $0x60] sm:$0xff]  }
 0x702   : > { %v9819_v48 = vadd.f32 %v7174_v40, %v5882_v31  ;;  %v9821_v6 = vadd.f32 %v7338_v2, %v5890_v7  ;;  %v7176_v17 = vpop.f32.mrb[42].mxu0  ;;  %v7340_v46 = vpop.f32.mrb[14].mxu1  ;;  %v11395_v26 = vld [vmem:[#allocation12 + $0x8] sm:$0xff]   ;;  %v11396_v31 = vld [vmem:[#allocation12 + $0x50] sm:$0xff]  }
 0x703   : > { %vm7344_vm2 = vcmp.ge.f32.partialorder %v9818_v36, 0.0  ;;  %v7349_v62 = vmul.f32 %v9818_v36, %v7348_v37  ;;  %vm7346_vm3 = vcmp.ge.f32.partialorder %v9820_v39, 0.0  ;;  %v7351_v42 = vmul.f32 %v9820_v39, %v7348_v37  ;;  %v7177_v58 = vpop.f32.mrb[43].mxu0  ;;  %v7341_v41 = vpop.f32.mrb[15].mxu1  ;;  %v11397_v7 = vld [vmem:[#allocation12 + $0x10] sm:$0xff]   ;;  %v11403_v40 = vld [vmem:[#allocation12 + $0x28] sm:$0xff]  }
 0x704   : > { %vm7345_vm4 = vcmp.ge.f32.partialorder %v9819_v48, 0.0  ;;  %v7350_v43 = vmul.f32 %v9819_v48, %v7348_v37  ;;  %vm7347_vm5 = vcmp.ge.f32.partialorder %v9821_v6, 0.0  ;;  %v7352_v35 = vmul.f32 %v9821_v6, %v7348_v37  ;;  %v11399_v37 = vld [vmem:[#allocation12 + $0x18] sm:$0xff]   ;;  %v11404_v2 = vld [vmem:[#allocation12 + $0x70] sm:$0xff]   ;;  %v11408_v46 = vld [vmem:[#allocation14] sm:$0xff]  }
 0x705   : > { %v7353_v45 = vsel %vm7344_vm2, %v9818_v36, %v7349_v62  ;;  %v12898_v47 = vsel %vm7346_vm3, %v9820_v39, %v7351_v42  ;;  %v11401_v36 = vld [vmem:[#allocation12 + $0x20] sm:$0xff]   ;;  %v11402_v39 = vld [vmem:[#allocation12 + $0x68] sm:$0xff]   ;;  %v11407_v17 = vld [vmem:[#allocation12 + $0x38] sm:$0xff]   ;;  %v12058_v62 = vmov 0.0  }
 0x706   : > { %v7354_v53 = vsel %vm7345_vm4, %v9819_v48, %v7350_v43  ;;  %v7356_v10 = vsel %vm7347_vm5, %v9821_v6, %v7352_v35  ;;  %v7357_v56 = vpack.c.bf16 %v7353_v45, %v7353_v45  ;;  %v7359_v21 = vpack.c.bf16 %v12898_v47, %v12898_v47  ;;  %v11405_v48 = vld [vmem:[#allocation12 + $0x30] sm:$0xff]   ;;  %v11406_v6 = vld [vmem:[#allocation12 + $0x78] sm:$0xff]   ;;  %9752 = vmatprep.subr.bf16.mxu1 %v12058_v62  ;;  %v11409_v42 = vld [vmem:[#allocation14 + $0x8] sm:$0xff]  }
 0x707   : > { %v7358_v38 = vpack.c.bf16 %v7354_v53, %v7354_v53  ;;  %v7360_v50 = vpack.c.bf16 %v7356_v10, %v7356_v10  ;;  %9753 = vmatpush3.bf16.msra.mxu1 %v11408_v46  ;;  %v11410_v58 = vld [vmem:[#allocation14 + $0x10] sm:$0xff]   ;;  %v11411_v41 = vld [vmem:[#allocation14 + $0x18] sm:$0xff]   ;;  %v11412_v43 = vld [vmem:[#allocation14 + $0x20] sm:$0xff]   ;;  %v7842_v10 = vstv %s9541_s0  ;;  %9768 = vmatprep.mubr.msk.bf16.mxu1 %vm12059_vm8, %v12058_v62  ;;  %v8260_v46 = vstv %s9579_s22  ;;  %s13079_s0 = sld [smem:[#allocation55_spill]]  ;;  %s11929_s22 = sshll.u32 %s12060_s1, 4  ;;  %s11930_s22 = int_to_ptr.vmem [resolvable:$false] %s11929_s22 }
 0x708   : > { %9754 = vmatprep.subr.bf16.mxu1 %v12058_v62  ;;  %v7425_v35 = vld [vmem:[#allocation23] sm:$0x3]  ;;  %s11931_s2 = scalar_lea.vmem %s11930_s22, 256  ;;  %p11932_p13 = scmp.lt.s32.totalorder %s12942_s25, %s11930_s22 }
 0x709   : > { %7789 = vmatprep.mubr.bf16.mxu0 %v7358_v38  ;;  %v7430_v45 = vrot.slane %v7425_v35, %v12699_v29  ;;  %v7434_v47 = vrot.slane %v7425_v35, %v12702_v30  ;;  %v11413_v29 = vld [vmem:[#allocation14 + $0x28] sm:$0xff]   ;;  %v11414_v30 = vld [vmem:[#allocation14 + $0x30] sm:$0xff]  }
 0x70a   : > { %7790 = vmatmul.mubr.bf16.vlgmr.msra.gmra.mrb[44].mxu0 %v7357_v56 }
 0x70b   : > { %7799 = vmatpush1.bf16.msra.mxu0 %v11344_v54  ;;  %7830 = vmatprep.mubr.bf16.mxu0 %v7360_v50 }
 0x70c   : > { %7800 = vmatprep.subr.bf16.mxu0 %v11349_v57  ;;  %9755 = vmatpush3.bf16.msra.mxu1 %v11409_v42 }
 0x70d   : > { %9756 = vmatprep.subr.bf16.mxu1 %v12058_v62 }
 0x70f   : > { %7801 = vmatpush1.bf16.msra.mxu0 %v11347_v60 }
 0x710   : > { %7802 = vmatprep.subr.bf16.mxu0 %v11352_v49  ;;  %9757 = vmatpush3.bf16.msra.mxu1 %v11410_v58 }
 0x711   : > { %9758 = vmatprep.subr.bf16.mxu1 %v12058_v62 }
 0x713   : > { %7803 = vmatpush1.bf16.msra.mxu0 %v11350_v5 }
 0x714   : > { %7804 = vmatprep.subr.bf16.mxu0 %v11355_v1  ;;  %9759 = vmatpush3.bf16.msra.mxu1 %v11411_v41 }
 0x715   : > { %9760 = vmatprep.subr.bf16.mxu1 %v12058_v62 }
 0x717   : > { %7805 = vmatpush1.bf16.msra.mxu0 %v11353_v52 }
 0x718   : > { %7806 = vmatprep.subr.bf16.mxu0 %v11358_v61  ;;  %9761 = vmatpush3.bf16.msra.mxu1 %v11412_v43 }
 0x719   : > { %9762 = vmatprep.subr.bf16.mxu1 %v12058_v62 }
 0x71b   : > { %7807 = vmatpush1.bf16.msra.mxu0 %v11356_v44  ;;  %v11415_v44 = vld [vmem:[#allocation14 + $0x38] sm:$0xff]  }
 0x71c   : > { %7808 = vmatprep.subr.bf16.mxu0 %v11361_v22  ;;  %9763 = vmatpush3.bf16.msra.mxu1 %v11413_v29  ;;  %v11416_v22 = vld [vmem:[#allocation15] sm:$0xff]  }
 0x71d   : > { %9764 = vmatprep.subr.bf16.mxu1 %v12058_v62 }
 0x71f   : > { %7809 = vmatpush1.bf16.msra.mxu0 %v11359_v20  ;;  %v11417_v20 = vld [vmem:[#allocation15 + $0x8] sm:$0xff]  }
 0x720   : > { %7810 = vmatprep.subr.bf16.mxu0 %v11364_v63  ;;  %9765 = vmatpush3.bf16.msra.mxu1 %v11414_v30  ;;  %v11418_v63 = vld [vmem:[#allocation15 + $0x10] sm:$0xff]  }
 0x721   : > { %9766 = vmatprep.subr.bf16.mxu1 %v12058_v62 }
 0x723   : > { %7811 = vmatpush1.bf16.msra.mxu0 %v11362_v0  ;;  %v11419_v0 = vld [vmem:[#allocation15 + $0x18] sm:$0xff]  }
 0x724   : > { %7812 = vmatprep.subr.bf16.mxu0 %v11367_v3  ;;  %9767 = vmatpush3.bf16.msra.mxu1 %v11415_v44  ;;  %v11420_v3 = vld [vmem:[#allocation15 + $0x20] sm:$0xff]  }
 0x725   : > { %9792 = vmatprep.subr.bf16.mxu1 %v12058_v62 }
 0x727   : > { %7813 = vmatpush1.bf16.msra.mxu0 %v11365_v4  ;;  %v11421_v4 = vld [vmem:[#allocation15 + $0x28] sm:$0xff]  }
 0x728   : > { %7814 = vmatprep.subr.bf16.mxu0 %v11370_v14 }
 0x72b   : > { %7815 = vmatpush1.bf16.msra.mxu0 %v11368_v8  ;;  %v9542_v8 = vld [vmem:[#allocation24] ss:$0 sm:$0xff] }
 0x72c   : > { %7816 = vmatprep.subr.bf16.mxu0 %v11373_v9 }
 0x72f   : > { %7817 = vmatpush1.bf16.msra.mxu0 %v11371_v25 }
 0x730   : > { %7818 = vmatprep.subr.bf16.mxu0 %v11376_v11 }
 0x733   : > { %7819 = vmatpush1.bf16.msra.mxu0 %v11374_v13  ;;  %v8026_v13 = vstv %s9559_s21  ;;  %s12940_s21 = scalar_lea.hbm %s13079_s0, %s9590_s17 }
 0x734   : > { %7820 = vmatprep.subr.bf16.mxu0 %v11379_v32 }
 0x737   : > { %7821 = vmatpush1.bf16.msra.mxu0 %v11377_v28 }
 0x738   : > { %7822 = vmatprep.subr.bf16.mxu0 %v11382_v15 }
 0x73b   : > { %7823 = vmatpush1.bf16.msra.mxu0 %v11380_v16 }
 0x73c   : > { %7824 = vmatprep.subr.bf16.mxu0 %v11385_v18 }
 0x73f   : > { %7825 = vmatpush1.bf16.msra.mxu0 %v11383_v19  ;;  %v11422_v19 = vld [vmem:[#allocation15 + $0x30] sm:$0xff]  }
 0x740   : > { %7826 = vmatprep.subr.bf16.mxu0 %v11388_v23  ;;  %v11423_v23 = vld [vmem:[#allocation15 + $0x38] sm:$0xff]  }
 0x743   : > { %7827 = vmatpush1.bf16.msra.mxu0 %v11386_v34  ;;  %v11424_v34 = vld [vmem:[#allocation17] sm:$0xff]  }
 0x744   : > { %7828 = vmatprep.subr.bf16.mxu0 %v11391_v27  ;;  %v11425_v27 = vld [vmem:[#allocation17 + $0x8] sm:$0xff]  }
 0x747   : > { %7829 = vmatpush1.bf16.msra.mxu0 %v11389_v59  ;;  %v11426_v59 = vld [vmem:[#allocation17 + $0x10] sm:$0xff]  }
 0x748   : > { %9703 = vmatprep.subr.bf16.mxu0 %v11392_v51  ;;  %v11427_v51 = vld [vmem:[#allocation17 + $0x18] sm:$0xff]  }
 0x74a   : > { %7831 = vmatmul.mubr.bf16.vlgmr.msra.gmra.mrb[44].mxu0 %v7359_v21  ;;  %v11429_v21 = vld [vmem:[#allocation17 + $0x28] sm:$0xff]  }
 0x74b   : > { %9704 = vmatpush3.bf16.msra.mxu0 %v11393_v55  ;;  %v11428_v55 = vld [vmem:[#allocation17 + $0x20] sm:$0xff]  }
 0x74c   : > { %9705 = vmatprep.subr.bf16.mxu0 %v11394_v24  ;;  %v9560_v24 = vld [vmem:[#allocation26] ss:$0 sm:$0xff] }
 0x74f   : > { %9706 = vmatpush3.bf16.msra.mxu0 %v11395_v26 }
 0x750   : > { %9707 = vmatprep.subr.bf16.mxu0 %v11396_v31  ;;  %v8143_v31 = vstv %s9569_s23  ;;  %s11925_s23 = scalar_lea.vmem %s12942_s25, 128 }
 0x751   : > { %p11926_p4 = scmp.ne.s32.totalorder %s12942_s25, %s11925_s23  ;;  %p11933_p0 = scmp.lt.s32.totalorder %s11931_s2, %s11925_s23 }
 0x753   : > { %9708 = vmatpush3.bf16.msra.mxu0 %v11397_v7  ;;  %p11927_p10 = pnand %p11926_p4, %p13080_p1  ;;  %p11934_p5 = por %p11933_p0, %p11932_p13 }
 0x754   : > { %9709 = vmatprep.subr.bf16.mxu0 %v11398_v12 }
 0x755   : > { %p11928_p3 = pneg %p11927_p10 }
 0x757   : > { %9710 = vmatpush3.bf16.msra.mxu0 %v11399_v37  ;;  %p11935_p7 = pnand %p11934_p5, %p11928_p3 }
 0x758   : > { %9711 = vmatprep.subr.bf16.mxu0 %v11400_v33 }
 0x75b   : > { %9712 = vmatpush3.bf16.msra.mxu0 %v11401_v36 }
 0x75c   : > { %9713 = vmatprep.subr.bf16.mxu0 %v11402_v39 }
 0x75f   : > { %9714 = vmatpush3.bf16.msra.mxu0 %v11403_v40 }
 0x760   : > { %9715 = vmatprep.subr.bf16.mxu0 %v11404_v2  ;;  %v11430_v2 = vld [vmem:[#allocation17 + $0x30] sm:$0xff]  }
 0x763   : > { %9716 = vmatpush3.bf16.msra.mxu0 %v11405_v48  ;;  %v11431_v48 = vld [vmem:[#allocation17 + $0x38] sm:$0xff]  }
 0x764   : > { %9717 = vmatprep.subr.bf16.mxu0 %v11406_v6  ;;  %v9570_v6 = vld [vmem:[#allocation27] ss:$0 sm:$0xff] }
 0x767   : > { %9718 = vmatpush3.bf16.msra.mxu0 %v11407_v17 }
 0x768   : > { %9772 = vmatprep.subr.bf16.mxu0 %v12058_v62 }
 0x81d   : > { %v7832_v53 = vpop.f32.mrb[44].mxu0 }
 0x81e   : > { %v9822_v38 = vadd.f32 %v7832_v53, %v7430_v45  ;;  %v7834_v54 = vpop.f32.mrb[45].mxu0 }
 0x81f   : > { %v9823_v56 = vadd.f32 %v7834_v54, %v7434_v47  ;;  %v7836_v57 = vpop.f32.mrb[46].mxu0 }
 0x820   : > { %vm7840_vm6 = vcmp.ge.f32.partialorder %v9822_v38, 0.0  ;;  %v7843_v50 = vmul.f32 %v9822_v38, %v7842_v10  ;;  %v7837_v60 = vpop.f32.mrb[47].mxu0 }
 0x821   : > { %vm7841_vm7 = vcmp.ge.f32.partialorder %v9823_v56, 0.0  ;;  %v7844_v49 = vmul.f32 %v9823_v56, %v7842_v10 }
 0x822   : > { %v7845_v5 = vsel %vm7840_vm6, %v9822_v38, %v7843_v50 }
 0x823   : > { %v7846_v1 = vsel %vm7841_vm7, %v9823_v56, %v7844_v49  ;;  %v7847_v61 = vpack.c.bf16 %v7845_v5, %v7845_v5 }
 0x824   : > { %v7848_v52 = vpack.c.bf16 %v7846_v1, %v7846_v1 }
 0x826   : > { %8016 = vmatprep.mubr.bf16.mxu0 %v7848_v52 }
 0x827   : > { %8017 = vmatmul.mubr.bf16.vlgmr.msra.gmra.mrb[48].mxu0 %v7847_v61 }
 0x828   : > { %9788 = vmatprep.mubr.msk.bf16.mxu0 %vm12059_vm8, %v12058_v62  ;;  %9773 = vmatpush3.bf16.msra.mxu0 %v11416_v22 }
 0x829   : > { %9774 = vmatprep.subr.bf16.mxu0 %v12058_v62 }
 0x82c   : > { %9775 = vmatpush3.bf16.msra.mxu0 %v11417_v20 }
 0x82d   : > { %9776 = vmatprep.subr.bf16.mxu0 %v12058_v62 }
 0x830   : > { %9777 = vmatpush3.bf16.msra.mxu0 %v11418_v63 }
 0x831   : > { %9778 = vmatprep.subr.bf16.mxu0 %v12058_v62 }
 0x834   : > { %9779 = vmatpush3.bf16.msra.mxu0 %v11419_v0 }
 0x835   : > { %9780 = vmatprep.subr.bf16.mxu0 %v12058_v62 }
 0x838   : > { %9781 = vmatpush3.bf16.msra.mxu0 %v11420_v3 }
 0x839   : > { %9782 = vmatprep.subr.bf16.mxu0 %v12058_v62 }
 0x83c   : > { %9783 = vmatpush3.bf16.msra.mxu0 %v11421_v4 }
 0x83d   : > { %9784 = vmatprep.subr.bf16.mxu0 %v12058_v62 }
 0x840   : > { %9785 = vmatpush3.bf16.msra.mxu0 %v11422_v19 }
 0x841   : > { %9786 = vmatprep.subr.bf16.mxu0 %v12058_v62 }
 0x844   : > { %9787 = vmatpush3.bf16.msra.mxu0 %v11423_v23 }
 0x8fa   : > { %v9719_v14 = vpop.f32.mrb[48].mxu0 }
 0x8fb   : > { %v9720_v9 = vpop.f32.mrb[49].mxu0 }
 0x8fc   : > { %v9721_v25 = vadd.f32 %v9720_v9, %v9719_v14  ;;  %v9722_v11 = vpop.f32.mrb[50].mxu0 }
 0x8fd   : > { %v9723_v32 = vpop.f32.mrb[51].mxu0 }
 0x8fe   : > { %v8019_v28 = vadd.f32 %v9721_v25, %v9542_v8 }
 0x900   : > { %vm8025_vm9 = vcmp.ge.f32.partialorder %v8019_v28, 0.0  ;;  %v8027_v15 = vmul.f32 %v8026_v13, %v8019_v28 }
 0x902   : > { %v8028_v16 = vsel %vm8025_vm9, %v8019_v28, %v8027_v15 }
 0x903   : > { %v8029_v18 = vpack.c.bf16 %v8028_v16, %v8028_v16 }
 0x905   : > { %9769 = vmatmul.mubr.bf16.vlgmr.msra.gmra.mrb[16].mxu1 %v8029_v18 }
 0x906   : > { %9808 = vmatprep.mubr.msk.bf16.mxu1 %vm12059_vm8, %v12058_v62  ;;  %9793 = vmatpush3.bf16.msra.mxu1 %v11424_v34 }
 0x907   : > { %9794 = vmatprep.subr.bf16.mxu1 %v12058_v62 }
 0x90a   : > { %9795 = vmatpush3.bf16.msra.mxu1 %v11425_v27 }
 0x90b   : > { %9796 = vmatprep.subr.bf16.mxu1 %v12058_v62 }
 0x90e   : > { %9797 = vmatpush3.bf16.msra.mxu1 %v11426_v59 }
 0x90f   : > { %9798 = vmatprep.subr.bf16.mxu1 %v12058_v62 }
 0x912   : > { %9799 = vmatpush3.bf16.msra.mxu1 %v11427_v51 }
 0x913   : > { %9800 = vmatprep.subr.bf16.mxu1 %v12058_v62 }
 0x916   : > { %9801 = vmatpush3.bf16.msra.mxu1 %v11428_v55 }
 0x917   : > { %9802 = vmatprep.subr.bf16.mxu1 %v12058_v62 }
 0x91a   : > { %9803 = vmatpush3.bf16.msra.mxu1 %v11429_v21 }
 0x91b   : > { %9804 = vmatprep.subr.bf16.mxu1 %v12058_v62 }
 0x91e   : > { %9805 = vmatpush3.bf16.msra.mxu1 %v11430_v2 }
 0x91f   : > { %9806 = vmatprep.subr.bf16.mxu1 %v12058_v62  ;;  %v9580_v62 = vld [vmem:[#allocation29] ss:$0 sm:$0xff] }
 0x922   : > { %9807 = vmatpush3.bf16.msra.mxu1 %v11431_v48 }
 0x9d8   : > { %v8135_v26 = vpop.f32.mrb[16].mxu1 }
 0x9d9   : > { %v8136_v7 = vadd.f32 %v9560_v24, %v8135_v26  ;;  %v9770_v12 = vpop.f32.mrb[17].mxu1 }
 0x9da   : > { %v8138_v37 = vpop.f32.mrb[18].mxu1 }
 0x9db   : > { %vm8142_vm10 = vcmp.ge.f32.partialorder %v8136_v7, 0.0  ;;  %v8144_v33 = vmul.f32 %v8143_v31, %v8136_v7  ;;  %v9771_v36 = vpop.f32.mrb[19].mxu1 }
 0x9dd   : > { %v8145_v39 = vsel %vm8142_vm10, %v8136_v7, %v8144_v33 }
 0x9de   : > { %v8146_v40 = vpack.c.bf16 %v8145_v39, %v8145_v39 }
 0x9e0   : > { %9789 = vmatmul.mubr.bf16.vlgmr.msra.gmra.mrb[52].mxu0 %v8146_v40 }
 0xab3   : > { %v8252_v17 = vpop.f32.mrb[52].mxu0 }
 0xab4   : > { %v8253_v42 = vadd.f32 %v9570_v6, %v8252_v17  ;;  %v9790_v58 = vpop.f32.mrb[53].mxu0 }
 0xab5   : > { %v8255_v41 = vpop.f32.mrb[54].mxu0 }
 0xab6   : > { %vm8259_vm11 = vcmp.ge.f32.partialorder %v8253_v42, 0.0  ;;  %v8261_v43 = vmul.f32 %v8260_v46, %v8253_v42  ;;  %v9791_v35 = vpop.f32.mrb[55].mxu0 }
 0xab8   : > { %v8262_v45 = vsel %vm8259_vm11, %v8253_v42, %v8261_v43 }
 0xab9   : > { %v8263_v47 = vpack.c.bf16 %v8262_v45, %v8262_v45 }
 0xabb   : > { %9809 = vmatmul.mubr.bf16.vlgmr.msra.gmra.mrb[20].mxu1 %v8263_v47 }
 0xb8e   : > { %v8369_v53 = vpop.f32.mrb[20].mxu1 }
 0xb8f   : > { %v8370_v10 = vadd.f32 %v9580_v62, %v8369_v53  ;;  %v9810_v38 = vpop.f32.mrb[21].mxu1 }
 0xb90   : > { %v8372_v54 = vpop.f32.mrb[22].mxu1 }
 0xb91   : > { %8375 = vst [vmem:[%s818_s19] sm:$0xff] %v8370_v10  ;;  %v9811_v56 = vpop.f32.mrb[23].mxu1 }
 0xb92   : > { %11938 = shalt.err (!%p11935_p7)
}
 0xb93   : > { %s11939_s29 = scalar_lea.hbm %s12940_s21, 128  ;;  %s11943_s28 = scalar_lea.hbm %s13079_s0, 256 }
 0xb94   : > { %p11940_p9 = scmp.ne.s32.totalorder %s12940_s21, %s11939_s29  ;;  %p11944_p11 = scmp.lt.u32.totalorder %s12940_s21, %s13079_s0 }
 0xb95   : > { %p11945_p12 = scmp.lt.u32.totalorder %s11943_s28, %s11939_s29  ;;  %p11947_p4 = scmp.lt.u32.totalorder %s11939_s29, %s12940_s21 }
 0xb96   : > { %p11941_p2 = pnand %p11940_p9, %p13080_p1 }
 0xb97   : > { %p11946_p8 = por %p11945_p12, %p11944_p11 }
 0xb98   : > { %p11942_p6 = pneg %p11941_p2 }
 0xb99   : > { %p11948_p10 = por %p11947_p4, %p11946_p8 }
 0xb9b   : > { %p11949_p3 = pnand %p11948_p10, %p11942_p6 }
 0xb9d   : > { %11952 = shalt.err (!%p11949_p3)
}
 0xb9e   : > { %9970 = dma.vmem_to_hbm [thread:$0]  (%p13080_p1), %s12942_s25, 128, %s12940_s21, %s8377_s4  }
 0xb9f PF: > { %s13081_s23 = sld [smem:[#allocation43_spill]]  ;;  %s13082_s2 = sld [smem:[#allocation46_spill]] }
 0xba0   : > { %p13083_p13 = scmp.ne.s32.totalorder %s13054_s27, 0 }
 0xba5   : > { %s8402_s17 = sand.u32 1, %s13081_s23   ;;  %p13084_p0 = scmp.ge.s32.totalorder %s13082_s2, 2 }
 0xba6   : > { %s8403_s19 = scalar_lea.sflag [#allocation4], %s8402_s17 }
 0xba7   : > { %p10029_p5 = pnand %p13084_p0, %p13083_p13 }
 0xba9   : > { %12010 = dma.done.wait (!%p10029_p5), %s8403_s19, 128  }
 0xbaa   : > { %12012 = vsyncadd (!%p10029_p5), %s8403_s19, 4294967168  ;;  %s13085_s27 = sld [smem:[#allocation44_spill]]  ;;  %s13086_s28 = sld [smem:[#allocation45_spill]] }
 0xbab   : > { %p40_p7 = scmp.ge.s32.totalorder %s12558_s30, 4   ;;  %s13087_s29 = smov %s12570_s20 }
 0xbad   :  { %42 = sbr.rel (!%p40_p7) target bundleno = 22 (0x16), region = 206 }
 0xbb4   :  { %8408 = vsyncpa [#allocation3], 1 }
 0xbb5   :  { %8410 = vsyncpa [#allocation3 + $0x1], 1 }
 0xbb6   :  { %8411 = vsyncpa [#allocation7], 1 }
 0xbb7   :  { %8412 = vsyncpa [#allocation10], 1 }
 0xbb8   :  { %8413 = vsyncpa [#allocation13], 1 }
 0xbb9   :  { %8414 = vsyncpa [#allocation16], 1 }
 0xbba   :  { %8415 = vsyncpa [#allocation19], 1 }
 0xbbb   :  { %8416 = vsyncpa [#allocation22], 1 }
 0xbbc   :  { %8417 = vsyncpa [#allocation25], 1 }
 0xbbd   :  { %8418 = vsyncpa [#allocation28], 1 }
 0xbbe   :  { %8419 = vsyncpa [#allocation4], 1 }
 0xbbf   :  { %8421 = vsyncpa [#allocation4 + $0x1], 1 }
 0xbc0   :  { %8422 = vsyncpa [#allocation5], 1 }
 0xbc1   :  { %8424 = vsyncpa [#allocation5 + $0x1], 1 }

// kernel: tpu_custom_call.1
= control target key start
LH: loop header
LB: loop body
LE: loop exit
PB: predicated region body
PF: predicated region fallthrough
CT: control target
= control target key end

     0   :  { %s12984_s0 = inlined_call_operand.hbm [shape: f32[16,32], index: 0, kind: input, shape index: {}]   ;;  %s12985_s1 = inlined_call_operand.hbm [shape: bf16[32,1280], index: 1, kind: input, shape index: {}]   ;;  %s12986_s2 = inlined_call_operand.hbm [shape: bf16[1280,896], index: 2, kind: input, shape index: {}]   ;;  %s12987_s3 = inlined_call_operand.hbm [shape: bf16[896,512], index: 3, kind: input, shape index: {}]   ;;  %s12988_s4 = inlined_call_operand.hbm [shape: bf16[512,256], index: 4, kind: input, shape index: {}]   ;;  %s12989_s5 = inlined_call_operand.hbm [shape: bf16[256,128], index: 5, kind: input, shape index: {}]   ;;  %s12990_s6 = inlined_call_operand.hbm [shape: bf16[128,128], index: 6, kind: input, shape index: {}]   ;;  %s12991_s7 = inlined_call_operand.hbm [shape: bf16[128,128], index: 7, kind: input, shape index: {}]   ;;  %s12992_s8 = inlined_call_operand.hbm [shape: bf16[128,128], index: 8, kind: input, shape index: {}]   ;;  %s12993_s9 = inlined_call_operand.hbm [shape: f32[1,1280], index: 9, kind: input, shape index: {}]   ;;  %s12994_s10 = inlined_call_operand.hbm [shape: f32[1,896], index: 10, kind: input, shape index: {}]   ;;  %s12995_s11 = inlined_call_operand.hbm [shape: f32[1,512], index: 11, kind: input, shape index: {}]   ;;  %s12996_s12 = inlined_call_operand.hbm [shape: f32[1,256], index: 12, kind: input, shape index: {}]   ;;  %s12997_s13 = inlined_call_operand.hbm [shape: f32[1,128], index: 13, kind: input, shape index: {}]   ;;  %s12998_s14 = inlined_call_operand.hbm [shape: f32[1,128], index: 14, kind: input, shape index: {}]   ;;  %s12999_s15 = inlined_call_operand.hbm [shape: f32[1,128], index: 15, kind: input, shape index: {}]   ;;  %s13000_s16 = inlined_call_operand.hbm [shape: f32[1,128], index: 16, kind: input, shape index: {}]   ;;  %s13001_s17 = inlined_call_operand.hbm [shape: f32[7], index: 17, kind: input, shape index: {}]   ;;  %s13002_s18 = inlined_call_operand.hbm [shape: f32[16,128], index: 18, kind: output, shape index: {}]  }
   0x1   :  { %13022 = sst [smem:[#allocation49_spill]] %s12984_s0 }
   0x2   :  { %13023 = sst [smem:[#allocation50_spill]] %s12985_s1 }
   0x3   :  { %13024 = sst [smem:[#allocation51_spill]] %s12986_s2 }
   0x4   :  { %13025 = sst [smem:[#allocation52_spill]] %s12987_s3 }
   0x5   :  { %13026 = sst [smem:[#allocation53_spill]] %s12988_s4 }
   0x6   :  { %13027 = sst [smem:[#allocation54_spill]] %s13001_s17 }
   0x7   :  { %13028 = sst [smem:[#allocation55_spill]] %s13002_s18 }
   0x8   :  { %23 = vsyncpa [#allocation3], 0 }
   0x9   :  { %25 = vsyncpa [#allocation3 + $0x1], 0 }
   0xa   :  { %26 = vsyncpa [#allocation7], 0 }
   0xb   :  { %27 = vsyncpa [#allocation10], 0 }
   0xc   :  { %28 = vsyncpa [#allocation13], 0 }
   0xd   :  { %29 = vsyncpa [#allocation16], 0 }
   0xe   :  { %30 = vsyncpa [#allocation19], 0 }
   0xf   :  { %31 = vsyncpa [#allocation22], 0 }
  0x10   :  { %32 = vsyncpa [#allocation25], 0 }
  0x11   :  { %33 = vsyncpa [#allocation28], 0 }
  0x12   :  { %34 = vsyncpa [#allocation5], 0 }
  0x13   :  { %35 = vsyncpa [#allocation4], 0 }
  0x14   :  { %37 = vsyncpa [#allocation4 + $0x1], 0  ;;  %s12156_s27 = smov 0   ;;  %s12158_s28 = smov 0  }
  0x15   :  { %s12160_s29 = smov 0   ;;  %s12162_s30 = smov 0  }
  0x16 LB: > { %13029 = sst [smem:[#allocation43_spill]] %s12015_s27  ;;  %s12029_s0 = smov [#allocation6]   ;;  %s12027_s30 = sphi %s12162_s30, %s12558_s30   ;;  %s12023_s29 = sphi %s12160_s29, %s13087_s29   ;;  %s12019_s28 = sphi %s12158_s28, %s13086_s28   ;;  %s12015_s27 = sphi %s12156_s27, %s13085_s27  }
  0x17   : > { %13030 = sst [smem:[#allocation44_spill]] %s12019_s28  ;;  %s469_s19 = sshll.u32 %s12029_s0, 4  ;;  %s12182_s19 = int_to_ptr.vmem [resolvable:$true] %s469_s19 }
  0x18   : > { %13031 = sst [smem:[#allocation45_spill]] %s12023_s29  ;;  %s12177_s1 = sadd.s32 4294967295, %s12027_s30  }
  0x19   : > { %13032 = sst [smem:[#allocation46_spill]] %s12027_s30  ;;  %p8625_p0 = scmp.ge.s32.totalorder %s12027_s30, 1 }
  0x1a   : > { %13033 = sst [smem:[#allocation47_spill]] %s12177_s1  ;;  %p13016_p1 = scmp.eq.s32.totalorder %s12177_s1, 0 }
  0x1b   : > { %p457_p2 = scmp.lt.s32.totalorder %s12027_s30, 3  ;;  %s12030_s21 = smov [#allocation9]  }
  0x1c   : > { %s495_s22 = sshll.u32 %s12030_s21, 4  ;;  %s12031_s23 = smov [#allocation12]   ;;  %s12197_s22 = int_to_ptr.vmem [resolvable:$true] %s495_s22 }
  0x1d   : > { %p12184_p3 = pnand %p8625_p0, %p457_p2  ;;  %s12199_s24 = sshll.u32 %s12031_s23, 4  ;;  %s522_s24 = int_to_ptr.vmem [resolvable:$true] %s12199_s24 }
  0x1e   : > { %s13037_s0 = sld [smem:[#allocation50_spill]] }
  0x1f   : > { %s13034_s20 = scalar_select %p12184_p3, 1, 0 }
  0x20   : > { %p9972_p5 = pneg %p12184_p3 }
  0x21   : > { %13035 = sst [smem:[#allocation48_spill]] %s13034_s20 }
  0x22   : > { %p12193_p6 = pnand %p9972_p5, %p13016_p1 }
  0x24   : > { %s11434_s18 = scalar_lea.hbm %s13037_s0, 2560  ;;  %p12209_p8 = pneg %p12193_p6 }
  0x25   : > { %p11435_p7 = scmp.ne.s32.totalorder %s13037_s0, %s11434_s18  ;;  %p11441_p11 = scmp.lt.u32.totalorder %s11434_s18, %s13037_s0 }
  0x27   : > { %p11437_p9 = pnand %p12209_p8, %p11435_p7 }
  0x29   : > { %p11438_p10 = pneg %p11437_p9 }
  0x2b   : > { %p11443_p12 = pnand %p11441_p11, %p11438_p10 }
  0x2d   : > { %11446 = shalt.err (!%p11443_p12)
}
  0x2e   : > { %s11447_s27 = scalar_lea.vmem %s12182_s19, 2560  ;;  %p11455_p5 = scmp.lt.s32.totalorder %s12182_s19, %s12182_s19 }
  0x2f   : > { %p11448_p13 = scmp.ne.s32.totalorder %s12182_s19, %s11447_s27  ;;  %p11456_p4 = scmp.lt.s32.totalorder %s11447_s27, %s11447_s27 }
  0x31   : > { %p11450_p0 = pnand %p11448_p13, %p12209_p8  ;;  %p11457_p7 = por %p11456_p4, %p11455_p5 }
  0x33   : > { %p11451_p2 = pneg %p11450_p0 }
  0x35   : > { %p11458_p9 = pnand %p11457_p7, %p11451_p2 }
  0x37   : > { %11461 = shalt.err (!%p11458_p9)
}
  0x38   : > { %s12032_s20 = smov 640   ;;  %s12033_s18 = smov 40  }
  0x39   : > { %9975 = dma.hbm_to_vmem [thread:$0]  (!%p12193_p6), %s13037_s0, 2560, %s12182_s19, [#allocation7], %s12032_s20, %s12032_s20, %s12033_s18  }
  0x3a   : > { %s13039_s3 = sld [smem:[#allocation52_spill]] }
  0x40   : > { %s11462_s28 = scalar_lea.hbm %s13039_s3, 28672 }
  0x41   : > { %p11463_p4 = scmp.ne.s32.totalorder %s13039_s3, %s11462_s28  ;;  %p11469_p12 = scmp.lt.u32.totalorder %s11462_s28, %s13039_s3 }
  0x43   : > { %p11465_p10 = pnand %p11463_p4, %p12209_p8 }
  0x45   : > { %p11466_p11 = pneg %p11465_p10 }
  0x47   : > { %p11471_p13 = pnand %p11469_p12, %p11466_p11 }
  0x49   : > { %11474 = shalt.err (!%p11471_p13)
}
  0x4a   : > { %s11475_s19 = scalar_lea.vmem %s12197_s22, 28672  ;;  %p11483_p7 = scmp.lt.s32.totalorder %s12197_s22, %s12197_s22 }
  0x4b   : > { %p11476_p0 = scmp.ne.s32.totalorder %s12197_s22, %s11475_s19  ;;  %p11484_p9 = scmp.lt.s32.totalorder %s11475_s19, %s11475_s19 }
  0x4d   : > { %p11478_p2 = pnand %p11476_p0, %p12209_p8  ;;  %p11485_p4 = por %p11484_p9, %p11483_p7 }
  0x4f   : > { %p11479_p5 = pneg %p11478_p2 }
  0x51   : > { %p11486_p10 = pnand %p11485_p4, %p11479_p5 }
  0x53   : > { %11489 = shalt.err (!%p11486_p10)
}
  0x54   : > { %s12034_s29 = smov 256   ;;  %s12035_s17 = smov 16  }
  0x55   : > { %9981 = dma.hbm_to_vmem [thread:$0]  (!%p12193_p6), %s13039_s3, 28672, %s12197_s22, [#allocation10], %s12034_s29, %s12034_s29, %s12035_s17  }
  0x56   : > { %s11490_s1 = scalar_lea.hbm %s12989_s5, 2048 }
  0x57   : > { %p11491_p11 = scmp.ne.s32.totalorder %s12989_s5, %s11490_s1  ;;  %p11497_p0 = scmp.lt.u32.totalorder %s11490_s1, %s12989_s5 }
  0x59   : > { %p11493_p12 = pnand %p11491_p11, %p12209_p8 }
  0x5b   : > { %p11494_p13 = pneg %p11493_p12 }
  0x5d   : > { %p11499_p2 = pnand %p11497_p0, %p11494_p13 }
  0x5f   : > { %11502 = shalt.err (!%p11499_p2)
}
  0x60   : > { %s11503_s19 = scalar_lea.vmem %s522_s24, 2048  ;;  %p11511_p4 = scmp.lt.s32.totalorder %s522_s24, %s522_s24 }
  0x61   : > { %p11504_p5 = scmp.ne.s32.totalorder %s522_s24, %s11503_s19  ;;  %p11512_p10 = scmp.lt.s32.totalorder %s11503_s19, %s11503_s19 }
  0x63   : > { %p11506_p7 = pnand %p11504_p5, %p12209_p8  ;;  %p11513_p1 = por %p11512_p10, %p11511_p4 }
  0x65   : > { %p11507_p9 = pneg %p11506_p7 }
  0x67   : > { %p11514_p3 = pnand %p11513_p1, %p11507_p9 }
  0x69   : > { %11517 = shalt.err (!%p11514_p3)
}
  0x6a   : > { %s13019_s22 = smov 64   ;;  %s12037_s29 = smov 4  }
  0x6b   : > { %9987 = dma.hbm_to_vmem [thread:$0]  (!%p12193_p6), %s12989_s5, 2048, %s522_s24, [#allocation13], %s13019_s22, %s13019_s22, %s12037_s29  }
  0x6c   : > { %s12038_s30 = smov [#allocation15]   ;;  %s12039_s18 = smov [#allocation18]  }
  0x6d   : > { %s547_s20 = sshll.u32 %s12038_s30, 4  ;;  %s574_s1 = sshll.u32 %s12039_s18, 4  ;;  %s548_s20 = int_to_ptr.vmem [resolvable:$true] %s547_s20  ;;  %s575_s1 = int_to_ptr.vmem [resolvable:$true] %s574_s1 }
  0x6e   : > { %s11518_s23 = scalar_lea.hbm %s12991_s7, 1024 }
  0x6f   : > { %p11519_p1 = scmp.ne.s32.totalorder %s12991_s7, %s11518_s23  ;;  %p11525_p12 = scmp.lt.u32.totalorder %s11518_s23, %s12991_s7 }
  0x71   : > { %p11521_p3 = pnand %p11519_p1, %p12209_p8 }
  0x73   : > { %p11522_p11 = pneg %p11521_p3 }
  0x75   : > { %p11527_p13 = pnand %p11525_p12, %p11522_p11 }
  0x77   : > { %11530 = shalt.err (!%p11527_p13)
}
  0x78   : > { %s11531_s24 = scalar_lea.vmem %s548_s20, 1024  ;;  %p11539_p7 = scmp.lt.s32.totalorder %s548_s20, %s548_s20 }
  0x79   : > { %p11532_p0 = scmp.ne.s32.totalorder %s548_s20, %s11531_s24  ;;  %p11540_p9 = scmp.lt.s32.totalorder %s11531_s24, %s11531_s24 }
  0x7b   : > { %p11534_p2 = pnand %p11532_p0, %p12209_p8  ;;  %p11541_p4 = por %p11540_p9, %p11539_p7 }
  0x7d   : > { %p11535_p5 = pneg %p11534_p2 }
  0x7f   : > { %p11542_p10 = pnand %p11541_p4, %p11535_p5 }
  0x81   : > { %11545 = shalt.err (!%p11542_p10)
}
  0x82   : > { %9993 = dma.hbm_to_vmem [thread:$0]  (!%p12193_p6), %s12991_s7, 1024, %s548_s20, [#allocation16], %s13019_s22, %s13019_s22, %s12037_s29  }
  0x83   : > { %s11546_s30 = scalar_lea.hbm %s12993_s9, 160 }
  0x84   : > { %p11547_p1 = scmp.ne.s32.totalorder %s12993_s9, %s11546_s30  ;;  %p11553_p12 = scmp.lt.u32.totalorder %s11546_s30, %s12993_s9 }
  0x86   : > { %p11549_p3 = pnand %p11547_p1, %p12209_p8 }
  0x88   : > { %p11550_p11 = pneg %p11549_p3 }
  0x8a   : > { %p11555_p13 = pnand %p11553_p12, %p11550_p11 }
  0x8c   : > { %11558 = shalt.err (!%p11555_p13)
}
  0x8d   : > { %s11559_s27 = scalar_lea.vmem %s575_s1, 160  ;;  %p11567_p7 = scmp.lt.s32.totalorder %s575_s1, %s575_s1 }
  0x8e   : > { %p11560_p0 = scmp.ne.s32.totalorder %s575_s1, %s11559_s27  ;;  %p11568_p9 = scmp.lt.s32.totalorder %s11559_s27, %s11559_s27 }
  0x90   : > { %p11562_p2 = pnand %p11560_p0, %p12209_p8  ;;  %p11569_p4 = por %p11568_p9, %p11567_p7 }
  0x92   : > { %p11563_p5 = pneg %p11562_p2 }
  0x94   : > { %p11570_p10 = pnand %p11569_p4, %p11563_p5 }
  0x96   : > { %11573 = shalt.err (!%p11570_p10)
}
  0x97   : > { %9999 = dma.hbm_to_vmem [thread:$0]  (!%p12193_p6), %s12993_s9, 160, %s575_s1, [#allocation19]  }
  0x98   : > { %s12040_s24 = smov [#allocation21]   ;;  %s12041_s0 = smov [#allocation24]  }
  0x99   : > { %s596_s3 = sshll.u32 %s12040_s24, 4  ;;  %s618_s17 = sshll.u32 %s12041_s0, 4  ;;  %s597_s3 = int_to_ptr.vmem [resolvable:$true] %s596_s3  ;;  %s619_s17 = int_to_ptr.vmem [resolvable:$true] %s618_s17 }
  0x9a   : > { %s11574_s18 = scalar_lea.hbm %s12995_s11, 64 }
  0x9b   : > { %p11575_p1 = scmp.ne.s32.totalorder %s12995_s11, %s11574_s18  ;;  %p11581_p12 = scmp.lt.u32.totalorder %s11574_s18, %s12995_s11 }
  0x9d   : > { %p11577_p3 = pnand %p11575_p1, %p12209_p8 }
  0x9f   : > { %p11578_p11 = pneg %p11577_p3 }
  0xa1   : > { %p11583_p13 = pnand %p11581_p12, %p11578_p11 }
  0xa3   : > { %11586 = shalt.err (!%p11583_p13)
}
  0xa4   : > { %s11587_s1 = scalar_lea.vmem %s597_s3, 64  ;;  %p11595_p7 = scmp.lt.s32.totalorder %s597_s3, %s597_s3 }
  0xa5   : > { %p11588_p0 = scmp.ne.s32.totalorder %s597_s3, %s11587_s1  ;;  %p11596_p9 = scmp.lt.s32.totalorder %s11587_s1, %s11587_s1 }
  0xa7   : > { %p11590_p2 = pnand %p11588_p0, %p12209_p8  ;;  %p11597_p4 = por %p11596_p9, %p11595_p7 }
  0xa9   : > { %p11591_p5 = pneg %p11590_p2 }
  0xab   : > { %p11598_p10 = pnand %p11597_p4, %p11591_p5 }
  0xad   : > { %11601 = shalt.err (!%p11598_p10)
}
  0xae   : > { %10005 = dma.hbm_to_vmem [thread:$0]  (!%p12193_p6), %s12995_s11, 64, %s597_s3, [#allocation22]  }
  0xaf   : > { %s11602_s28 = scalar_lea.hbm %s12997_s13, 16 }
  0xb0   : > { %p11603_p1 = scmp.ne.s32.totalorder %s12997_s13, %s11602_s28  ;;  %p11609_p12 = scmp.lt.u32.totalorder %s11602_s28, %s12997_s13 }
  0xb2   : > { %p11605_p3 = pnand %p11603_p1, %p12209_p8 }
  0xb4   : > { %p11606_p11 = pneg %p11605_p3 }
  0xb6   : > { %p11611_p13 = pnand %p11609_p12, %p11606_p11 }
  0xb8   : > { %11614 = shalt.err (!%p11611_p13)
}
  0xb9   : > { %s11615_s23 = scalar_lea.vmem %s619_s17, 16  ;;  %s11622_s3 = scalar_lea.vmem %s619_s17, 32 }
  0xba   : > { %p11616_p0 = scmp.ne.s32.totalorder %s619_s17, %s11615_s23  ;;  %p11623_p7 = scmp.lt.s32.totalorder %s619_s17, %s619_s17 }
  0xbb   : > { %p11624_p9 = scmp.lt.s32.totalorder %s11622_s3, %s11615_s23 }
  0xbc   : > { %p11618_p2 = pnand %p11616_p0, %p12209_p8 }
  0xbd   : > { %p11625_p4 = por %p11624_p9, %p11623_p7 }
  0xbe   : > { %p11619_p5 = pneg %p11618_p2 }
  0xc0   : > { %p11626_p10 = pnand %p11625_p4, %p11619_p5 }
  0xc2   : > { %11629 = shalt.err (!%p11626_p10)
}
  0xc3   : > { %10011 = dma.hbm_to_vmem [thread:$0]  (!%p12193_p6), %s12997_s13, 16, %s619_s17, [#allocation25]  }
  0xc4   : > { %s12042_s20 = smov [#allocation27]   ;;  %s12043_s24 = smov [#allocation8]  }
  0xc5   : > { %s640_s19 = sshll.u32 %s12042_s20, 4  ;;  %s482_s0 = sshll.u32 %s12043_s24, 4  ;;  %s641_s19 = int_to_ptr.vmem [resolvable:$true] %s640_s19  ;;  %s483_s0 = int_to_ptr.vmem [resolvable:$true] %s482_s0 }
  0xc6   : > { %s11630_s18 = scalar_lea.hbm %s12999_s15, 16 }
  0xc7   : > { %p11631_p1 = scmp.ne.s32.totalorder %s12999_s15, %s11630_s18  ;;  %p11637_p12 = scmp.lt.u32.totalorder %s11630_s18, %s12999_s15 }
  0xc9   : > { %p11633_p3 = pnand %p11631_p1, %p12209_p8 }
  0xcb   : > { %p11634_p11 = pneg %p11633_p3 }
  0xcd   : > { %p11639_p13 = pnand %p11637_p12, %p11634_p11 }
  0xcf   : > { %11642 = shalt.err (!%p11639_p13)
}
  0xd0   : > { %s11643_s17 = scalar_lea.vmem %s641_s19, 16  ;;  %s11650_s27 = scalar_lea.vmem %s641_s19, 32 }
  0xd1   : > { %p11644_p0 = scmp.ne.s32.totalorder %s641_s19, %s11643_s17  ;;  %p11651_p7 = scmp.lt.s32.totalorder %s641_s19, %s641_s19 }
  0xd2   : > { %p11652_p9 = scmp.lt.s32.totalorder %s11650_s27, %s11643_s17 }
  0xd3   : > { %p11646_p2 = pnand %p11644_p0, %p12209_p8 }
  0xd4   : > { %p11653_p4 = por %p11652_p9, %p11651_p7 }
  0xd5   : > { %p11647_p5 = pneg %p11646_p2 }
  0xd7   : > { %p11654_p10 = pnand %p11653_p4, %p11647_p5 }
  0xd9   : > { %11657 = shalt.err (!%p11654_p10)
}
  0xda   : > { %10017 = dma.hbm_to_vmem [thread:$0]  (!%p12193_p6), %s12999_s15, 16, %s641_s19, [#allocation28]  }
  0xdb   : > { %s13040_s30 = sld [smem:[#allocation51_spill]] }
  0xe1   : > { %s13041_s18 = smov %s13040_s30  ;;  %s11658_s25 = scalar_lea.hbm %s13040_s30, 71680 }
  0xe2   : > { %p11659_p1 = scmp.ne.s32.totalorder %s13041_s18, %s11658_s25  ;;  %p11665_p12 = scmp.lt.u32.totalorder %s11658_s25, %s13041_s18 }
  0xe4   : > { %p11661_p3 = pnand %p11659_p1, %p12209_p8 }
  0xe6   : > { %p11662_p11 = pneg %p11661_p3 }
  0xe8   : > { %p11667_p13 = pnand %p11665_p12, %p11662_p11 }
  0xea   : > { %11670 = shalt.err (!%p11667_p13)
}
  0xeb   : > { %s11671_s27 = scalar_lea.vmem %s483_s0, 71680  ;;  %p11679_p7 = scmp.lt.s32.totalorder %s483_s0, %s483_s0 }
  0xec   : > { %p11672_p0 = scmp.ne.s32.totalorder %s483_s0, %s11671_s27  ;;  %p11680_p9 = scmp.lt.s32.totalorder %s11671_s27, %s11671_s27 }
  0xee   : > { %p11674_p2 = pnand %p11672_p0, %p12209_p8  ;;  %p11681_p4 = por %p11680_p9, %p11679_p7 }
  0xf0   : > { %p11675_p5 = pneg %p11674_p2 }
  0xf2   : > { %p11682_p10 = pnand %p11681_p4, %p11675_p5 }
  0xf4   : > { %11685 = shalt.err (!%p11682_p10)
}
  0xf5   : > { %s12044_s19 = smov 448   ;;  %s12045_s1 = smov 28  }
  0xf6   : > { %9978 = dma.hbm_to_vmem [thread:$0]  (!%p12193_p6), %s13041_s18, 71680, %s483_s0, [#allocation7], %s12044_s19, %s12044_s19, %s12045_s1  }
  0xf7   : > { %s12046_s28 = smov [#allocation11]   ;;  %s13042_s4 = sld [smem:[#allocation53_spill]] }
  0xf8   : > { %s508_s30 = sshll.u32 %s12046_s28, 4  ;;  %s509_s30 = int_to_ptr.vmem [resolvable:$true] %s508_s30 }
  0xfd   : > { %s11686_s23 = scalar_lea.hbm %s13042_s4, 8192 }
  0xfe   : > { %p11687_p1 = scmp.ne.s32.totalorder %s13042_s4, %s11686_s23  ;;  %p11693_p12 = scmp.lt.u32.totalorder %s11686_s23, %s13042_s4 }
 0x100   : > { %p11689_p3 = pnand %p11687_p1, %p12209_p8 }
 0x102   : > { %p11690_p11 = pneg %p11689_p3 }
 0x104   : > { %p11695_p13 = pnand %p11693_p12, %p11690_p11 }
 0x106   : > { %11698 = shalt.err (!%p11695_p13)
}
 0x107   : > { %s11699_s0 = scalar_lea.vmem %s509_s30, 8192  ;;  %p11707_p7 = scmp.lt.s32.totalorder %s509_s30, %s509_s30 }
 0x108   : > { %p11700_p0 = scmp.ne.s32.totalorder %s509_s30, %s11699_s0  ;;  %p11708_p9 = scmp.lt.s32.totalorder %s11699_s0, %s11699_s0 }
 0x10a   : > { %p11702_p2 = pnand %p11700_p0, %p12209_p8  ;;  %p11709_p4 = por %p11708_p9, %p11707_p7 }
 0x10c   : > { %p11703_p5 = pneg %p11702_p2 }
 0x10e   : > { %p11710_p10 = pnand %p11709_p4, %p11703_p5 }
 0x110   : > { %11713 = shalt.err (!%p11710_p10)
}
 0x111   : > { %s12047_s19 = smov 128   ;;  %s12048_s1 = smov 8  }
 0x112   : > { %9984 = dma.hbm_to_vmem [thread:$0]  (!%p12193_p6), %s13042_s4, 8192, %s509_s30, [#allocation10], %s12047_s19, %s12047_s19, %s12048_s1  }
 0x113   : > { %s12049_s24 = smov [#allocation14]   ;;  %s12050_s25 = smov [#allocation17]  }
 0x114   : > { %s534_s28 = sshll.u32 %s12049_s24, 4  ;;  %s560_s26 = sshll.u32 %s12050_s25, 4  ;;  %s535_s28 = int_to_ptr.vmem [resolvable:$true] %s534_s28  ;;  %s12404_s26 = int_to_ptr.vmem [resolvable:$true] %s560_s26 }
 0x115   : > { %s11714_s17 = scalar_lea.hbm %s12990_s6, 1024 }
 0x116   : > { %p11715_p1 = scmp.ne.s32.totalorder %s12990_s6, %s11714_s17  ;;  %p11721_p12 = scmp.lt.u32.totalorder %s11714_s17, %s12990_s6 }
 0x118   : > { %p11717_p3 = pnand %p11715_p1, %p12209_p8 }
 0x11a   : > { %p11718_p11 = pneg %p11717_p3 }
 0x11c   : > { %p11723_p13 = pnand %p11721_p12, %p11718_p11 }
 0x11e   : > { %11726 = shalt.err (!%p11723_p13)
}
 0x11f   : > { %s11727_s19 = scalar_lea.vmem %s535_s28, 1024  ;;  %p11735_p7 = scmp.lt.s32.totalorder %s535_s28, %s535_s28 }
 0x120   : > { %p11728_p0 = scmp.ne.s32.totalorder %s535_s28, %s11727_s19  ;;  %p11736_p9 = scmp.lt.s32.totalorder %s11727_s19, %s11727_s19 }
 0x122   : > { %p11730_p2 = pnand %p11728_p0, %p12209_p8  ;;  %p11737_p4 = por %p11736_p9, %p11735_p7 }
 0x124   : > { %p11731_p5 = pneg %p11730_p2 }
 0x126   : > { %p11738_p10 = pnand %p11737_p4, %p11731_p5 }
 0x128   : > { %11741 = shalt.err (!%p11738_p10)
}
 0x129   : > { %s13043_s1 = smov 64   ;;  %s11742_s3 = scalar_lea.hbm %s12992_s8, 1024 }
 0x12a   : > { %9990 = dma.hbm_to_vmem [thread:$0]  (!%p12193_p6), %s12990_s6, 1024, %s535_s28, [#allocation13], %s13043_s1, %s13043_s1, %s12037_s29  }
 0x12b   : > { %p11743_p1 = scmp.ne.s32.totalorder %s12992_s8, %s11742_s3  ;;  %p11749_p12 = scmp.lt.u32.totalorder %s11742_s3, %s12992_s8 }
 0x12d   : > { %p11745_p3 = pnand %p11743_p1, %p12209_p8 }
 0x12f   : > { %p11746_p11 = pneg %p11745_p3 }
 0x131   : > { %p11751_p13 = pnand %p11749_p12, %p11746_p11 }
 0x133   : > { %11754 = shalt.err (!%p11751_p13)
}
 0x134   : > { %s11755_s28 = scalar_lea.vmem %s12404_s26, 1024  ;;  %p11763_p7 = scmp.lt.s32.totalorder %s12404_s26, %s12404_s26 }
 0x135   : > { %p11756_p0 = scmp.ne.s32.totalorder %s12404_s26, %s11755_s28  ;;  %p11764_p9 = scmp.lt.s32.totalorder %s11755_s28, %s11755_s28 }
 0x137   : > { %p11758_p2 = pnand %p11756_p0, %p12209_p8  ;;  %p11765_p4 = por %p11764_p9, %p11763_p7 }
 0x139   : > { %p11759_p5 = pneg %p11758_p2 }
 0x13b   : > { %p11766_p10 = pnand %p11765_p4, %p11759_p5 }
 0x13d   : > { %11769 = shalt.err (!%p11766_p10)
}
 0x13e   : > { %9996 = dma.hbm_to_vmem [thread:$0]  (!%p12193_p6), %s12992_s8, 1024, %s12404_s26, [#allocation16], %s13043_s1, %s13043_s1, %s12037_s29  }
 0x13f   : > { %s12051_s20 = smov [#allocation20]   ;;  %s12052_s25 = smov [#allocation23]  }
 0x140   : > { %s585_s24 = sshll.u32 %s12051_s20, 4  ;;  %s607_s23 = sshll.u32 %s12052_s25, 4  ;;  %s586_s24 = int_to_ptr.vmem [resolvable:$true] %s585_s24  ;;  %s12453_s23 = int_to_ptr.vmem [resolvable:$true] %s607_s23 }
 0x141   : > { %s11770_s27 = scalar_lea.hbm %s12994_s10, 112 }
 0x142   : > { %p11771_p1 = scmp.ne.s32.totalorder %s12994_s10, %s11770_s27  ;;  %p11777_p12 = scmp.lt.u32.totalorder %s11770_s27, %s12994_s10 }
 0x144   : > { %p11773_p3 = pnand %p11771_p1, %p12209_p8 }
 0x146   : > { %p11774_p11 = pneg %p11773_p3 }
 0x148   : > { %p11779_p13 = pnand %p11777_p12, %p11774_p11 }
 0x14a   : > { %11782 = shalt.err (!%p11779_p13)
}
 0x14b   : > { %s11783_s26 = scalar_lea.vmem %s586_s24, 112  ;;  %s11790_s1 = scalar_lea.vmem %s586_s24, 128 }
 0x14c   : > { %p11784_p0 = scmp.ne.s32.totalorder %s586_s24, %s11783_s26  ;;  %p11791_p7 = scmp.lt.s32.totalorder %s586_s24, %s586_s24 }
 0x14d   : > { %p11792_p9 = scmp.lt.s32.totalorder %s11790_s1, %s11783_s26 }
 0x14e   : > { %p11786_p2 = pnand %p11784_p0, %p12209_p8 }
 0x14f   : > { %p11793_p4 = por %p11792_p9, %p11791_p7 }
 0x150   : > { %p11787_p5 = pneg %p11786_p2 }
 0x152   : > { %p11794_p10 = pnand %p11793_p4, %p11787_p5 }
 0x154   : > { %11797 = shalt.err (!%p11794_p10)
}
 0x155   : > { %10002 = dma.hbm_to_vmem [thread:$0]  (!%p12193_p6), %s12994_s10, 112, %s586_s24, [#allocation19]  }
 0x156   : > { %s11798_s3 = scalar_lea.hbm %s12996_s12, 32 }
 0x157   : > { %p11799_p1 = scmp.ne.s32.totalorder %s12996_s12, %s11798_s3  ;;  %p11805_p12 = scmp.lt.u32.totalorder %s11798_s3, %s12996_s12 }
 0x159   : > { %p11801_p3 = pnand %p11799_p1, %p12209_p8 }
 0x15b   : > { %p11802_p11 = pneg %p11801_p3 }
 0x15d   : > { %p11807_p13 = pnand %p11805_p12, %p11802_p11 }
 0x15f   : > { %11810 = shalt.err (!%p11807_p13)
}
 0x160   : > { %s11811_s24 = scalar_lea.vmem %s12453_s23, 32  ;;  %p11819_p7 = scmp.lt.s32.totalorder %s12453_s23, %s12453_s23 }
 0x161   : > { %p11812_p0 = scmp.ne.s32.totalorder %s12453_s23, %s11811_s24  ;;  %p11820_p9 = scmp.lt.s32.totalorder %s11811_s24, %s11811_s24 }
 0x163   : > { %p11814_p2 = pnand %p11812_p0, %p12209_p8  ;;  %p11821_p4 = por %p11820_p9, %p11819_p7 }
 0x165   : > { %p11815_p5 = pneg %p11814_p2 }
 0x167   : > { %p11822_p10 = pnand %p11821_p4, %p11815_p5 }
 0x169   : > { %11825 = shalt.err (!%p11822_p10)
}
 0x16a   : > { %10008 = dma.hbm_to_vmem [thread:$0]  (!%p12193_p6), %s12996_s12, 32, %s12453_s23, [#allocation22]  }
 0x16b   : > { %s12053_s26 = smov [#allocation26]   ;;  %s12054_s30 = smov [#allocation29]  }
 0x16c   : > { %s629_s1 = sshll.u32 %s12053_s26, 4  ;;  %s651_s19 = sshll.u32 %s12054_s30, 4  ;;  %s630_s1 = int_to_ptr.vmem [resolvable:$true] %s629_s1  ;;  %s12496_s19 = int_to_ptr.vmem [resolvable:$true] %s651_s19 }
 0x16d   : > { %s11826_s3 = scalar_lea.hbm %s12998_s14, 16 }
 0x16e   : > { %p11827_p1 = scmp.ne.s32.totalorder %s12998_s14, %s11826_s3  ;;  %p11833_p12 = scmp.lt.u32.totalorder %s11826_s3, %s12998_s14 }
 0x170   : > { %p11829_p3 = pnand %p11827_p1, %p12209_p8 }
 0x172   : > { %p11830_p11 = pneg %p11829_p3 }
 0x174   : > { %p11835_p13 = pnand %p11833_p12, %p11830_p11 }
 0x176   : > { %11838 = shalt.err (!%p11835_p13)
}
 0x177   : > { %s11839_s22 = scalar_lea.vmem %s630_s1, 16  ;;  %s11846_s24 = scalar_lea.vmem %s630_s1, 32 }
 0x178   : > { %p11840_p0 = scmp.ne.s32.totalorder %s630_s1, %s11839_s22  ;;  %p11847_p7 = scmp.lt.s32.totalorder %s630_s1, %s630_s1 }
 0x179   : > { %p11848_p9 = scmp.lt.s32.totalorder %s11846_s24, %s11839_s22 }
 0x17a   : > { %p11842_p2 = pnand %p11840_p0, %p12209_p8 }
 0x17b   : > { %p11849_p4 = por %p11848_p9, %p11847_p7 }
 0x17c   : > { %p11843_p5 = pneg %p11842_p2 }
 0x17e   : > { %p11850_p10 = pnand %p11849_p4, %p11843_p5 }
 0x180   : > { %11853 = shalt.err (!%p11850_p10)
}
 0x181   : > { %10014 = dma.hbm_to_vmem [thread:$0]  (!%p12193_p6), %s12998_s14, 16, %s630_s1, [#allocation25]  }
 0x182   : > { %s11854_s20 = scalar_lea.hbm %s13000_s16, 16 }
 0x183   : > { %p11855_p1 = scmp.ne.s32.totalorder %s13000_s16, %s11854_s20  ;;  %p11861_p12 = scmp.lt.u32.totalorder %s11854_s20, %s13000_s16 }
 0x185   : > { %p11857_p3 = pnand %p11855_p1, %p12209_p8 }
 0x187   : > { %p11858_p11 = pneg %p11857_p3 }
 0x189   : > { %p11863_p13 = pnand %p11861_p12, %p11858_p11 }
 0x18b   : > { %11866 = shalt.err (!%p11863_p13)
}
 0x18c   : > { %s11867_s1 = scalar_lea.vmem %s12496_s19, 16  ;;  %s11874_s0 = scalar_lea.vmem %s12496_s19, 32 }
 0x18d   : > { %p11868_p0 = scmp.ne.s32.totalorder %s12496_s19, %s11867_s1  ;;  %p11875_p7 = scmp.lt.s32.totalorder %s12496_s19, %s12496_s19 }
 0x18e   : > { %p11876_p9 = scmp.lt.s32.totalorder %s11874_s0, %s11867_s1 }
 0x18f   : > { %p11870_p2 = pnand %p11868_p0, %p12209_p8 }
 0x190   : > { %p11877_p4 = por %p11876_p9, %p11875_p7 }
 0x191   : > { %p11871_p5 = pneg %p11870_p2 }
 0x193   : > { %p11878_p10 = pnand %p11877_p4, %p11871_p5 }
 0x195   : > { %11881 = shalt.err (!%p11878_p10)
}
 0x196   : > { %10020 = dma.hbm_to_vmem [thread:$0]  (!%p12193_p6), %s13000_s16, 16, %s12496_s19, [#allocation28]  }
 0x197   : > { %s13044_s29 = sld [smem:[#allocation54_spill]] }
 0x19d   : > { %s13045_s26 = smov %s13044_s29  ;;  %s11882_s30 = scalar_lea.hbm %s13044_s29, 16 }
 0x19e   : > { %p11883_p1 = scmp.ne.s32.totalorder %s13045_s26, %s11882_s30  ;;  %p11889_p12 = scmp.lt.u32.totalorder %s11882_s30, %s13045_s26 }
 0x1a0   : > { %p11885_p3 = pnand %p11883_p1, %p12209_p8 }
 0x1a2   : > { %p11886_p11 = pneg %p11885_p3 }
 0x1a4   : > { %p11891_p13 = pnand %p11889_p12, %p11886_p11 }
 0x1a6   : > { %11894 = shalt.err (!%p11891_p13)
}
 0x1a7   : > { %s12055_s27 = smov [#allocation30]   ;;  %s13046_s0 = sld [smem:[#allocation46_spill]] }
 0x1a8   : > { %s13047_s23 = sld [smem:[#allocation45_spill]]  ;;  %s13048_s22 = sld [smem:[#allocation44_spill]] }
 0x1a9   : > { %s13049_s21 = sld [smem:[#allocation43_spill]]  ;;  %s13050_s24 = sld [smem:[#allocation47_spill]] }
 0x1aa   : > { %10023 = dma.hbm_to_smem (!%p12193_p6), %s13045_s26, 16, %s12055_s27, [#allocation5]  }
 0x1ad   : > { %s8624_s28 = sadd.s32 4294967294, %s13046_s0   ;;  %s12558_s30 = sadd.s32 1, %s13046_s0  }
 0x1ae   : > { %s50_s2 = sadd.s32 1, %s13047_s23  ;;  %s47_s29 = ssub.s32 %s13046_s0, %s12558_s30 }
 0x1af   : > { %p57_p8 = scmp.ne.s32.totalorder %s13047_s23, %s13048_s22  ;;  %p48_p0 = scmp.eq.s32.totalorder %s47_s29, 0 }
 0x1b0   : > { %p58_p2 = scmp.eq.s32.totalorder %s13046_s0, 0  ;;  %p63_p5 = scmp.ne.s32.totalorder %s13048_s22, %s13049_s21 }
 0x1b1   : > { %p444_p7 = scmp.eq.s32.totalorder %s13050_s24, 1  ;;  %p13051_p4 = scmp.eq.s32.totalorder %s13050_s24, 0 }
 0x1b2   : > { %s12570_s20 = scalar_select %p48_p0, %s13047_s23, %s50_s2  }
 0x1b3   : > { %p59_p9 = por %p58_p2, %p57_p8  ;;  %p12574_p10 = por %p13051_p4, %p63_p5 }
 0x1b4   : > { %p12578_p6 = por %p444_p7, %p57_p8  ;;  %p450_p1 = scmp.eq.s32.totalorder %s8624_s28, 1 }
 0x1b5   : > { %p10049_p3 = scmp.lt.s32.totalorder %s13046_s0, 2  ;;  %s671_s17 = sand.u32 1, %s13047_s23  }
 0x1b6   : > { %s13053_s3 = scalar_select %p12578_p6, 1, 0 }
 0x1b7   : > { %p12584_p11 = por %p450_p1, %p63_p5  ;;  %s8644_s19 = sshll.u32 %s671_s17, 3 }
 0x1b8   : > { %s8645_s1 = sshll.u32 %s13046_s0, 7  ;;  %s13055_s24 = sld [smem:[#allocation49_spill]] }
 0x1b9   : > { %s13054_s27 = scalar_select %p12584_p11, 1, 0 }
 0x1ba   : > { %s675_s29 = scalar_lea.vmem [#allocation2], %s8644_s19  ;;  %p12594_p12 = pnand %p10049_p3, %p59_p9 }
 0x1bb   : > { %s682_s4 = sshll.u32 %s675_s29, 4  ;;  %s672_s0 = scalar_lea.sflag [#allocation3], %s671_s17  ;;  %s12598_s4 = int_to_ptr.vmem [resolvable:$true] %s682_s4 }
 0x1bc   : > { %p11897_p8 = pneg %p12594_p12 }
 0x1be   : > { %s12592_s2 = scalar_lea.hbm %s13055_s24, %s8645_s1  ;;  %s11900_s22 = scalar_lea.hbm %s13055_s24, 256 }
 0x1bf   : > { %s11895_s23 = scalar_lea.hbm %s12592_s2, 128  ;;  %p11901_p5 = scmp.lt.u32.totalorder %s12592_s2, %s13055_s24 }
 0x1c0   : > { %p11896_p13 = scmp.ne.s32.totalorder %s12592_s2, %s11895_s23  ;;  %p11902_p7 = scmp.lt.u32.totalorder %s11900_s22, %s11895_s23 }
 0x1c1   : > { %p11904_p4 = scmp.lt.u32.totalorder %s11895_s23, %s12592_s2 }
 0x1c2   : > { %p11898_p0 = pnand %p11897_p8, %p11896_p13  ;;  %p11903_p9 = por %p11902_p7, %p11901_p5 }
 0x1c4   : > { %p11899_p2 = pneg %p11898_p0  ;;  %p11905_p1 = por %p11904_p4, %p11903_p9 }
 0x1c6   : > { %p11906_p3 = pnand %p11905_p1, %p11899_p2 }
 0x1c8   : > { %11909 = shalt.err (!%p11906_p3)
}
 0x1c9   : > { %s11910_s17 = scalar_lea.vmem %s12598_s4, 128  ;;  %s12056_s1 = smov [#allocation2]  }
 0x1ca   : > { %p11911_p13 = scmp.ne.s32.totalorder %s12598_s4, %s11910_s17  ;;  %s11915_s19 = sshll.u32 %s12056_s1, 4  ;;  %s11916_s19 = int_to_ptr.vmem [resolvable:$false] %s11915_s19 }
 0x1cb   : > { %s11917_s21 = scalar_lea.vmem %s11916_s19, 256  ;;  %p11918_p6 = scmp.lt.s32.totalorder %s12598_s4, %s11916_s19 }
 0x1cc   : > { %p11913_p0 = pnand %p11911_p13, %p11897_p8  ;;  %p11919_p5 = scmp.lt.s32.totalorder %s11917_s21, %s11910_s17 }
 0x1ce   : > { %p11914_p11 = pneg %p11913_p0  ;;  %p11920_p7 = por %p11919_p5, %p11918_p6 }
 0x1d0   : > { %p11921_p9 = pnand %p11920_p7, %p11914_p11 }
 0x1d2   : > { %11924 = shalt.err (!%p11921_p9)
}
 0x1d3   : > { %10027 = dma.hbm_to_vmem [thread:$0]  (!%p12594_p12), %s12592_s2, 128, %s12598_s4, %s672_s0  }
 0x1d4   : > { %s13057_s23 = sld [smem:[#allocation48_spill]] }
 0x1da   : > { %p13058_p2 = scmp.ne.s32.totalorder %s13057_s23, 0 }
 0x1db   : > { %s13059_s22 = sld [smem:[#allocation44_spill]] (!%p13058_p2) }
 0x1dc   : > { %691 = sbr.rel (%p13058_p2) target bundleno = 2975 (0xb9f), region = 92 }
 0x1e1   : > { %s12628_s29 = sand.u32 (!%p13058_p2), 1, %s13059_s22  }
 0x1e2   : > { %s8647_s1 = sshll.u32 (!%p13058_p2), %s12628_s29, 3  ;;  %s694_s17 = scalar_lea.sflag (!%p13058_p2), [#allocation3], %s12628_s29 }
 0x1e3   : > { %s12634_s19 = scalar_lea.vmem [#allocation2], %s8647_s1 }
 0x1e4   : > { %11970 = dma.done.wait (%p12574_p10), %s694_s17, 128  }
 0x1e5   : > { %11972 = vsyncadd (%p12574_p10), %s694_s17, 4294967168  ;;  %s13060_s4 = sld [smem:[#allocation47_spill]] }
 0x1eb   : > { %p13061_p6 = scmp.eq.s32.totalorder %s13060_s4, 0 }
 0x1ed   : > { %11974 = dma.done.wait (%p13061_p6), [#allocation7], 74240   ;;  %p13062_p11 = pmov %p13061_p6 }
 0x1ee   : > { %p13063_p12 = pmov %p13061_p6 }
 0x1ef   : > { %11976 = vsyncadd (%p13062_p11), [#allocation7], 4294893056 }
 0x1f0   : > { %11978 = dma.done.wait (%p13063_p12), [#allocation10], 36864   ;;  %p13064_p8 = pmov %p13061_p6 }
 0x1f1   : > { %p13065_p4 = pmov %p13061_p6 }
 0x1f2   : > { %11980 = vsyncadd (%p13064_p8), [#allocation10], 4294930432 }
 0x1f3   : > { %11982 = dma.done.wait (%p13065_p4), [#allocation13], 3072   ;;  %p13066_p1 = pmov %p13065_p4 }
 0x1f5   : > { %11984 = vsyncadd (%p13066_p1), [#allocation13], 4294964224  ;;  %p13067_p10 = pmov %p13066_p1 }
 0x1f6   : > { %p13068_p3 = pmov %p13066_p1 }
 0x1f7   : > { %11986 = dma.done.wait (%p13067_p10), [#allocation16], 2048  }
 0x1f8   : > { %11988 = vsyncadd (%p13068_p3), [#allocation16], 4294965248  ;;  %p13069_p13 = pmov %p13066_p1 }
 0x1f9   : > { %p13070_p0 = pmov %p13066_p1 }
 0x1fa   : > { %11990 = dma.done.wait (%p13069_p13), [#allocation19], 272  }
 0x1fb   : > { %11992 = vsyncadd (%p13070_p0), [#allocation19], 4294967024  ;;  %p13071_p5 = pmov %p13070_p0 }
 0x1fc   : > { %p13072_p7 = pmov %p13070_p0 }
 0x1fd   : > { %11994 = dma.done.wait (%p13071_p5), [#allocation22], 96  }
 0x1fe   : > { %11996 = vsyncadd (%p13072_p7), [#allocation22], 4294967200  ;;  %p13073_p9 = pmov %p13070_p0 }
 0x1ff   : > { %p13074_p2 = pmov %p13070_p0 }
 0x200   : > { %11998 = dma.done.wait (%p13073_p9), [#allocation25], 32  }
 0x201   : > { %12000 = vsyncadd (%p13074_p2), [#allocation25], 4294967264  ;;  %p13075_p6 = pmov %p13070_p0 }
 0x202   : > { %p13076_p11 = pmov %p13070_p0 }
 0x203   : > { %12002 = dma.done.wait (%p13075_p6), [#allocation28], 32  }
 0x204   : > { %12004 = vsyncadd (%p13076_p11), [#allocation28], 4294967264  ;;  %p13077_p12 = pmov %p13070_p0 }
 0x205   : > { %p13078_p8 = pmov %p13070_p0 }
 0x206   : > { %12006 = dma.done.wait (%p13077_p12), [#allocation5], 16  }
 0x207   : > { %12008 = vsyncadd (%p13078_p8), [#allocation5], 4294967280 }
 0x208   : > { %770 = sfence }
 0x209   : > { %v10130_v0 = vld [vmem:[#allocation6 + $0x4] ss:$40 sps:$4 sm:$0xff]   ;;  %v10132_v1 = vld [vmem:[#allocation6] ss:$40 sps:$4 sm:$0xff]   ;;  %v12057_v2 = vmov 0   ;;  %v820_v5 = vld [vmem:[%s12634_s19] sm:$0xff] }
 0x20a   : > { %1032 = vmatprep.mubr.bf16.mxu0 %v12057_v2  ;;  %1155 = vmatprep.mubr.bf16.mxu1 %v12057_v2  ;;  %v10133_v3 = vld [vmem:[#allocation6 + $0x54] ss:$40 sps:$4 sm:$0xff]   ;;  %v10135_v4 = vld [vmem:[#allocation6 + $0x50] ss:$40 sps:$4 sm:$0xff]   ;;  %v12679_v7 = vpack.c.bf16 %v820_v5, %v820_v5  ;;  %vm996_vm0 = vcmask 261120   ;;  %s1205_s25 = sld [smem:[#allocation30]] }
 0x20b   : > { %1000 = vmatprep.subr.bf16.mxu0 %v10130_v0  ;;  %v10138_v6 = vld [vmem:[#allocation6 + $0xc] ss:$40 sps:$4 sm:$0xff]   ;;  %v10136_v8 = vld [vmem:[#allocation6 + $0x8] ss:$40 sps:$4 sm:$0xff]   ;;  %v10141_v9 = vld [vmem:[#allocation6 + $0x5c] ss:$40 sps:$4 sm:$0xff]  }
 0x20c   : > { %1001 = vmatpush1.bf16.msra.mxu0 %v10132_v1  ;;  %v10148_v10 = vld [vmem:[#allocation6 + $0x1c] ss:$40 sps:$4 sm:$0xff]   ;;  %v10150_v11 = vld [vmem:[#allocation6 + $0x18] ss:$40 sps:$4 sm:$0xff]   ;;  %v10154_v13 = vld [vmem:[#allocation6 + $0x6c] ss:$40 sps:$4 sm:$0xff]  }
 0x20d   : > { %1002 = vmatprep.subr.bf16.mxu0 %v10133_v3  ;;  %v10139_v12 = vld [vmem:[#allocation6 + $0x58] ss:$40 sps:$4 sm:$0xff]   ;;  %v10144_v14 = vld [vmem:[#allocation6 + $0x14] ss:$40 sps:$4 sm:$0xff]   ;;  %1123 = vmatprep.subr.bf16.mxu1 %v10148_v10  ;;  %v10156_v15 = vld [vmem:[#allocation6 + $0x68] ss:$40 sps:$4 sm:$0xff]  }
 0x20e   : > { %1124 = vmatpush1.bf16.msra.mxu1 %v10150_v11  ;;  %v10162_v16 = vld [vmem:[#allocation8 + $0x4] ss:$28 sps:$4 sm:$0xff]   ;;  %v10142_v17 = vld [vmem:[#allocation6 + $0x10] ss:$40 sps:$4 sm:$0xff]   ;;  %v10159_v26 = vld [vmem:[#allocation6 + $0x74] ss:$40 sps:$4 sm:$0xff]  }
 0x20f   : > { %1125 = vmatprep.subr.bf16.mxu1 %v10154_v13  ;;  %v10147_v18 = vld [vmem:[#allocation6 + $0x64] ss:$40 sps:$4 sm:$0xff]   ;;  %v10160_v19 = vld [vmem:[#allocation8] ss:$28 sps:$4 sm:$0xff]   ;;  %v10166_v23 = vld [vmem:[#allocation8 + $0x38] ss:$28 sps:$4 sm:$0xff]  }
 0x210   : > { %1003 = vmatpush1.bf16.msra.mxu0 %v10135_v4  ;;  %v10168_v20 = vld [vmem:[#allocation8 + $0x3c] ss:$28 sps:$4 sm:$0xff]   ;;  %v10145_v21 = vld [vmem:[#allocation6 + $0x60] ss:$40 sps:$4 sm:$0xff]   ;;  %v10153_v22 = vld [vmem:[#allocation6 + $0x24] ss:$40 sps:$4 sm:$0xff]  }
 0x211   : > { %1041 = vmatprep.subr.bf16.mxu0 %v10138_v6  ;;  %v10174_v24 = vld [vmem:[#allocation8 + $0x74] ss:$28 sps:$4 sm:$0xff]   ;;  %v10151_v25 = vld [vmem:[#allocation6 + $0x20] ss:$40 sps:$4 sm:$0xff]   ;;  %v10192_v36 = vld [vmem:[#allocation8 + $0x11c] ss:$28 sps:$4 sm:$0xff]  }
 0x212   : > { %1126 = vmatpush1.bf16.msra.mxu1 %v10156_v15  ;;  %v10172_v27 = vld [vmem:[#allocation8 + $0x70] ss:$28 sps:$4 sm:$0xff]   ;;  %v10178_v31 = vld [vmem:[#allocation8 + $0xa8] ss:$28 sps:$4 sm:$0xff]   ;;  %v10184_v35 = vld [vmem:[#allocation8 + $0xe0] ss:$28 sps:$4 sm:$0xff]  }
 0x213   : > { %8686 = vmatmul.mubr.msk.bf16.vlgmr.msra.gmra.mrb[0].mxu0 %vm996_vm0, %v12679_v7  ;;  %4804 = vmatprep.subr.bf16.mxu1 %v10162_v16  ;;  %v10180_v28 = vld [vmem:[#allocation8 + $0xac] ss:$28 sps:$4 sm:$0xff]   ;;  %v10157_v29 = vld [vmem:[#allocation6 + $0x70] ss:$40 sps:$4 sm:$0xff]   ;;  %v10186_v32 = vld [vmem:[#allocation8 + $0xe4] ss:$28 sps:$4 sm:$0xff]  }
 0x214   : > { %1042 = vmatpush1.bf16.msra.mxu0 %v10136_v8  ;;  %1073 = vmatprep.mubr.bf16.mxu0 %v12057_v2  ;;  %v10165_v30 = vld [vmem:[#allocation8 + $0xc] ss:$28 sps:$4 sm:$0xff]   ;;  %v10171_v34 = vld [vmem:[#allocation8 + $0x44] ss:$28 sps:$4 sm:$0xff]   ;;  %v10177_v38 = vld [vmem:[#allocation8 + $0x7c] ss:$28 sps:$4 sm:$0xff]  }
 0x215   : > { %1043 = vmatprep.subr.bf16.mxu0 %v10141_v9  ;;  %8689 = vmatmul.mubr.msk.bf16.vlgmr.msra.gmra.mrb[0].mxu1 %vm996_vm0, %v12679_v7  ;;  %v10163_v33 = vld [vmem:[#allocation8 + $0x8] ss:$28 sps:$4 sm:$0xff]   ;;  %v10169_v37 = vld [vmem:[#allocation8 + $0x40] ss:$28 sps:$4 sm:$0xff]   ;;  %v10190_v39 = vld [vmem:[#allocation8 + $0x118] ss:$28 sps:$4 sm:$0xff]  }
 0x216   : > { %4805 = vmatpush1.bf16.msra.mxu1 %v10160_v19  ;;  %v10198_v40 = vld [vmem:[#allocation8 + $0x154] ss:$28 sps:$4 sm:$0xff]   ;;  %v10204_v44 = vld [vmem:[#allocation8 + $0x18c] ss:$28 sps:$4 sm:$0xff]   ;;  %v10210_v48 = vld [vmem:[#allocation8 + $0x1c4] ss:$28 sps:$4 sm:$0xff]  }
 0x217   : > { %4806 = vmatprep.subr.bf16.mxu1 %v10168_v20  ;;  %v10175_v41 = vld [vmem:[#allocation8 + $0x78] ss:$28 sps:$4 sm:$0xff]   ;;  %v10196_v43 = vld [vmem:[#allocation8 + $0x150] ss:$28 sps:$4 sm:$0xff]   ;;  %v10202_v47 = vld [vmem:[#allocation8 + $0x188] ss:$28 sps:$4 sm:$0xff]  }
 0x218   : > { %1044 = vmatpush1.bf16.msra.mxu0 %v10139_v12  ;;  %v10183_v42 = vld [vmem:[#allocation8 + $0xb4] ss:$28 sps:$4 sm:$0xff]   ;;  %v10189_v46 = vld [vmem:[#allocation8 + $0xec] ss:$28 sps:$4 sm:$0xff]   ;;  %v10195_v50 = vld [vmem:[#allocation8 + $0x124] ss:$28 sps:$4 sm:$0xff]  }
 0x219   : > { %1082 = vmatprep.subr.bf16.mxu0 %v10144_v14  ;;  %v10181_v45 = vld [vmem:[#allocation8 + $0xb0] ss:$28 sps:$4 sm:$0xff]   ;;  %v10187_v49 = vld [vmem:[#allocation8 + $0xe8] ss:$28 sps:$4 sm:$0xff]   ;;  %v10193_v51 = vld [vmem:[#allocation8 + $0x120] ss:$28 sps:$4 sm:$0xff]  }
 0x21a   : > { %4807 = vmatpush1.bf16.msra.mxu1 %v10166_v23  ;;  %v10208_v52 = vld [vmem:[#allocation8 + $0x1c0] ss:$28 sps:$4 sm:$0xff]   ;;  %v10214_v55 = vld [vmem:[#allocation8 + $0x1f8] ss:$28 sps:$4 sm:$0xff]   ;;  %v10220_v59 = vld [vmem:[#allocation8 + $0x230] ss:$28 sps:$4 sm:$0xff]  }
 0x21b   : > { %8687 = vmatmul.mubr.msk.bf16.vlgmr.msra.gmra.mrb[4].mxu0 %vm996_vm0, %v12679_v7  ;;  %4808 = vmatprep.subr.bf16.mxu1 %v10174_v24  ;;  %v10201_v53 = vld [vmem:[#allocation8 + $0x15c] ss:$28 sps:$4 sm:$0xff]   ;;  %v10222_v56 = vld [vmem:[#allocation8 + $0x234] ss:$28 sps:$4 sm:$0xff]   ;;  %v10228_v60 = vld [vmem:[#allocation8 + $0x26c] ss:$28 sps:$4 sm:$0xff]  }
 0x21c   : > { %1083 = vmatpush1.bf16.msra.mxu0 %v10142_v17  ;;  %1114 = vmatprep.mubr.bf16.mxu0 %v12057_v2  ;;  %v10216_v54 = vld [vmem:[#allocation8 + $0x1fc] ss:$28 sps:$4 sm:$0xff]   ;;  %v10207_v58 = vld [vmem:[#allocation8 + $0x194] ss:$28 sps:$4 sm:$0xff]   ;;  %v10213_v62 = vld [vmem:[#allocation8 + $0x1cc] ss:$28 sps:$4 sm:$0xff]  }
 0x21d   : > { %1084 = vmatprep.subr.bf16.mxu0 %v10147_v18  ;;  %v10199_v57 = vld [vmem:[#allocation8 + $0x158] ss:$28 sps:$4 sm:$0xff]   ;;  %v10205_v61 = vld [vmem:[#allocation8 + $0x190] ss:$28 sps:$4 sm:$0xff]   ;;  %v10226_v63 = vld [vmem:[#allocation8 + $0x268] ss:$28 sps:$4 sm:$0xff]  }
 0x21e   : > { %4809 = vmatpush1.bf16.msra.mxu1 %v10172_v27  ;;  %v10234_v0 = vld [vmem:[#allocation8 + $0x2a4] ss:$28 sps:$4 sm:$0xff]   ;;  %v10240_v5 = vld [vmem:[#allocation8 + $0x2dc] ss:$28 sps:$4 sm:$0xff]   ;;  %v10231_v10 = vld [vmem:[#allocation8 + $0x274] ss:$28 sps:$4 sm:$0xff]  }
 0x21f   : > { %4810 = vmatprep.subr.bf16.mxu1 %v10180_v28  ;;  %v10211_v1 = vld [vmem:[#allocation8 + $0x1c8] ss:$28 sps:$4 sm:$0xff]   ;;  %v10232_v4 = vld [vmem:[#allocation8 + $0x2a0] ss:$28 sps:$4 sm:$0xff]   ;;  %v10238_v8 = vld [vmem:[#allocation8 + $0x2d8] ss:$28 sps:$4 sm:$0xff]  }
 0x220   : > { %1085 = vmatpush1.bf16.msra.mxu0 %v10145_v21  ;;  %v10219_v3 = vld [vmem:[#allocation8 + $0x204] ss:$28 sps:$4 sm:$0xff]   ;;  %v10223_v9 = vld [vmem:[#allocation8 + $0x238] ss:$28 sps:$4 sm:$0xff]   ;;  %v10229_v11 = vld [vmem:[#allocation8 + $0x270] ss:$28 sps:$4 sm:$0xff]  }
 0x221   : > { %1164 = vmatprep.subr.bf16.mxu0 %v10153_v22  ;;  %v10217_v6 = vld [vmem:[#allocation8 + $0x200] ss:$28 sps:$4 sm:$0xff]   ;;  %v10237_v12 = vld [vmem:[#allocation8 + $0x2ac] ss:$28 sps:$4 sm:$0xff]   ;;  %v10246_v16 = vld [vmem:[#allocation8 + $0x314] ss:$28 sps:$4 sm:$0xff]  }
 0x222   : > { %4811 = vmatpush1.bf16.msra.mxu1 %v10178_v31  ;;  %v10235_v13 = vld [vmem:[#allocation8 + $0x2a8] ss:$28 sps:$4 sm:$0xff]   ;;  %v10241_v15 = vld [vmem:[#allocation8 + $0x2e0] ss:$28 sps:$4 sm:$0xff]   ;;  %v10244_v18 = vld [vmem:[#allocation8 + $0x310] ss:$28 sps:$4 sm:$0xff]  }
 0x223   : > { %8688 = vmatmul.mubr.msk.bf16.vlgmr.msra.gmra.mrb[8].mxu0 %vm996_vm0, %v12679_v7  ;;  %4812 = vmatprep.subr.bf16.mxu1 %v10186_v32  ;;  %v10243_v14 = vld [vmem:[#allocation8 + $0x2e4] ss:$28 sps:$4 sm:$0xff]   ;;  %v10249_v17 = vld [vmem:[#allocation8 + $0x31c] ss:$28 sps:$4 sm:$0xff]   ;;  %v10252_v20 = vld [vmem:[#allocation8 + $0x34c] ss:$28 sps:$4 sm:$0xff]  }
 0x224   : > { %1165 = vmatpush1.bf16.msra.mxu0 %v10151_v25  ;;  %1196 = vmatprep.mubr.bf16.mxu0 %v12057_v2  ;;  %v10247_v19 = vld [vmem:[#allocation8 + $0x318] ss:$28 sps:$4 sm:$0xff]   ;;  %v10250_v22 = vld [vmem:[#allocation8 + $0x348] ss:$28 sps:$4 sm:$0xff]   ;;  %v10253_v23 = vld [vmem:[#allocation8 + $0x350] ss:$28 sps:$4 sm:$0xff]  }
 0x225   : > { %1166 = vmatprep.subr.bf16.mxu0 %v10159_v26  ;;  %v10255_v21 = vld [vmem:[#allocation8 + $0x354] ss:$28 sps:$4 sm:$0xff]   ;;  %v10258_v24 = vld [vmem:[#allocation8 + $0x384] ss:$28 sps:$4 sm:$0xff]   ;;  %v10261_v25 = vld [vmem:[#allocation8 + $0x38c] ss:$28 sps:$4 sm:$0xff]   ;;  %v846_v26 = vlaneseq }
 0x226   : > { %4813 = vmatpush1.bf16.msra.mxu1 %v10184_v35  ;;  %v12696_v28 = vld [vmem:[#allocation18] sm:$0xff]  ;;  %s9251_s2 = sld [smem:[#allocation30 + $0x1]]  ;;  %s9476_s28 = sld [smem:[#allocation30 + $0x2]] }
 0x227   : > { %4814 = vmatprep.subr.bf16.mxu1 %v10192_v36  ;;  %v12694_v27 = vshrl.u32 %v846_v26, 7  ;;  %v10295_v26 = vld [vmem:[#allocation8 + $0x4d8] ss:$28 sps:$4 sm:$0xff]   ;;  %s9541_s0 = sld [smem:[#allocation30 + $0x3]]  ;;  %s9559_s21 = sld [smem:[#allocation30 + $0x4]] }
 0x228   : > { %1167 = vmatpush1.bf16.msra.mxu0 %v10157_v29  ;;  %s9569_s23 = sld [smem:[#allocation30 + $0x5]]  ;;  %s9579_s22 = sld [smem:[#allocation30 + $0x6]] }
 0x229   : > { %5009 = vmatprep.subr.bf16.mxu0 %v10165_v30  ;;  %v12699_v29 = vsub.s32 0, %v12694_v27  ;;  %v12702_v30 = vsub.s32 1, %v12694_v27  ;;  %v12711_v35 = vsub.s32 3, %v12694_v27  ;;  %s9590_s17 = sshll.u32 %s13060_s4, 7  ;;  %s818_s19 = scalar_lea.vmem [#allocation31], %s8647_s1 }
 0x22a   : > { %4815 = vmatpush1.bf16.msra.mxu1 %v10190_v39  ;;  %s8377_s4 = scalar_lea.sflag [#allocation4], %s12628_s29  ;;  %p13080_p1 = scmp.ne.s32.totalorder %s13053_s3, 0 }
 0x22b   : > { %8690 = vmatmul.mubr.msk.bf16.vlgmr.msra.gmra.mrb[12].mxu0 %vm996_vm0, %v12679_v7  ;;  %4816 = vmatprep.subr.bf16.mxu1 %v10198_v40  ;;  %v10225_v7 = vld [vmem:[#allocation8 + $0x23c] ss:$28 sps:$4 sm:$0xff]   ;;  %v849_v31 = vrot.slane %v12696_v28, %v12699_v29  ;;  %v853_v32 = vrot.slane %v12696_v28, %v12702_v30  ;;  %s12060_s1 = smov [#allocation31]  }
 0x22c   : > { %5010 = vmatpush1.bf16.msra.mxu0 %v10163_v33 }
 0x22d   : > { %5011 = vmatprep.subr.bf16.mxu0 %v10171_v34  ;;  %v12708_v34 = vstv %s1205_s25  ;;  %s8390_s25 = sshll.u32 %s818_s19, 4  ;;  %s12942_s25 = int_to_ptr.vmem [resolvable:$true] %s8390_s25 }
 0x22e   : > { %4817 = vmatpush1.bf16.msra.mxu1 %v10196_v43 }
 0x22f   : > { %4818 = vmatprep.subr.bf16.mxu1 %v10204_v44  ;;  %v10256_v44 = vld [vmem:[#allocation8 + $0x380] ss:$28 sps:$4 sm:$0xff]  }
 0x230   : > { %5012 = vmatpush1.bf16.msra.mxu0 %v10169_v37 }
 0x231   : > { %5013 = vmatprep.subr.bf16.mxu0 %v10177_v38 }
 0x232   : > { %4819 = vmatpush1.bf16.msra.mxu1 %v10202_v47  ;;  %v861_v47 = vrot.slane %v12696_v28, %v12711_v35 }
 0x233   : > { %4820 = vmatprep.subr.bf16.mxu1 %v10210_v48 }
 0x234   : > { %5014 = vmatpush1.bf16.msra.mxu0 %v10175_v41 }
 0x235   : > { %5015 = vmatprep.subr.bf16.mxu0 %v10183_v42 }
 0x236   : > { %4821 = vmatpush1.bf16.msra.mxu1 %v10208_v52 }
 0x237   : > { %4822 = vmatprep.subr.bf16.mxu1 %v10216_v54 }
 0x238   : > { %5016 = vmatpush1.bf16.msra.mxu0 %v10181_v45  ;;  %v10259_v45 = vld [vmem:[#allocation8 + $0x388] ss:$28 sps:$4 sm:$0xff]  }
 0x239   : > { %5017 = vmatprep.subr.bf16.mxu0 %v10189_v46 }
 0x23a   : > { %4823 = vmatpush1.bf16.msra.mxu1 %v10214_v55 }
 0x23b   : > { %4824 = vmatprep.subr.bf16.mxu1 %v10222_v56  ;;  %v10262_v56 = vld [vmem:[#allocation8 + $0x3b8] ss:$28 sps:$4 sm:$0xff]  }
 0x23c   : > { %5018 = vmatpush1.bf16.msra.mxu0 %v10187_v49 }
 0x23d   : > { %5019 = vmatprep.subr.bf16.mxu0 %v10195_v50  ;;  %v10264_v50 = vld [vmem:[#allocation8 + $0x3bc] ss:$28 sps:$4 sm:$0xff]  }
 0x23e   : > { %4825 = vmatpush1.bf16.msra.mxu1 %v10220_v59  ;;  %v10270_v59 = vld [vmem:[#allocation8 + $0x3f4] ss:$28 sps:$4 sm:$0xff]  }
 0x23f   : > { %4826 = vmatprep.subr.bf16.mxu1 %v10228_v60  ;;  %v10273_v60 = vld [vmem:[#allocation8 + $0x3fc] ss:$28 sps:$4 sm:$0xff]  }
 0x240   : > { %5020 = vmatpush1.bf16.msra.mxu0 %v10193_v51  ;;  %v10267_v51 = vld [vmem:[#allocation8 + $0x3c4] ss:$28 sps:$4 sm:$0xff]  }
 0x241   : > { %5021 = vmatprep.subr.bf16.mxu0 %v10201_v53 }
 0x242   : > { %4827 = vmatpush1.bf16.msra.mxu1 %v10226_v63  ;;  %v10268_v63 = vld [vmem:[#allocation8 + $0x3f0] ss:$28 sps:$4 sm:$0xff]  }
 0x243   : > { %4828 = vmatprep.subr.bf16.mxu1 %v10234_v0  ;;  %v10271_v0 = vld [vmem:[#allocation8 + $0x3f8] ss:$28 sps:$4 sm:$0xff]  }
 0x244   : > { %5022 = vmatpush1.bf16.msra.mxu0 %v10199_v57  ;;  %v10265_v57 = vld [vmem:[#allocation8 + $0x3c0] ss:$28 sps:$4 sm:$0xff]  }
 0x245   : > { %5023 = vmatprep.subr.bf16.mxu0 %v10207_v58 }
 0x246   : > { %4829 = vmatpush1.bf16.msra.mxu1 %v10232_v4  ;;  %v10279_v4 = vld [vmem:[#allocation8 + $0x434] ss:$28 sps:$4 sm:$0xff]  }
 0x247   : > { %4830 = vmatprep.subr.bf16.mxu1 %v10240_v5 }
 0x248   : > { %5024 = vmatpush1.bf16.msra.mxu0 %v10205_v61 }
 0x249   : > { %5025 = vmatprep.subr.bf16.mxu0 %v10213_v62 }
 0x24a   : > { %4831 = vmatpush1.bf16.msra.mxu1 %v10238_v8  ;;  %v10274_v8 = vld [vmem:[#allocation8 + $0x428] ss:$28 sps:$4 sm:$0xff]  }
 0x24b   : > { %4832 = vmatprep.subr.bf16.mxu1 %v10246_v16  ;;  %v10291_v16 = vld [vmem:[#allocation8 + $0x4a4] ss:$28 sps:$4 sm:$0xff]  }
 0x24c   : > { %5026 = vmatpush1.bf16.msra.mxu0 %v10211_v1 }
 0x24d   : > { %5027 = vmatprep.subr.bf16.mxu0 %v10219_v3  ;;  %v10276_v3 = vld [vmem:[#allocation8 + $0x42c] ss:$28 sps:$4 sm:$0xff]  }
 0x24e   : > { %4833 = vmatpush1.bf16.msra.mxu1 %v10244_v18  ;;  %v10286_v18 = vld [vmem:[#allocation8 + $0x498] ss:$28 sps:$4 sm:$0xff]  }
 0x24f   : > { %4834 = vmatprep.subr.bf16.mxu1 %v10252_v20 }
 0x250   : > { %5028 = vmatpush1.bf16.msra.mxu0 %v10217_v6 }
 0x251   : > { %5029 = vmatprep.subr.bf16.mxu0 %v10225_v7 }
 0x252   : > { %4835 = vmatpush1.bf16.msra.mxu1 %v10250_v22  ;;  %v10297_v22 = vld [vmem:[#allocation8 + $0x4dc] ss:$28 sps:$4 sm:$0xff]  }
 0x253   : > { %4845 = vmatprep.subr.bf16.mxu1 %v10258_v24 }
 0x254   : > { %5030 = vmatpush1.bf16.msra.mxu0 %v10223_v9  ;;  %v10277_v9 = vld [vmem:[#allocation8 + $0x430] ss:$28 sps:$4 sm:$0xff]  }
 0x255   : > { %5031 = vmatprep.subr.bf16.mxu0 %v10231_v10 }
 0x258   : > { %5032 = vmatpush1.bf16.msra.mxu0 %v10229_v11  ;;  %v10282_v11 = vld [vmem:[#allocation8 + $0x464] ss:$28 sps:$4 sm:$0xff]  }
 0x259   : > { %5033 = vmatprep.subr.bf16.mxu0 %v10237_v12  ;;  %v10285_v12 = vld [vmem:[#allocation8 + $0x46c] ss:$28 sps:$4 sm:$0xff]  }
 0x25c   : > { %5034 = vmatpush1.bf16.msra.mxu0 %v10235_v13  ;;  %v10280_v13 = vld [vmem:[#allocation8 + $0x460] ss:$28 sps:$4 sm:$0xff]  }
 0x25d   : > { %5035 = vmatprep.subr.bf16.mxu0 %v10243_v14  ;;  %v10283_v14 = vld [vmem:[#allocation8 + $0x468] ss:$28 sps:$4 sm:$0xff]  }
 0x260   : > { %5036 = vmatpush1.bf16.msra.mxu0 %v10241_v15  ;;  %v10288_v15 = vld [vmem:[#allocation8 + $0x49c] ss:$28 sps:$4 sm:$0xff]  }
 0x261   : > { %5037 = vmatprep.subr.bf16.mxu0 %v10249_v17 }
 0x264   : > { %5038 = vmatpush1.bf16.msra.mxu0 %v10247_v19  ;;  %v10289_v19 = vld [vmem:[#allocation8 + $0x4a0] ss:$28 sps:$4 sm:$0xff]  }
 0x265   : > { %5039 = vmatprep.subr.bf16.mxu0 %v10255_v21  ;;  %v10294_v21 = vld [vmem:[#allocation8 + $0x4d4] ss:$28 sps:$4 sm:$0xff]  }
 0x268   : > { %5040 = vmatpush1.bf16.msra.mxu0 %v10253_v23 }
 0x269   : > { %5050 = vmatprep.subr.bf16.mxu0 %v10261_v25  ;;  %v10292_v25 = vld [vmem:[#allocation8 + $0x4d0] ss:$28 sps:$4 sm:$0xff]  }
 0x2e6   : > { %v1034_v33 = vpop.f32.mrb[0].mxu0 }
 0x2e7   : > { %v1035_v36 = vadd.f32 %v1034_v33, %v849_v31  ;;  %v1036_v37 = vpop.f32.mrb[1].mxu0  ;;  %v10300_v31 = vld [vmem:[#allocation8 + $0x50c] ss:$28 sps:$4 sm:$0xff]  }
 0x2e8   : > { %v1037_v38 = vadd.f32 %v1036_v37, %v853_v32  ;;  %v1038_v39 = vpop.f32.mrb[2].mxu0  ;;  %v12736_v17 = vpop.f32.mrb[0].mxu1  ;;  %v10303_v32 = vld [vmem:[#allocation8 + $0x514] ss:$28 sps:$4 sm:$0xff]   ;;  %v10298_v33 = vld [vmem:[#allocation8 + $0x508] ss:$28 sps:$4 sm:$0xff]  }
 0x2e9   : > { %vm1206_vm1 = vcmp.ge.f32.partialorder %v1035_v36, 0.0  ;;  %v1217_v40 = vmul.f32 %v12708_v34, %v1035_v36  ;;  %v1039_v41 = vpop.f32.mrb[3].mxu0  ;;  %v12738_v20 = vpop.f32.mrb[1].mxu1  ;;  %v10306_v37 = vld [vmem:[#allocation8 + $0x544] ss:$28 sps:$4 sm:$0xff]  }
 0x2ea   : > { %vm1207_vm2 = vcmp.ge.f32.partialorder %v1037_v38, 0.0  ;;  %v1218_v42 = vmul.f32 %v12708_v34, %v1037_v38  ;;  %v1161_v23 = vpop.f32.mrb[2].mxu1  ;;  %v10304_v39 = vld [vmem:[#allocation8 + $0x540] ss:$28 sps:$4 sm:$0xff]  }
 0x2eb   : > { %v1227_v43 = vsel %vm1206_vm1, %v1035_v36, %v1217_v40  ;;  %v1162_v24 = vpop.f32.mrb[3].mxu1  ;;  %v10301_v36 = vld [vmem:[#allocation8 + $0x510] ss:$28 sps:$4 sm:$0xff]   ;;  %v10307_v40 = vld [vmem:[#allocation8 + $0x548] ss:$28 sps:$4 sm:$0xff]  }
 0x2ec   : > { %v1228_v46 = vsel %vm1207_vm2, %v1037_v38, %v1218_v42  ;;  %v12719_v49 = vpack.c.bf16 %v1227_v43, %v1227_v43  ;;  %v10309_v38 = vld [vmem:[#allocation8 + $0x54c] ss:$28 sps:$4 sm:$0xff]   ;;  %v10312_v41 = vld [vmem:[#allocation8 + $0x57c] ss:$28 sps:$4 sm:$0xff]   ;;  %v10315_v42 = vld [vmem:[#allocation8 + $0x584] ss:$28 sps:$4 sm:$0xff]  }
 0x2ed   : > { %v12717_v48 = vpack.c.bf16 %v1228_v46, %v1228_v46  ;;  %v10310_v43 = vld [vmem:[#allocation8 + $0x578] ss:$28 sps:$4 sm:$0xff]   ;;  %v10355_v23 = vld [vmem:[#allocation8 + $0x708] ss:$28 sps:$4 sm:$0xff]  }
 0x2ee   : > { %v12721_v52 = vpop.f32.mrb[4].mxu0  ;;  %v10321_v46 = vld [vmem:[#allocation8 + $0x5bc] ss:$28 sps:$4 sm:$0xff]  }
 0x2ef   : > { %4836 = vmatprep.mubr.bf16.mxu1 %v12717_v48  ;;  %5041 = vmatprep.mubr.bf16.mxu0 %v12717_v48  ;;  %v1077_v53 = vpop.f32.mrb[5].mxu0 }
 0x2f0   : > { %4837 = vmatmul.mubr.bf16.vlgmr.msra.gmra.mrb[4].mxu1 %v12719_v49  ;;  %5042 = vmatmul.mubr.bf16.vlgmr.msra.gmra.mrb[16].mxu0 %v12719_v49  ;;  %v1078_v54 = vadd.f32 %v1077_v53, %v861_v47  ;;  %v1079_v55 = vpop.f32.mrb[6].mxu0  ;;  %v10316_v47 = vld [vmem:[#allocation8 + $0x5b0] ss:$28 sps:$4 sm:$0xff]  }
 0x2f1   : > { %4846 = vmatpush1.bf16.msra.mxu1 %v10256_v44  ;;  %5051 = vmatpush1.bf16.msra.mxu0 %v10259_v45  ;;  %v1080_v58 = vpop.f32.mrb[7].mxu0  ;;  %v10313_v44 = vld [vmem:[#allocation8 + $0x580] ss:$28 sps:$4 sm:$0xff]   ;;  %v10318_v45 = vld [vmem:[#allocation8 + $0x5b4] ss:$28 sps:$4 sm:$0xff]  }
 0x2f2   : > { %4847 = vmatprep.subr.bf16.mxu1 %v10264_v50  ;;  %5052 = vmatprep.subr.bf16.mxu0 %v10267_v51  ;;  %vm1209_vm3 = vcmp.ge.f32.partialorder %v1078_v54, 0.0  ;;  %v1220_v61 = vmul.f32 %v12708_v34, %v1078_v54  ;;  %v10319_v50 = vld [vmem:[#allocation8 + $0x5b8] ss:$28 sps:$4 sm:$0xff]   ;;  %v10324_v51 = vld [vmem:[#allocation8 + $0x5ec] ss:$28 sps:$4 sm:$0xff]   ;;  %v12741_v58 = vsub.s32 2, %v12694_v27 }
 0x2f3   : > { %v10327_v53 = vld [vmem:[#allocation8 + $0x5f4] ss:$28 sps:$4 sm:$0xff]  }
 0x2f4   : > { %v1230_v62 = vsel %vm1209_vm3, %v1078_v54, %v1220_v61  ;;  %v10322_v54 = vld [vmem:[#allocation8 + $0x5e8] ss:$28 sps:$4 sm:$0xff]   ;;  %v10325_v55 = vld [vmem:[#allocation8 + $0x5f0] ss:$28 sps:$4 sm:$0xff]  }
 0x2f5   : > { %4848 = vmatpush1.bf16.msra.mxu1 %v10262_v56  ;;  %5053 = vmatpush1.bf16.msra.mxu0 %v10265_v57  ;;  %v12728_v1 = vpack.c.bf16 %v1230_v62, %v1230_v62  ;;  %v10330_v56 = vld [vmem:[#allocation8 + $0x624] ss:$28 sps:$4 sm:$0xff]   ;;  %v10333_v57 = vld [vmem:[#allocation8 + $0x62c] ss:$28 sps:$4 sm:$0xff]   ;;  %v10336_v62 = vld [vmem:[#allocation8 + $0x65c] ss:$28 sps:$4 sm:$0xff]  }
 0x2f6   : > { %4849 = vmatprep.subr.bf16.mxu1 %v10270_v59  ;;  %5054 = vmatprep.subr.bf16.mxu0 %v10273_v60  ;;  %v12730_v5 = vpop.f32.mrb[8].mxu0  ;;  %v868_v59 = vsub.s32 5, %v12694_v27  ;;  %v10328_v60 = vld [vmem:[#allocation8 + $0x620] ss:$28 sps:$4 sm:$0xff]   ;;  %v10331_v61 = vld [vmem:[#allocation8 + $0x628] ss:$28 sps:$4 sm:$0xff]  }
 0x2f7   : > { %4877 = vmatprep.mubr.bf16.mxu1 %v12728_v1  ;;  %5082 = vmatprep.mubr.bf16.mxu0 %v12728_v1  ;;  %v12734_v6 = vpop.f32.mrb[9].mxu0 }
 0x2f8   : > { %v1120_v7 = vpop.f32.mrb[10].mxu0 }
 0x2f9   : > { %4850 = vmatpush1.bf16.msra.mxu1 %v10268_v63  ;;  %5055 = vmatpush1.bf16.msra.mxu0 %v10271_v0  ;;  %v1121_v10 = vpop.f32.mrb[11].mxu0  ;;  %v10339_v63 = vld [vmem:[#allocation8 + $0x664] ss:$28 sps:$4 sm:$0xff]   ;;  %v857_v0 = vrot.slane %v12696_v28, %v12741_v58 }
 0x2fa   : > { %4851 = vmatprep.subr.bf16.mxu1 %v10276_v3  ;;  %5056 = vmatprep.subr.bf16.mxu0 %v10279_v4  ;;  %v869_v3 = vrot.slane %v12696_v28, %v868_v59  ;;  %v10334_v4 = vld [vmem:[#allocation8 + $0x658] ss:$28 sps:$4 sm:$0xff]   ;;  %v10337_v7 = vld [vmem:[#allocation8 + $0x660] ss:$28 sps:$4 sm:$0xff]  }
 0x2fb   : > { %v1076_v10 = vadd.f32 %v12721_v52, %v857_v0  ;;  %v10351_v28 = vld [vmem:[#allocation8 + $0x6d4] ss:$28 sps:$4 sm:$0xff]   ;;  %v10354_v52 = vld [vmem:[#allocation8 + $0x704] ss:$28 sps:$4 sm:$0xff]  }
 0x2fc   : > { %v10394_v0 = vld [vmem:[#allocation8 + $0x888] ss:$28 sps:$4 sm:$0xff]  }
 0x2fd   : > { %4852 = vmatpush1.bf16.msra.mxu1 %v10274_v8  ;;  %5057 = vmatpush1.bf16.msra.mxu0 %v10277_v9  ;;  %v10342_v8 = vld [vmem:[#allocation8 + $0x694] ss:$28 sps:$4 sm:$0xff]   ;;  %v10345_v9 = vld [vmem:[#allocation8 + $0x69c] ss:$28 sps:$4 sm:$0xff]   ;;  %vm1208_vm4 = vcmp.ge.f32.partialorder %v1076_v10, 0.0 }
 0x2fe   : > { %4853 = vmatprep.subr.bf16.mxu1 %v10282_v11  ;;  %5058 = vmatprep.subr.bf16.mxu0 %v10285_v12  ;;  %v1119_v11 = vadd.f32 %v12734_v6, %v869_v3  ;;  %v10340_v12 = vld [vmem:[#allocation8 + $0x690] ss:$28 sps:$4 sm:$0xff]  }
 0x2ff   : > { %v10357_v6 = vld [vmem:[#allocation8 + $0x70c] ss:$28 sps:$4 sm:$0xff]  }
 0x300   : > { %vm1211_vm5 = vcmp.ge.f32.partialorder %v1119_v11, 0.0  ;;  %v10397_v3 = vld [vmem:[#allocation8 + $0x890] ss:$28 sps:$4 sm:$0xff]  }
 0x301   : > { %4854 = vmatpush1.bf16.msra.mxu1 %v10280_v13  ;;  %5059 = vmatpush1.bf16.msra.mxu0 %v10283_v14  ;;  %v10343_v13 = vld [vmem:[#allocation8 + $0x698] ss:$28 sps:$4 sm:$0xff]   ;;  %v10348_v14 = vld [vmem:[#allocation8 + $0x6cc] ss:$28 sps:$4 sm:$0xff]  }
 0x302   : > { %4855 = vmatprep.subr.bf16.mxu1 %v10288_v15  ;;  %5060 = vmatprep.subr.bf16.mxu0 %v10291_v16  ;;  %v1219_v15 = vmul.f32 %v12708_v34, %v1076_v10  ;;  %v1222_v16 = vmul.f32 %v12708_v34, %v1119_v11 }
 0x304   : > { %v1232_v24 = vsel %vm1211_vm5, %v1119_v11, %v1222_v16  ;;  %v10411_v11 = vld [vmem:[#allocation8 + $0x904] ss:$28 sps:$4 sm:$0xff]   ;;  %v10415_v16 = vld [vmem:[#allocation8 + $0x938] ss:$28 sps:$4 sm:$0xff]  }
 0x305   : > { %4856 = vmatpush1.bf16.msra.mxu1 %v10286_v18  ;;  %5061 = vmatpush1.bf16.msra.mxu0 %v10289_v19  ;;  %v10346_v18 = vld [vmem:[#allocation8 + $0x6c8] ss:$28 sps:$4 sm:$0xff]   ;;  %v10349_v19 = vld [vmem:[#allocation8 + $0x6d0] ss:$28 sps:$4 sm:$0xff]  }
 0x306   : > { %4857 = vmatprep.subr.bf16.mxu1 %v10294_v21  ;;  %5062 = vmatprep.subr.bf16.mxu0 %v10297_v22  ;;  %v1229_v21 = vsel %vm1208_vm4, %v1076_v10, %v1219_v15  ;;  %v10352_v22 = vld [vmem:[#allocation8 + $0x700] ss:$28 sps:$4 sm:$0xff]   ;;  %v10412_v15 = vld [vmem:[#allocation8 + $0x930] ss:$28 sps:$4 sm:$0xff]  }
 0x307   : > { %v10408_v10 = vld [vmem:[#allocation8 + $0x8fc] ss:$28 sps:$4 sm:$0xff]  }
 0x309   : > { %4858 = vmatpush1.bf16.msra.mxu1 %v10292_v25  ;;  %5063 = vmatpush1.bf16.msra.mxu0 %v10295_v26  ;;  %v12753_v25 = vpack.c.bf16 %v1229_v21, %v1229_v21  ;;  %v10360_v26 = vld [vmem:[#allocation8 + $0x73c] ss:$28 sps:$4 sm:$0xff]   ;;  %v10426_v21 = vld [vmem:[#allocation8 + $0x9a4] ss:$28 sps:$4 sm:$0xff]  }
 0x30a   : > { %4859 = vmatprep.subr.bf16.mxu1 %v10300_v31  ;;  %5064 = vmatprep.subr.bf16.mxu0 %v10303_v32  ;;  %v10363_v31 = vld [vmem:[#allocation8 + $0x744] ss:$28 sps:$4 sm:$0xff]   ;;  %v12755_v32 = vpack.c.bf16 %v1232_v24, %v1232_v24  ;;  %v876_v24 = vsub.s32 7, %v12694_v27 }
 0x30d   : > { %4860 = vmatpush1.bf16.msra.mxu1 %v10298_v33  ;;  %5065 = vmatpush1.bf16.msra.mxu0 %v10301_v36  ;;  %v10358_v33 = vld [vmem:[#allocation8 + $0x738] ss:$28 sps:$4 sm:$0xff]   ;;  %v10361_v36 = vld [vmem:[#allocation8 + $0x740] ss:$28 sps:$4 sm:$0xff]  }
 0x30e   : > { %4861 = vmatprep.subr.bf16.mxu1 %v10306_v37  ;;  %5066 = vmatprep.subr.bf16.mxu0 %v10309_v38  ;;  %v10366_v37 = vld [vmem:[#allocation8 + $0x774] ss:$28 sps:$4 sm:$0xff]   ;;  %v10369_v38 = vld [vmem:[#allocation8 + $0x77c] ss:$28 sps:$4 sm:$0xff]  }
 0x311   : > { %4862 = vmatpush1.bf16.msra.mxu1 %v10304_v39  ;;  %5067 = vmatpush1.bf16.msra.mxu0 %v10307_v40  ;;  %v10364_v39 = vld [vmem:[#allocation8 + $0x770] ss:$28 sps:$4 sm:$0xff]   ;;  %v10367_v40 = vld [vmem:[#allocation8 + $0x778] ss:$28 sps:$4 sm:$0xff]  }
 0x312   : > { %4863 = vmatprep.subr.bf16.mxu1 %v10312_v41  ;;  %5068 = vmatprep.subr.bf16.mxu0 %v10315_v42  ;;  %v10372_v41 = vld [vmem:[#allocation8 + $0x7ac] ss:$28 sps:$4 sm:$0xff]   ;;  %v10375_v42 = vld [vmem:[#allocation8 + $0x7b4] ss:$28 sps:$4 sm:$0xff]  }
 0x315   : > { %4864 = vmatpush1.bf16.msra.mxu1 %v10310_v43  ;;  %5069 = vmatpush1.bf16.msra.mxu0 %v10313_v44  ;;  %v10370_v43 = vld [vmem:[#allocation8 + $0x7a8] ss:$28 sps:$4 sm:$0xff]   ;;  %v10373_v44 = vld [vmem:[#allocation8 + $0x7b0] ss:$28 sps:$4 sm:$0xff]  }
 0x316   : > { %4865 = vmatprep.subr.bf16.mxu1 %v10318_v45  ;;  %5070 = vmatprep.subr.bf16.mxu0 %v10321_v46  ;;  %v10378_v45 = vld [vmem:[#allocation8 + $0x7e4] ss:$28 sps:$4 sm:$0xff]   ;;  %v10381_v46 = vld [vmem:[#allocation8 + $0x7ec] ss:$28 sps:$4 sm:$0xff]  }
 0x319   : > { %4866 = vmatpush1.bf16.msra.mxu1 %v10316_v47  ;;  %5071 = vmatpush1.bf16.msra.mxu0 %v10319_v50  ;;  %v10376_v47 = vld [vmem:[#allocation8 + $0x7e0] ss:$28 sps:$4 sm:$0xff]   ;;  %v10379_v50 = vld [vmem:[#allocation8 + $0x7e8] ss:$28 sps:$4 sm:$0xff]  }
 0x31a   : > { %4867 = vmatprep.subr.bf16.mxu1 %v10324_v51  ;;  %5072 = vmatprep.subr.bf16.mxu0 %v10327_v53  ;;  %v10384_v51 = vld [vmem:[#allocation8 + $0x81c] ss:$28 sps:$4 sm:$0xff]   ;;  %v10387_v53 = vld [vmem:[#allocation8 + $0x824] ss:$28 sps:$4 sm:$0xff]  }
 0x31d   : > { %4868 = vmatpush1.bf16.msra.mxu1 %v10322_v54  ;;  %5073 = vmatpush1.bf16.msra.mxu0 %v10325_v55  ;;  %v10382_v54 = vld [vmem:[#allocation8 + $0x818] ss:$28 sps:$4 sm:$0xff]   ;;  %v10385_v55 = vld [vmem:[#allocation8 + $0x820] ss:$28 sps:$4 sm:$0xff]  }
 0x31e   : > { %4869 = vmatprep.subr.bf16.mxu1 %v10330_v56  ;;  %5074 = vmatprep.subr.bf16.mxu0 %v10333_v57  ;;  %v10390_v56 = vld [vmem:[#allocation8 + $0x854] ss:$28 sps:$4 sm:$0xff]   ;;  %v10393_v57 = vld [vmem:[#allocation8 + $0x85c] ss:$28 sps:$4 sm:$0xff]  }
 0x321   : > { %4870 = vmatpush1.bf16.msra.mxu1 %v10328_v60  ;;  %5075 = vmatpush1.bf16.msra.mxu0 %v10331_v61  ;;  %v10388_v60 = vld [vmem:[#allocation8 + $0x850] ss:$28 sps:$4 sm:$0xff]   ;;  %v10391_v61 = vld [vmem:[#allocation8 + $0x858] ss:$28 sps:$4 sm:$0xff]  }
 0x322   : > { %4871 = vmatprep.subr.bf16.mxu1 %v10336_v62  ;;  %5076 = vmatprep.subr.bf16.mxu0 %v10339_v63  ;;  %v10396_v62 = vld [vmem:[#allocation8 + $0x88c] ss:$28 sps:$4 sm:$0xff]   ;;  %v10399_v63 = vld [vmem:[#allocation8 + $0x894] ss:$28 sps:$4 sm:$0xff]  }
 0x325   : > { %4872 = vmatpush1.bf16.msra.mxu1 %v10334_v4  ;;  %5077 = vmatpush1.bf16.msra.mxu0 %v10337_v7  ;;  %v10402_v4 = vld [vmem:[#allocation8 + $0x8c4] ss:$28 sps:$4 sm:$0xff]   ;;  %v10405_v7 = vld [vmem:[#allocation8 + $0x8cc] ss:$28 sps:$4 sm:$0xff]  }
 0x326   : > { %4873 = vmatprep.subr.bf16.mxu1 %v10342_v8  ;;  %5078 = vmatprep.subr.bf16.mxu0 %v10345_v9  ;;  %v10400_v8 = vld [vmem:[#allocation8 + $0x8c0] ss:$28 sps:$4 sm:$0xff]   ;;  %v10403_v9 = vld [vmem:[#allocation8 + $0x8c8] ss:$28 sps:$4 sm:$0xff]  }
 0x329   : > { %4874 = vmatpush1.bf16.msra.mxu1 %v10340_v12  ;;  %5079 = vmatpush1.bf16.msra.mxu0 %v10343_v13  ;;  %v10406_v12 = vld [vmem:[#allocation8 + $0x8f8] ss:$28 sps:$4 sm:$0xff]   ;;  %v10409_v13 = vld [vmem:[#allocation8 + $0x900] ss:$28 sps:$4 sm:$0xff]  }
 0x32a   : > { %4875 = vmatprep.subr.bf16.mxu1 %v10348_v14  ;;  %5080 = vmatprep.subr.bf16.mxu0 %v10351_v28  ;;  %v10414_v14 = vld [vmem:[#allocation8 + $0x934] ss:$28 sps:$4 sm:$0xff]   ;;  %v10417_v28 = vld [vmem:[#allocation8 + $0x93c] ss:$28 sps:$4 sm:$0xff]  }
 0x32d   : > { %4876 = vmatpush1.bf16.msra.mxu1 %v10346_v18  ;;  %5081 = vmatpush1.bf16.msra.mxu0 %v10349_v19  ;;  %v10420_v18 = vld [vmem:[#allocation8 + $0x96c] ss:$28 sps:$4 sm:$0xff]   ;;  %v10423_v19 = vld [vmem:[#allocation8 + $0x974] ss:$28 sps:$4 sm:$0xff]  }
 0x32e   : > { %4886 = vmatprep.subr.bf16.mxu1 %v10354_v52  ;;  %5091 = vmatprep.subr.bf16.mxu0 %v10357_v6  ;;  %v10418_v52 = vld [vmem:[#allocation8 + $0x968] ss:$28 sps:$4 sm:$0xff]   ;;  %v10421_v6 = vld [vmem:[#allocation8 + $0x970] ss:$28 sps:$4 sm:$0xff]  }
 0x330   : > { %4878 = vmatmul.mubr.bf16.vlgmr.msra.gmra.mrb[4].mxu1 %v12753_v25  ;;  %5083 = vmatmul.mubr.bf16.vlgmr.msra.gmra.mrb[16].mxu0 %v12753_v25 }
 0x331   : > { %4887 = vmatpush1.bf16.msra.mxu1 %v10352_v22  ;;  %5092 = vmatpush1.bf16.msra.mxu0 %v10355_v23  ;;  %v10429_v22 = vld [vmem:[#allocation8 + $0x9ac] ss:$28 sps:$4 sm:$0xff]   ;;  %v864_v23 = vsub.s32 4, %v12694_v27 }
 0x332   : > { %4888 = vmatprep.subr.bf16.mxu1 %v10360_v26  ;;  %5093 = vmatprep.subr.bf16.mxu0 %v10363_v31  ;;  %v10424_v26 = vld [vmem:[#allocation8 + $0x9a0] ss:$28 sps:$4 sm:$0xff]   ;;  %v10427_v31 = vld [vmem:[#allocation8 + $0x9a8] ss:$28 sps:$4 sm:$0xff]  }
 0x333   : > { %4918 = vmatprep.mubr.bf16.mxu1 %v12755_v32  ;;  %5123 = vmatprep.mubr.bf16.mxu0 %v12755_v32 }
 0x335   : > { %4889 = vmatpush1.bf16.msra.mxu1 %v10358_v33  ;;  %5094 = vmatpush1.bf16.msra.mxu0 %v10361_v36  ;;  %v10432_v33 = vld [vmem:[#allocation8 + $0x9dc] ss:$28 sps:$4 sm:$0xff]   ;;  %v10435_v36 = vld [vmem:[#allocation8 + $0x9e4] ss:$28 sps:$4 sm:$0xff]  }
 0x336   : > { %4890 = vmatprep.subr.bf16.mxu1 %v10366_v37  ;;  %5095 = vmatprep.subr.bf16.mxu0 %v10369_v38  ;;  %v12763_v37 = vld [vmem:[#allocation18] sm:$0xff] }
 0x337   : > { %v865_v38 = vrot.slane %v12763_v37, %v864_v23 }
 0x339   : > { %4891 = vmatpush1.bf16.msra.mxu1 %v10364_v39  ;;  %5096 = vmatpush1.bf16.msra.mxu0 %v10367_v40  ;;  %v877_v39 = vrot.slane %v12763_v37, %v876_v24  ;;  %v10430_v40 = vld [vmem:[#allocation8 + $0x9d8] ss:$28 sps:$4 sm:$0xff]   ;;  %v10475_v24 = vld [vmem:[#allocation8 + $0xb68] ss:$28 sps:$4 sm:$0xff]  }
 0x33a   : > { %4892 = vmatprep.subr.bf16.mxu1 %v10372_v41  ;;  %5097 = vmatprep.subr.bf16.mxu0 %v10375_v42  ;;  %v10433_v41 = vld [vmem:[#allocation8 + $0x9e0] ss:$28 sps:$4 sm:$0xff]   ;;  %v12769_v42 = vpop.f32.mrb[12].mxu0 }
 0x33d   : > { %4893 = vmatpush1.bf16.msra.mxu1 %v10370_v43  ;;  %5098 = vmatpush1.bf16.msra.mxu0 %v10373_v44  ;;  %v10438_v43 = vld [vmem:[#allocation8 + $0xa14] ss:$28 sps:$4 sm:$0xff]   ;;  %v10441_v44 = vld [vmem:[#allocation8 + $0xa1c] ss:$28 sps:$4 sm:$0xff]  }
 0x33e   : > { %4894 = vmatprep.subr.bf16.mxu1 %v10378_v45  ;;  %5099 = vmatprep.subr.bf16.mxu0 %v10381_v46  ;;  %v1117_v45 = vadd.f32 %v12730_v5, %v865_v38  ;;  %v12772_v46 = vpop.f32.mrb[13].mxu0  ;;  %v10442_v5 = vld [vmem:[#allocation8 + $0xa48] ss:$28 sps:$4 sm:$0xff]   ;;  %v10486_v38 = vld [vmem:[#allocation8 + $0xbd4] ss:$28 sps:$4 sm:$0xff]  }
 0x340   : > { %vm1210_vm6 = vcmp.ge.f32.partialorder %v1117_v45, 0.0 }
 0x341   : > { %4895 = vmatpush1.bf16.msra.mxu1 %v10376_v47  ;;  %5100 = vmatpush1.bf16.msra.mxu0 %v10379_v50  ;;  %v1160_v47 = vadd.f32 %v12738_v20, %v877_v39  ;;  %v1202_v50 = vpop.f32.mrb[14].mxu0  ;;  %v10450_v20 = vld [vmem:[#allocation8 + $0xa84] ss:$28 sps:$4 sm:$0xff]   ;;  %v10489_v39 = vld [vmem:[#allocation8 + $0xbdc] ss:$28 sps:$4 sm:$0xff]  }
 0x342   : > { %4896 = vmatprep.subr.bf16.mxu1 %v10384_v51  ;;  %5101 = vmatprep.subr.bf16.mxu0 %v10387_v53  ;;  %v10436_v51 = vld [vmem:[#allocation8 + $0xa10] ss:$28 sps:$4 sm:$0xff]   ;;  %v10439_v53 = vld [vmem:[#allocation8 + $0xa18] ss:$28 sps:$4 sm:$0xff]   ;;  %v10498_v50 = vld [vmem:[#allocation8 + $0xc44] ss:$28 sps:$4 sm:$0xff]  }
 0x343   : > { %vm1213_vm7 = vcmp.ge.f32.partialorder %v1160_v47, 0.0 }
 0x345   : > { %4897 = vmatpush1.bf16.msra.mxu1 %v10382_v54  ;;  %5102 = vmatpush1.bf16.msra.mxu0 %v10385_v55  ;;  %v1203_v54 = vpop.f32.mrb[15].mxu0  ;;  %v10444_v55 = vld [vmem:[#allocation8 + $0xa4c] ss:$28 sps:$4 sm:$0xff]  }
 0x346   : > { %4898 = vmatprep.subr.bf16.mxu1 %v10390_v56  ;;  %5103 = vmatprep.subr.bf16.mxu0 %v10393_v57  ;;  %v10447_v56 = vld [vmem:[#allocation8 + $0xa54] ss:$28 sps:$4 sm:$0xff]   ;;  %v1221_v57 = vmul.f32 %v12708_v34, %v1117_v45  ;;  %v10499_v54 = vld [vmem:[#allocation8 + $0xc48] ss:$28 sps:$4 sm:$0xff]  }
 0x349   : > { %4899 = vmatpush1.bf16.msra.mxu1 %v10388_v60  ;;  %5104 = vmatpush1.bf16.msra.mxu0 %v10391_v61  ;;  %v1224_v60 = vmul.f32 %v12708_v34, %v1160_v47  ;;  %v10445_v61 = vld [vmem:[#allocation8 + $0xa50] ss:$28 sps:$4 sm:$0xff]  }
 0x34a   : > { %4900 = vmatprep.subr.bf16.mxu1 %v10396_v62  ;;  %5105 = vmatprep.subr.bf16.mxu0 %v10399_v63  ;;  %v10453_v62 = vld [vmem:[#allocation8 + $0xa8c] ss:$28 sps:$4 sm:$0xff]   ;;  %v1231_v63 = vsel %vm1210_vm6, %v1117_v45, %v1221_v57  ;;  %v10502_v57 = vld [vmem:[#allocation8 + $0xc78] ss:$28 sps:$4 sm:$0xff]  }
 0x34b   : > { %v10490_v45 = vld [vmem:[#allocation8 + $0xc08] ss:$28 sps:$4 sm:$0xff]  }
 0x34d   : > { %4901 = vmatpush1.bf16.msra.mxu1 %v10394_v0  ;;  %5106 = vmatpush1.bf16.msra.mxu0 %v10397_v3  ;;  %v10448_v0 = vld [vmem:[#allocation8 + $0xa80] ss:$28 sps:$4 sm:$0xff]   ;;  %v10451_v3 = vld [vmem:[#allocation8 + $0xa88] ss:$28 sps:$4 sm:$0xff]  }
 0x34e   : > { %4902 = vmatprep.subr.bf16.mxu1 %v10402_v4  ;;  %5107 = vmatprep.subr.bf16.mxu0 %v10405_v7  ;;  %v1234_v4 = vsel %vm1213_vm7, %v1160_v47, %v1224_v60  ;;  %v12777_v7 = vpack.c.bf16 %v1231_v63, %v1231_v63  ;;  %v10493_v47 = vld [vmem:[#allocation8 + $0xc10] ss:$28 sps:$4 sm:$0xff]   ;;  %v10505_v60 = vld [vmem:[#allocation8 + $0xc80] ss:$28 sps:$4 sm:$0xff]  }
 0x34f   : > { %v10516_v63 = vld [vmem:[#allocation8 + $0xcec] ss:$28 sps:$4 sm:$0xff]  }
 0x351   : > { %4903 = vmatpush1.bf16.msra.mxu1 %v10400_v8  ;;  %5108 = vmatpush1.bf16.msra.mxu0 %v10403_v9  ;;  %v10456_v8 = vld [vmem:[#allocation8 + $0xabc] ss:$28 sps:$4 sm:$0xff]   ;;  %v10459_v9 = vld [vmem:[#allocation8 + $0xac4] ss:$28 sps:$4 sm:$0xff]  }
 0x352   : > { %4904 = vmatprep.subr.bf16.mxu1 %v10408_v10  ;;  %5109 = vmatprep.subr.bf16.mxu0 %v10411_v11  ;;  %v10454_v10 = vld [vmem:[#allocation8 + $0xab8] ss:$28 sps:$4 sm:$0xff]   ;;  %v10457_v11 = vld [vmem:[#allocation8 + $0xac0] ss:$28 sps:$4 sm:$0xff]  }
 0x355   : > { %4905 = vmatpush1.bf16.msra.mxu1 %v10406_v12  ;;  %5110 = vmatpush1.bf16.msra.mxu0 %v10409_v13  ;;  %v12779_v12 = vpack.c.bf16 %v1234_v4, %v1234_v4  ;;  %v10462_v13 = vld [vmem:[#allocation8 + $0xaf4] ss:$28 sps:$4 sm:$0xff]  }
 0x356   : > { %4906 = vmatprep.subr.bf16.mxu1 %v10414_v14  ;;  %5111 = vmatprep.subr.bf16.mxu0 %v10417_v28  ;;  %v10465_v14 = vld [vmem:[#allocation8 + $0xafc] ss:$28 sps:$4 sm:$0xff]   ;;  %v10460_v28 = vld [vmem:[#allocation8 + $0xaf0] ss:$28 sps:$4 sm:$0xff]  }
 0x357   : > { %v10517_v4 = vld [vmem:[#allocation8 + $0xcf0] ss:$28 sps:$4 sm:$0xff]  }
 0x359   : > { %4907 = vmatpush1.bf16.msra.mxu1 %v10412_v15  ;;  %5112 = vmatpush1.bf16.msra.mxu0 %v10415_v16  ;;  %v10463_v15 = vld [vmem:[#allocation8 + $0xaf8] ss:$28 sps:$4 sm:$0xff]   ;;  %v10468_v16 = vld [vmem:[#allocation8 + $0xb2c] ss:$28 sps:$4 sm:$0xff]  }
 0x35a   : > { %4908 = vmatprep.subr.bf16.mxu1 %v10420_v18  ;;  %5113 = vmatprep.subr.bf16.mxu0 %v10423_v19  ;;  %v10471_v18 = vld [vmem:[#allocation8 + $0xb34] ss:$28 sps:$4 sm:$0xff]   ;;  %v10466_v19 = vld [vmem:[#allocation8 + $0xb28] ss:$28 sps:$4 sm:$0xff]  }
 0x35d   : > { %4909 = vmatpush1.bf16.msra.mxu1 %v10418_v52  ;;  %5114 = vmatpush1.bf16.msra.mxu0 %v10421_v6  ;;  %v10469_v52 = vld [vmem:[#allocation8 + $0xb30] ss:$28 sps:$4 sm:$0xff]   ;;  %v10474_v6 = vld [vmem:[#allocation8 + $0xb64] ss:$28 sps:$4 sm:$0xff]  }
 0x35e   : > { %4910 = vmatprep.subr.bf16.mxu1 %v10426_v21  ;;  %5115 = vmatprep.subr.bf16.mxu0 %v10429_v22  ;;  %v10477_v21 = vld [vmem:[#allocation8 + $0xb6c] ss:$28 sps:$4 sm:$0xff]   ;;  %v10472_v22 = vld [vmem:[#allocation8 + $0xb60] ss:$28 sps:$4 sm:$0xff]  }
 0x361   : > { %4911 = vmatpush1.bf16.msra.mxu1 %v10424_v26  ;;  %5116 = vmatpush1.bf16.msra.mxu0 %v10427_v31  ;;  %v10480_v26 = vld [vmem:[#allocation8 + $0xb9c] ss:$28 sps:$4 sm:$0xff]   ;;  %v10483_v31 = vld [vmem:[#allocation8 + $0xba4] ss:$28 sps:$4 sm:$0xff]  }
 0x362   : > { %4912 = vmatprep.subr.bf16.mxu1 %v10432_v33  ;;  %5117 = vmatprep.subr.bf16.mxu0 %v10435_v36  ;;  %v10478_v33 = vld [vmem:[#allocation8 + $0xb98] ss:$28 sps:$4 sm:$0xff]   ;;  %v10481_v36 = vld [vmem:[#allocation8 + $0xba0] ss:$28 sps:$4 sm:$0xff]  }
 0x365   : > { %4913 = vmatpush1.bf16.msra.mxu1 %v10430_v40  ;;  %5118 = vmatpush1.bf16.msra.mxu0 %v10433_v41  ;;  %v10484_v40 = vld [vmem:[#allocation8 + $0xbd0] ss:$28 sps:$4 sm:$0xff]   ;;  %v10487_v41 = vld [vmem:[#allocation8 + $0xbd8] ss:$28 sps:$4 sm:$0xff]  }
 0x366   : > { %4914 = vmatprep.subr.bf16.mxu1 %v10438_v43  ;;  %5119 = vmatprep.subr.bf16.mxu0 %v10441_v44  ;;  %v10492_v43 = vld [vmem:[#allocation8 + $0xc0c] ss:$28 sps:$4 sm:$0xff]   ;;  %v10495_v44 = vld [vmem:[#allocation8 + $0xc14] ss:$28 sps:$4 sm:$0xff]  }
 0x369   : > { %4915 = vmatpush1.bf16.msra.mxu1 %v10436_v51  ;;  %5120 = vmatpush1.bf16.msra.mxu0 %v10439_v53  ;;  %v10501_v51 = vld [vmem:[#allocation8 + $0xc4c] ss:$28 sps:$4 sm:$0xff]   ;;  %v10496_v53 = vld [vmem:[#allocation8 + $0xc40] ss:$28 sps:$4 sm:$0xff]  }
 0x36a   : > { %4916 = vmatprep.subr.bf16.mxu1 %v10444_v55  ;;  %5121 = vmatprep.subr.bf16.mxu0 %v10447_v56  ;;  %v10504_v55 = vld [vmem:[#allocation8 + $0xc7c] ss:$28 sps:$4 sm:$0xff]   ;;  %v10507_v56 = vld [vmem:[#allocation8 + $0xc84] ss:$28 sps:$4 sm:$0xff]  }
 0x36d   : > { %4917 = vmatpush1.bf16.msra.mxu1 %v10442_v5  ;;  %5122 = vmatpush1.bf16.msra.mxu0 %v10445_v61  ;;  %v10510_v5 = vld [vmem:[#allocation8 + $0xcb4] ss:$28 sps:$4 sm:$0xff]   ;;  %v10513_v61 = vld [vmem:[#allocation8 + $0xcbc] ss:$28 sps:$4 sm:$0xff]  }
 0x36e   : > { %4927 = vmatprep.subr.bf16.mxu1 %v10450_v20  ;;  %5132 = vmatprep.subr.bf16.mxu0 %v10453_v62  ;;  %v10508_v20 = vld [vmem:[#allocation8 + $0xcb0] ss:$28 sps:$4 sm:$0xff]   ;;  %v10511_v62 = vld [vmem:[#allocation8 + $0xcb8] ss:$28 sps:$4 sm:$0xff]  }
 0x370   : > { %4919 = vmatmul.mubr.bf16.vlgmr.msra.gmra.mrb[4].mxu1 %v12777_v7  ;;  %5124 = vmatmul.mubr.bf16.vlgmr.msra.gmra.mrb[16].mxu0 %v12777_v7 }
 0x371   : > { %4928 = vmatpush1.bf16.msra.mxu1 %v10448_v0  ;;  %5133 = vmatpush1.bf16.msra.mxu0 %v10451_v3  ;;  %v10519_v0 = vld [vmem:[#allocation8 + $0xcf4] ss:$28 sps:$4 sm:$0xff]   ;;  %v10514_v3 = vld [vmem:[#allocation8 + $0xce8] ss:$28 sps:$4 sm:$0xff]  }
 0x372   : > { %4929 = vmatprep.subr.bf16.mxu1 %v10456_v8  ;;  %5134 = vmatprep.subr.bf16.mxu0 %v10459_v9  ;;  %v10522_v8 = vld [vmem:[#allocation8 + $0xd24] ss:$28 sps:$4 sm:$0xff]   ;;  %v10525_v9 = vld [vmem:[#allocation8 + $0xd2c] ss:$28 sps:$4 sm:$0xff]  }
 0x373   : > { %4959 = vmatprep.mubr.bf16.mxu1 %v12779_v12  ;;  %5164 = vmatprep.mubr.bf16.mxu0 %v12779_v12 }
 0x375   : > { %4930 = vmatpush1.bf16.msra.mxu1 %v10454_v10  ;;  %5135 = vmatpush1.bf16.msra.mxu0 %v10457_v11  ;;  %v872_v10 = vsub.s32 6, %v12694_v27  ;;  %v10520_v11 = vld [vmem:[#allocation8 + $0xd20] ss:$28 sps:$4 sm:$0xff]   ;;  %v11256_v27 = vld [vmem:[#allocation9 + $0x624] ss:$16 sps:$4 sm:$0xff]  }
 0x376   : > { %4931 = vmatprep.subr.bf16.mxu1 %v10462_v13  ;;  %5136 = vmatprep.subr.bf16.mxu0 %v10465_v14  ;;  %v10523_v13 = vld [vmem:[#allocation8 + $0xd28] ss:$28 sps:$4 sm:$0xff]  }
 0x377   : > { %v12786_v14 = vld [vmem:[#allocation18 + $0x8] sm:$0x3] }
 0x379   : > { %4932 = vmatpush1.bf16.msra.mxu1 %v10460_v28  ;;  %5137 = vmatpush1.bf16.msra.mxu0 %v10463_v15  ;;  %v10528_v28 = vld [vmem:[#allocation8 + $0xd5c] ss:$28 sps:$4 sm:$0xff]   ;;  %v10531_v15 = vld [vmem:[#allocation8 + $0xd64] ss:$28 sps:$4 sm:$0xff]  }
 0x37a   : > { %4933 = vmatprep.subr.bf16.mxu1 %v10468_v16  ;;  %5138 = vmatprep.subr.bf16.mxu0 %v10471_v18  ;;  %v873_v16 = vrot.slane %v12763_v37, %v872_v10  ;;  %v10526_v18 = vld [vmem:[#allocation8 + $0xd58] ss:$28 sps:$4 sm:$0xff]   ;;  %v10540_v37 = vld [vmem:[#allocation8 + $0xdcc] ss:$28 sps:$4 sm:$0xff]  }
 0x37d   : > { %4934 = vmatpush1.bf16.msra.mxu1 %v10466_v19  ;;  %5139 = vmatpush1.bf16.msra.mxu0 %v10469_v52  ;;  %v10529_v19 = vld [vmem:[#allocation8 + $0xd60] ss:$28 sps:$4 sm:$0xff]   ;;  %v885_v52 = vrot.slane %v12786_v14, %v12702_v30 }
 0x37e   : > { %4935 = vmatprep.subr.bf16.mxu1 %v10474_v6  ;;  %5140 = vmatprep.subr.bf16.mxu0 %v10477_v21  ;;  %v10534_v6 = vld [vmem:[#allocation8 + $0xd94] ss:$28 sps:$4 sm:$0xff]   ;;  %v10537_v21 = vld [vmem:[#allocation8 + $0xd9c] ss:$28 sps:$4 sm:$0xff]  }
 0x381   : > { %4936 = vmatpush1.bf16.msra.mxu1 %v10472_v22  ;;  %5141 = vmatpush1.bf16.msra.mxu0 %v10475_v24  ;;  %v1158_v22 = vadd.f32 %v12736_v17, %v873_v16  ;;  %v10532_v24 = vld [vmem:[#allocation8 + $0xd90] ss:$28 sps:$4 sm:$0xff]   ;;  %v10546_v17 = vld [vmem:[#allocation8 + $0xe04] ss:$28 sps:$4 sm:$0xff]   ;;  %v10585_v16 = vld [vmem:[#allocation8 + $0xf5c] ss:$28 sps:$4 sm:$0xff]  }
 0x382   : > { %4937 = vmatprep.subr.bf16.mxu1 %v10480_v26  ;;  %5142 = vmatprep.subr.bf16.mxu0 %v10483_v31  ;;  %v10535_v26 = vld [vmem:[#allocation8 + $0xd98] ss:$28 sps:$4 sm:$0xff]   ;;  %v1201_v31 = vadd.f32 %v12772_v46, %v885_v52  ;;  %v10549_v46 = vld [vmem:[#allocation8 + $0xe0c] ss:$28 sps:$4 sm:$0xff]  }
 0x383   : > { %vm1212_vm8 = vcmp.ge.f32.partialorder %v1158_v22, 0.0  ;;  %v10588_v52 = vld [vmem:[#allocation8 + $0xf8c] ss:$28 sps:$4 sm:$0xff]  }
 0x384   : > { %vm1215_vm9 = vcmp.ge.f32.partialorder %v1201_v31, 0.0 }
 0x385   : > { %4938 = vmatpush1.bf16.msra.mxu1 %v10478_v33  ;;  %5143 = vmatpush1.bf16.msra.mxu0 %v10481_v36  ;;  %v10543_v33 = vld [vmem:[#allocation8 + $0xdd4] ss:$28 sps:$4 sm:$0xff]   ;;  %v1223_v36 = vmul.f32 %v12708_v34, %v1158_v22 }
 0x386   : > { %4939 = vmatprep.subr.bf16.mxu1 %v10486_v38  ;;  %5144 = vmatprep.subr.bf16.mxu0 %v10489_v39  ;;  %v10538_v38 = vld [vmem:[#allocation8 + $0xdc8] ss:$28 sps:$4 sm:$0xff]   ;;  %v10541_v39 = vld [vmem:[#allocation8 + $0xdd0] ss:$28 sps:$4 sm:$0xff]  }
 0x389   : > { %4940 = vmatpush1.bf16.msra.mxu1 %v10484_v40  ;;  %5145 = vmatpush1.bf16.msra.mxu0 %v10487_v41  ;;  %v1226_v40 = vmul.f32 %v12708_v34, %v1201_v31  ;;  %v1233_v41 = vsel %vm1212_vm8, %v1158_v22, %v1223_v36  ;;  %v10589_v22 = vld [vmem:[#allocation8 + $0xf90] ss:$28 sps:$4 sm:$0xff]   ;;  %v10603_v36 = vld [vmem:[#allocation8 + $0x1004] ss:$28 sps:$4 sm:$0xff]   ;;  %vm12059_vm8 = vmmov 0  }
 0x38a   : > { %4941 = vmatprep.subr.bf16.mxu1 %v10492_v43  ;;  %5146 = vmatprep.subr.bf16.mxu0 %v10495_v44  ;;  %v10544_v43 = vld [vmem:[#allocation8 + $0xe00] ss:$28 sps:$4 sm:$0xff]   ;;  %v10547_v44 = vld [vmem:[#allocation8 + $0xe08] ss:$28 sps:$4 sm:$0xff]  }
 0x38d   : > { %4942 = vmatpush1.bf16.msra.mxu1 %v10490_v45  ;;  %5147 = vmatpush1.bf16.msra.mxu0 %v10493_v47  ;;  %v10552_v45 = vld [vmem:[#allocation8 + $0xe3c] ss:$28 sps:$4 sm:$0xff]   ;;  %v10555_v47 = vld [vmem:[#allocation8 + $0xe44] ss:$28 sps:$4 sm:$0xff]  }
 0x38e   : > { %4943 = vmatprep.subr.bf16.mxu1 %v10498_v50  ;;  %5148 = vmatprep.subr.bf16.mxu0 %v10501_v51  ;;  %v1236_v50 = vsel %vm1215_vm9, %v1201_v31, %v1226_v40  ;;  %v12797_v51 = vpack.c.bf16 %v1233_v41, %v1233_v41  ;;  %v10592_v31 = vld [vmem:[#allocation8 + $0xfc0] ss:$28 sps:$4 sm:$0xff]   ;;  %v10606_v40 = vld [vmem:[#allocation8 + $0x1034] ss:$28 sps:$4 sm:$0xff]  }
 0x38f   : > { %v10607_v41 = vld [vmem:[#allocation8 + $0x1038] ss:$28 sps:$4 sm:$0xff]  }
 0x391   : > { %4944 = vmatpush1.bf16.msra.mxu1 %v10496_v53  ;;  %5149 = vmatpush1.bf16.msra.mxu0 %v10499_v54  ;;  %v10550_v53 = vld [vmem:[#allocation8 + $0xe38] ss:$28 sps:$4 sm:$0xff]   ;;  %v10553_v54 = vld [vmem:[#allocation8 + $0xe40] ss:$28 sps:$4 sm:$0xff]  }
 0x392   : > { %4945 = vmatprep.subr.bf16.mxu1 %v10504_v55  ;;  %5150 = vmatprep.subr.bf16.mxu0 %v10507_v56  ;;  %v12799_v55 = vpack.c.bf16 %v1236_v50, %v1236_v50  ;;  %v10558_v56 = vld [vmem:[#allocation8 + $0xe74] ss:$28 sps:$4 sm:$0xff]   ;;  %v10618_v50 = vld [vmem:[#allocation8 + $0x10a4] ss:$28 sps:$4 sm:$0xff]  }
 0x395   : > { %4946 = vmatpush1.bf16.msra.mxu1 %v10502_v57  ;;  %5151 = vmatpush1.bf16.msra.mxu0 %v10505_v60  ;;  %v10561_v57 = vld [vmem:[#allocation8 + $0xe7c] ss:$28 sps:$4 sm:$0xff]   ;;  %v10556_v60 = vld [vmem:[#allocation8 + $0xe70] ss:$28 sps:$4 sm:$0xff]  }
 0x396   : > { %4947 = vmatprep.subr.bf16.mxu1 %v10510_v5  ;;  %5152 = vmatprep.subr.bf16.mxu0 %v10513_v61  ;;  %v10559_v5 = vld [vmem:[#allocation8 + $0xe78] ss:$28 sps:$4 sm:$0xff]   ;;  %v10564_v61 = vld [vmem:[#allocation8 + $0xeac] ss:$28 sps:$4 sm:$0xff]  }
 0x399   : > { %4948 = vmatpush1.bf16.msra.mxu1 %v10508_v20  ;;  %5153 = vmatpush1.bf16.msra.mxu0 %v10511_v62  ;;  %v10567_v20 = vld [vmem:[#allocation8 + $0xeb4] ss:$28 sps:$4 sm:$0xff]   ;;  %v10562_v62 = vld [vmem:[#allocation8 + $0xea8] ss:$28 sps:$4 sm:$0xff]  }
 0x39a   : > { %4949 = vmatprep.subr.bf16.mxu1 %v10516_v63  ;;  %5154 = vmatprep.subr.bf16.mxu0 %v10519_v0  ;;  %v10565_v63 = vld [vmem:[#allocation8 + $0xeb0] ss:$28 sps:$4 sm:$0xff]   ;;  %v10570_v0 = vld [vmem:[#allocation8 + $0xee4] ss:$28 sps:$4 sm:$0xff]  }
 0x39d   : > { %4950 = vmatpush1.bf16.msra.mxu1 %v10514_v3  ;;  %5155 = vmatpush1.bf16.msra.mxu0 %v10517_v4  ;;  %v10573_v3 = vld [vmem:[#allocation8 + $0xeec] ss:$28 sps:$4 sm:$0xff]   ;;  %v10568_v4 = vld [vmem:[#allocation8 + $0xee0] ss:$28 sps:$4 sm:$0xff]  }
 0x39e   : > { %4951 = vmatprep.subr.bf16.mxu1 %v10522_v8  ;;  %5156 = vmatprep.subr.bf16.mxu0 %v10525_v9  ;;  %v10571_v8 = vld [vmem:[#allocation8 + $0xee8] ss:$28 sps:$4 sm:$0xff]   ;;  %v10576_v9 = vld [vmem:[#allocation8 + $0xf1c] ss:$28 sps:$4 sm:$0xff]  }
 0x3a1   : > { %4952 = vmatpush1.bf16.msra.mxu1 %v10520_v11  ;;  %5157 = vmatpush1.bf16.msra.mxu0 %v10523_v13  ;;  %v10579_v11 = vld [vmem:[#allocation8 + $0xf24] ss:$28 sps:$4 sm:$0xff]   ;;  %v10574_v13 = vld [vmem:[#allocation8 + $0xf18] ss:$28 sps:$4 sm:$0xff]  }
 0x3a2   : > { %4953 = vmatprep.subr.bf16.mxu1 %v10528_v28  ;;  %5158 = vmatprep.subr.bf16.mxu0 %v10531_v15  ;;  %v10577_v28 = vld [vmem:[#allocation8 + $0xf20] ss:$28 sps:$4 sm:$0xff]   ;;  %v10582_v15 = vld [vmem:[#allocation8 + $0xf54] ss:$28 sps:$4 sm:$0xff]  }
 0x3a5   : > { %4954 = vmatpush1.bf16.msra.mxu1 %v10526_v18  ;;  %5159 = vmatpush1.bf16.msra.mxu0 %v10529_v19  ;;  %v10580_v18 = vld [vmem:[#allocation8 + $0xf50] ss:$28 sps:$4 sm:$0xff]   ;;  %v10583_v19 = vld [vmem:[#allocation8 + $0xf58] ss:$28 sps:$4 sm:$0xff]  }
 0x3a6   : > { %4955 = vmatprep.subr.bf16.mxu1 %v10534_v6  ;;  %5160 = vmatprep.subr.bf16.mxu0 %v10537_v21  ;;  %v10591_v6 = vld [vmem:[#allocation8 + $0xf94] ss:$28 sps:$4 sm:$0xff]   ;;  %v10586_v21 = vld [vmem:[#allocation8 + $0xf88] ss:$28 sps:$4 sm:$0xff]  }
 0x3a9   : > { %4956 = vmatpush1.bf16.msra.mxu1 %v10532_v24  ;;  %5161 = vmatpush1.bf16.msra.mxu0 %v10535_v26  ;;  %v10594_v24 = vld [vmem:[#allocation8 + $0xfc4] ss:$28 sps:$4 sm:$0xff]   ;;  %v10597_v26 = vld [vmem:[#allocation8 + $0xfcc] ss:$28 sps:$4 sm:$0xff]  }
 0x3aa   : > { %4957 = vmatprep.subr.bf16.mxu1 %v10540_v37  ;;  %5162 = vmatprep.subr.bf16.mxu0 %v10543_v33  ;;  %v10595_v37 = vld [vmem:[#allocation8 + $0xfc8] ss:$28 sps:$4 sm:$0xff]   ;;  %v10600_v33 = vld [vmem:[#allocation8 + $0xffc] ss:$28 sps:$4 sm:$0xff]  }
 0x3ad   : > { %4958 = vmatpush1.bf16.msra.mxu1 %v10538_v38  ;;  %5163 = vmatpush1.bf16.msra.mxu0 %v10541_v39  ;;  %v10598_v38 = vld [vmem:[#allocation8 + $0xff8] ss:$28 sps:$4 sm:$0xff]   ;;  %v10601_v39 = vld [vmem:[#allocation8 + $0x1000] ss:$28 sps:$4 sm:$0xff]  }
 0x3ae   : > { %4968 = vmatprep.subr.bf16.mxu1 %v10546_v17  ;;  %5173 = vmatprep.subr.bf16.mxu0 %v10549_v46  ;;  %v10609_v17 = vld [vmem:[#allocation8 + $0x103c] ss:$28 sps:$4 sm:$0xff]   ;;  %v10604_v46 = vld [vmem:[#allocation8 + $0x1030] ss:$28 sps:$4 sm:$0xff]  }
 0x3b0   : > { %4960 = vmatmul.mubr.bf16.vlgmr.msra.gmra.mrb[4].mxu1 %v12797_v51  ;;  %5165 = vmatmul.mubr.bf16.vlgmr.msra.gmra.mrb[16].mxu0 %v12797_v51 }
 0x3b1   : > { %4969 = vmatpush1.bf16.msra.mxu1 %v10544_v43  ;;  %5174 = vmatpush1.bf16.msra.mxu0 %v10547_v44  ;;  %v10612_v43 = vld [vmem:[#allocation8 + $0x106c] ss:$28 sps:$4 sm:$0xff]   ;;  %v10615_v44 = vld [vmem:[#allocation8 + $0x1074] ss:$28 sps:$4 sm:$0xff]  }
 0x3b2   : > { %4970 = vmatprep.subr.bf16.mxu1 %v10552_v45  ;;  %5175 = vmatprep.subr.bf16.mxu0 %v10555_v47  ;;  %v10610_v45 = vld [vmem:[#allocation8 + $0x1068] ss:$28 sps:$4 sm:$0xff]   ;;  %v10613_v47 = vld [vmem:[#allocation8 + $0x1070] ss:$28 sps:$4 sm:$0xff]  }
 0x3b3   : > { %5000 = vmatprep.mubr.bf16.mxu1 %v12799_v55  ;;  %5205 = vmatprep.mubr.bf16.mxu0 %v12799_v55 }
 0x3b5   : > { %4971 = vmatpush1.bf16.msra.mxu1 %v10550_v53  ;;  %5176 = vmatpush1.bf16.msra.mxu0 %v10553_v54  ;;  %v10621_v53 = vld [vmem:[#allocation8 + $0x10ac] ss:$28 sps:$4 sm:$0xff]   ;;  %v10616_v54 = vld [vmem:[#allocation8 + $0x10a0] ss:$28 sps:$4 sm:$0xff]  }
 0x3b6   : > { %4972 = vmatprep.subr.bf16.mxu1 %v10558_v56  ;;  %5177 = vmatprep.subr.bf16.mxu0 %v10561_v57  ;;  %v10619_v56 = vld [vmem:[#allocation8 + $0x10a8] ss:$28 sps:$4 sm:$0xff]   ;;  %v881_v57 = vrot.slane %v12786_v14, %v12699_v29 }
 0x3b7   : > { %v10636_v14 = vld [vmem:[#allocation8 + $0x114c] ss:$28 sps:$4 sm:$0xff]  }
 0x3b9   : > { %4973 = vmatpush1.bf16.msra.mxu1 %v10556_v60  ;;  %5178 = vmatpush1.bf16.msra.mxu0 %v10559_v5  ;;  %v10624_v60 = vld [vmem:[#allocation8 + $0x10dc] ss:$28 sps:$4 sm:$0xff]   ;;  %v10627_v5 = vld [vmem:[#allocation8 + $0x10e4] ss:$28 sps:$4 sm:$0xff]  }
 0x3ba   : > { %4974 = vmatprep.subr.bf16.mxu1 %v10564_v61  ;;  %5179 = vmatprep.subr.bf16.mxu0 %v10567_v20  ;;  %v10622_v61 = vld [vmem:[#allocation8 + $0x10d8] ss:$28 sps:$4 sm:$0xff]   ;;  %v10625_v20 = vld [vmem:[#allocation8 + $0x10e0] ss:$28 sps:$4 sm:$0xff]  }
 0x3bd   : > { %4975 = vmatpush1.bf16.msra.mxu1 %v10562_v62  ;;  %5180 = vmatpush1.bf16.msra.mxu0 %v10565_v63  ;;  %v1199_v62 = vadd.f32 %v12769_v42, %v881_v57  ;;  %v10630_v63 = vld [vmem:[#allocation8 + $0x1114] ss:$28 sps:$4 sm:$0xff]  }
 0x3be   : > { %4976 = vmatprep.subr.bf16.mxu1 %v10570_v0  ;;  %5181 = vmatprep.subr.bf16.mxu0 %v10573_v3  ;;  %v10633_v0 = vld [vmem:[#allocation8 + $0x111c] ss:$28 sps:$4 sm:$0xff]   ;;  %v10628_v3 = vld [vmem:[#allocation8 + $0x1110] ss:$28 sps:$4 sm:$0xff]  }
 0x3bf   : > { %vm1214_vm10 = vcmp.ge.f32.partialorder %v1199_v62, 0.0  ;;  %v10642_v42 = vld [vmem:[#allocation8 + $0x14] ss:$28 sps:$4 sm:$0xff]  }
 0x3c0   : > { %v10675_v57 = vld [vmem:[#allocation8 + $0x198] ss:$28 sps:$4 sm:$0xff]  }
 0x3c1   : > { %4977 = vmatpush1.bf16.msra.mxu1 %v10568_v4  ;;  %5182 = vmatpush1.bf16.msra.mxu0 %v10571_v8  ;;  %v10631_v4 = vld [vmem:[#allocation8 + $0x1118] ss:$28 sps:$4 sm:$0xff]  }
 0x3c2   : > { %4978 = vmatprep.subr.bf16.mxu1 %v10576_v9  ;;  %5183 = vmatprep.subr.bf16.mxu0 %v10579_v11  ;;  %v10639_v8 = vld [vmem:[#allocation8 + $0x1154] ss:$28 sps:$4 sm:$0xff]   ;;  %v1225_v9 = vmul.f32 %v12708_v34, %v1199_v62  ;;  %v10634_v11 = vld [vmem:[#allocation8 + $0x1148] ss:$28 sps:$4 sm:$0xff]  }
 0x3c3   : > { %v10645_v34 = vld [vmem:[#allocation8 + $0x48] ss:$28 sps:$4 sm:$0xff]  }
 0x3c5   : > { %4979 = vmatpush1.bf16.msra.mxu1 %v10574_v13  ;;  %5184 = vmatpush1.bf16.msra.mxu0 %v10577_v28  ;;  %v10637_v13 = vld [vmem:[#allocation8 + $0x1150] ss:$28 sps:$4 sm:$0xff]   ;;  %v10643_v28 = vld [vmem:[#allocation8 + $0x1d8] ss:$28 sps:$4 sm:$0xff]  }
 0x3c6   : > { %4980 = vmatprep.subr.bf16.mxu1 %v10582_v15  ;;  %5185 = vmatprep.subr.bf16.mxu0 %v10585_v16  ;;  %v1235_v15 = vsel %vm1214_vm10, %v1199_v62, %v1225_v9  ;;  %v10640_v16 = vld [vmem:[#allocation8 + $0x10] ss:$28 sps:$4 sm:$0xff]   ;;  %v10684_v62 = vld [vmem:[#allocation8 + $0x398] ss:$28 sps:$4 sm:$0xff]   ;;  %v10690_v9 = vld [vmem:[#allocation8 + $0x240] ss:$28 sps:$4 sm:$0xff]  }
 0x3c9   : > { %4981 = vmatpush1.bf16.msra.mxu1 %v10580_v18  ;;  %5186 = vmatpush1.bf16.msra.mxu0 %v10583_v19  ;;  %v10644_v18 = vld [vmem:[#allocation8 + $0x18] ss:$28 sps:$4 sm:$0xff]   ;;  %v10647_v19 = vld [vmem:[#allocation8 + $0x4c] ss:$28 sps:$4 sm:$0xff]  }
 0x3ca   : > { %4982 = vmatprep.subr.bf16.mxu1 %v10588_v52  ;;  %5187 = vmatprep.subr.bf16.mxu0 %v10591_v6  ;;  %v10648_v52 = vld [vmem:[#allocation8 + $0x210] ss:$28 sps:$4 sm:$0xff]   ;;  %v12809_v6 = vpack.c.bf16 %v1235_v15, %v1235_v15  ;;  %v10699_v15 = vld [vmem:[#allocation8 + $0x440] ss:$28 sps:$4 sm:$0xff]  }
 0x3cd   : > { %4983 = vmatpush1.bf16.msra.mxu1 %v10586_v21  ;;  %5188 = vmatpush1.bf16.msra.mxu0 %v10589_v22  ;;  %v10649_v21 = vld [vmem:[#allocation8 + $0x50] ss:$28 sps:$4 sm:$0xff]   ;;  %v10652_v22 = vld [vmem:[#allocation8 + $0x84] ss:$28 sps:$4 sm:$0xff]  }
 0x3ce   : > { %4984 = vmatprep.subr.bf16.mxu1 %v10594_v24  ;;  %5189 = vmatprep.subr.bf16.mxu0 %v10597_v26  ;;  %v10653_v24 = vld [vmem:[#allocation8 + $0x248] ss:$28 sps:$4 sm:$0xff]   ;;  %v10650_v26 = vld [vmem:[#allocation8 + $0x80] ss:$28 sps:$4 sm:$0xff]  }
 0x3d1   : > { %4985 = vmatpush1.bf16.msra.mxu1 %v10592_v31  ;;  %5190 = vmatpush1.bf16.msra.mxu0 %v10595_v37  ;;  %v10654_v31 = vld [vmem:[#allocation8 + $0x88] ss:$28 sps:$4 sm:$0xff]   ;;  %v10657_v37 = vld [vmem:[#allocation8 + $0xbc] ss:$28 sps:$4 sm:$0xff]  }
 0x3d2   : > { %4986 = vmatprep.subr.bf16.mxu1 %v10600_v33  ;;  %5191 = vmatprep.subr.bf16.mxu0 %v10603_v36  ;;  %v10658_v33 = vld [vmem:[#allocation8 + $0x280] ss:$28 sps:$4 sm:$0xff]   ;;  %v10655_v36 = vld [vmem:[#allocation8 + $0xb8] ss:$28 sps:$4 sm:$0xff]  }
 0x3d5   : > { %4987 = vmatpush1.bf16.msra.mxu1 %v10598_v38  ;;  %5192 = vmatpush1.bf16.msra.mxu0 %v10601_v39  ;;  %v10659_v38 = vld [vmem:[#allocation8 + $0xc0] ss:$28 sps:$4 sm:$0xff]   ;;  %v10662_v39 = vld [vmem:[#allocation8 + $0xf4] ss:$28 sps:$4 sm:$0xff]  }
 0x3d6   : > { %4988 = vmatprep.subr.bf16.mxu1 %v10606_v40  ;;  %5193 = vmatprep.subr.bf16.mxu0 %v10609_v17  ;;  %v10663_v40 = vld [vmem:[#allocation8 + $0x2b8] ss:$28 sps:$4 sm:$0xff]  }
 0x3d7   : > { %v10664_v17 = vld [vmem:[#allocation8 + $0xf8] ss:$28 sps:$4 sm:$0xff]  }
 0x3d9   : > { %4989 = vmatpush1.bf16.msra.mxu1 %v10604_v46  ;;  %5194 = vmatpush1.bf16.msra.mxu0 %v10607_v41  ;;  %v10667_v46 = vld [vmem:[#allocation8 + $0x12c] ss:$28 sps:$4 sm:$0xff]  }
 0x3da   : > { %4990 = vmatprep.subr.bf16.mxu1 %v10612_v43  ;;  %5195 = vmatprep.subr.bf16.mxu0 %v10615_v44  ;;  %v10668_v41 = vld [vmem:[#allocation8 + $0x2f0] ss:$28 sps:$4 sm:$0xff]   ;;  %v10665_v43 = vld [vmem:[#allocation8 + $0x128] ss:$28 sps:$4 sm:$0xff]  }
 0x3db   : > { %v10669_v44 = vld [vmem:[#allocation8 + $0x130] ss:$28 sps:$4 sm:$0xff]  }
 0x3dd   : > { %4991 = vmatpush1.bf16.msra.mxu1 %v10610_v45  ;;  %5196 = vmatpush1.bf16.msra.mxu0 %v10613_v47  ;;  %v10672_v45 = vld [vmem:[#allocation8 + $0x164] ss:$28 sps:$4 sm:$0xff]  }
 0x3de   : > { %4992 = vmatprep.subr.bf16.mxu1 %v10618_v50  ;;  %5197 = vmatprep.subr.bf16.mxu0 %v10621_v53  ;;  %v10673_v47 = vld [vmem:[#allocation8 + $0x328] ss:$28 sps:$4 sm:$0xff]   ;;  %v10670_v50 = vld [vmem:[#allocation8 + $0x160] ss:$28 sps:$4 sm:$0xff]  }
 0x3df   : > { %v10674_v53 = vld [vmem:[#allocation8 + $0x168] ss:$28 sps:$4 sm:$0xff]  }
 0x3e1   : > { %4993 = vmatpush1.bf16.msra.mxu1 %v10616_v54  ;;  %5198 = vmatpush1.bf16.msra.mxu0 %v10619_v56  ;;  %v10677_v54 = vld [vmem:[#allocation8 + $0x19c] ss:$28 sps:$4 sm:$0xff]  }
 0x3e2   : > { %4994 = vmatprep.subr.bf16.mxu1 %v10624_v60  ;;  %5199 = vmatprep.subr.bf16.mxu0 %v10627_v5  ;;  %v10678_v56 = vld [vmem:[#allocation8 + $0x360] ss:$28 sps:$4 sm:$0xff]   ;;  %v10682_v5 = vld [vmem:[#allocation8 + $0x1d4] ss:$28 sps:$4 sm:$0xff]  }
 0x3e3   : > { %v10679_v60 = vld [vmem:[#allocation8 + $0x1a0] ss:$28 sps:$4 sm:$0xff]  }
 0x3e5   : > { %4995 = vmatpush1.bf16.msra.mxu1 %v10622_v61  ;;  %5200 = vmatpush1.bf16.msra.mxu0 %v10625_v20  ;;  %v10683_v61 = vld [vmem:[#allocation8 + $0x558] ss:$28 sps:$4 sm:$0xff]   ;;  %v10680_v20 = vld [vmem:[#allocation8 + $0x1d0] ss:$28 sps:$4 sm:$0xff]  }
 0x3e6   : > { %4996 = vmatprep.subr.bf16.mxu1 %v10630_v63  ;;  %5201 = vmatprep.subr.bf16.mxu0 %v10633_v0  ;;  %v10687_v63 = vld [vmem:[#allocation8 + $0x20c] ss:$28 sps:$4 sm:$0xff]  }
 0x3e7   : > { %v10688_v0 = vld [vmem:[#allocation8 + $0x590] ss:$28 sps:$4 sm:$0xff]  }
 0x3e9   : > { %4997 = vmatpush1.bf16.msra.mxu1 %v10628_v3  ;;  %5202 = vmatpush1.bf16.msra.mxu0 %v10631_v4  ;;  %v10685_v3 = vld [vmem:[#allocation8 + $0x208] ss:$28 sps:$4 sm:$0xff]   ;;  %v10689_v4 = vld [vmem:[#allocation8 + $0x3d0] ss:$28 sps:$4 sm:$0xff]  }
 0x3ea   : > { %4998 = vmatprep.subr.bf16.mxu1 %v10636_v14  ;;  %5203 = vmatprep.subr.bf16.mxu0 %v10639_v8  ;;  %v10692_v14 = vld [vmem:[#allocation8 + $0x244] ss:$28 sps:$4 sm:$0xff]  }
 0x3eb   : > { %v10693_v8 = vld [vmem:[#allocation8 + $0x5c8] ss:$28 sps:$4 sm:$0xff]  }
 0x3ed   : > { %4999 = vmatpush1.bf16.msra.mxu1 %v10634_v11  ;;  %5204 = vmatpush1.bf16.msra.mxu0 %v10637_v13  ;;  %v10694_v11 = vld [vmem:[#allocation8 + $0x408] ss:$28 sps:$4 sm:$0xff]   ;;  %v10697_v13 = vld [vmem:[#allocation8 + $0x27c] ss:$28 sps:$4 sm:$0xff]  }
 0x3ee   : > { %5214 = vmatprep.subr.bf16.mxu1 %v10642_v42  ;;  %9593 = vmatprep.subr.bf16.mxu0 %v10643_v28  ;;  %v10698_v42 = vld [vmem:[#allocation8 + $0x600] ss:$28 sps:$4 sm:$0xff]   ;;  %v10695_v28 = vld [vmem:[#allocation8 + $0x278] ss:$28 sps:$4 sm:$0xff]  }
 0x3f0   : > { %5001 = vmatmul.mubr.bf16.vlgmr.msra.gmra.mrb[4].mxu1 %v12809_v6  ;;  %5206 = vmatmul.mubr.bf16.vlgmr.msra.gmra.mrb[16].mxu0 %v12809_v6 }
 0x3f1   : > { %5215 = vmatpush1.bf16.msra.mxu1 %v10640_v16  ;;  %5246 = vmatprep.mubr.bf16.mxu1 %v12717_v48  ;;  %v10702_v16 = vld [vmem:[#allocation8 + $0x2b4] ss:$28 sps:$4 sm:$0xff]  }
 0x3f2   : > { %9594 = vmatpush3.bf16.msra.mxu0 %v10644_v18  ;;  %5451 = vmatprep.mubr.bf16.mxu0 %v12717_v48  ;;  %v10660_v48 = vld [vmem:[#allocation8 + $0xf0] ss:$28 sps:$4 sm:$0xff]   ;;  %v10703_v18 = vld [vmem:[#allocation8 + $0x638] ss:$28 sps:$4 sm:$0xff]  }
 0x3f3   : > { %5216 = vmatprep.subr.bf16.mxu1 %v10647_v19  ;;  %9595 = vmatprep.subr.bf16.mxu0 %v10648_v52  ;;  %v10700_v19 = vld [vmem:[#allocation8 + $0x2b0] ss:$28 sps:$4 sm:$0xff]   ;;  %v10704_v52 = vld [vmem:[#allocation8 + $0x478] ss:$28 sps:$4 sm:$0xff]  }
 0x3f5   : > { %5217 = vmatpush1.bf16.msra.mxu1 %v10645_v34  ;;  %v10707_v34 = vld [vmem:[#allocation8 + $0x2ec] ss:$28 sps:$4 sm:$0xff]  }
 0x3f6   : > { %9596 = vmatpush3.bf16.msra.mxu0 %v10649_v21  ;;  %5218 = vmatprep.subr.bf16.mxu1 %v10652_v22  ;;  %v10708_v21 = vld [vmem:[#allocation8 + $0x670] ss:$28 sps:$4 sm:$0xff]   ;;  %v10705_v22 = vld [vmem:[#allocation8 + $0x2e8] ss:$28 sps:$4 sm:$0xff]  }
 0x3f7   : > { %9597 = vmatprep.subr.bf16.mxu0 %v10653_v24  ;;  %v10709_v24 = vld [vmem:[#allocation8 + $0x4b0] ss:$28 sps:$4 sm:$0xff]  }
 0x3f9   : > { %5219 = vmatpush1.bf16.msra.mxu1 %v10650_v26  ;;  %v10712_v26 = vld [vmem:[#allocation8 + $0x324] ss:$28 sps:$4 sm:$0xff]  }
 0x3fa   : > { %9598 = vmatpush3.bf16.msra.mxu0 %v10654_v31  ;;  %5220 = vmatprep.subr.bf16.mxu1 %v10657_v37  ;;  %v10713_v31 = vld [vmem:[#allocation8 + $0x6a8] ss:$28 sps:$4 sm:$0xff]   ;;  %v10710_v37 = vld [vmem:[#allocation8 + $0x320] ss:$28 sps:$4 sm:$0xff]  }
 0x3fb   : > { %9599 = vmatprep.subr.bf16.mxu0 %v10658_v33  ;;  %v10714_v33 = vld [vmem:[#allocation8 + $0x4e8] ss:$28 sps:$4 sm:$0xff]  }
 0x3fd   : > { %5221 = vmatpush1.bf16.msra.mxu1 %v10655_v36  ;;  %v10717_v36 = vld [vmem:[#allocation8 + $0x35c] ss:$28 sps:$4 sm:$0xff]  }
 0x3fe   : > { %9600 = vmatpush3.bf16.msra.mxu0 %v10659_v38  ;;  %5222 = vmatprep.subr.bf16.mxu1 %v10662_v39  ;;  %v10718_v38 = vld [vmem:[#allocation8 + $0x6e0] ss:$28 sps:$4 sm:$0xff]   ;;  %v10715_v39 = vld [vmem:[#allocation8 + $0x358] ss:$28 sps:$4 sm:$0xff]  }
 0x3ff   : > { %9601 = vmatprep.subr.bf16.mxu0 %v10663_v40  ;;  %v10719_v40 = vld [vmem:[#allocation8 + $0x520] ss:$28 sps:$4 sm:$0xff]  }
 0x401   : > { %5223 = vmatpush1.bf16.msra.mxu1 %v10660_v48  ;;  %v10722_v48 = vld [vmem:[#allocation8 + $0x394] ss:$28 sps:$4 sm:$0xff]  }
 0x402   : > { %9602 = vmatpush3.bf16.msra.mxu0 %v10664_v17  ;;  %5224 = vmatprep.subr.bf16.mxu1 %v10667_v46  ;;  %v10723_v17 = vld [vmem:[#allocation8 + $0x8d8] ss:$28 sps:$4 sm:$0xff]   ;;  %v10720_v46 = vld [vmem:[#allocation8 + $0x390] ss:$28 sps:$4 sm:$0xff]  }
 0x403   : > { %9603 = vmatprep.subr.bf16.mxu0 %v10668_v41  ;;  %v10724_v41 = vld [vmem:[#allocation8 + $0x718] ss:$28 sps:$4 sm:$0xff]  }
 0x405   : > { %5225 = vmatpush1.bf16.msra.mxu1 %v10665_v43  ;;  %v10727_v43 = vld [vmem:[#allocation8 + $0x3cc] ss:$28 sps:$4 sm:$0xff]  }
 0x406   : > { %9604 = vmatpush3.bf16.msra.mxu0 %v10669_v44  ;;  %5226 = vmatprep.subr.bf16.mxu1 %v10672_v45  ;;  %v10728_v44 = vld [vmem:[#allocation8 + $0x910] ss:$28 sps:$4 sm:$0xff]   ;;  %v10725_v45 = vld [vmem:[#allocation8 + $0x3c8] ss:$28 sps:$4 sm:$0xff]  }
 0x407   : > { %9605 = vmatprep.subr.bf16.mxu0 %v10673_v47  ;;  %v10729_v47 = vld [vmem:[#allocation8 + $0x750] ss:$28 sps:$4 sm:$0xff]  }
 0x409   : > { %5227 = vmatpush1.bf16.msra.mxu1 %v10670_v50  ;;  %v10732_v50 = vld [vmem:[#allocation8 + $0x404] ss:$28 sps:$4 sm:$0xff]  }
 0x40a   : > { %9606 = vmatpush3.bf16.msra.mxu0 %v10674_v53  ;;  %5228 = vmatprep.subr.bf16.mxu1 %v10677_v54  ;;  %v10733_v53 = vld [vmem:[#allocation8 + $0x948] ss:$28 sps:$4 sm:$0xff]   ;;  %v10730_v54 = vld [vmem:[#allocation8 + $0x400] ss:$28 sps:$4 sm:$0xff]  }
 0x40b   : > { %9607 = vmatprep.subr.bf16.mxu0 %v10678_v56  ;;  %v10737_v56 = vld [vmem:[#allocation8 + $0x43c] ss:$28 sps:$4 sm:$0xff]  }
 0x40d   : > { %5229 = vmatpush1.bf16.msra.mxu1 %v10675_v57  ;;  %v10738_v57 = vld [vmem:[#allocation8 + $0x980] ss:$28 sps:$4 sm:$0xff]  }
 0x40e   : > { %9608 = vmatpush3.bf16.msra.mxu0 %v10679_v60  ;;  %5230 = vmatprep.subr.bf16.mxu1 %v10682_v5  ;;  %v10735_v60 = vld [vmem:[#allocation8 + $0x438] ss:$28 sps:$4 sm:$0xff]  }
 0x40f   : > { %9615 = vmatprep.subr.bf16.mxu0 %v10683_v61  ;;  %v10742_v5 = vld [vmem:[#allocation8 + $0x474] ss:$28 sps:$4 sm:$0xff]  }
 0x410   : > { %v10743_v61 = vld [vmem:[#allocation8 + $0x9b8] ss:$28 sps:$4 sm:$0xff]  }
 0x411   : > { %5452 = vmatmul.mubr.bf16.vlgmr.msra.gmra.mrb[20].mxu0 %v12719_v49  ;;  %5231 = vmatpush1.bf16.msra.mxu1 %v10680_v20  ;;  %v10740_v20 = vld [vmem:[#allocation8 + $0x470] ss:$28 sps:$4 sm:$0xff]  }
 0x412   : > { %9616 = vmatpush3.bf16.msra.mxu0 %v10684_v62  ;;  %5491 = vmatprep.mubr.bf16.mxu0 %v12728_v1  ;;  %v10744_v62 = vld [vmem:[#allocation8 + $0x7f8] ss:$28 sps:$4 sm:$0xff]  }
 0x413   : > { %5232 = vmatprep.subr.bf16.mxu1 %v10687_v63  ;;  %9617 = vmatprep.subr.bf16.mxu0 %v10688_v0  ;;  %v10747_v63 = vld [vmem:[#allocation8 + $0x4ac] ss:$28 sps:$4 sm:$0xff]  }
 0x414   : > { %v10748_v0 = vld [vmem:[#allocation8 + $0x9f0] ss:$28 sps:$4 sm:$0xff]  }
 0x415   : > { %5233 = vmatpush1.bf16.msra.mxu1 %v10685_v3  ;;  %v10745_v3 = vld [vmem:[#allocation8 + $0x4a8] ss:$28 sps:$4 sm:$0xff]  }
 0x416   : > { %9618 = vmatpush3.bf16.msra.mxu0 %v10689_v4  ;;  %5234 = vmatprep.subr.bf16.mxu1 %v10692_v14  ;;  %v10749_v4 = vld [vmem:[#allocation8 + $0x830] ss:$28 sps:$4 sm:$0xff]   ;;  %v10752_v14 = vld [vmem:[#allocation8 + $0x4e4] ss:$28 sps:$4 sm:$0xff]  }
 0x417   : > { %9619 = vmatprep.subr.bf16.mxu0 %v10693_v8  ;;  %v10753_v8 = vld [vmem:[#allocation8 + $0xa28] ss:$28 sps:$4 sm:$0xff]  }
 0x419   : > { %5235 = vmatpush1.bf16.msra.mxu1 %v10690_v9  ;;  %v10750_v9 = vld [vmem:[#allocation8 + $0x4e0] ss:$28 sps:$4 sm:$0xff]  }
 0x41a   : > { %9620 = vmatpush3.bf16.msra.mxu0 %v10694_v11  ;;  %5236 = vmatprep.subr.bf16.mxu1 %v10697_v13  ;;  %v10754_v11 = vld [vmem:[#allocation8 + $0x868] ss:$28 sps:$4 sm:$0xff]   ;;  %v10757_v13 = vld [vmem:[#allocation8 + $0x51c] ss:$28 sps:$4 sm:$0xff]  }
 0x41b   : > { %9621 = vmatprep.subr.bf16.mxu0 %v10698_v42  ;;  %v10758_v42 = vld [vmem:[#allocation8 + $0xa60] ss:$28 sps:$4 sm:$0xff]  }
 0x41d   : > { %5237 = vmatpush1.bf16.msra.mxu1 %v10695_v28  ;;  %v10755_v28 = vld [vmem:[#allocation8 + $0x518] ss:$28 sps:$4 sm:$0xff]  }
 0x41e   : > { %9622 = vmatpush3.bf16.msra.mxu0 %v10699_v15  ;;  %5238 = vmatprep.subr.bf16.mxu1 %v10702_v16  ;;  %v10759_v15 = vld [vmem:[#allocation8 + $0x8a0] ss:$28 sps:$4 sm:$0xff]   ;;  %v10762_v16 = vld [vmem:[#allocation8 + $0x554] ss:$28 sps:$4 sm:$0xff]  }
 0x41f   : > { %9623 = vmatprep.subr.bf16.mxu0 %v10703_v18  ;;  %v10763_v18 = vld [vmem:[#allocation8 + $0xc58] ss:$28 sps:$4 sm:$0xff]  }
 0x421   : > { %5239 = vmatpush1.bf16.msra.mxu1 %v10700_v19  ;;  %v10760_v19 = vld [vmem:[#allocation8 + $0x550] ss:$28 sps:$4 sm:$0xff]  }
 0x422   : > { %9624 = vmatpush3.bf16.msra.mxu0 %v10704_v52  ;;  %5240 = vmatprep.subr.bf16.mxu1 %v10707_v34  ;;  %v10764_v52 = vld [vmem:[#allocation8 + $0xa98] ss:$28 sps:$4 sm:$0xff]   ;;  %v10767_v34 = vld [vmem:[#allocation8 + $0x58c] ss:$28 sps:$4 sm:$0xff]  }
 0x423   : > { %9625 = vmatprep.subr.bf16.mxu0 %v10708_v21  ;;  %v10768_v21 = vld [vmem:[#allocation8 + $0xc90] ss:$28 sps:$4 sm:$0xff]  }
 0x425   : > { %5241 = vmatpush1.bf16.msra.mxu1 %v10705_v22  ;;  %v10765_v22 = vld [vmem:[#allocation8 + $0x588] ss:$28 sps:$4 sm:$0xff]  }
 0x426   : > { %9626 = vmatpush3.bf16.msra.mxu0 %v10709_v24  ;;  %5242 = vmatprep.subr.bf16.mxu1 %v10712_v26  ;;  %v10769_v24 = vld [vmem:[#allocation8 + $0xad0] ss:$28 sps:$4 sm:$0xff]   ;;  %v10772_v26 = vld [vmem:[#allocation8 + $0x5c4] ss:$28 sps:$4 sm:$0xff]  }
 0x427   : > { %9627 = vmatprep.subr.bf16.mxu0 %v10713_v31  ;;  %v10773_v31 = vld [vmem:[#allocation8 + $0xcc8] ss:$28 sps:$4 sm:$0xff]  }
 0x429   : > { %5243 = vmatpush1.bf16.msra.mxu1 %v10710_v37  ;;  %v10770_v37 = vld [vmem:[#allocation8 + $0x5c0] ss:$28 sps:$4 sm:$0xff]  }
 0x42a   : > { %9628 = vmatpush3.bf16.msra.mxu0 %v10714_v33  ;;  %5244 = vmatprep.subr.bf16.mxu1 %v10717_v36  ;;  %v10774_v33 = vld [vmem:[#allocation8 + $0xb08] ss:$28 sps:$4 sm:$0xff]   ;;  %v10777_v36 = vld [vmem:[#allocation8 + $0x5fc] ss:$28 sps:$4 sm:$0xff]  }
 0x42b   : > { %9629 = vmatprep.subr.bf16.mxu0 %v10718_v38  ;;  %v10778_v38 = vld [vmem:[#allocation8 + $0xd00] ss:$28 sps:$4 sm:$0xff]  }
 0x42d   : > { %5245 = vmatpush1.bf16.msra.mxu1 %v10715_v39  ;;  %v10775_v39 = vld [vmem:[#allocation8 + $0x5f8] ss:$28 sps:$4 sm:$0xff]  }
 0x42e   : > { %9630 = vmatpush3.bf16.msra.mxu0 %v10719_v40  ;;  %5255 = vmatprep.subr.bf16.mxu1 %v10722_v48  ;;  %v10779_v40 = vld [vmem:[#allocation8 + $0xb40] ss:$28 sps:$4 sm:$0xff]   ;;  %v10782_v48 = vld [vmem:[#allocation8 + $0x634] ss:$28 sps:$4 sm:$0xff]  }
 0x42f   : > { %9637 = vmatprep.subr.bf16.mxu0 %v10723_v17  ;;  %v10783_v17 = vld [vmem:[#allocation8 + $0xd38] ss:$28 sps:$4 sm:$0xff]  }
 0x430   : > { %5247 = vmatmul.mubr.bf16.vlgmr.msra.gmra.mrb[8].mxu1 %v12719_v49  ;;  %v10734_v49 = vld [vmem:[#allocation8 + $0x788] ss:$28 sps:$4 sm:$0xff]  }
 0x431   : > { %5492 = vmatmul.mubr.bf16.vlgmr.msra.gmra.mrb[24].mxu0 %v12753_v25  ;;  %5256 = vmatpush1.bf16.msra.mxu1 %v10720_v46  ;;  %v10780_v46 = vld [vmem:[#allocation8 + $0x630] ss:$28 sps:$4 sm:$0xff]  }
 0x432   : > { %5287 = vmatprep.mubr.bf16.mxu1 %v12728_v1  ;;  %9638 = vmatpush3.bf16.msra.mxu0 %v10724_v41  ;;  %v10739_v1 = vld [vmem:[#allocation8 + $0x7c0] ss:$28 sps:$4 sm:$0xff]   ;;  %v10784_v41 = vld [vmem:[#allocation8 + $0xb78] ss:$28 sps:$4 sm:$0xff]  }
 0x433   : > { %5531 = vmatprep.mubr.bf16.mxu0 %v12755_v32  ;;  %5257 = vmatprep.subr.bf16.mxu1 %v10727_v43  ;;  %v10787_v43 = vld [vmem:[#allocation8 + $0x66c] ss:$28 sps:$4 sm:$0xff]  }
 0x434   : > { %9639 = vmatprep.subr.bf16.mxu0 %v10728_v44  ;;  %v10788_v44 = vld [vmem:[#allocation8 + $0xd70] ss:$28 sps:$4 sm:$0xff]  }
 0x435   : > { %5258 = vmatpush1.bf16.msra.mxu1 %v10725_v45  ;;  %v10785_v45 = vld [vmem:[#allocation8 + $0x668] ss:$28 sps:$4 sm:$0xff]  }
 0x436   : > { %9640 = vmatpush3.bf16.msra.mxu0 %v10729_v47  ;;  %5259 = vmatprep.subr.bf16.mxu1 %v10732_v50  ;;  %v10789_v47 = vld [vmem:[#allocation8 + $0xbb0] ss:$28 sps:$4 sm:$0xff]   ;;  %v10792_v50 = vld [vmem:[#allocation8 + $0x6a4] ss:$28 sps:$4 sm:$0xff]  }
 0x437   : > { %9641 = vmatprep.subr.bf16.mxu0 %v10733_v53  ;;  %v10793_v53 = vld [vmem:[#allocation8 + $0xda8] ss:$28 sps:$4 sm:$0xff]  }
 0x439   : > { %5260 = vmatpush1.bf16.msra.mxu1 %v10730_v54  ;;  %v10790_v54 = vld [vmem:[#allocation8 + $0x6a0] ss:$28 sps:$4 sm:$0xff]  }
 0x43a   : > { %9642 = vmatpush3.bf16.msra.mxu0 %v10734_v49  ;;  %5261 = vmatprep.subr.bf16.mxu1 %v10737_v56  ;;  %v10794_v49 = vld [vmem:[#allocation8 + $0xbe8] ss:$28 sps:$4 sm:$0xff]   ;;  %v10797_v56 = vld [vmem:[#allocation8 + $0x6dc] ss:$28 sps:$4 sm:$0xff]  }
 0x43b   : > { %9643 = vmatprep.subr.bf16.mxu0 %v10738_v57  ;;  %v10798_v57 = vld [vmem:[#allocation8 + $0xde0] ss:$28 sps:$4 sm:$0xff]  }
 0x43d   : > { %5262 = vmatpush1.bf16.msra.mxu1 %v10735_v60  ;;  %v10795_v60 = vld [vmem:[#allocation8 + $0x6d8] ss:$28 sps:$4 sm:$0xff]  }
 0x43e   : > { %9644 = vmatpush3.bf16.msra.mxu0 %v10739_v1  ;;  %5263 = vmatprep.subr.bf16.mxu1 %v10742_v5  ;;  %v10799_v1 = vld [vmem:[#allocation8 + $0xc20] ss:$28 sps:$4 sm:$0xff]   ;;  %v10802_v5 = vld [vmem:[#allocation8 + $0x714] ss:$28 sps:$4 sm:$0xff]  }
 0x43f   : > { %9645 = vmatprep.subr.bf16.mxu0 %v10743_v61  ;;  %v10803_v61 = vld [vmem:[#allocation8 + $0xfd8] ss:$28 sps:$4 sm:$0xff]  }
 0x441   : > { %5264 = vmatpush1.bf16.msra.mxu1 %v10740_v20  ;;  %v10800_v20 = vld [vmem:[#allocation8 + $0x710] ss:$28 sps:$4 sm:$0xff]  }
 0x442   : > { %9646 = vmatpush3.bf16.msra.mxu0 %v10744_v62  ;;  %5265 = vmatprep.subr.bf16.mxu1 %v10747_v63  ;;  %v10804_v62 = vld [vmem:[#allocation8 + $0xe18] ss:$28 sps:$4 sm:$0xff]   ;;  %v10807_v63 = vld [vmem:[#allocation8 + $0x74c] ss:$28 sps:$4 sm:$0xff]  }
 0x443   : > { %9647 = vmatprep.subr.bf16.mxu0 %v10748_v0  ;;  %v10808_v0 = vld [vmem:[#allocation8 + $0x1010] ss:$28 sps:$4 sm:$0xff]  }
 0x445   : > { %5266 = vmatpush1.bf16.msra.mxu1 %v10745_v3  ;;  %v10805_v3 = vld [vmem:[#allocation8 + $0x748] ss:$28 sps:$4 sm:$0xff]  }
 0x446   : > { %9648 = vmatpush3.bf16.msra.mxu0 %v10749_v4  ;;  %5267 = vmatprep.subr.bf16.mxu1 %v10752_v14  ;;  %v10809_v4 = vld [vmem:[#allocation8 + $0xe50] ss:$28 sps:$4 sm:$0xff]   ;;  %v10812_v14 = vld [vmem:[#allocation8 + $0x784] ss:$28 sps:$4 sm:$0xff]  }
 0x447   : > { %9649 = vmatprep.subr.bf16.mxu0 %v10753_v8  ;;  %v10813_v8 = vld [vmem:[#allocation8 + $0x1048] ss:$28 sps:$4 sm:$0xff]  }
 0x449   : > { %5268 = vmatpush1.bf16.msra.mxu1 %v10750_v9  ;;  %v10810_v9 = vld [vmem:[#allocation8 + $0x780] ss:$28 sps:$4 sm:$0xff]  }
 0x44a   : > { %9650 = vmatpush3.bf16.msra.mxu0 %v10754_v11  ;;  %5269 = vmatprep.subr.bf16.mxu1 %v10757_v13  ;;  %v10817_v11 = vld [vmem:[#allocation8 + $0x7bc] ss:$28 sps:$4 sm:$0xff]  }
 0x44b   : > { %9651 = vmatprep.subr.bf16.mxu0 %v10758_v42  ;;  %v10818_v13 = vld [vmem:[#allocation8 + $0x1080] ss:$28 sps:$4 sm:$0xff]   ;;  %v10815_v42 = vld [vmem:[#allocation8 + $0x7b8] ss:$28 sps:$4 sm:$0xff]  }
 0x44d   : > { %5270 = vmatpush1.bf16.msra.mxu1 %v10755_v28  ;;  %v10822_v28 = vld [vmem:[#allocation8 + $0x7f4] ss:$28 sps:$4 sm:$0xff]  }
 0x44e   : > { %9652 = vmatpush3.bf16.msra.mxu0 %v10759_v15  ;;  %5271 = vmatprep.subr.bf16.mxu1 %v10762_v16  ;;  %v10823_v15 = vld [vmem:[#allocation8 + $0x10b8] ss:$28 sps:$4 sm:$0xff]   ;;  %v10820_v16 = vld [vmem:[#allocation8 + $0x7f0] ss:$28 sps:$4 sm:$0xff]  }
 0x44f   : > { %9659 = vmatprep.subr.bf16.mxu0 %v10763_v18  ;;  %v10824_v18 = vld [vmem:[#allocation8 + $0xef8] ss:$28 sps:$4 sm:$0xff]  }
 0x451   : > { %5532 = vmatmul.mubr.bf16.vlgmr.msra.gmra.mrb[28].mxu0 %v12777_v7  ;;  %5272 = vmatpush1.bf16.msra.mxu1 %v10760_v19  ;;  %v10827_v19 = vld [vmem:[#allocation8 + $0x82c] ss:$28 sps:$4 sm:$0xff]  }
 0x452   : > { %9660 = vmatpush3.bf16.msra.mxu0 %v10764_v52  ;;  %5571 = vmatprep.mubr.bf16.mxu0 %v12779_v12  ;;  %v10828_v52 = vld [vmem:[#allocation8 + $0x10f0] ss:$28 sps:$4 sm:$0xff]  }
 0x453   : > { %5273 = vmatprep.subr.bf16.mxu1 %v10767_v34  ;;  %9661 = vmatprep.subr.bf16.mxu0 %v10768_v21  ;;  %v10825_v34 = vld [vmem:[#allocation8 + $0x828] ss:$28 sps:$4 sm:$0xff]   ;;  %v10829_v21 = vld [vmem:[#allocation8 + $0xf30] ss:$28 sps:$4 sm:$0xff]  }
 0x455   : > { %5274 = vmatpush1.bf16.msra.mxu1 %v10765_v22  ;;  %v10832_v22 = vld [vmem:[#allocation8 + $0x864] ss:$28 sps:$4 sm:$0xff]  }
 0x456   : > { %9662 = vmatpush3.bf16.msra.mxu0 %v10769_v24  ;;  %5275 = vmatprep.subr.bf16.mxu1 %v10772_v26  ;;  %v10833_v24 = vld [vmem:[#allocation8 + $0x1128] ss:$28 sps:$4 sm:$0xff]   ;;  %v10830_v26 = vld [vmem:[#allocation8 + $0x860] ss:$28 sps:$4 sm:$0xff]  }
 0x457   : > { %9663 = vmatprep.subr.bf16.mxu0 %v10773_v31  ;;  %v10834_v31 = vld [vmem:[#allocation8 + $0xf68] ss:$28 sps:$4 sm:$0xff]  }
 0x459   : > { %5276 = vmatpush1.bf16.msra.mxu1 %v10770_v37  ;;  %v10837_v37 = vld [vmem:[#allocation8 + $0x89c] ss:$28 sps:$4 sm:$0xff]  }
 0x45a   : > { %9664 = vmatpush3.bf16.msra.mxu0 %v10774_v33  ;;  %5277 = vmatprep.subr.bf16.mxu1 %v10777_v36  ;;  %v10838_v33 = vld [vmem:[#allocation8 + $0x1160] ss:$28 sps:$4 sm:$0xff]   ;;  %v10835_v36 = vld [vmem:[#allocation8 + $0x898] ss:$28 sps:$4 sm:$0xff]  }
 0x45b   : > { %9665 = vmatprep.subr.bf16.mxu0 %v10778_v38  ;;  %v10839_v38 = vld [vmem:[#allocation8 + $0xfa0] ss:$28 sps:$4 sm:$0xff]  }
 0x45d   : > { %5278 = vmatpush1.bf16.msra.mxu1 %v10775_v39  ;;  %v10842_v39 = vld [vmem:[#allocation8 + $0x8d4] ss:$28 sps:$4 sm:$0xff]  }
 0x45e   : > { %9666 = vmatpush3.bf16.msra.mxu0 %v10779_v40  ;;  %5279 = vmatprep.subr.bf16.mxu1 %v10782_v48  ;;  %v10845_v40 = vld [vmem:[#allocation9 + $0x4] ss:$16 sps:$4 sm:$0xff]   ;;  %v10840_v48 = vld [vmem:[#allocation8 + $0x8d0] ss:$28 sps:$4 sm:$0xff]  }
 0x45f   : > { %9667 = vmatprep.subr.bf16.mxu0 %v10783_v17  ;;  %v10843_v17 = vld [vmem:[#allocation9] ss:$16 sps:$4 sm:$0xff]  }
 0x461   : > { %5280 = vmatpush1.bf16.msra.mxu1 %v10780_v46  ;;  %v10848_v46 = vld [vmem:[#allocation8 + $0x90c] ss:$28 sps:$4 sm:$0xff]  }
 0x462   : > { %9668 = vmatpush3.bf16.msra.mxu0 %v10784_v41  ;;  %5281 = vmatprep.subr.bf16.mxu1 %v10787_v43  ;;  %v10851_v41 = vld [vmem:[#allocation9 + $0x24] ss:$16 sps:$4 sm:$0xff]  }
 0x463   : > { %9669 = vmatprep.subr.bf16.mxu0 %v10788_v44  ;;  %v10846_v43 = vld [vmem:[#allocation8 + $0x908] ss:$28 sps:$4 sm:$0xff]   ;;  %v10849_v44 = vld [vmem:[#allocation9 + $0x20] ss:$16 sps:$4 sm:$0xff]  }
 0x465   : > { %5282 = vmatpush1.bf16.msra.mxu1 %v10785_v45  ;;  %v10854_v45 = vld [vmem:[#allocation8 + $0x944] ss:$28 sps:$4 sm:$0xff]  }
 0x466   : > { %9670 = vmatpush3.bf16.msra.mxu0 %v10789_v47  ;;  %5283 = vmatprep.subr.bf16.mxu1 %v10792_v50  ;;  %v10857_v47 = vld [vmem:[#allocation9 + $0x44] ss:$16 sps:$4 sm:$0xff]   ;;  %v10852_v50 = vld [vmem:[#allocation8 + $0x940] ss:$28 sps:$4 sm:$0xff]  }
 0x467   : > { %9671 = vmatprep.subr.bf16.mxu0 %v10793_v53  ;;  %v10855_v53 = vld [vmem:[#allocation9 + $0x40] ss:$16 sps:$4 sm:$0xff]  }
 0x469   : > { %5284 = vmatpush1.bf16.msra.mxu1 %v10790_v54  ;;  %v10860_v54 = vld [vmem:[#allocation8 + $0x97c] ss:$28 sps:$4 sm:$0xff]  }
 0x46a   : > { %9672 = vmatpush3.bf16.msra.mxu0 %v10794_v49  ;;  %5285 = vmatprep.subr.bf16.mxu1 %v10797_v56  ;;  %v10863_v49 = vld [vmem:[#allocation9 + $0x64] ss:$16 sps:$4 sm:$0xff]  }
 0x46b   : > { %9673 = vmatprep.subr.bf16.mxu0 %v10798_v57  ;;  %v10858_v56 = vld [vmem:[#allocation8 + $0x978] ss:$28 sps:$4 sm:$0xff]   ;;  %v10861_v57 = vld [vmem:[#allocation9 + $0x60] ss:$16 sps:$4 sm:$0xff]  }
 0x46d   : > { %5286 = vmatpush1.bf16.msra.mxu1 %v10795_v60  ;;  %v10866_v60 = vld [vmem:[#allocation8 + $0x9b4] ss:$28 sps:$4 sm:$0xff]  }
 0x46e   : > { %9674 = vmatpush3.bf16.msra.mxu0 %v10799_v1  ;;  %5296 = vmatprep.subr.bf16.mxu1 %v10802_v5  ;;  %v10869_v1 = vld [vmem:[#allocation9 + $0x84] ss:$16 sps:$4 sm:$0xff]   ;;  %v10864_v5 = vld [vmem:[#allocation8 + $0x9b0] ss:$28 sps:$4 sm:$0xff]  }
 0x46f   : > { %9681 = vmatprep.subr.bf16.mxu0 %v10803_v61  ;;  %v10867_v61 = vld [vmem:[#allocation9 + $0x80] ss:$16 sps:$4 sm:$0xff]  }
 0x470   : > { %5288 = vmatmul.mubr.bf16.vlgmr.msra.gmra.mrb[8].mxu1 %v12753_v25  ;;  %v10814_v25 = vld [vmem:[#allocation8 + $0xe88] ss:$28 sps:$4 sm:$0xff]  }
 0x471   : > { %5572 = vmatmul.mubr.bf16.vlgmr.msra.gmra.mrb[32].mxu0 %v12797_v51  ;;  %5297 = vmatpush1.bf16.msra.mxu1 %v10800_v20  ;;  %v10872_v20 = vld [vmem:[#allocation8 + $0x9ec] ss:$28 sps:$4 sm:$0xff]  }
 0x472   : > { %5328 = vmatprep.mubr.bf16.mxu1 %v12755_v32  ;;  %9682 = vmatpush3.bf16.msra.mxu0 %v10804_v62  ;;  %v10819_v32 = vld [vmem:[#allocation8 + $0xec0] ss:$28 sps:$4 sm:$0xff]   ;;  %v10875_v62 = vld [vmem:[#allocation9 + $0xa4] ss:$16 sps:$4 sm:$0xff]  }
 0x473   : > { %5611 = vmatprep.mubr.bf16.mxu0 %v12799_v55  ;;  %5298 = vmatprep.subr.bf16.mxu1 %v10807_v63  ;;  %v10870_v63 = vld [vmem:[#allocation8 + $0x9e8] ss:$28 sps:$4 sm:$0xff]  }
 0x474   : > { %9683 = vmatprep.subr.bf16.mxu0 %v10808_v0  ;;  %v10873_v0 = vld [vmem:[#allocation9 + $0xa0] ss:$16 sps:$4 sm:$0xff]  }
 0x475   : > { %5299 = vmatpush1.bf16.msra.mxu1 %v10805_v3  ;;  %v10878_v3 = vld [vmem:[#allocation8 + $0xa24] ss:$28 sps:$4 sm:$0xff]  }
 0x476   : > { %9684 = vmatpush3.bf16.msra.mxu0 %v10809_v4  ;;  %5300 = vmatprep.subr.bf16.mxu1 %v10812_v14  ;;  %v10881_v4 = vld [vmem:[#allocation9 + $0xc4] ss:$16 sps:$4 sm:$0xff]   ;;  %v10876_v14 = vld [vmem:[#allocation8 + $0xa20] ss:$28 sps:$4 sm:$0xff]  }
 0x477   : > { %9685 = vmatprep.subr.bf16.mxu0 %v10813_v8  ;;  %v10879_v8 = vld [vmem:[#allocation9 + $0xc0] ss:$16 sps:$4 sm:$0xff]  }
 0x479   : > { %5301 = vmatpush1.bf16.msra.mxu1 %v10810_v9  ;;  %v10884_v9 = vld [vmem:[#allocation8 + $0xa5c] ss:$28 sps:$4 sm:$0xff]  }
 0x47a   : > { %9686 = vmatpush3.bf16.msra.mxu0 %v10814_v25  ;;  %5302 = vmatprep.subr.bf16.mxu1 %v10817_v11  ;;  %v10887_v25 = vld [vmem:[#allocation9 + $0xe4] ss:$16 sps:$4 sm:$0xff]  }
 0x47b   : > { %9687 = vmatprep.subr.bf16.mxu0 %v10818_v13  ;;  %v10882_v11 = vld [vmem:[#allocation8 + $0xa58] ss:$28 sps:$4 sm:$0xff]   ;;  %v10885_v13 = vld [vmem:[#allocation9 + $0xe0] ss:$16 sps:$4 sm:$0xff]  }
 0x47d   : > { %5303 = vmatpush1.bf16.msra.mxu1 %v10815_v42  ;;  %v10890_v42 = vld [vmem:[#allocation8 + $0xa94] ss:$28 sps:$4 sm:$0xff]  }
 0x47e   : > { %9688 = vmatpush3.bf16.msra.mxu0 %v10819_v32  ;;  %5304 = vmatprep.subr.bf16.mxu1 %v10822_v28  ;;  %v10893_v32 = vld [vmem:[#allocation9 + $0x104] ss:$16 sps:$4 sm:$0xff]   ;;  %v10888_v28 = vld [vmem:[#allocation8 + $0xa90] ss:$28 sps:$4 sm:$0xff]  }
 0x47f   : > { %9689 = vmatprep.subr.bf16.mxu0 %v10823_v15  ;;  %v10891_v15 = vld [vmem:[#allocation9 + $0x100] ss:$16 sps:$4 sm:$0xff]  }
 0x481   : > { %5305 = vmatpush1.bf16.msra.mxu1 %v10820_v16  ;;  %v10896_v16 = vld [vmem:[#allocation8 + $0xacc] ss:$28 sps:$4 sm:$0xff]  }
 0x482   : > { %9690 = vmatpush3.bf16.msra.mxu0 %v10824_v18  ;;  %5306 = vmatprep.subr.bf16.mxu1 %v10827_v19  ;;  %v10899_v18 = vld [vmem:[#allocation9 + $0x124] ss:$16 sps:$4 sm:$0xff]  }
 0x483   : > { %9691 = vmatprep.subr.bf16.mxu0 %v10828_v52  ;;  %v10894_v19 = vld [vmem:[#allocation8 + $0xac8] ss:$28 sps:$4 sm:$0xff]   ;;  %v10897_v52 = vld [vmem:[#allocation9 + $0x120] ss:$16 sps:$4 sm:$0xff]  }
 0x485   : > { %5307 = vmatpush1.bf16.msra.mxu1 %v10825_v34  ;;  %v10902_v34 = vld [vmem:[#allocation8 + $0xb04] ss:$28 sps:$4 sm:$0xff]  }
 0x486   : > { %9692 = vmatpush3.bf16.msra.mxu0 %v10829_v21  ;;  %5308 = vmatprep.subr.bf16.mxu1 %v10832_v22  ;;  %v10905_v21 = vld [vmem:[#allocation9 + $0x144] ss:$16 sps:$4 sm:$0xff]   ;;  %v10900_v22 = vld [vmem:[#allocation8 + $0xb00] ss:$28 sps:$4 sm:$0xff]  }
 0x487   : > { %9693 = vmatprep.subr.bf16.mxu0 %v10833_v24  ;;  %v10903_v24 = vld [vmem:[#allocation9 + $0x140] ss:$16 sps:$4 sm:$0xff]  }
 0x489   : > { %5309 = vmatpush1.bf16.msra.mxu1 %v10830_v26  ;;  %v10908_v26 = vld [vmem:[#allocation8 + $0xb3c] ss:$28 sps:$4 sm:$0xff]  }
 0x48a   : > { %9694 = vmatpush3.bf16.msra.mxu0 %v10834_v31  ;;  %5310 = vmatprep.subr.bf16.mxu1 %v10837_v37  ;;  %v10911_v31 = vld [vmem:[#allocation9 + $0x164] ss:$16 sps:$4 sm:$0xff]  }
 0x48b   : > { %9695 = vmatprep.subr.bf16.mxu0 %v10838_v33  ;;  %v10914_v37 = vld [vmem:[#allocation8 + $0xb74] ss:$28 sps:$4 sm:$0xff]  }
 0x48c   : > { %v10917_v33 = vld [vmem:[#allocation9 + $0x184] ss:$16 sps:$4 sm:$0xff]  }
 0x48d   : > { %5311 = vmatpush1.bf16.msra.mxu1 %v10835_v36  ;;  %v10912_v36 = vld [vmem:[#allocation8 + $0xb70] ss:$28 sps:$4 sm:$0xff]  }
 0x48e   : > { %9696 = vmatpush3.bf16.msra.mxu0 %v10839_v38  ;;  %5312 = vmatprep.subr.bf16.mxu1 %v10842_v39  ;;  %v12830_v38 = vld [vmem:[#allocation20] sm:$0xff] }
 0x48f   : > { %7015 = vmatprep.subr.bf16.mxu0 %v10845_v40  ;;  %v10915_v39 = vld [vmem:[#allocation9 + $0x180] ss:$16 sps:$4 sm:$0xff]   ;;  %v10920_v40 = vld [vmem:[#allocation8 + $0xbac] ss:$28 sps:$4 sm:$0xff]  }
 0x491   : > { %5612 = vmatmul.mubr.bf16.vlgmr.msra.gmra.mrb[36].mxu0 %v12809_v6  ;;  %5313 = vmatpush1.bf16.msra.mxu1 %v10840_v48  ;;  %v10923_v48 = vld [vmem:[#allocation9 + $0x1a4] ss:$16 sps:$4 sm:$0xff]  }
 0x492   : > { %7016 = vmatpush1.bf16.msra.mxu0 %v10843_v17  ;;  %5314 = vmatprep.subr.bf16.mxu1 %v10848_v46  ;;  %v1892_v17 = vrot.slane %v12830_v38, %v12699_v29  ;;  %v1896_v46 = vrot.slane %v12830_v38, %v12702_v30 }
 0x493   : > { %7017 = vmatprep.subr.bf16.mxu0 %v10851_v41  ;;  %v1904_v41 = vrot.slane %v12830_v38, %v12711_v35 }
 0x495   : > { %5315 = vmatpush1.bf16.msra.mxu1 %v10846_v43  ;;  %v10918_v43 = vld [vmem:[#allocation8 + $0xba8] ss:$28 sps:$4 sm:$0xff]  }
 0x496   : > { %7018 = vmatpush1.bf16.msra.mxu0 %v10849_v44  ;;  %5316 = vmatprep.subr.bf16.mxu1 %v10854_v45  ;;  %v10921_v44 = vld [vmem:[#allocation9 + $0x1a0] ss:$16 sps:$4 sm:$0xff]  }
 0x497   : > { %7019 = vmatprep.subr.bf16.mxu0 %v10857_v47  ;;  %v10926_v45 = vld [vmem:[#allocation8 + $0xbe4] ss:$28 sps:$4 sm:$0xff]  }
 0x499   : > { %5317 = vmatpush1.bf16.msra.mxu1 %v10852_v50 }
 0x49a   : > { %7020 = vmatpush1.bf16.msra.mxu0 %v10855_v53  ;;  %5318 = vmatprep.subr.bf16.mxu1 %v10860_v54  ;;  %v10929_v53 = vld [vmem:[#allocation9 + $0x1c4] ss:$16 sps:$4 sm:$0xff]  }
 0x49b   : > { %7021 = vmatprep.subr.bf16.mxu0 %v10863_v49  ;;  %v12840_v49 = vstv %s9251_s2 }
 0x49d   : > { %5319 = vmatpush1.bf16.msra.mxu1 %v10858_v56 }
 0x49e   : > { %7022 = vmatpush1.bf16.msra.mxu0 %v10861_v57  ;;  %5320 = vmatprep.subr.bf16.mxu1 %v10866_v60 }
 0x49f   : > { %7023 = vmatprep.subr.bf16.mxu0 %v10869_v1 }
 0x4a1   : > { %5321 = vmatpush1.bf16.msra.mxu1 %v10864_v5 }
 0x4a2   : > { %7024 = vmatpush1.bf16.msra.mxu0 %v10867_v61  ;;  %5322 = vmatprep.subr.bf16.mxu1 %v10872_v20  ;;  %v10924_v20 = vld [vmem:[#allocation8 + $0xbe0] ss:$28 sps:$4 sm:$0xff]  }
 0x4a3   : > { %7025 = vmatprep.subr.bf16.mxu0 %v10875_v62 }
 0x4a5   : > { %5323 = vmatpush1.bf16.msra.mxu1 %v10870_v63 }
 0x4a6   : > { %7026 = vmatpush1.bf16.msra.mxu0 %v10873_v0  ;;  %5324 = vmatprep.subr.bf16.mxu1 %v10878_v3  ;;  %v10927_v0 = vld [vmem:[#allocation9 + $0x1c0] ss:$16 sps:$4 sm:$0xff]   ;;  %v10932_v3 = vld [vmem:[#allocation8 + $0xc1c] ss:$28 sps:$4 sm:$0xff]  }
 0x4a7   : > { %7027 = vmatprep.subr.bf16.mxu0 %v10881_v4 }
 0x4a9   : > { %5325 = vmatpush1.bf16.msra.mxu1 %v10876_v14  ;;  %v10935_v14 = vld [vmem:[#allocation9 + $0x1e4] ss:$16 sps:$4 sm:$0xff]  }
 0x4aa   : > { %7028 = vmatpush1.bf16.msra.mxu0 %v10879_v8  ;;  %5326 = vmatprep.subr.bf16.mxu1 %v10884_v9 }
 0x4ab   : > { %7029 = vmatprep.subr.bf16.mxu0 %v10887_v25  ;;  %v10930_v25 = vld [vmem:[#allocation8 + $0xc18] ss:$28 sps:$4 sm:$0xff]  }
 0x4ad   : > { %5327 = vmatpush1.bf16.msra.mxu1 %v10882_v11 }
 0x4ae   : > { %7030 = vmatpush1.bf16.msra.mxu0 %v10885_v13  ;;  %5337 = vmatprep.subr.bf16.mxu1 %v10890_v42  ;;  %v10933_v13 = vld [vmem:[#allocation9 + $0x1e0] ss:$16 sps:$4 sm:$0xff]  }
 0x4af   : > { %7031 = vmatprep.subr.bf16.mxu0 %v10893_v32  ;;  %v10938_v32 = vld [vmem:[#allocation8 + $0xc54] ss:$28 sps:$4 sm:$0xff]  }
 0x4b0   : > { %5329 = vmatmul.mubr.bf16.vlgmr.msra.gmra.mrb[8].mxu1 %v12777_v7  ;;  %v10906_v7 = vld [vmem:[#allocation8 + $0xb38] ss:$28 sps:$4 sm:$0xff]  }
 0x4b1   : > { %5338 = vmatpush1.bf16.msra.mxu1 %v10888_v28  ;;  %5369 = vmatprep.mubr.bf16.mxu1 %v12779_v12  ;;  %v10909_v12 = vld [vmem:[#allocation9 + $0x160] ss:$16 sps:$4 sm:$0xff]   ;;  %v10941_v28 = vld [vmem:[#allocation9 + $0x204] ss:$16 sps:$4 sm:$0xff]  }
 0x4b2   : > { %7032 = vmatpush1.bf16.msra.mxu0 %v10891_v15  ;;  %5339 = vmatprep.subr.bf16.mxu1 %v10896_v16  ;;  %v10936_v16 = vld [vmem:[#allocation8 + $0xc50] ss:$28 sps:$4 sm:$0xff]  }
 0x4b3   : > { %7033 = vmatprep.subr.bf16.mxu0 %v10899_v18 }
 0x4b5   : > { %5340 = vmatpush1.bf16.msra.mxu1 %v10894_v19  ;;  %v10939_v19 = vld [vmem:[#allocation9 + $0x200] ss:$16 sps:$4 sm:$0xff]  }
 0x4b6   : > { %7034 = vmatpush1.bf16.msra.mxu0 %v10897_v52  ;;  %5341 = vmatprep.subr.bf16.mxu1 %v10902_v34  ;;  %v10944_v34 = vld [vmem:[#allocation8 + $0xc8c] ss:$28 sps:$4 sm:$0xff]  }
 0x4b7   : > { %7035 = vmatprep.subr.bf16.mxu0 %v10905_v21  ;;  %v10947_v21 = vld [vmem:[#allocation9 + $0x224] ss:$16 sps:$4 sm:$0xff]  }
 0x4b9   : > { %5342 = vmatpush1.bf16.msra.mxu1 %v10900_v22 }
 0x4ba   : > { %7036 = vmatpush1.bf16.msra.mxu0 %v10903_v24  ;;  %5343 = vmatprep.subr.bf16.mxu1 %v10908_v26  ;;  %v10942_v24 = vld [vmem:[#allocation8 + $0xc88] ss:$28 sps:$4 sm:$0xff]   ;;  %v10945_v26 = vld [vmem:[#allocation9 + $0x220] ss:$16 sps:$4 sm:$0xff]  }
 0x4bb   : > { %7037 = vmatprep.subr.bf16.mxu0 %v10911_v31  ;;  %v10950_v31 = vld [vmem:[#allocation8 + $0xcc4] ss:$28 sps:$4 sm:$0xff]  }
 0x4bd   : > { %5344 = vmatpush1.bf16.msra.mxu1 %v10906_v7  ;;  %v10953_v7 = vld [vmem:[#allocation9 + $0x244] ss:$16 sps:$4 sm:$0xff]  }
 0x4be   : > { %7038 = vmatpush1.bf16.msra.mxu0 %v10909_v12  ;;  %5345 = vmatprep.subr.bf16.mxu1 %v10914_v37  ;;  %v10948_v12 = vld [vmem:[#allocation8 + $0xcc0] ss:$28 sps:$4 sm:$0xff]  }
 0x4bf   : > { %7039 = vmatprep.subr.bf16.mxu0 %v10917_v33  ;;  %v10951_v37 = vld [vmem:[#allocation9 + $0x240] ss:$16 sps:$4 sm:$0xff]   ;;  %v10956_v33 = vld [vmem:[#allocation8 + $0xcfc] ss:$28 sps:$4 sm:$0xff]  }
 0x4c1   : > { %5346 = vmatpush1.bf16.msra.mxu1 %v10912_v36  ;;  %v10959_v36 = vld [vmem:[#allocation9 + $0x264] ss:$16 sps:$4 sm:$0xff]  }
 0x4c2   : > { %7040 = vmatpush1.bf16.msra.mxu0 %v10915_v39  ;;  %5347 = vmatprep.subr.bf16.mxu1 %v10920_v40  ;;  %v10954_v39 = vld [vmem:[#allocation8 + $0xcf8] ss:$28 sps:$4 sm:$0xff]   ;;  %v10957_v40 = vld [vmem:[#allocation9 + $0x260] ss:$16 sps:$4 sm:$0xff]  }
 0x4c3   : > { %v5002_v47 = vpop.f32.mrb[4].mxu1  ;;  %v12838_v50 = vpop.f32.mrb[16].mxu0  ;;  %7041 = vmatprep.subr.bf16.mxu0 %v10923_v48  ;;  %v10962_v48 = vld [vmem:[#allocation8 + $0xd34] ss:$28 sps:$4 sm:$0xff]  }
 0x4c4   : > { %v9812_v54 = vadd.f32 %v5002_v47, %v1892_v17  ;;  %v5004_v56 = vpop.f32.mrb[5].mxu1  ;;  %v5209_v57 = vpop.f32.mrb[17].mxu0  ;;  %v10965_v17 = vld [vmem:[#allocation9 + $0x284] ss:$16 sps:$4 sm:$0xff]   ;;  %v10969_v47 = vld [vmem:[#allocation9 + $0x2a0] ss:$16 sps:$4 sm:$0xff]  }
 0x4c5   : > { %v9813_v60 = vadd.f32 %v5004_v56, %v1896_v46  ;;  %v9815_v1 = vadd.f32 %v5209_v57, %v1904_v41  ;;  %v5006_v5 = vpop.f32.mrb[6].mxu1  ;;  %v5211_v61 = vpop.f32.mrb[18].mxu0  ;;  %5348 = vmatpush1.bf16.msra.mxu1 %v10918_v43  ;;  %v10960_v46 = vld [vmem:[#allocation8 + $0xd30] ss:$28 sps:$4 sm:$0xff]  }
 0x4c6   : > { %7042 = vmatpush1.bf16.msra.mxu0 %v10921_v44  ;;  %v5007_v62 = vpop.f32.mrb[7].mxu1  ;;  %v5212_v63 = vpop.f32.mrb[19].mxu0  ;;  %5349 = vmatprep.subr.bf16.mxu1 %v10926_v45  ;;  %v5628_v8 = vmul.f32 %v9812_v54, %v12840_v49  ;;  %vm5620_vm12 = vcmp.ge.f32.partialorder %v9812_v54, 0.0  ;;  %v10963_v41 = vld [vmem:[#allocation9 + $0x280] ss:$16 sps:$4 sm:$0xff]  }
 0x4c7   : > { %vm5621_vm11 = vcmp.ge.f32.partialorder %v9813_v60, 0.0  ;;  %v5629_v4 = vmul.f32 %v9813_v60, %v12840_v49  ;;  %7043 = vmatprep.subr.bf16.mxu0 %v10929_v53  ;;  %v5631_v9 = vmul.f32 %v9815_v1, %v12840_v49  ;;  %vm5623_vm13 = vcmp.ge.f32.partialorder %v9815_v1, 0.0  ;;  %v10968_v43 = vld [vmem:[#allocation8 + $0xd6c] ss:$28 sps:$4 sm:$0xff]   ;;  %v10971_v44 = vld [vmem:[#allocation9 + $0x2a4] ss:$16 sps:$4 sm:$0xff]  }
 0x4c8   : > { %v5635_v15 = vsel %vm5620_vm12, %v9812_v54, %v5628_v8  ;;  %v10966_v45 = vld [vmem:[#allocation8 + $0xd68] ss:$28 sps:$4 sm:$0xff]   ;;  %v10975_v61 = vld [vmem:[#allocation9 + $0x2c0] ss:$16 sps:$4 sm:$0xff]  }
 0x4c9   : > { %5350 = vmatpush1.bf16.msra.mxu1 %v10924_v20  ;;  %v5636_v11 = vsel %vm5621_vm11, %v9813_v60, %v5629_v4  ;;  %v5638_v18 = vsel %vm5623_vm13, %v9815_v1, %v5631_v9  ;;  %v12848_v52 = vpack.c.bf16 %v5635_v15, %v5635_v15  ;;  %v10974_v53 = vld [vmem:[#allocation8 + $0xda4] ss:$28 sps:$4 sm:$0xff]   ;;  %v10980_v20 = vld [vmem:[#allocation8 + $0xddc] ss:$28 sps:$4 sm:$0xff]   ;;  %v10986_v4 = vld [vmem:[#allocation8 + $0xe14] ss:$28 sps:$4 sm:$0xff]  }
 0x4ca   : > { %7044 = vmatpush1.bf16.msra.mxu0 %v10927_v0  ;;  %5351 = vmatprep.subr.bf16.mxu1 %v10932_v3  ;;  %v12845_v42 = vpack.c.bf16 %v5636_v11, %v5636_v11  ;;  %v12850_v22 = vpack.c.bf16 %v5638_v18, %v5638_v18  ;;  %v10977_v54 = vld [vmem:[#allocation9 + $0x2c4] ss:$16 sps:$4 sm:$0xff]   ;;  %v10972_v60 = vld [vmem:[#allocation8 + $0xda0] ss:$28 sps:$4 sm:$0xff]   ;;  %v10984_v8 = vld [vmem:[#allocation8 + $0xe10] ss:$28 sps:$4 sm:$0xff]  }
 0x4cb   : > { %7045 = vmatprep.subr.bf16.mxu0 %v10935_v14  ;;  %v10983_v63 = vld [vmem:[#allocation9 + $0x2e4] ss:$16 sps:$4 sm:$0xff]   ;;  %v10981_v3 = vld [vmem:[#allocation9 + $0x2e0] ss:$16 sps:$4 sm:$0xff]  }
 0x4cc   : > { %7047 = vmatprep.mubr.bf16.mxu0 %v12845_v42  ;;  %v10978_v0 = vld [vmem:[#allocation8 + $0xdd8] ss:$28 sps:$4 sm:$0xff]   ;;  %v10987_v9 = vld [vmem:[#allocation9 + $0x300] ss:$16 sps:$4 sm:$0xff]  }
 0x4cd   : > { %5352 = vmatpush1.bf16.msra.mxu1 %v10930_v25  ;;  %v10989_v14 = vld [vmem:[#allocation9 + $0x304] ss:$16 sps:$4 sm:$0xff]   ;;  %v10992_v25 = vld [vmem:[#allocation8 + $0xe4c] ss:$28 sps:$4 sm:$0xff]   ;;  %v10999_v18 = vld [vmem:[#allocation9 + $0x340] ss:$16 sps:$4 sm:$0xff]  }
 0x4ce   : > { %7046 = vmatpush1.bf16.msra.mxu0 %v10933_v13  ;;  %5353 = vmatprep.subr.bf16.mxu1 %v10938_v32  ;;  %v10995_v11 = vld [vmem:[#allocation9 + $0x324] ss:$16 sps:$4 sm:$0xff]   ;;  %v10993_v32 = vld [vmem:[#allocation9 + $0x320] ss:$16 sps:$4 sm:$0xff]  }
 0x4cf   : > { %7056 = vmatprep.subr.bf16.mxu0 %v10941_v28  ;;  %v10990_v13 = vld [vmem:[#allocation8 + $0xe48] ss:$28 sps:$4 sm:$0xff]  }
 0x4d0   : > { %v10998_v28 = vld [vmem:[#allocation8 + $0xe84] ss:$28 sps:$4 sm:$0xff]  }
 0x4d1   : > { %7048 = vmatmul.mubr.bf16.vlgmr.msra.gmra.mrb[40].mxu0 %v12848_v52  ;;  %5354 = vmatpush1.bf16.msra.mxu1 %v10936_v16  ;;  %v11001_v15 = vld [vmem:[#allocation9 + $0x344] ss:$16 sps:$4 sm:$0xff]   ;;  %v10996_v16 = vld [vmem:[#allocation8 + $0xe80] ss:$28 sps:$4 sm:$0xff]  }
 0x4d2   : > { %7057 = vmatpush1.bf16.msra.mxu0 %v10939_v19  ;;  %7088 = vmatprep.mubr.bf16.mxu0 %v12850_v22  ;;  %v11004_v19 = vld [vmem:[#allocation8 + $0xebc] ss:$28 sps:$4 sm:$0xff]  }
 0x4d3   : > { %5355 = vmatprep.subr.bf16.mxu1 %v10944_v34  ;;  %7058 = vmatprep.subr.bf16.mxu0 %v10947_v21  ;;  %v11007_v34 = vld [vmem:[#allocation9 + $0x364] ss:$16 sps:$4 sm:$0xff]  }
 0x4d4   : > { %v11010_v21 = vld [vmem:[#allocation8 + $0xef4] ss:$28 sps:$4 sm:$0xff]  }
 0x4d5   : > { %5356 = vmatpush1.bf16.msra.mxu1 %v10942_v24  ;;  %v11013_v24 = vld [vmem:[#allocation9 + $0x384] ss:$16 sps:$4 sm:$0xff]  }
 0x4d6   : > { %7059 = vmatpush1.bf16.msra.mxu0 %v10945_v26  ;;  %5357 = vmatprep.subr.bf16.mxu1 %v10950_v31  ;;  %v11008_v26 = vld [vmem:[#allocation8 + $0xef0] ss:$28 sps:$4 sm:$0xff]  }
 0x4d7   : > { %7060 = vmatprep.subr.bf16.mxu0 %v10953_v7  ;;  %v11011_v31 = vld [vmem:[#allocation9 + $0x380] ss:$16 sps:$4 sm:$0xff]   ;;  %v11016_v7 = vld [vmem:[#allocation8 + $0xf2c] ss:$28 sps:$4 sm:$0xff]  }
 0x4d9   : > { %5358 = vmatpush1.bf16.msra.mxu1 %v10948_v12  ;;  %v11019_v12 = vld [vmem:[#allocation9 + $0x3a4] ss:$16 sps:$4 sm:$0xff]  }
 0x4da   : > { %7061 = vmatpush1.bf16.msra.mxu0 %v10951_v37  ;;  %5359 = vmatprep.subr.bf16.mxu1 %v10956_v33  ;;  %v1900_v37 = vrot.slane %v12830_v38, %v12741_v58  ;;  %v11014_v33 = vld [vmem:[#allocation8 + $0xf28] ss:$28 sps:$4 sm:$0xff]  }
 0x4db   : > { %7062 = vmatprep.subr.bf16.mxu0 %v10959_v36  ;;  %v1916_v36 = vrot.slane %v12830_v38, %v872_v10  ;;  %v11028_v10 = vld [vmem:[#allocation8 + $0xf9c] ss:$28 sps:$4 sm:$0xff]  }
 0x4dd   : > { %5360 = vmatpush1.bf16.msra.mxu1 %v10954_v39  ;;  %v11017_v39 = vld [vmem:[#allocation9 + $0x3a0] ss:$16 sps:$4 sm:$0xff]  }
 0x4de   : > { %7063 = vmatpush1.bf16.msra.mxu0 %v10957_v40  ;;  %5361 = vmatprep.subr.bf16.mxu1 %v10962_v48  ;;  %v11022_v40 = vld [vmem:[#allocation8 + $0xf64] ss:$28 sps:$4 sm:$0xff]  }
 0x4df   : > { %7064 = vmatprep.subr.bf16.mxu0 %v10965_v17  ;;  %v11025_v48 = vld [vmem:[#allocation9 + $0x3c4] ss:$16 sps:$4 sm:$0xff]   ;;  %v9814_v17 = vadd.f32 %v12838_v50, %v1900_v37 }
 0x4e0   : > { %v11026_v50 = vld [vmem:[#allocation8 + $0xf98] ss:$28 sps:$4 sm:$0xff]  }
 0x4e1   : > { %5362 = vmatpush1.bf16.msra.mxu1 %v10960_v46  ;;  %vm5622_vm14 = vcmp.ge.f32.partialorder %v9814_v17, 0.0  ;;  %v11160_v37 = vld [vmem:[#allocation9 + $0x424] ss:$16 sps:$4 sm:$0xff]  }
 0x4e2   : > { %7065 = vmatpush1.bf16.msra.mxu0 %v10963_v41  ;;  %5363 = vmatprep.subr.bf16.mxu1 %v10968_v43  ;;  %v11020_v43 = vld [vmem:[#allocation8 + $0xf60] ss:$28 sps:$4 sm:$0xff]  }
 0x4e3   : > { %7066 = vmatprep.subr.bf16.mxu0 %v10971_v44 }
 0x4e4   : > { %v9609_v56 = vpop.f32.mrb[20].mxu0 }
 0x4e5   : > { %v9610_v57 = vpop.f32.mrb[21].mxu0  ;;  %5364 = vmatpush1.bf16.msra.mxu1 %v10966_v45 }
 0x4e6   : > { %v12854_v1 = vadd.f32 %v9610_v57, %v9609_v56  ;;  %v9612_v5 = vpop.f32.mrb[22].mxu0  ;;  %7067 = vmatpush1.bf16.msra.mxu0 %v10969_v47  ;;  %5365 = vmatprep.subr.bf16.mxu1 %v10974_v53  ;;  %v11023_v53 = vld [vmem:[#allocation9 + $0x3c0] ss:$16 sps:$4 sm:$0xff]   ;;  %v5630_v56 = vmul.f32 %v9814_v17, %v12840_v49 }
 0x4e7   : > { %v9613_v62 = vpop.f32.mrb[23].mxu0  ;;  %7068 = vmatprep.subr.bf16.mxu0 %v10977_v54  ;;  %v11031_v54 = vld [vmem:[#allocation9 + $0x3e4] ss:$16 sps:$4 sm:$0xff]  }
 0x4e8   : > { %v5454_v44 = vadd.f32 %v12854_v1, %v1916_v36  ;;  %v11034_v5 = vld [vmem:[#allocation8 + $0xfd4] ss:$28 sps:$4 sm:$0xff]   ;;  %v5637_v1 = vsel %vm5622_vm14, %v9814_v17, %v5630_v56  ;;  %v11065_v17 = vld [vmem:[#allocation9 + $0x68] ss:$16 sps:$4 sm:$0xff]  }
 0x4e9   : > { %5366 = vmatpush1.bf16.msra.mxu1 %v10972_v60  ;;  %v11029_v60 = vld [vmem:[#allocation9 + $0x3e0] ss:$16 sps:$4 sm:$0xff]   ;;  %v12866_v62 = vpack.c.bf16 %v5637_v1, %v5637_v1 }
 0x4ea   : > { %7069 = vmatpush1.bf16.msra.mxu0 %v10975_v61  ;;  %5367 = vmatprep.subr.bf16.mxu1 %v10980_v20  ;;  %v11032_v61 = vld [vmem:[#allocation8 + $0xfd0] ss:$28 sps:$4 sm:$0xff]  }
 0x4eb   : > { %7070 = vmatprep.subr.bf16.mxu0 %v10983_v63  ;;  %v11037_v20 = vld [vmem:[#allocation8 + $0x100c] ss:$28 sps:$4 sm:$0xff]   ;;  %v11158_v36 = vld [vmem:[#allocation9 + $0x420] ss:$16 sps:$4 sm:$0xff]  }
 0x4ec   : > { %v11035_v63 = vld [vmem:[#allocation8 + $0x1008] ss:$28 sps:$4 sm:$0xff]  }
 0x4ed   : > { %5368 = vmatpush1.bf16.msra.mxu1 %v10978_v0  ;;  %v11040_v0 = vld [vmem:[#allocation8 + $0x1044] ss:$28 sps:$4 sm:$0xff]  }
 0x4ee   : > { %7071 = vmatpush1.bf16.msra.mxu0 %v10981_v3  ;;  %5378 = vmatprep.subr.bf16.mxu1 %v10986_v4  ;;  %v11038_v3 = vld [vmem:[#allocation8 + $0x1040] ss:$28 sps:$4 sm:$0xff]  }
 0x4ef   : > { %7072 = vmatprep.subr.bf16.mxu0 %v10989_v14  ;;  %v11043_v4 = vld [vmem:[#allocation8 + $0x107c] ss:$28 sps:$4 sm:$0xff]  }
 0x4f0   : > { %5370 = vmatmul.mubr.bf16.vlgmr.msra.gmra.mrb[8].mxu1 %v12797_v51  ;;  %v11002_v51 = vld [vmem:[#allocation8 + $0xeb8] ss:$28 sps:$4 sm:$0xff]  }
 0x4f1   : > { %5379 = vmatpush1.bf16.msra.mxu1 %v10984_v8  ;;  %5410 = vmatprep.mubr.bf16.mxu1 %v12799_v55  ;;  %v11005_v55 = vld [vmem:[#allocation9 + $0x360] ss:$16 sps:$4 sm:$0xff]   ;;  %v11041_v14 = vld [vmem:[#allocation8 + $0x1078] ss:$28 sps:$4 sm:$0xff]  }
 0x4f2   : > { %7073 = vmatpush1.bf16.msra.mxu0 %v10987_v9  ;;  %5380 = vmatprep.subr.bf16.mxu1 %v10992_v25  ;;  %v11046_v8 = vld [vmem:[#allocation8 + $0x10b4] ss:$28 sps:$4 sm:$0xff]   ;;  %v11049_v25 = vld [vmem:[#allocation8 + $0x10ec] ss:$28 sps:$4 sm:$0xff]  }
 0x4f3   : > { %7074 = vmatprep.subr.bf16.mxu0 %v10995_v11  ;;  %v11044_v9 = vld [vmem:[#allocation8 + $0x10b0] ss:$28 sps:$4 sm:$0xff]   ;;  %v11047_v11 = vld [vmem:[#allocation8 + $0x10e8] ss:$28 sps:$4 sm:$0xff]  }
 0x4f5   : > { %5381 = vmatpush1.bf16.msra.mxu1 %v10990_v13  ;;  %v11052_v13 = vld [vmem:[#allocation8 + $0x1124] ss:$28 sps:$4 sm:$0xff]  }
 0x4f6   : > { %7075 = vmatpush1.bf16.msra.mxu0 %v10993_v32  ;;  %5382 = vmatprep.subr.bf16.mxu1 %v10998_v28 }
 0x4f7   : > { %7076 = vmatprep.subr.bf16.mxu0 %v11001_v15  ;;  %v11050_v15 = vld [vmem:[#allocation8 + $0x1120] ss:$28 sps:$4 sm:$0xff]  }
 0x4f9   : > { %5383 = vmatpush1.bf16.msra.mxu1 %v10996_v16 }
 0x4fa   : > { %7077 = vmatpush1.bf16.msra.mxu0 %v10999_v18  ;;  %5384 = vmatprep.subr.bf16.mxu1 %v11004_v19  ;;  %v11055_v19 = vld [vmem:[#allocation8 + $0x115c] ss:$28 sps:$4 sm:$0xff]  }
 0x4fb   : > { %7078 = vmatprep.subr.bf16.mxu0 %v11007_v34 }
 0x4fd   : > { %5385 = vmatpush1.bf16.msra.mxu1 %v11002_v51 }
 0x4fe   : > { %7079 = vmatpush1.bf16.msra.mxu0 %v11005_v55  ;;  %5386 = vmatprep.subr.bf16.mxu1 %v11010_v21  ;;  %v11053_v55 = vld [vmem:[#allocation8 + $0x1158] ss:$28 sps:$4 sm:$0xff]   ;;  %v11058_v21 = vld [vmem:[#allocation9 + $0xc] ss:$16 sps:$4 sm:$0xff]  }
 0x4ff   : > { %7080 = vmatprep.subr.bf16.mxu0 %v11013_v24  ;;  %v11056_v24 = vld [vmem:[#allocation9 + $0x8] ss:$16 sps:$4 sm:$0xff]  }
 0x501   : > { %5387 = vmatpush1.bf16.msra.mxu1 %v11008_v26  ;;  %v11061_v26 = vld [vmem:[#allocation9 + $0x2c] ss:$16 sps:$4 sm:$0xff]  }
 0x502   : > { %7081 = vmatpush1.bf16.msra.mxu0 %v11011_v31  ;;  %5388 = vmatprep.subr.bf16.mxu1 %v11016_v7  ;;  %v11152_v31 = vld [vmem:[#allocation9 + $0x400] ss:$16 sps:$4 sm:$0xff]   ;;  %v11154_v7 = vld [vmem:[#allocation9 + $0x404] ss:$16 sps:$4 sm:$0xff]  }
 0x503   : > { %7082 = vmatprep.subr.bf16.mxu0 %v11019_v12  ;;  %v11059_v12 = vld [vmem:[#allocation9 + $0x28] ss:$16 sps:$4 sm:$0xff]  }
 0x504   : > { %v9631_v46 = vpop.f32.mrb[24].mxu0 }
 0x505   : > { %v9632_v41 = vpop.f32.mrb[25].mxu0  ;;  %5389 = vmatpush1.bf16.msra.mxu1 %v11014_v33  ;;  %v11064_v33 = vld [vmem:[#allocation9 + $0x4c] ss:$16 sps:$4 sm:$0xff]  }
 0x506   : > { %v9633_v45 = vadd.f32 %v9632_v41, %v9631_v46  ;;  %v9634_v47 = vpop.f32.mrb[26].mxu0  ;;  %7083 = vmatpush1.bf16.msra.mxu0 %v11017_v39  ;;  %5390 = vmatprep.subr.bf16.mxu1 %v11022_v40  ;;  %v11062_v39 = vld [vmem:[#allocation9 + $0x48] ss:$16 sps:$4 sm:$0xff]   ;;  %v11166_v40 = vld [vmem:[#allocation9 + $0x444] ss:$16 sps:$4 sm:$0xff]  }
 0x507   : > { %v9635_v38 = vpop.f32.mrb[27].mxu0  ;;  %7084 = vmatprep.subr.bf16.mxu0 %v11025_v48  ;;  %v11067_v48 = vld [vmem:[#allocation9 + $0x6c] ss:$16 sps:$4 sm:$0xff]   ;;  %v11172_v46 = vld [vmem:[#allocation9 + $0x464] ss:$16 sps:$4 sm:$0xff]  }
 0x508   : > { %v5494_v57 = vadd.f32 %v9633_v45, %v5454_v44  ;;  %v11170_v41 = vld [vmem:[#allocation9 + $0x460] ss:$16 sps:$4 sm:$0xff]   ;;  %v11178_v44 = vld [vmem:[#allocation9 + $0x484] ss:$16 sps:$4 sm:$0xff]   ;;  %v11073_v45 = vld [vmem:[#allocation9 + $0xac] ss:$16 sps:$4 sm:$0xff]  }
 0x509   : > { %5391 = vmatpush1.bf16.msra.mxu1 %v11020_v43  ;;  %v11068_v43 = vld [vmem:[#allocation9 + $0x88] ss:$16 sps:$4 sm:$0xff]   ;;  %v11176_v47 = vld [vmem:[#allocation9 + $0x480] ss:$16 sps:$4 sm:$0xff]   ;;  %v11076_v38 = vld [vmem:[#allocation9 + $0xcc] ss:$16 sps:$4 sm:$0xff]  }
 0x50a   : > { %7085 = vmatpush1.bf16.msra.mxu0 %v11023_v53  ;;  %5392 = vmatprep.subr.bf16.mxu1 %v11028_v10  ;;  %v11071_v53 = vld [vmem:[#allocation9 + $0xa8] ss:$16 sps:$4 sm:$0xff]   ;;  %v11184_v10 = vld [vmem:[#allocation9 + $0x4a4] ss:$16 sps:$4 sm:$0xff]  }
 0x50b   : > { %7086 = vmatprep.subr.bf16.mxu0 %v11031_v54  ;;  %v11182_v54 = vld [vmem:[#allocation9 + $0x4a0] ss:$16 sps:$4 sm:$0xff]  }
 0x50d   : > { %5393 = vmatpush1.bf16.msra.mxu1 %v11026_v50  ;;  %v11074_v50 = vld [vmem:[#allocation9 + $0xc8] ss:$16 sps:$4 sm:$0xff]  }
 0x50e   : > { %7087 = vmatpush1.bf16.msra.mxu0 %v11029_v60  ;;  %5394 = vmatprep.subr.bf16.mxu1 %v11034_v5  ;;  %v11190_v60 = vld [vmem:[#allocation9 + $0x4c4] ss:$16 sps:$4 sm:$0xff]  }
 0x50f   : > { %7097 = vmatprep.subr.bf16.mxu0 %v11154_v7  ;;  %v11226_v7 = vld [vmem:[#allocation9 + $0x584] ss:$16 sps:$4 sm:$0xff]  }
 0x511   : > { %7089 = vmatmul.mubr.bf16.vlgmr.msra.gmra.mrb[40].mxu0 %v12866_v62  ;;  %5395 = vmatpush1.bf16.msra.mxu1 %v11032_v61  ;;  %v11079_v61 = vld [vmem:[#allocation9 + $0xec] ss:$16 sps:$4 sm:$0xff]  }
 0x512   : > { %5396 = vmatprep.subr.bf16.mxu1 %v11037_v20  ;;  %7098 = vmatpush1.bf16.msra.mxu0 %v11152_v31  ;;  %v11092_v31 = vld [vmem:[#allocation9 + $0x188] ss:$16 sps:$4 sm:$0xff]  }
 0x513   : > { %7099 = vmatprep.subr.bf16.mxu0 %v11160_v37  ;;  %v11224_v37 = vld [vmem:[#allocation9 + $0x580] ss:$16 sps:$4 sm:$0xff]  }
 0x515   : > { %5397 = vmatpush1.bf16.msra.mxu1 %v11035_v63  ;;  %v11188_v63 = vld [vmem:[#allocation9 + $0x4c0] ss:$16 sps:$4 sm:$0xff]  }
 0x516   : > { %5398 = vmatprep.subr.bf16.mxu1 %v11040_v0  ;;  %7100 = vmatpush1.bf16.msra.mxu0 %v11158_v36  ;;  %v11232_v36 = vld [vmem:[#allocation9 + $0x5a4] ss:$16 sps:$4 sm:$0xff]  }
 0x517   : > { %7101 = vmatprep.subr.bf16.mxu0 %v11166_v40  ;;  %v11230_v40 = vld [vmem:[#allocation9 + $0x5a0] ss:$16 sps:$4 sm:$0xff]  }
 0x519   : > { %5399 = vmatpush1.bf16.msra.mxu1 %v11038_v3  ;;  %v11077_v3 = vld [vmem:[#allocation9 + $0xe8] ss:$16 sps:$4 sm:$0xff]  }
 0x51a   : > { %5400 = vmatprep.subr.bf16.mxu1 %v11043_v4  ;;  %v11196_v4 = vld [vmem:[#allocation9 + $0x4e4] ss:$16 sps:$4 sm:$0xff]  }
 0x51d   : > { %5401 = vmatpush1.bf16.msra.mxu1 %v11041_v14  ;;  %v11082_v14 = vld [vmem:[#allocation9 + $0x10c] ss:$16 sps:$4 sm:$0xff]  }
 0x51e   : > { %5402 = vmatprep.subr.bf16.mxu1 %v11046_v8  ;;  %v11194_v8 = vld [vmem:[#allocation9 + $0x4e0] ss:$16 sps:$4 sm:$0xff]  }
 0x521   : > { %5403 = vmatpush1.bf16.msra.mxu1 %v11044_v9  ;;  %v11080_v9 = vld [vmem:[#allocation9 + $0x108] ss:$16 sps:$4 sm:$0xff]  }
 0x522   : > { %5404 = vmatprep.subr.bf16.mxu1 %v11049_v25  ;;  %v11202_v25 = vld [vmem:[#allocation9 + $0x504] ss:$16 sps:$4 sm:$0xff]  }
 0x524   : > { %v9653_v32 = vpop.f32.mrb[28].mxu0 }
 0x525   : > { %v9654_v28 = vpop.f32.mrb[29].mxu0  ;;  %5405 = vmatpush1.bf16.msra.mxu1 %v11047_v11  ;;  %v11085_v11 = vld [vmem:[#allocation9 + $0x12c] ss:$16 sps:$4 sm:$0xff]  }
 0x526   : > { %v9655_v16 = vadd.f32 %v9654_v28, %v9653_v32  ;;  %v9656_v18 = vpop.f32.mrb[30].mxu0  ;;  %5406 = vmatprep.subr.bf16.mxu1 %v11052_v13  ;;  %v11200_v13 = vld [vmem:[#allocation9 + $0x500] ss:$16 sps:$4 sm:$0xff]   ;;  %v11083_v32 = vld [vmem:[#allocation9 + $0x128] ss:$16 sps:$4 sm:$0xff]  }
 0x527   : > { %v9657_v34 = vpop.f32.mrb[31].mxu0  ;;  %v11208_v28 = vld [vmem:[#allocation9 + $0x524] ss:$16 sps:$4 sm:$0xff]   ;;  %v11086_v18 = vld [vmem:[#allocation9 + $0x148] ss:$16 sps:$4 sm:$0xff]  }
 0x528   : > { %v12869_v51 = vadd.f32 %v9655_v16, %v5494_v57  ;;  %v11206_v16 = vld [vmem:[#allocation9 + $0x520] ss:$16 sps:$4 sm:$0xff]   ;;  %v11091_v34 = vld [vmem:[#allocation9 + $0x16c] ss:$16 sps:$4 sm:$0xff]  }
 0x529   : > { %5407 = vmatpush1.bf16.msra.mxu1 %v11050_v15  ;;  %v11088_v15 = vld [vmem:[#allocation9 + $0x14c] ss:$16 sps:$4 sm:$0xff]  }
 0x52a   : > { %5408 = vmatprep.subr.bf16.mxu1 %v11055_v19  ;;  %v11214_v19 = vld [vmem:[#allocation9 + $0x544] ss:$16 sps:$4 sm:$0xff]  }
 0x52d   : > { %5409 = vmatpush1.bf16.msra.mxu1 %v11053_v55  ;;  %v11089_v55 = vld [vmem:[#allocation9 + $0x168] ss:$16 sps:$4 sm:$0xff]  }
 0x52e   : > { %7179 = vmatprep.subr.bf16.mxu1 %v11058_v21  ;;  %v11220_v21 = vld [vmem:[#allocation9 + $0x564] ss:$16 sps:$4 sm:$0xff]  }
 0x530   : > { %5411 = vmatmul.mubr.bf16.vlgmr.msra.gmra.mrb[8].mxu1 %v12809_v6  ;;  %v11164_v6 = vld [vmem:[#allocation9 + $0x440] ss:$16 sps:$4 sm:$0xff]  }
 0x531   : > { %7180 = vmatpush1.bf16.msra.mxu1 %v11056_v24  ;;  %7211 = vmatprep.mubr.bf16.mxu1 %v12845_v42  ;;  %v11070_v42 = vld [vmem:[#allocation9 + $0x8c] ss:$16 sps:$4 sm:$0xff]  }
 0x532   : > { %7181 = vmatprep.subr.bf16.mxu1 %v11061_v26  ;;  %7102 = vmatpush1.bf16.msra.mxu0 %v11164_v6  ;;  %v11094_v24 = vld [vmem:[#allocation9 + $0x18c] ss:$16 sps:$4 sm:$0xff]   ;;  %v11218_v26 = vld [vmem:[#allocation9 + $0x560] ss:$16 sps:$4 sm:$0xff]  }
 0x533   : > { %7103 = vmatprep.subr.bf16.mxu0 %v11172_v46 }
 0x535   : > { %7182 = vmatpush1.bf16.msra.mxu1 %v11059_v12  ;;  %v11097_v12 = vld [vmem:[#allocation9 + $0x1ac] ss:$16 sps:$4 sm:$0xff]  }
 0x536   : > { %7183 = vmatprep.subr.bf16.mxu1 %v11064_v33  ;;  %7104 = vmatpush1.bf16.msra.mxu0 %v11170_v41  ;;  %v11095_v33 = vld [vmem:[#allocation9 + $0x1a8] ss:$16 sps:$4 sm:$0xff]   ;;  %v11103_v41 = vld [vmem:[#allocation9 + $0x1ec] ss:$16 sps:$4 sm:$0xff]  }
 0x537   : > { %7105 = vmatprep.subr.bf16.mxu0 %v11178_v44 }
 0x539   : > { %7184 = vmatpush1.bf16.msra.mxu1 %v11062_v39  ;;  %v11100_v39 = vld [vmem:[#allocation9 + $0x1cc] ss:$16 sps:$4 sm:$0xff]  }
 0x53a   : > { %7185 = vmatprep.subr.bf16.mxu1 %v11067_v48  ;;  %7106 = vmatpush1.bf16.msra.mxu0 %v11176_v47  ;;  %v11106_v47 = vld [vmem:[#allocation9 + $0x20c] ss:$16 sps:$4 sm:$0xff]  }
 0x53b   : > { %7107 = vmatprep.subr.bf16.mxu0 %v11184_v10  ;;  %v11109_v10 = vld [vmem:[#allocation9 + $0x22c] ss:$16 sps:$4 sm:$0xff]  }
 0x53d   : > { %7186 = vmatpush1.bf16.msra.mxu1 %v11065_v17  ;;  %v11098_v17 = vld [vmem:[#allocation9 + $0x1c8] ss:$16 sps:$4 sm:$0xff]  }
 0x53e   : > { %7187 = vmatprep.subr.bf16.mxu1 %v11070_v42  ;;  %7108 = vmatpush1.bf16.msra.mxu0 %v11182_v54  ;;  %v11112_v54 = vld [vmem:[#allocation9 + $0x24c] ss:$16 sps:$4 sm:$0xff]  }
 0x53f   : > { %7109 = vmatprep.subr.bf16.mxu0 %v11190_v60  ;;  %v11118_v60 = vld [vmem:[#allocation9 + $0x28c] ss:$16 sps:$4 sm:$0xff]  }
 0x541   : > { %7188 = vmatpush1.bf16.msra.mxu1 %v11068_v43 }
 0x542   : > { %7189 = vmatprep.subr.bf16.mxu1 %v11073_v45  ;;  %7110 = vmatpush1.bf16.msra.mxu0 %v11188_v63  ;;  %v11101_v45 = vld [vmem:[#allocation9 + $0x1e8] ss:$16 sps:$4 sm:$0xff]   ;;  %v11236_v63 = vld [vmem:[#allocation9 + $0x5c0] ss:$16 sps:$4 sm:$0xff]  }
 0x543   : > { %7111 = vmatprep.subr.bf16.mxu0 %v11196_v4  ;;  %v11125_v4 = vld [vmem:[#allocation9 + $0x2e8] ss:$16 sps:$4 sm:$0xff]  }
 0x544   : > { %v9675_v56 = vpop.f32.mrb[32].mxu0 }
 0x545   : > { %v9676_v57 = vpop.f32.mrb[33].mxu0  ;;  %7190 = vmatpush1.bf16.msra.mxu1 %v11071_v53  ;;  %v11104_v53 = vld [vmem:[#allocation9 + $0x208] ss:$16 sps:$4 sm:$0xff]  }
 0x546   : > { %v9677_v5 = vadd.f32 %v9676_v57, %v9675_v56  ;;  %v9678_v1 = vpop.f32.mrb[34].mxu0  ;;  %7191 = vmatprep.subr.bf16.mxu1 %v11076_v38  ;;  %7112 = vmatpush1.bf16.msra.mxu0 %v11194_v8  ;;  %v11107_v38 = vld [vmem:[#allocation9 + $0x228] ss:$16 sps:$4 sm:$0xff]   ;;  %v11115_v57 = vld [vmem:[#allocation9 + $0x26c] ss:$16 sps:$4 sm:$0xff]  }
 0x547   : > { %v9679_v20 = vpop.f32.mrb[35].mxu0  ;;  %7113 = vmatprep.subr.bf16.mxu0 %v11202_v25  ;;  %v11110_v56 = vld [vmem:[#allocation9 + $0x248] ss:$16 sps:$4 sm:$0xff]   ;;  %v11121_v1 = vld [vmem:[#allocation9 + $0x2ac] ss:$16 sps:$4 sm:$0xff]  }
 0x548   : > { %v12874_v0 = vadd.f32 %v9677_v5, %v12869_v51  ;;  %v11212_v51 = vld [vmem:[#allocation9 + $0x540] ss:$16 sps:$4 sm:$0xff]   ;;  %v11116_v5 = vld [vmem:[#allocation9 + $0x288] ss:$16 sps:$4 sm:$0xff]   ;;  %v11130_v8 = vld [vmem:[#allocation9 + $0x30c] ss:$16 sps:$4 sm:$0xff]  }
 0x549   : > { %7192 = vmatpush1.bf16.msra.mxu1 %v11074_v50  ;;  %v11113_v50 = vld [vmem:[#allocation9 + $0x268] ss:$16 sps:$4 sm:$0xff]  }
 0x54a   : > { %7193 = vmatprep.subr.bf16.mxu1 %v11079_v61  ;;  %7114 = vmatpush1.bf16.msra.mxu0 %v11200_v13  ;;  %v11124_v61 = vld [vmem:[#allocation9 + $0x2cc] ss:$16 sps:$4 sm:$0xff]   ;;  %v11122_v20 = vld [vmem:[#allocation9 + $0x2c8] ss:$16 sps:$4 sm:$0xff]  }
 0x54b   : > { %7115 = vmatprep.subr.bf16.mxu0 %v11208_v28  ;;  %v11128_v25 = vld [vmem:[#allocation9 + $0x308] ss:$16 sps:$4 sm:$0xff]  }
 0x54c   : > { %v11131_v13 = vld [vmem:[#allocation9 + $0x328] ss:$16 sps:$4 sm:$0xff]  }
 0x54d   : > { %7194 = vmatpush1.bf16.msra.mxu1 %v11077_v3  ;;  %v11244_v3 = vld [vmem:[#allocation9 + $0x5e4] ss:$16 sps:$4 sm:$0xff]   ;;  %v11134_v28 = vld [vmem:[#allocation9 + $0x348] ss:$16 sps:$4 sm:$0xff]  }
 0x54e   : > { %7195 = vmatprep.subr.bf16.mxu1 %v11082_v14  ;;  %7116 = vmatpush1.bf16.msra.mxu0 %v11206_v16  ;;  %v11242_v14 = vld [vmem:[#allocation9 + $0x5e0] ss:$16 sps:$4 sm:$0xff]   ;;  %v11137_v16 = vld [vmem:[#allocation9 + $0x368] ss:$16 sps:$4 sm:$0xff]  }
 0x54f   : > { %7117 = vmatprep.subr.bf16.mxu0 %v11214_v19  ;;  %v11140_v19 = vld [vmem:[#allocation9 + $0x388] ss:$16 sps:$4 sm:$0xff]  }
 0x551   : > { %7196 = vmatpush1.bf16.msra.mxu1 %v11080_v9  ;;  %v11250_v9 = vld [vmem:[#allocation9 + $0x604] ss:$16 sps:$4 sm:$0xff]  }
 0x552   : > { %7197 = vmatprep.subr.bf16.mxu1 %v11085_v11  ;;  %7118 = vmatpush1.bf16.msra.mxu0 %v11212_v51  ;;  %v11133_v11 = vld [vmem:[#allocation9 + $0x32c] ss:$16 sps:$4 sm:$0xff]   ;;  %v11143_v51 = vld [vmem:[#allocation9 + $0x3a8] ss:$16 sps:$4 sm:$0xff]  }
 0x553   : > { %7119 = vmatprep.subr.bf16.mxu0 %v11220_v21  ;;  %v11146_v21 = vld [vmem:[#allocation9 + $0x3c8] ss:$16 sps:$4 sm:$0xff]  }
 0x555   : > { %7198 = vmatpush1.bf16.msra.mxu1 %v11083_v32  ;;  %v11136_v32 = vld [vmem:[#allocation9 + $0x34c] ss:$16 sps:$4 sm:$0xff]  }
 0x556   : > { %7199 = vmatprep.subr.bf16.mxu1 %v11088_v15  ;;  %7120 = vmatpush1.bf16.msra.mxu0 %v11218_v26  ;;  %v11139_v15 = vld [vmem:[#allocation9 + $0x36c] ss:$16 sps:$4 sm:$0xff]   ;;  %v11149_v26 = vld [vmem:[#allocation9 + $0x3e8] ss:$16 sps:$4 sm:$0xff]  }
 0x557   : > { %7121 = vmatprep.subr.bf16.mxu0 %v11226_v7  ;;  %v11155_v7 = vld [vmem:[#allocation9 + $0x408] ss:$16 sps:$4 sm:$0xff]  }
 0x559   : > { %7200 = vmatpush1.bf16.msra.mxu1 %v11086_v18  ;;  %v11142_v18 = vld [vmem:[#allocation9 + $0x38c] ss:$16 sps:$4 sm:$0xff]  }
 0x55a   : > { %7201 = vmatprep.subr.bf16.mxu1 %v11091_v34  ;;  %7122 = vmatpush1.bf16.msra.mxu0 %v11224_v37  ;;  %v11145_v34 = vld [vmem:[#allocation9 + $0x3ac] ss:$16 sps:$4 sm:$0xff]   ;;  %v11161_v37 = vld [vmem:[#allocation9 + $0x428] ss:$16 sps:$4 sm:$0xff]  }
 0x55b   : > { %7123 = vmatprep.subr.bf16.mxu0 %v11232_v36  ;;  %v11167_v36 = vld [vmem:[#allocation9 + $0x448] ss:$16 sps:$4 sm:$0xff]  }
 0x55d   : > { %7202 = vmatpush1.bf16.msra.mxu1 %v11089_v55  ;;  %v11148_v55 = vld [vmem:[#allocation9 + $0x3cc] ss:$16 sps:$4 sm:$0xff]  }
 0x55e   : > { %7203 = vmatprep.subr.bf16.mxu1 %v11094_v24  ;;  %7124 = vmatpush1.bf16.msra.mxu0 %v11230_v40  ;;  %v11151_v24 = vld [vmem:[#allocation9 + $0x3ec] ss:$16 sps:$4 sm:$0xff]   ;;  %v11173_v40 = vld [vmem:[#allocation9 + $0x468] ss:$16 sps:$4 sm:$0xff]  }
 0x561   : > { %7204 = vmatpush1.bf16.msra.mxu1 %v11092_v31  ;;  %v11157_v31 = vld [vmem:[#allocation9 + $0x40c] ss:$16 sps:$4 sm:$0xff]  }
 0x562   : > { %7205 = vmatprep.subr.bf16.mxu1 %v11097_v12  ;;  %v11163_v12 = vld [vmem:[#allocation9 + $0x42c] ss:$16 sps:$4 sm:$0xff]  }
 0x564   : > { %v9697_v48 = vpop.f32.mrb[36].mxu0 }
 0x565   : > { %v9698_v6 = vpop.f32.mrb[37].mxu0  ;;  %7206 = vmatpush1.bf16.msra.mxu1 %v11095_v33  ;;  %v11169_v33 = vld [vmem:[#allocation9 + $0x44c] ss:$16 sps:$4 sm:$0xff]  }
 0x566   : > { %v9699_v46 = vadd.f32 %v9698_v6, %v9697_v48  ;;  %v9700_v42 = vpop.f32.mrb[38].mxu0  ;;  %7207 = vmatprep.subr.bf16.mxu1 %v11100_v39  ;;  %v11175_v39 = vld [vmem:[#allocation9 + $0x46c] ss:$16 sps:$4 sm:$0xff]   ;;  %v11179_v6 = vld [vmem:[#allocation9 + $0x488] ss:$16 sps:$4 sm:$0xff]  }
 0x567   : > { %v9701_v43 = vpop.f32.mrb[39].mxu0  ;;  %v11181_v48 = vld [vmem:[#allocation9 + $0x48c] ss:$16 sps:$4 sm:$0xff]   ;;  %v11191_v42 = vld [vmem:[#allocation9 + $0x4c8] ss:$16 sps:$4 sm:$0xff]  }
 0x568   : > { %v12877_v44 = vadd.f32 %v9699_v46, %v12874_v0  ;;  %v11127_v0 = vld [vmem:[#allocation9 + $0x2ec] ss:$16 sps:$4 sm:$0xff]   ;;  %v11185_v46 = vld [vmem:[#allocation9 + $0x4a8] ss:$16 sps:$4 sm:$0xff]  }
 0x569   : > { %7208 = vmatpush1.bf16.msra.mxu1 %v11098_v17  ;;  %v11187_v17 = vld [vmem:[#allocation9 + $0x4ac] ss:$16 sps:$4 sm:$0xff]   ;;  %v11197_v43 = vld [vmem:[#allocation9 + $0x4e8] ss:$16 sps:$4 sm:$0xff]  }
 0x56a   : > { %7209 = vmatprep.subr.bf16.mxu1 %v11103_v41  ;;  %v11199_v41 = vld [vmem:[#allocation9 + $0x4ec] ss:$16 sps:$4 sm:$0xff]   ;;  %vm5626_vm1 = vcmp.ge.f32.partialorder %v12877_v44, 0.0 }
 0x56d   : > { %7210 = vmatpush1.bf16.msra.mxu1 %v11101_v45  ;;  %v11205_v45 = vld [vmem:[#allocation9 + $0x50c] ss:$16 sps:$4 sm:$0xff]  }
 0x56e   : > { %7220 = vmatprep.subr.bf16.mxu1 %v11106_v47  ;;  %v11203_v47 = vld [vmem:[#allocation9 + $0x508] ss:$16 sps:$4 sm:$0xff]  }
 0x570   : > { %7212 = vmatmul.mubr.bf16.vlgmr.msra.gmra.mrb[12].mxu1 %v12848_v52  ;;  %v11119_v52 = vld [vmem:[#allocation9 + $0x2a8] ss:$16 sps:$4 sm:$0xff]  }
 0x571   : > { %7221 = vmatpush1.bf16.msra.mxu1 %v11104_v53  ;;  %7252 = vmatprep.mubr.bf16.mxu1 %v12850_v22  ;;  %v11238_v22 = vld [vmem:[#allocation9 + $0x5c4] ss:$16 sps:$4 sm:$0xff]   ;;  %v11211_v53 = vld [vmem:[#allocation9 + $0x52c] ss:$16 sps:$4 sm:$0xff]  }
 0x572   : > { %7222 = vmatprep.subr.bf16.mxu1 %v11109_v10  ;;  %7125 = vmatprep.subr.bf16.mxu0 %v11238_v22  ;;  %v11209_v10 = vld [vmem:[#allocation9 + $0x528] ss:$16 sps:$4 sm:$0xff]   ;;  %v11247_v22 = vld [vmem:[#allocation9 + $0x5ec] ss:$16 sps:$4 sm:$0xff]  }
 0x573   : > { %7126 = vmatpush1.bf16.msra.mxu0 %v11236_v63  ;;  %v11253_v63 = vld [vmem:[#allocation9 + $0x60c] ss:$16 sps:$4 sm:$0xff]  }
 0x574   : > { %7127 = vmatprep.subr.bf16.mxu0 %v11244_v3 }
 0x575   : > { %7223 = vmatpush1.bf16.msra.mxu1 %v11107_v38  ;;  %v11217_v38 = vld [vmem:[#allocation9 + $0x54c] ss:$16 sps:$4 sm:$0xff]  }
 0x576   : > { %7224 = vmatprep.subr.bf16.mxu1 %v11112_v54  ;;  %v11215_v54 = vld [vmem:[#allocation9 + $0x548] ss:$16 sps:$4 sm:$0xff]  }
 0x577   : > { %7128 = vmatpush1.bf16.msra.mxu0 %v11242_v14 }
 0x578   : > { %7138 = vmatprep.subr.bf16.mxu0 %v11250_v9 }
 0x579   : > { %7225 = vmatpush1.bf16.msra.mxu1 %v11110_v56  ;;  %v11223_v56 = vld [vmem:[#allocation9 + $0x56c] ss:$16 sps:$4 sm:$0xff]  }
 0x57a   : > { %7226 = vmatprep.subr.bf16.mxu1 %v11115_v57  ;;  %v11221_v57 = vld [vmem:[#allocation9 + $0x568] ss:$16 sps:$4 sm:$0xff]  }
 0x57d   : > { %7227 = vmatpush1.bf16.msra.mxu1 %v11113_v50  ;;  %v11229_v50 = vld [vmem:[#allocation9 + $0x58c] ss:$16 sps:$4 sm:$0xff]  }
 0x57e   : > { %7228 = vmatprep.subr.bf16.mxu1 %v11118_v60  ;;  %v11227_v60 = vld [vmem:[#allocation9 + $0x588] ss:$16 sps:$4 sm:$0xff]  }
 0x581   : > { %7229 = vmatpush1.bf16.msra.mxu1 %v11116_v5  ;;  %v11235_v5 = vld [vmem:[#allocation9 + $0x5ac] ss:$16 sps:$4 sm:$0xff]  }
 0x582   : > { %7230 = vmatprep.subr.bf16.mxu1 %v11121_v1  ;;  %v11233_v1 = vld [vmem:[#allocation9 + $0x5a8] ss:$16 sps:$4 sm:$0xff]  }
 0x585   : > { %7231 = vmatpush1.bf16.msra.mxu1 %v11119_v52  ;;  %v11241_v52 = vld [vmem:[#allocation9 + $0x5cc] ss:$16 sps:$4 sm:$0xff]  }
 0x586   : > { %7232 = vmatprep.subr.bf16.mxu1 %v11124_v61  ;;  %v11239_v61 = vld [vmem:[#allocation9 + $0x5c8] ss:$16 sps:$4 sm:$0xff]  }
 0x589   : > { %7233 = vmatpush1.bf16.msra.mxu1 %v11122_v20  ;;  %v11245_v20 = vld [vmem:[#allocation9 + $0x5e8] ss:$16 sps:$4 sm:$0xff]  }
 0x58a   : > { %7234 = vmatprep.subr.bf16.mxu1 %v11127_v0  ;;  %v11433_v0 = vld [vmem:[#allocation20] sm:$0xff] }
 0x58b   : > { %v1908_v3 = vrot.slane %v11433_v0, %v864_v23  ;;  %v11251_v23 = vld [vmem:[#allocation9 + $0x608] ss:$16 sps:$4 sm:$0xff]  }
 0x58d   : > { %7235 = vmatpush1.bf16.msra.mxu1 %v11125_v4  ;;  %v1912_v4 = vrot.slane %v11433_v0, %v868_v59  ;;  %v11259_v59 = vld [vmem:[#allocation9 + $0x62c] ss:$16 sps:$4 sm:$0xff]  }
 0x58e   : > { %7236 = vmatprep.subr.bf16.mxu1 %v11130_v8  ;;  %v11316_v0 = vld [vmem:[#allocation11 + $0x64] ss:$8 sps:$4 sm:$0xff]  }
 0x591   : > { %7237 = vmatpush1.bf16.msra.mxu1 %v11128_v25 }
 0x592   : > { %7238 = vmatprep.subr.bf16.mxu1 %v11133_v11 }
 0x595   : > { %7239 = vmatpush1.bf16.msra.mxu1 %v11131_v13 }
 0x596   : > { %7240 = vmatprep.subr.bf16.mxu1 %v11136_v32 }
 0x599   : > { %7241 = vmatpush1.bf16.msra.mxu1 %v11134_v28 }
 0x59a   : > { %7242 = vmatprep.subr.bf16.mxu1 %v11139_v15 }
 0x59d   : > { %7243 = vmatpush1.bf16.msra.mxu1 %v11137_v16 }
 0x59e   : > { %7244 = vmatprep.subr.bf16.mxu1 %v11142_v18 }
 0x5a1   : > { %7245 = vmatpush1.bf16.msra.mxu1 %v11140_v19  ;;  %v11248_v19 = vld [vmem:[#allocation9 + $0x600] ss:$16 sps:$4 sm:$0xff]  }
 0x5a2   : > { %7246 = vmatprep.subr.bf16.mxu1 %v11145_v34 }
 0x5a5   : > { %7247 = vmatpush1.bf16.msra.mxu1 %v11143_v51  ;;  %v11254_v51 = vld [vmem:[#allocation9 + $0x620] ss:$16 sps:$4 sm:$0xff]  }
 0x5a6   : > { %7248 = vmatprep.subr.bf16.mxu1 %v11148_v55  ;;  %v11257_v55 = vld [vmem:[#allocation9 + $0x628] ss:$16 sps:$4 sm:$0xff]  }
 0x5a9   : > { %7249 = vmatpush1.bf16.msra.mxu1 %v11146_v21  ;;  %v11262_v21 = vld [vmem:[#allocation9 + $0x644] ss:$16 sps:$4 sm:$0xff]  }
 0x5aa   : > { %7250 = vmatprep.subr.bf16.mxu1 %v11151_v24  ;;  %v11265_v24 = vld [vmem:[#allocation9 + $0x64c] ss:$16 sps:$4 sm:$0xff]  }
 0x5ad   : > { %7251 = vmatpush1.bf16.msra.mxu1 %v11149_v26  ;;  %v11260_v26 = vld [vmem:[#allocation9 + $0x640] ss:$16 sps:$4 sm:$0xff]  }
 0x5ae   : > { %7261 = vmatprep.subr.bf16.mxu1 %v11157_v31  ;;  %v11263_v31 = vld [vmem:[#allocation9 + $0x648] ss:$16 sps:$4 sm:$0xff]  }
 0x5b0   : > { %7253 = vmatmul.mubr.bf16.vlgmr.msra.gmra.mrb[12].mxu1 %v12866_v62  ;;  %v11193_v62 = vld [vmem:[#allocation9 + $0x4cc] ss:$16 sps:$4 sm:$0xff]  }
 0x5b1   : > { %7262 = vmatpush1.bf16.msra.mxu1 %v11155_v7  ;;  %v11268_v7 = vld [vmem:[#allocation9 + $0x664] ss:$16 sps:$4 sm:$0xff]  }
 0x5b2   : > { %7263 = vmatprep.subr.bf16.mxu1 %v11163_v12  ;;  %v11271_v12 = vld [vmem:[#allocation9 + $0x66c] ss:$16 sps:$4 sm:$0xff]  }
 0x5b5   : > { %7264 = vmatpush1.bf16.msra.mxu1 %v11161_v37  ;;  %v11266_v37 = vld [vmem:[#allocation9 + $0x660] ss:$16 sps:$4 sm:$0xff]  }
 0x5b6   : > { %7265 = vmatprep.subr.bf16.mxu1 %v11169_v33  ;;  %v11269_v33 = vld [vmem:[#allocation9 + $0x668] ss:$16 sps:$4 sm:$0xff]  }
 0x5b9   : > { %7266 = vmatpush1.bf16.msra.mxu1 %v11167_v36  ;;  %v11274_v36 = vld [vmem:[#allocation9 + $0x684] ss:$16 sps:$4 sm:$0xff]  }
 0x5ba   : > { %7267 = vmatprep.subr.bf16.mxu1 %v11175_v39  ;;  %v11277_v39 = vld [vmem:[#allocation9 + $0x68c] ss:$16 sps:$4 sm:$0xff]  }
 0x5bd   : > { %7268 = vmatpush1.bf16.msra.mxu1 %v11173_v40  ;;  %v11272_v40 = vld [vmem:[#allocation9 + $0x680] ss:$16 sps:$4 sm:$0xff]  }
 0x5be   : > { %7269 = vmatprep.subr.bf16.mxu1 %v11181_v48  ;;  %v11280_v48 = vld [vmem:[#allocation9 + $0x6a4] ss:$16 sps:$4 sm:$0xff]  }
 0x5c1   : > { %7270 = vmatpush1.bf16.msra.mxu1 %v11179_v6  ;;  %v11283_v6 = vld [vmem:[#allocation9 + $0x6ac] ss:$16 sps:$4 sm:$0xff]  }
 0x5c2   : > { %7271 = vmatprep.subr.bf16.mxu1 %v11187_v17  ;;  %v11278_v17 = vld [vmem:[#allocation9 + $0x6a0] ss:$16 sps:$4 sm:$0xff]  }
 0x5c5   : > { %7272 = vmatpush1.bf16.msra.mxu1 %v11185_v46  ;;  %v11281_v46 = vld [vmem:[#allocation9 + $0x6a8] ss:$16 sps:$4 sm:$0xff]  }
 0x5c6   : > { %7273 = vmatprep.subr.bf16.mxu1 %v11193_v62  ;;  %v11286_v62 = vld [vmem:[#allocation9 + $0x6c4] ss:$16 sps:$4 sm:$0xff]  }
 0x5c9   : > { %7274 = vmatpush1.bf16.msra.mxu1 %v11191_v42  ;;  %v11289_v42 = vld [vmem:[#allocation9 + $0x6cc] ss:$16 sps:$4 sm:$0xff]  }
 0x5ca   : > { %7275 = vmatprep.subr.bf16.mxu1 %v11199_v41  ;;  %v11284_v41 = vld [vmem:[#allocation9 + $0x6c0] ss:$16 sps:$4 sm:$0xff]  }
 0x5cd   : > { %7276 = vmatpush1.bf16.msra.mxu1 %v11197_v43  ;;  %v11287_v43 = vld [vmem:[#allocation9 + $0x6c8] ss:$16 sps:$4 sm:$0xff]  }
 0x5ce   : > { %7277 = vmatprep.subr.bf16.mxu1 %v11205_v45  ;;  %v11292_v45 = vld [vmem:[#allocation9 + $0x6e4] ss:$16 sps:$4 sm:$0xff]  }
 0x5d1   : > { %7278 = vmatpush1.bf16.msra.mxu1 %v11203_v47  ;;  %v11295_v47 = vld [vmem:[#allocation9 + $0x6ec] ss:$16 sps:$4 sm:$0xff]  }
 0x5d2   : > { %7279 = vmatprep.subr.bf16.mxu1 %v11211_v53  ;;  %v5634_v53 = vmul.f32 %v12840_v49, %v12877_v44 }
 0x5d5   : > { %7280 = vmatpush1.bf16.msra.mxu1 %v11209_v10  ;;  %v11290_v10 = vld [vmem:[#allocation9 + $0x6e0] ss:$16 sps:$4 sm:$0xff]  }
 0x5d6   : > { %7281 = vmatprep.subr.bf16.mxu1 %v11217_v38  ;;  %v11293_v38 = vld [vmem:[#allocation9 + $0x6e8] ss:$16 sps:$4 sm:$0xff]  }
 0x5d9   : > { %7282 = vmatpush1.bf16.msra.mxu1 %v11215_v54  ;;  %v11298_v54 = vld [vmem:[#allocation11 + $0x4] ss:$8 sps:$4 sm:$0xff]  }
 0x5da   : > { %7283 = vmatprep.subr.bf16.mxu1 %v11223_v56  ;;  %v5641_v56 = vsel %vm5626_vm1, %v12877_v44, %v5634_v53  ;;  %v11310_v44 = vld [vmem:[#allocation11 + $0x44] ss:$8 sps:$4 sm:$0xff]  }
 0x5dd   : > { %7284 = vmatpush1.bf16.msra.mxu1 %v11221_v57  ;;  %v11296_v57 = vld [vmem:[#allocation11] ss:$8 sps:$4 sm:$0xff]  }
 0x5de   : > { %7285 = vmatprep.subr.bf16.mxu1 %v11229_v50  ;;  %v5648_v50 = vpack.c.bf16 %v5641_v56, %v5641_v56 }
 0x5e1   : > { %7286 = vmatpush1.bf16.msra.mxu1 %v11227_v60  ;;  %v11301_v60 = vld [vmem:[#allocation11 + $0x14] ss:$8 sps:$4 sm:$0xff]  }
 0x5e2   : > { %7287 = vmatprep.subr.bf16.mxu1 %v11235_v5  ;;  %v11304_v5 = vld [vmem:[#allocation11 + $0x24] ss:$8 sps:$4 sm:$0xff]  }
 0x5e5   : > { %7288 = vmatpush1.bf16.msra.mxu1 %v11233_v1  ;;  %v11302_v1 = vld [vmem:[#allocation11 + $0x20] ss:$8 sps:$4 sm:$0xff]  }
 0x5e6   : > { %7289 = vmatprep.subr.bf16.mxu1 %v11241_v52  ;;  %v11307_v52 = vld [vmem:[#allocation11 + $0x34] ss:$8 sps:$4 sm:$0xff]  }
 0x5e9   : > { %7290 = vmatpush1.bf16.msra.mxu1 %v11239_v61  ;;  %v11305_v61 = vld [vmem:[#allocation11 + $0x30] ss:$8 sps:$4 sm:$0xff]  }
 0x5ea   : > { %7291 = vmatprep.subr.bf16.mxu1 %v11247_v22  ;;  %v11308_v22 = vld [vmem:[#allocation11 + $0x40] ss:$8 sps:$4 sm:$0xff]  }
 0x5ed   : > { %7292 = vmatpush1.bf16.msra.mxu1 %v11245_v20  ;;  %v11313_v20 = vld [vmem:[#allocation11 + $0x54] ss:$8 sps:$4 sm:$0xff]  }
 0x5ee   : > { %7302 = vmatprep.subr.bf16.mxu1 %v11253_v63  ;;  %v11311_v63 = vld [vmem:[#allocation11 + $0x50] ss:$8 sps:$4 sm:$0xff]  }
 0x603   : > { %v5412_v14 = vpop.f32.mrb[8].mxu1 }
 0x604   : > { %v9816_v8 = vadd.f32 %v5412_v14, %v1908_v3  ;;  %v5414_v9 = vpop.f32.mrb[9].mxu1  ;;  %v11314_v3 = vld [vmem:[#allocation11 + $0x60] ss:$8 sps:$4 sm:$0xff]   ;;  %v11317_v14 = vld [vmem:[#allocation11 + $0x70] ss:$8 sps:$4 sm:$0xff]  }
 0x605   : > { %v9817_v25 = vadd.f32 %v5414_v9, %v1912_v4  ;;  %v5416_v11 = vpop.f32.mrb[10].mxu1  ;;  %v11319_v4 = vld [vmem:[#allocation11 + $0x74] ss:$8 sps:$4 sm:$0xff]   ;;  %v11320_v9 = vld [vmem:[#allocation11 + $0x80] ss:$8 sps:$4 sm:$0xff]  }
 0x606   : > { %vm5624_vm15 = vcmp.ge.f32.partialorder %v9816_v8, 0.0  ;;  %v5632_v13 = vmul.f32 %v9816_v8, %v12840_v49  ;;  %v5417_v32 = vpop.f32.mrb[11].mxu1  ;;  %v11323_v11 = vld [vmem:[#allocation11 + $0x90] ss:$8 sps:$4 sm:$0xff]  }
 0x607   : > { %vm5625_vm0 = vcmp.ge.f32.partialorder %v9817_v25, 0.0  ;;  %v5633_v28 = vmul.f32 %v9817_v25, %v12840_v49  ;;  %v11299_v49 = vld [vmem:[#allocation11 + $0x10] ss:$8 sps:$4 sm:$0xff]   ;;  %v11326_v32 = vld [vmem:[#allocation11 + $0xa0] ss:$8 sps:$4 sm:$0xff]  }
 0x608   : > { %v5639_v15 = vsel %vm5624_vm15, %v9816_v8, %v5632_v13  ;;  %v11322_v8 = vld [vmem:[#allocation11 + $0x84] ss:$8 sps:$4 sm:$0xff]  }
 0x609   : > { %v5640_v16 = vsel %vm5625_vm0, %v9817_v25, %v5633_v28  ;;  %v5646_v34 = vpack.c.bf16 %v5639_v15, %v5639_v15  ;;  %v11325_v25 = vld [vmem:[#allocation11 + $0x94] ss:$8 sps:$4 sm:$0xff]   ;;  %v11328_v13 = vld [vmem:[#allocation11 + $0xa4] ss:$8 sps:$4 sm:$0xff]   ;;  %v11329_v15 = vld [vmem:[#allocation11 + $0xb0] ss:$8 sps:$4 sm:$0xff]  }
 0x60a   : > { %v5647_v18 = vpack.c.bf16 %v5640_v16, %v5640_v16  ;;  %v11331_v28 = vld [vmem:[#allocation11 + $0xb4] ss:$8 sps:$4 sm:$0xff]   ;;  %v11334_v16 = vld [vmem:[#allocation11 + $0xc4] ss:$8 sps:$4 sm:$0xff]  }
 0x60c   : > { %7129 = vmatprep.mubr.bf16.mxu0 %v5647_v18  ;;  %7293 = vmatprep.mubr.bf16.mxu1 %v5647_v18  ;;  %v11332_v18 = vld [vmem:[#allocation11 + $0xc0] ss:$8 sps:$4 sm:$0xff]  }
 0x60d   : > { %7130 = vmatmul.mubr.bf16.vlgmr.msra.gmra.mrb[40].mxu0 %v5646_v34  ;;  %7294 = vmatmul.mubr.bf16.vlgmr.msra.gmra.mrb[12].mxu1 %v5646_v34  ;;  %v11340_v34 = vld [vmem:[#allocation11 + $0xe4] ss:$8 sps:$4 sm:$0xff]  }
 0x60e   : > { %7139 = vmatpush1.bf16.msra.mxu0 %v11248_v19  ;;  %7303 = vmatpush1.bf16.msra.mxu1 %v11251_v23  ;;  %v11337_v19 = vld [vmem:[#allocation11 + $0xd4] ss:$8 sps:$4 sm:$0xff]   ;;  %v11335_v23 = vld [vmem:[#allocation11 + $0xd0] ss:$8 sps:$4 sm:$0xff]  }
 0x60f   : > { %7140 = vmatprep.subr.bf16.mxu0 %v11256_v27  ;;  %7304 = vmatprep.subr.bf16.mxu1 %v11259_v59  ;;  %v11338_v27 = vld [vmem:[#allocation11 + $0xe0] ss:$8 sps:$4 sm:$0xff]   ;;  %v11343_v59 = vld [vmem:[#allocation11 + $0xf4] ss:$8 sps:$4 sm:$0xff]  }
 0x610   : > { %7170 = vmatprep.mubr.bf16.mxu0 %v12057_v2  ;;  %7334 = vmatprep.mubr.bf16.mxu1 %v12057_v2  ;;  %v11275_v2 = vld [vmem:[#allocation9 + $0x688] ss:$16 sps:$4 sm:$0xff]  }
 0x612   : > { %7141 = vmatpush1.bf16.msra.mxu0 %v11254_v51  ;;  %7305 = vmatpush1.bf16.msra.mxu1 %v11257_v55  ;;  %v11341_v51 = vld [vmem:[#allocation11 + $0xf0] ss:$8 sps:$4 sm:$0xff]   ;;  %v11346_v55 = vld [vmem:[#allocation11 + $0x104] ss:$8 sps:$4 sm:$0xff]  }
 0x613   : > { %7142 = vmatprep.subr.bf16.mxu0 %v11262_v21  ;;  %7306 = vmatprep.subr.bf16.mxu1 %v11265_v24  ;;  %v5873_v21 = vld [vmem:[#allocation21] sm:$0xf] }
 0x614   : > { %v5878_v24 = vrot.slane %v5873_v21, %v12699_v29 }
 0x616   : > { %7143 = vmatpush1.bf16.msra.mxu0 %v11260_v26  ;;  %7307 = vmatpush1.bf16.msra.mxu1 %v11263_v31  ;;  %v5886_v26 = vrot.slane %v5873_v21, %v12741_v58  ;;  %v5882_v31 = vrot.slane %v5873_v21, %v12702_v30 }
 0x617   : > { %7144 = vmatprep.subr.bf16.mxu0 %v11268_v7  ;;  %7308 = vmatprep.subr.bf16.mxu1 %v11271_v12  ;;  %v5890_v7 = vrot.slane %v5873_v21, %v12711_v35 }
 0x61a   : > { %7145 = vmatpush1.bf16.msra.mxu0 %v11266_v37  ;;  %7309 = vmatpush1.bf16.msra.mxu1 %v11269_v33  ;;  %v7348_v37 = vstv %s9476_s28 }
 0x61b   : > { %7146 = vmatprep.subr.bf16.mxu0 %v11274_v36  ;;  %7310 = vmatprep.subr.bf16.mxu1 %v11277_v39 }
 0x61e   : > { %7147 = vmatpush1.bf16.msra.mxu0 %v11272_v40  ;;  %7311 = vmatpush1.bf16.msra.mxu1 %v11275_v2 }
 0x61f   : > { %7148 = vmatprep.subr.bf16.mxu0 %v11280_v48  ;;  %7312 = vmatprep.subr.bf16.mxu1 %v11283_v6 }
 0x622   : > { %7149 = vmatpush1.bf16.msra.mxu0 %v11278_v17  ;;  %7313 = vmatpush1.bf16.msra.mxu1 %v11281_v46 }
 0x623   : > { %7150 = vmatprep.subr.bf16.mxu0 %v11286_v62  ;;  %7314 = vmatprep.subr.bf16.mxu1 %v11289_v42 }
 0x626   : > { %7151 = vmatpush1.bf16.msra.mxu0 %v11284_v41  ;;  %7315 = vmatpush1.bf16.msra.mxu1 %v11287_v43 }
 0x627   : > { %7152 = vmatprep.subr.bf16.mxu0 %v11292_v45  ;;  %7316 = vmatprep.subr.bf16.mxu1 %v11295_v47 }
 0x62a   : > { %7153 = vmatpush1.bf16.msra.mxu0 %v11290_v10  ;;  %7317 = vmatpush1.bf16.msra.mxu1 %v11293_v38 }
 0x62b   : > { %7757 = vmatprep.subr.bf16.mxu0 %v11298_v54  ;;  %v11344_v54 = vld [vmem:[#allocation11 + $0x100] ss:$8 sps:$4 sm:$0xff]  }
 0x62d   : > { %7171 = vmatmul.mubr.bf16.vlgmr.msra.gmra.mrb[40].mxu0 %v5648_v50  ;;  %7335 = vmatmul.mubr.bf16.vlgmr.msra.gmra.mrb[12].mxu1 %v5648_v50 }
 0x62e   : > { %7758 = vmatpush1.bf16.msra.mxu0 %v11296_v57  ;;  %v11349_v57 = vld [vmem:[#allocation11 + $0x114] ss:$8 sps:$4 sm:$0xff]  }
 0x62f   : > { %7759 = vmatprep.subr.bf16.mxu0 %v11301_v60  ;;  %v11347_v60 = vld [vmem:[#allocation11 + $0x110] ss:$8 sps:$4 sm:$0xff]  }
 0x632   : > { %7760 = vmatpush1.bf16.msra.mxu0 %v11299_v49  ;;  %v11352_v49 = vld [vmem:[#allocation11 + $0x124] ss:$8 sps:$4 sm:$0xff]  }
 0x633   : > { %7761 = vmatprep.subr.bf16.mxu0 %v11304_v5  ;;  %v11350_v5 = vld [vmem:[#allocation11 + $0x120] ss:$8 sps:$4 sm:$0xff]  }
 0x636   : > { %7762 = vmatpush1.bf16.msra.mxu0 %v11302_v1  ;;  %v11355_v1 = vld [vmem:[#allocation11 + $0x134] ss:$8 sps:$4 sm:$0xff]  }
 0x637   : > { %7763 = vmatprep.subr.bf16.mxu0 %v11307_v52  ;;  %v11353_v52 = vld [vmem:[#allocation11 + $0x130] ss:$8 sps:$4 sm:$0xff]  }
 0x63a   : > { %7764 = vmatpush1.bf16.msra.mxu0 %v11305_v61  ;;  %v11358_v61 = vld [vmem:[#allocation11 + $0x144] ss:$8 sps:$4 sm:$0xff]  }
 0x63b   : > { %7765 = vmatprep.subr.bf16.mxu0 %v11310_v44  ;;  %v11356_v44 = vld [vmem:[#allocation11 + $0x140] ss:$8 sps:$4 sm:$0xff]  }
 0x63e   : > { %7766 = vmatpush1.bf16.msra.mxu0 %v11308_v22  ;;  %v11361_v22 = vld [vmem:[#allocation11 + $0x154] ss:$8 sps:$4 sm:$0xff]  }
 0x63f   : > { %7767 = vmatprep.subr.bf16.mxu0 %v11313_v20  ;;  %v11359_v20 = vld [vmem:[#allocation11 + $0x150] ss:$8 sps:$4 sm:$0xff]  }
 0x642   : > { %7768 = vmatpush1.bf16.msra.mxu0 %v11311_v63  ;;  %v11364_v63 = vld [vmem:[#allocation11 + $0x164] ss:$8 sps:$4 sm:$0xff]  }
 0x643   : > { %7769 = vmatprep.subr.bf16.mxu0 %v11316_v0  ;;  %v11362_v0 = vld [vmem:[#allocation11 + $0x160] ss:$8 sps:$4 sm:$0xff]  }
 0x646   : > { %7770 = vmatpush1.bf16.msra.mxu0 %v11314_v3  ;;  %v11367_v3 = vld [vmem:[#allocation11 + $0x174] ss:$8 sps:$4 sm:$0xff]  }
 0x647   : > { %7771 = vmatprep.subr.bf16.mxu0 %v11319_v4  ;;  %v11365_v4 = vld [vmem:[#allocation11 + $0x170] ss:$8 sps:$4 sm:$0xff]  }
 0x64a   : > { %7772 = vmatpush1.bf16.msra.mxu0 %v11317_v14  ;;  %v11370_v14 = vld [vmem:[#allocation11 + $0x184] ss:$8 sps:$4 sm:$0xff]  }
 0x64b   : > { %7773 = vmatprep.subr.bf16.mxu0 %v11322_v8  ;;  %v11368_v8 = vld [vmem:[#allocation11 + $0x180] ss:$8 sps:$4 sm:$0xff]  }
 0x64e   : > { %7774 = vmatpush1.bf16.msra.mxu0 %v11320_v9  ;;  %v11373_v9 = vld [vmem:[#allocation11 + $0x194] ss:$8 sps:$4 sm:$0xff]  }
 0x64f   : > { %7775 = vmatprep.subr.bf16.mxu0 %v11325_v25  ;;  %v11371_v25 = vld [vmem:[#allocation11 + $0x190] ss:$8 sps:$4 sm:$0xff]  }
 0x652   : > { %7776 = vmatpush1.bf16.msra.mxu0 %v11323_v11  ;;  %v11376_v11 = vld [vmem:[#allocation11 + $0x1a4] ss:$8 sps:$4 sm:$0xff]  }
 0x653   : > { %7777 = vmatprep.subr.bf16.mxu0 %v11328_v13  ;;  %v11374_v13 = vld [vmem:[#allocation11 + $0x1a0] ss:$8 sps:$4 sm:$0xff]  }
 0x656   : > { %7778 = vmatpush1.bf16.msra.mxu0 %v11326_v32  ;;  %v11379_v32 = vld [vmem:[#allocation11 + $0x1b4] ss:$8 sps:$4 sm:$0xff]  }
 0x657   : > { %7779 = vmatprep.subr.bf16.mxu0 %v11331_v28  ;;  %v11377_v28 = vld [vmem:[#allocation11 + $0x1b0] ss:$8 sps:$4 sm:$0xff]  }
 0x65a   : > { %7780 = vmatpush1.bf16.msra.mxu0 %v11329_v15  ;;  %v11382_v15 = vld [vmem:[#allocation11 + $0x1c4] ss:$8 sps:$4 sm:$0xff]  }
 0x65b   : > { %7781 = vmatprep.subr.bf16.mxu0 %v11334_v16  ;;  %v11380_v16 = vld [vmem:[#allocation11 + $0x1c0] ss:$8 sps:$4 sm:$0xff]  }
 0x65e   : > { %7782 = vmatpush1.bf16.msra.mxu0 %v11332_v18  ;;  %v11385_v18 = vld [vmem:[#allocation11 + $0x1d4] ss:$8 sps:$4 sm:$0xff]  }
 0x65f   : > { %7783 = vmatprep.subr.bf16.mxu0 %v11337_v19  ;;  %v11383_v19 = vld [vmem:[#allocation11 + $0x1d0] ss:$8 sps:$4 sm:$0xff]  }
 0x662   : > { %7784 = vmatpush1.bf16.msra.mxu0 %v11335_v23  ;;  %v11388_v23 = vld [vmem:[#allocation11 + $0x1e4] ss:$8 sps:$4 sm:$0xff]  }
 0x663   : > { %7785 = vmatprep.subr.bf16.mxu0 %v11340_v34  ;;  %v11386_v34 = vld [vmem:[#allocation11 + $0x1e0] ss:$8 sps:$4 sm:$0xff]  }
 0x666   : > { %7786 = vmatpush1.bf16.msra.mxu0 %v11338_v27  ;;  %v11391_v27 = vld [vmem:[#allocation11 + $0x1f4] ss:$8 sps:$4 sm:$0xff]  }
 0x667   : > { %7787 = vmatprep.subr.bf16.mxu0 %v11343_v59  ;;  %v11389_v59 = vld [vmem:[#allocation11 + $0x1f0] ss:$8 sps:$4 sm:$0xff]  }
 0x66a   : > { %7788 = vmatpush1.bf16.msra.mxu0 %v11341_v51  ;;  %v11392_v51 = vld [vmem:[#allocation12 + $0x40] sm:$0xff]  }
 0x66b   : > { %7798 = vmatprep.subr.bf16.mxu0 %v11346_v55  ;;  %v11393_v55 = vld [vmem:[#allocation12] sm:$0xff]  }
 0x700   : > { %v7172_v12 = vpop.f32.mrb[40].mxu0  ;;  %v7336_v33 = vpop.f32.mrb[12].mxu1 }
 0x701   : > { %v9818_v36 = vadd.f32 %v7172_v12, %v5878_v24  ;;  %v9820_v39 = vadd.f32 %v7336_v33, %v5886_v26  ;;  %v7174_v40 = vpop.f32.mrb[41].mxu0  ;;  %v7338_v2 = vpop.f32.mrb[13].mxu1  ;;  %v11394_v24 = vld [vmem:[#allocation12 + $0x48] sm:$0xff]   ;;  %v11398_v12 = vld [vmem:[#allocation12 + $0x58] sm:$0xff]   ;;  %v11400_v33 = vld [vmem:[#allocation12 + $0x60] sm:$0xff]  }
 0x702   : > { %v9819_v48 = vadd.f32 %v7174_v40, %v5882_v31  ;;  %v9821_v6 = vadd.f32 %v7338_v2, %v5890_v7  ;;  %v7176_v17 = vpop.f32.mrb[42].mxu0  ;;  %v7340_v46 = vpop.f32.mrb[14].mxu1  ;;  %v11395_v26 = vld [vmem:[#allocation12 + $0x8] sm:$0xff]   ;;  %v11396_v31 = vld [vmem:[#allocation12 + $0x50] sm:$0xff]  }
 0x703   : > { %vm7344_vm2 = vcmp.ge.f32.partialorder %v9818_v36, 0.0  ;;  %v7349_v62 = vmul.f32 %v9818_v36, %v7348_v37  ;;  %vm7346_vm3 = vcmp.ge.f32.partialorder %v9820_v39, 0.0  ;;  %v7351_v42 = vmul.f32 %v9820_v39, %v7348_v37  ;;  %v7177_v58 = vpop.f32.mrb[43].mxu0  ;;  %v7341_v41 = vpop.f32.mrb[15].mxu1  ;;  %v11397_v7 = vld [vmem:[#allocation12 + $0x10] sm:$0xff]   ;;  %v11403_v40 = vld [vmem:[#allocation12 + $0x28] sm:$0xff]  }
 0x704   : > { %vm7345_vm4 = vcmp.ge.f32.partialorder %v9819_v48, 0.0  ;;  %v7350_v43 = vmul.f32 %v9819_v48, %v7348_v37  ;;  %vm7347_vm5 = vcmp.ge.f32.partialorder %v9821_v6, 0.0  ;;  %v7352_v35 = vmul.f32 %v9821_v6, %v7348_v37  ;;  %v11399_v37 = vld [vmem:[#allocation12 + $0x18] sm:$0xff]   ;;  %v11404_v2 = vld [vmem:[#allocation12 + $0x70] sm:$0xff]   ;;  %v11408_v46 = vld [vmem:[#allocation14] sm:$0xff]  }
 0x705   : > { %v7353_v45 = vsel %vm7344_vm2, %v9818_v36, %v7349_v62  ;;  %v12898_v47 = vsel %vm7346_vm3, %v9820_v39, %v7351_v42  ;;  %v11401_v36 = vld [vmem:[#allocation12 + $0x20] sm:$0xff]   ;;  %v11402_v39 = vld [vmem:[#allocation12 + $0x68] sm:$0xff]   ;;  %v11407_v17 = vld [vmem:[#allocation12 + $0x38] sm:$0xff]   ;;  %v12058_v62 = vmov 0.0  }
 0x706   : > { %v7354_v53 = vsel %vm7345_vm4, %v9819_v48, %v7350_v43  ;;  %v7356_v10 = vsel %vm7347_vm5, %v9821_v6, %v7352_v35  ;;  %v7357_v56 = vpack.c.bf16 %v7353_v45, %v7353_v45  ;;  %v7359_v21 = vpack.c.bf16 %v12898_v47, %v12898_v47  ;;  %v11405_v48 = vld [vmem:[#allocation12 + $0x30] sm:$0xff]   ;;  %v11406_v6 = vld [vmem:[#allocation12 + $0x78] sm:$0xff]   ;;  %9752 = vmatprep.subr.bf16.mxu1 %v12058_v62  ;;  %v11409_v42 = vld [vmem:[#allocation14 + $0x8] sm:$0xff]  }
 0x707   : > { %v7358_v38 = vpack.c.bf16 %v7354_v53, %v7354_v53  ;;  %v7360_v50 = vpack.c.bf16 %v7356_v10, %v7356_v10  ;;  %9753 = vmatpush3.bf16.msra.mxu1 %v11408_v46  ;;  %v11410_v58 = vld [vmem:[#allocation14 + $0x10] sm:$0xff]   ;;  %v11411_v41 = vld [vmem:[#allocation14 + $0x18] sm:$0xff]   ;;  %v11412_v43 = vld [vmem:[#allocation14 + $0x20] sm:$0xff]   ;;  %v7842_v10 = vstv %s9541_s0  ;;  %9768 = vmatprep.mubr.msk.bf16.mxu1 %vm12059_vm8, %v12058_v62  ;;  %v8260_v46 = vstv %s9579_s22  ;;  %s13079_s0 = sld [smem:[#allocation55_spill]]  ;;  %s11929_s22 = sshll.u32 %s12060_s1, 4  ;;  %s11930_s22 = int_to_ptr.vmem [resolvable:$false] %s11929_s22 }
 0x708   : > { %9754 = vmatprep.subr.bf16.mxu1 %v12058_v62  ;;  %v7425_v35 = vld [vmem:[#allocation23] sm:$0x3]  ;;  %s11931_s2 = scalar_lea.vmem %s11930_s22, 256  ;;  %p11932_p13 = scmp.lt.s32.totalorder %s12942_s25, %s11930_s22 }
 0x709   : > { %7789 = vmatprep.mubr.bf16.mxu0 %v7358_v38  ;;  %v7430_v45 = vrot.slane %v7425_v35, %v12699_v29  ;;  %v7434_v47 = vrot.slane %v7425_v35, %v12702_v30  ;;  %v11413_v29 = vld [vmem:[#allocation14 + $0x28] sm:$0xff]   ;;  %v11414_v30 = vld [vmem:[#allocation14 + $0x30] sm:$0xff]  }
 0x70a   : > { %7790 = vmatmul.mubr.bf16.vlgmr.msra.gmra.mrb[44].mxu0 %v7357_v56 }
 0x70b   : > { %7799 = vmatpush1.bf16.msra.mxu0 %v11344_v54  ;;  %7830 = vmatprep.mubr.bf16.mxu0 %v7360_v50 }
 0x70c   : > { %7800 = vmatprep.subr.bf16.mxu0 %v11349_v57  ;;  %9755 = vmatpush3.bf16.msra.mxu1 %v11409_v42 }
 0x70d   : > { %9756 = vmatprep.subr.bf16.mxu1 %v12058_v62 }
 0x70f   : > { %7801 = vmatpush1.bf16.msra.mxu0 %v11347_v60 }
 0x710   : > { %7802 = vmatprep.subr.bf16.mxu0 %v11352_v49  ;;  %9757 = vmatpush3.bf16.msra.mxu1 %v11410_v58 }
 0x711   : > { %9758 = vmatprep.subr.bf16.mxu1 %v12058_v62 }
 0x713   : > { %7803 = vmatpush1.bf16.msra.mxu0 %v11350_v5 }
 0x714   : > { %7804 = vmatprep.subr.bf16.mxu0 %v11355_v1  ;;  %9759 = vmatpush3.bf16.msra.mxu1 %v11411_v41 }
 0x715   : > { %9760 = vmatprep.subr.bf16.mxu1 %v12058_v62 }
 0x717   : > { %7805 = vmatpush1.bf16.msra.mxu0 %v11353_v52 }
 0x718   : > { %7806 = vmatprep.subr.bf16.mxu0 %v11358_v61  ;;  %9761 = vmatpush3.bf16.msra.mxu1 %v11412_v43 }
 0x719   : > { %9762 = vmatprep.subr.bf16.mxu1 %v12058_v62 }
 0x71b   : > { %7807 = vmatpush1.bf16.msra.mxu0 %v11356_v44  ;;  %v11415_v44 = vld [vmem:[#allocation14 + $0x38] sm:$0xff]  }
 0x71c   : > { %7808 = vmatprep.subr.bf16.mxu0 %v11361_v22  ;;  %9763 = vmatpush3.bf16.msra.mxu1 %v11413_v29  ;;  %v11416_v22 = vld [vmem:[#allocation15] sm:$0xff]  }
 0x71d   : > { %9764 = vmatprep.subr.bf16.mxu1 %v12058_v62 }
 0x71f   : > { %7809 = vmatpush1.bf16.msra.mxu0 %v11359_v20  ;;  %v11417_v20 = vld [vmem:[#allocation15 + $0x8] sm:$0xff]  }
 0x720   : > { %7810 = vmatprep.subr.bf16.mxu0 %v11364_v63  ;;  %9765 = vmatpush3.bf16.msra.mxu1 %v11414_v30  ;;  %v11418_v63 = vld [vmem:[#allocation15 + $0x10] sm:$0xff]  }
 0x721   : > { %9766 = vmatprep.subr.bf16.mxu1 %v12058_v62 }
 0x723   : > { %7811 = vmatpush1.bf16.msra.mxu0 %v11362_v0  ;;  %v11419_v0 = vld [vmem:[#allocation15 + $0x18] sm:$0xff]  }
 0x724   : > { %7812 = vmatprep.subr.bf16.mxu0 %v11367_v3  ;;  %9767 = vmatpush3.bf16.msra.mxu1 %v11415_v44  ;;  %v11420_v3 = vld [vmem:[#allocation15 + $0x20] sm:$0xff]  }
 0x725   : > { %9792 = vmatprep.subr.bf16.mxu1 %v12058_v62 }
 0x727   : > { %7813 = vmatpush1.bf16.msra.mxu0 %v11365_v4  ;;  %v11421_v4 = vld [vmem:[#allocation15 + $0x28] sm:$0xff]  }
 0x728   : > { %7814 = vmatprep.subr.bf16.mxu0 %v11370_v14 }
 0x72b   : > { %7815 = vmatpush1.bf16.msra.mxu0 %v11368_v8  ;;  %v9542_v8 = vld [vmem:[#allocation24] ss:$0 sm:$0xff] }
 0x72c   : > { %7816 = vmatprep.subr.bf16.mxu0 %v11373_v9 }
 0x72f   : > { %7817 = vmatpush1.bf16.msra.mxu0 %v11371_v25 }
 0x730   : > { %7818 = vmatprep.subr.bf16.mxu0 %v11376_v11 }
 0x733   : > { %7819 = vmatpush1.bf16.msra.mxu0 %v11374_v13  ;;  %v8026_v13 = vstv %s9559_s21  ;;  %s12940_s21 = scalar_lea.hbm %s13079_s0, %s9590_s17 }
 0x734   : > { %7820 = vmatprep.subr.bf16.mxu0 %v11379_v32 }
 0x737   : > { %7821 = vmatpush1.bf16.msra.mxu0 %v11377_v28 }
 0x738   : > { %7822 = vmatprep.subr.bf16.mxu0 %v11382_v15 }
 0x73b   : > { %7823 = vmatpush1.bf16.msra.mxu0 %v11380_v16 }
 0x73c   : > { %7824 = vmatprep.subr.bf16.mxu0 %v11385_v18 }
 0x73f   : > { %7825 = vmatpush1.bf16.msra.mxu0 %v11383_v19  ;;  %v11422_v19 = vld [vmem:[#allocation15 + $0x30] sm:$0xff]  }
 0x740   : > { %7826 = vmatprep.subr.bf16.mxu0 %v11388_v23  ;;  %v11423_v23 = vld [vmem:[#allocation15 + $0x38] sm:$0xff]  }
 0x743   : > { %7827 = vmatpush1.bf16.msra.mxu0 %v11386_v34  ;;  %v11424_v34 = vld [vmem:[#allocation17] sm:$0xff]  }
 0x744   : > { %7828 = vmatprep.subr.bf16.mxu0 %v11391_v27  ;;  %v11425_v27 = vld [vmem:[#allocation17 + $0x8] sm:$0xff]  }
 0x747   : > { %7829 = vmatpush1.bf16.msra.mxu0 %v11389_v59  ;;  %v11426_v59 = vld [vmem:[#allocation17 + $0x10] sm:$0xff]  }
 0x748   : > { %9703 = vmatprep.subr.bf16.mxu0 %v11392_v51  ;;  %v11427_v51 = vld [vmem:[#allocation17 + $0x18] sm:$0xff]  }
 0x74a   : > { %7831 = vmatmul.mubr.bf16.vlgmr.msra.gmra.mrb[44].mxu0 %v7359_v21  ;;  %v11429_v21 = vld [vmem:[#allocation17 + $0x28] sm:$0xff]  }
 0x74b   : > { %9704 = vmatpush3.bf16.msra.mxu0 %v11393_v55  ;;  %v11428_v55 = vld [vmem:[#allocation17 + $0x20] sm:$0xff]  }
 0x74c   : > { %9705 = vmatprep.subr.bf16.mxu0 %v11394_v24  ;;  %v9560_v24 = vld [vmem:[#allocation26] ss:$0 sm:$0xff] }
 0x74f   : > { %9706 = vmatpush3.bf16.msra.mxu0 %v11395_v26 }
 0x750   : > { %9707 = vmatprep.subr.bf16.mxu0 %v11396_v31  ;;  %v8143_v31 = vstv %s9569_s23  ;;  %s11925_s23 = scalar_lea.vmem %s12942_s25, 128 }
 0x751   : > { %p11926_p4 = scmp.ne.s32.totalorder %s12942_s25, %s11925_s23  ;;  %p11933_p0 = scmp.lt.s32.totalorder %s11931_s2, %s11925_s23 }
 0x753   : > { %9708 = vmatpush3.bf16.msra.mxu0 %v11397_v7  ;;  %p11927_p10 = pnand %p11926_p4, %p13080_p1  ;;  %p11934_p5 = por %p11933_p0, %p11932_p13 }
 0x754   : > { %9709 = vmatprep.subr.bf16.mxu0 %v11398_v12 }
 0x755   : > { %p11928_p3 = pneg %p11927_p10 }
 0x757   : > { %9710 = vmatpush3.bf16.msra.mxu0 %v11399_v37  ;;  %p11935_p7 = pnand %p11934_p5, %p11928_p3 }
 0x758   : > { %9711 = vmatprep.subr.bf16.mxu0 %v11400_v33 }
 0x75b   : > { %9712 = vmatpush3.bf16.msra.mxu0 %v11401_v36 }
 0x75c   : > { %9713 = vmatprep.subr.bf16.mxu0 %v11402_v39 }
 0x75f   : > { %9714 = vmatpush3.bf16.msra.mxu0 %v11403_v40 }
 0x760   : > { %9715 = vmatprep.subr.bf16.mxu0 %v11404_v2  ;;  %v11430_v2 = vld [vmem:[#allocation17 + $0x30] sm:$0xff]  }
 0x763   : > { %9716 = vmatpush3.bf16.msra.mxu0 %v11405_v48  ;;  %v11431_v48 = vld [vmem:[#allocation17 + $0x38] sm:$0xff]  }
 0x764   : > { %9717 = vmatprep.subr.bf16.mxu0 %v11406_v6  ;;  %v9570_v6 = vld [vmem:[#allocation27] ss:$0 sm:$0xff] }
 0x767   : > { %9718 = vmatpush3.bf16.msra.mxu0 %v11407_v17 }
 0x768   : > { %9772 = vmatprep.subr.bf16.mxu0 %v12058_v62 }
 0x81d   : > { %v7832_v53 = vpop.f32.mrb[44].mxu0 }
 0x81e   : > { %v9822_v38 = vadd.f32 %v7832_v53, %v7430_v45  ;;  %v7834_v54 = vpop.f32.mrb[45].mxu0 }
 0x81f   : > { %v9823_v56 = vadd.f32 %v7834_v54, %v7434_v47  ;;  %v7836_v57 = vpop.f32.mrb[46].mxu0 }
 0x820   : > { %vm7840_vm6 = vcmp.ge.f32.partialorder %v9822_v38, 0.0  ;;  %v7843_v50 = vmul.f32 %v9822_v38, %v7842_v10  ;;  %v7837_v60 = vpop.f32.mrb[47].mxu0 }
 0x821   : > { %vm7841_vm7 = vcmp.ge.f32.partialorder %v9823_v56, 0.0  ;;  %v7844_v49 = vmul.f32 %v9823_v56, %v7842_v10 }
 0x822   : > { %v7845_v5 = vsel %vm7840_vm6, %v9822_v38, %v7843_v50 }
 0x823   : > { %v7846_v1 = vsel %vm7841_vm7, %v9823_v56, %v7844_v49  ;;  %v7847_v61 = vpack.c.bf16 %v7845_v5, %v7845_v5 }
 0x824   : > { %v7848_v52 = vpack.c.bf16 %v7846_v1, %v7846_v1 }
 0x826   : > { %8016 = vmatprep.mubr.bf16.mxu0 %v7848_v52 }
 0x827   : > { %8017 = vmatmul.mubr.bf16.vlgmr.msra.gmra.mrb[48].mxu0 %v7847_v61 }
 0x828   : > { %9788 = vmatprep.mubr.msk.bf16.mxu0 %vm12059_vm8, %v12058_v62  ;;  %9773 = vmatpush3.bf16.msra.mxu0 %v11416_v22 }
 0x829   : > { %9774 = vmatprep.subr.bf16.mxu0 %v12058_v62 }
 0x82c   : > { %9775 = vmatpush3.bf16.msra.mxu0 %v11417_v20 }
 0x82d   : > { %9776 = vmatprep.subr.bf16.mxu0 %v12058_v62 }
 0x830   : > { %9777 = vmatpush3.bf16.msra.mxu0 %v11418_v63 }
 0x831   : > { %9778 = vmatprep.subr.bf16.mxu0 %v12058_v62 }
 0x834   : > { %9779 = vmatpush3.bf16.msra.mxu0 %v11419_v0 }
 0x835   : > { %9780 = vmatprep.subr.bf16.mxu0 %v12058_v62 }
 0x838   : > { %9781 = vmatpush3.bf16.msra.mxu0 %v11420_v3 }
 0x839   : > { %9782 = vmatprep.subr.bf16.mxu0 %v12058_v62 }
 0x83c   : > { %9783 = vmatpush3.bf16.msra.mxu0 %v11421_v4 }
 0x83d   : > { %9784 = vmatprep.subr.bf16.mxu0 %v12058_v62 }
 0x840   : > { %9785 = vmatpush3.bf16.msra.mxu0 %v11422_v19 }
 0x841   : > { %9786 = vmatprep.subr.bf16.mxu0 %v12058_v62 }
 0x844   : > { %9787 = vmatpush3.bf16.msra.mxu0 %v11423_v23 }
 0x8fa   : > { %v9719_v14 = vpop.f32.mrb[48].mxu0 }
 0x8fb   : > { %v9720_v9 = vpop.f32.mrb[49].mxu0 }
 0x8fc   : > { %v9721_v25 = vadd.f32 %v9720_v9, %v9719_v14  ;;  %v9722_v11 = vpop.f32.mrb[50].mxu0 }
 0x8fd   : > { %v9723_v32 = vpop.f32.mrb[51].mxu0 }
 0x8fe   : > { %v8019_v28 = vadd.f32 %v9721_v25, %v9542_v8 }
 0x900   : > { %vm8025_vm9 = vcmp.ge.f32.partialorder %v8019_v28, 0.0  ;;  %v8027_v15 = vmul.f32 %v8026_v13, %v8019_v28 }
 0x902   : > { %v8028_v16 = vsel %vm8025_vm9, %v8019_v28, %v8027_v15 }
 0x903   : > { %v8029_v18 = vpack.c.bf16 %v8028_v16, %v8028_v16 }
 0x905   : > { %9769 = vmatmul.mubr.bf16.vlgmr.msra.gmra.mrb[16].mxu1 %v8029_v18 }
 0x906   : > { %9808 = vmatprep.mubr.msk.bf16.mxu1 %vm12059_vm8, %v12058_v62  ;;  %9793 = vmatpush3.bf16.msra.mxu1 %v11424_v34 }
 0x907   : > { %9794 = vmatprep.subr.bf16.mxu1 %v12058_v62 }
 0x90a   : > { %9795 = vmatpush3.bf16.msra.mxu1 %v11425_v27 }
 0x90b   : > { %9796 = vmatprep.subr.bf16.mxu1 %v12058_v62 }
 0x90e   : > { %9797 = vmatpush3.bf16.msra.mxu1 %v11426_v59 }
 0x90f   : > { %9798 = vmatprep.subr.bf16.mxu1 %v12058_v62 }
 0x912   : > { %9799 = vmatpush3.bf16.msra.mxu1 %v11427_v51 }
 0x913   : > { %9800 = vmatprep.subr.bf16.mxu1 %v12058_v62 }
 0x916   : > { %9801 = vmatpush3.bf16.msra.mxu1 %v11428_v55 }
 0x917   : > { %9802 = vmatprep.subr.bf16.mxu1 %v12058_v62 }
 0x91a   : > { %9803 = vmatpush3.bf16.msra.mxu1 %v11429_v21 }
 0x91b   : > { %9804 = vmatprep.subr.bf16.mxu1 %v12058_v62 }
 0x91e   : > { %9805 = vmatpush3.bf16.msra.mxu1 %v11430_v2 }
 0x91f   : > { %9806 = vmatprep.subr.bf16.mxu1 %v12058_v62  ;;  %v9580_v62 = vld [vmem:[#allocation29] ss:$0 sm:$0xff] }
 0x922   : > { %9807 = vmatpush3.bf16.msra.mxu1 %v11431_v48 }
 0x9d8   : > { %v8135_v26 = vpop.f32.mrb[16].mxu1 }
 0x9d9   : > { %v8136_v7 = vadd.f32 %v9560_v24, %v8135_v26  ;;  %v9770_v12 = vpop.f32.mrb[17].mxu1 }
 0x9da   : > { %v8138_v37 = vpop.f32.mrb[18].mxu1 }
 0x9db   : > { %vm8142_vm10 = vcmp.ge.f32.partialorder %v8136_v7, 0.0  ;;  %v8144_v33 = vmul.f32 %v8143_v31, %v8136_v7  ;;  %v9771_v36 = vpop.f32.mrb[19].mxu1 }
 0x9dd   : > { %v8145_v39 = vsel %vm8142_vm10, %v8136_v7, %v8144_v33 }
 0x9de   : > { %v8146_v40 = vpack.c.bf16 %v8145_v39, %v8145_v39 }
 0x9e0   : > { %9789 = vmatmul.mubr.bf16.vlgmr.msra.gmra.mrb[52].mxu0 %v8146_v40 }
 0xab3   : > { %v8252_v17 = vpop.f32.mrb[52].mxu0 }
 0xab4   : > { %v8253_v42 = vadd.f32 %v9570_v6, %v8252_v17  ;;  %v9790_v58 = vpop.f32.mrb[53].mxu0 }
 0xab5   : > { %v8255_v41 = vpop.f32.mrb[54].mxu0 }
 0xab6   : > { %vm8259_vm11 = vcmp.ge.f32.partialorder %v8253_v42, 0.0  ;;  %v8261_v43 = vmul.f32 %v8260_v46, %v8253_v42  ;;  %v9791_v35 = vpop.f32.mrb[55].mxu0 }
 0xab8   : > { %v8262_v45 = vsel %vm8259_vm11, %v8253_v42, %v8261_v43 }
 0xab9   : > { %v8263_v47 = vpack.c.bf16 %v8262_v45, %v8262_v45 }
 0xabb   : > { %9809 = vmatmul.mubr.bf16.vlgmr.msra.gmra.mrb[20].mxu1 %v8263_v47 }
 0xb8e   : > { %v8369_v53 = vpop.f32.mrb[20].mxu1 }
 0xb8f   : > { %v8370_v10 = vadd.f32 %v9580_v62, %v8369_v53  ;;  %v9810_v38 = vpop.f32.mrb[21].mxu1 }
 0xb90   : > { %v8372_v54 = vpop.f32.mrb[22].mxu1 }
 0xb91   : > { %8375 = vst [vmem:[%s818_s19] sm:$0xff] %v8370_v10  ;;  %v9811_v56 = vpop.f32.mrb[23].mxu1 }
 0xb92   : > { %11938 = shalt.err (!%p11935_p7)
}
 0xb93   : > { %s11939_s29 = scalar_lea.hbm %s12940_s21, 128  ;;  %s11943_s28 = scalar_lea.hbm %s13079_s0, 256 }
 0xb94   : > { %p11940_p9 = scmp.ne.s32.totalorder %s12940_s21, %s11939_s29  ;;  %p11944_p11 = scmp.lt.u32.totalorder %s12940_s21, %s13079_s0 }
 0xb95   : > { %p11945_p12 = scmp.lt.u32.totalorder %s11943_s28, %s11939_s29  ;;  %p11947_p4 = scmp.lt.u32.totalorder %s11939_s29, %s12940_s21 }
 0xb96   : > { %p11941_p2 = pnand %p11940_p9, %p13080_p1 }
 0xb97   : > { %p11946_p8 = por %p11945_p12, %p11944_p11 }
 0xb98   : > { %p11942_p6 = pneg %p11941_p2 }
 0xb99   : > { %p11948_p10 = por %p11947_p4, %p11946_p8 }
 0xb9b   : > { %p11949_p3 = pnand %p11948_p10, %p11942_p6 }
 0xb9d   : > { %11952 = shalt.err (!%p11949_p3)
}
 0xb9e   : > { %9970 = dma.vmem_to_hbm [thread:$0]  (%p13080_p1), %s12942_s25, 128, %s12940_s21, %s8377_s4  }
 0xb9f PF: > { %s13081_s23 = sld [smem:[#allocation43_spill]]  ;;  %s13082_s2 = sld [smem:[#allocation46_spill]] }
 0xba0   : > { %p13083_p13 = scmp.ne.s32.totalorder %s13054_s27, 0 }
 0xba5   : > { %s8402_s17 = sand.u32 1, %s13081_s23   ;;  %p13084_p0 = scmp.ge.s32.totalorder %s13082_s2, 2 }
 0xba6   : > { %s8403_s19 = scalar_lea.sflag [#allocation4], %s8402_s17 }
 0xba7   : > { %p10029_p5 = pnand %p13084_p0, %p13083_p13 }
 0xba9   : > { %12010 = dma.done.wait (!%p10029_p5), %s8403_s19, 128  }
 0xbaa   : > { %12012 = vsyncadd (!%p10029_p5), %s8403_s19, 4294967168  ;;  %s13085_s27 = sld [smem:[#allocation44_spill]]  ;;  %s13086_s28 = sld [smem:[#allocation45_spill]] }
 0xbab   : > { %p40_p7 = scmp.ge.s32.totalorder %s12558_s30, 4   ;;  %s13087_s29 = smov %s12570_s20 }
 0xbad   :  { %42 = sbr.rel (!%p40_p7) target bundleno = 22 (0x16), region = 206 }
 0xbb4   :  { %8408 = vsyncpa [#allocation3], 1 }
 0xbb5   :  { %8410 = vsyncpa [#allocation3 + $0x1], 1 }
 0xbb6   :  { %8411 = vsyncpa [#allocation7], 1 }
 0xbb7   :  { %8412 = vsyncpa [#allocation10], 1 }
 0xbb8   :  { %8413 = vsyncpa [#allocation13], 1 }
 0xbb9   :  { %8414 = vsyncpa [#allocation16], 1 }
 0xbba   :  { %8415 = vsyncpa [#allocation19], 1 }
 0xbbb   :  { %8416 = vsyncpa [#allocation22], 1 }
 0xbbc   :  { %8417 = vsyncpa [#allocation25], 1 }
 0xbbd   :  { %8418 = vsyncpa [#allocation28], 1 }
 0xbbe   :  { %8419 = vsyncpa [#allocation4], 1 }
 0xbbf   :  { %8421 = vsyncpa [#allocation4 + $0x1], 1 }
 0xbc0   :  { %8422 = vsyncpa [#allocation5], 1 }
 0xbc1   :  { %8424 = vsyncpa [#allocation5 + $0x1], 1 }

</bundles_post_ra>
